<compile_context>
chip_gen: v6e
topology: v6e:2x2x1
jax: 0.10.0
libtpu: 0.0.40
codegen_flags: <defaults>
</compile_context>

<pallas_src>
import jax
import jax.numpy as jnp
from jax.experimental import pallas as pl
from jax.experimental.pallas import tpu as pltpu

C_IN = 4
C_OUT = 2
H = 16
W = 16
HIDDEN = 512                  # fc1 out_features
NUM_ACTIONS = 8
INPUT_DIM = C_OUT * H * W     # 512 (example_input path)
OUT_PAD = 128                 # lane-dense fc2 output width (>= NUM_ACTIONS)


def fused_cnn_kernel(xp_ref, wc_ref, bc_ref, w1_ref, b1_ref, w2_ref, b2_ref,
                     o_ref, y_ref):
    """Fused conv3x3(pad=1)+ReLU -> flatten -> fc1+ReLU -> fc2, whole batch.

    xp_ref: (B, C_IN, H+2, W+2)  VMEM  zero-padded input
    wc_ref: (C_OUT*C_IN*9,)      SMEM  flattened OIHW conv weight
    bc_ref: (C_OUT,)             SMEM  conv bias
    w1_ref: (C_OUT*H, W, HIDDEN) VMEM  fc1 weight; block R=co*H+r is the (W,HIDDEN)
                                       slab multiplying conv-out row r of channel co
    b1_ref: (1, HIDDEN)          VMEM
    w2_ref: (HIDDEN, OUT_PAD)    VMEM  fc2 weight, zero-padded to 128 columns
    b2_ref: (1, OUT_PAD)         VMEM
    o_ref:  (B, OUT_PAD)         VMEM  output (columns >= NUM_ACTIONS are zero)
    y_ref:  (B, C_OUT, H, W)     VMEM  scratch: conv+ReLU activations
    """
    B = o_ref.shape[0]

    # ---------------- conv 3x3 (padding=1) + bias + ReLU ----------------
    for b in range(B):
        acc = [jnp.full((H, W), bc_ref[co], dtype=jnp.float32)
               for co in range(C_OUT)]
        for ci in range(C_IN):
            for kh in range(3):
                for kw in range(3):
                    # one shifted-window load, shared by both output channels
                    sl = xp_ref[b, ci, kh:kh + H, kw:kw + W]
                    for co in range(C_OUT):
                        wv = wc_ref[((co * C_IN + ci) * 3 + kh) * 3 + kw]
                        acc[co] = acc[co] + wv * sl
        for co in range(C_OUT):
            y_ref[b, co, :, :] = jnp.maximum(acc[co], 0.0)

    # -------- fc1 (+ReLU) and fc2; flatten folded into per-row dots --------
    # h[b, co*H*W + r*W + c] == y[b, co, r, c]  (torch row-major view(B,-1))
    z1 = [b1_ref[...] for _ in range(B)]              # each (1, HIDDEN)
    for co in range(C_OUT):
        for r in range(H):
            wblk = w1_ref[co * H + r]                  # (W, HIDDEN), loaded once
            for b in range(B):
                row = y_ref[b, co, r:r + 1, :]         # (1, W)
                z1[b] = z1[b] + jnp.dot(row, wblk,
                                        preferred_element_type=jnp.float32)
    for b in range(B):
        a1 = jnp.maximum(z1[b], 0.0)                   # (1, HIDDEN)
        o_ref[b:b + 1, :] = (jnp.dot(a1, w2_ref[...],
                                     preferred_element_type=jnp.float32)
                             + b2_ref[...])


def prepare_kernel_params(params):
    """Repack PyTorch-layout params into kernel-friendly layouts (done once)."""
    w_conv, b_conv, w1t, b1, w2t, b2 = params
    wc_flat = w_conv.reshape(-1)                                   # (72,)
    w1_blocks = w1t.reshape(C_OUT * H, W, HIDDEN)                  # (32, 16, 512)
    b1_row = b1.reshape(1, HIDDEN)
    w2_pad = jnp.pad(w2t, ((0, 0), (0, OUT_PAD - NUM_ACTIONS)))    # (512, 128)
    b2_pad = jnp.pad(b2, (0, OUT_PAD - NUM_ACTIONS)).reshape(1, OUT_PAD)
    return (wc_flat, b_conv, w1_blocks, b1_row, w2_pad, b2_pad)


def cnn_forward(x, kparams):
    wc_flat, b_conv, w1_blocks, b1_row, w2_pad, b2_pad = kparams
    B = x.shape[0]

    # zero-pad spatial dims by 1 (padding=1 in the PyTorch conv). Kept host-side:
    # a single tiny fused XLA op; in-kernel padding would need unaligned stores.
    xp = jnp.pad(x, ((0, 0), (0, 0), (1, 1), (1, 1)))

    out_pad = pl.pallas_call(
        fused_cnn_kernel,
        out_shape=jax.ShapeDtypeStruct((B, OUT_PAD), jnp.float32),
        in_specs=[
            pl.BlockSpec(memory_space=pltpu.MemorySpace.VMEM),   # padded x
            pl.BlockSpec(memory_space=pltpu.MemorySpace.SMEM),   # conv weight
            pl.BlockSpec(memory_space=pltpu.MemorySpace.SMEM),   # conv bias
            pl.BlockSpec(memory_space=pltpu.MemorySpace.VMEM),   # fc1 weight blocks
            pl.BlockSpec(memory_space=pltpu.MemorySpace.VMEM),   # fc1 bias
            pl.BlockSpec(memory_space=pltpu.MemorySpace.VMEM),   # fc2 weight (padded)
            pl.BlockSpec(memory_space=pltpu.MemorySpace.VMEM),   # fc2 bias (padded)
        ],
        out_specs=pl.BlockSpec(memory_space=pltpu.MemorySpace.VMEM),
        scratch_shapes=[pltpu.VMEM((B, C_OUT, H, W), jnp.float32)],
    )(xp, wc_flat, b_conv, w1_blocks, b1_row, w2_pad, b2_pad)

    return out_pad[:, :NUM_ACTIONS]


def reference_forward(x, params):
    """Pure-JAX reference mirroring the PyTorch forward (torch-layout params)."""
    w_conv, b_conv, w1t, b1, w2t, b2 = params
    y = jax.lax.conv_general_dilated(
        x, w_conv, window_strides=(1, 1), padding=((1, 1), (1, 1)),
        dimension_numbers=("NCHW", "OIHW", "NCHW"))
    y = jnp.maximum(y + b_conv[None, :, None, None], 0.0)
    h = y.reshape(x.shape[0], -1)
    a1 = jnp.maximum(h @ w1t + b1[None, :], 0.0)
    return a1 @ w2t + b2[None, :]


def init_params(key):
    ks = jax.random.split(key, 6)
    w_conv = 0.1 * jax.random.normal(ks[0], (C_OUT, C_IN, 3, 3), jnp.float32)  # OIHW
    b_conv = 0.1 * jax.random.normal(ks[1], (C_OUT,), jnp.float32)
    # fc1: Linear(INPUT_DIM, 512), stored pre-transposed as (in, out)
    w1t = 0.05 * jax.random.normal(ks[2], (INPUT_DIM, HIDDEN), jnp.float32)
    b1 = 0.05 * jax.random.normal(ks[3], (HIDDEN,), jnp.float32)
    # fc2: Linear(512, NUM_ACTIONS), stored pre-transposed as (in, out)
    w2t = 0.05 * jax.random.normal(ks[4], (HIDDEN, NUM_ACTIONS), jnp.float32)
    b2 = 0.05 * jax.random.normal(ks[5], (NUM_ACTIONS,), jnp.float32)
    # TODO(synk): fc3 is defined in CNN.__init__ but never used by forward().
    return (w_conv, b_conv, w1t, b1, w2t, b2)


if __name__ == "__main__":
    key = jax.random.PRNGKey(0)
    k_x, k_p = jax.random.split(key)
    x = jax.random.normal(k_x, (2, C_IN, H, W), jnp.float32)   # (B, C_in, H, W)
    params = init_params(k_p)
    kparams = prepare_kernel_params(params)

    out = jax.block_until_ready(jax.jit(cnn_forward)(x, kparams))
    ref = jax.block_until_ready(reference_forward(x, params))

    assert out.shape == (2, NUM_ACTIONS), out.shape
    assert jnp.allclose(out, ref, rtol=2e-4, atol=2e-4), (out, ref)
    print("KERNEL_OK")
</pallas_src>

<mosaic_0001>
module attributes {stable_mosaic.version = 11 : i64} {
  func.func @fused_cnn_kernel(%arg0: memref<2x4x18x18xf32, #tpu.memory_space<vmem>>, %arg1: memref<72xf32, #tpu.memory_space<smem>>, %arg2: memref<2xf32, #tpu.memory_space<smem>>, %arg3: memref<32x16x512xf32, #tpu.memory_space<vmem>>, %arg4: memref<1x512xf32, #tpu.memory_space<vmem>>, %arg5: memref<512x128xf32, #tpu.memory_space<vmem>>, %arg6: memref<1x128xf32, #tpu.memory_space<vmem>>, %arg7: memref<2x128xf32, #tpu.memory_space<vmem>>, %arg8: memref<2x2x16x16xf32, #tpu.memory_space<vmem>>) attributes {dimension_semantics = [], scalar_prefetch = 0 : i64, scratch_operands = 1 : i64, tpu.core_type = #tpu.core_type<tc>} {
    %c0 = arith.constant 0 : index
    %0 = memref.load %arg2[%c0] : memref<2xf32, #tpu.memory_space<smem>>
    %1 = vector.broadcast %0 : f32 to vector<16x16xf32>
    %c1 = arith.constant 1 : index
    %2 = memref.load %arg2[%c1] : memref<2xf32, #tpu.memory_space<smem>>
    %3 = vector.broadcast %2 : f32 to vector<16x16xf32>
    %c0_0 = arith.constant 0 : index
    %c0_1 = arith.constant 0 : index
    %c0_2 = arith.constant 0 : index
    %c0_3 = arith.constant 0 : index
    %4 = vector.load %arg0[%c0_0, %c0_1, %c0_2, %c0_3] : memref<2x4x18x18xf32, #tpu.memory_space<vmem>>, vector<1x1x16x16xf32>
    %5 = vector.shape_cast %4 : vector<1x1x16x16xf32> to vector<16x16xf32>
    %c0_4 = arith.constant 0 : index
    %6 = memref.load %arg1[%c0_4] : memref<72xf32, #tpu.memory_space<smem>>
    %7 = vector.broadcast %6 : f32 to vector<16x16xf32>
    %8 = arith.mulf %7, %5 : vector<16x16xf32>
    %9 = arith.addf %1, %8 : vector<16x16xf32>
    %c36 = arith.constant 36 : index
    %10 = memref.load %arg1[%c36] : memref<72xf32, #tpu.memory_space<smem>>
    %11 = vector.broadcast %10 : f32 to vector<16x16xf32>
    %12 = arith.mulf %11, %5 : vector<16x16xf32>
    %13 = arith.addf %3, %12 : vector<16x16xf32>
    %c0_5 = arith.constant 0 : index
    %c0_6 = arith.constant 0 : index
    %c0_7 = arith.constant 0 : index
    %c1_8 = arith.constant 1 : index
    %14 = vector.load %arg0[%c0_5, %c0_6, %c0_7, %c1_8] : memref<2x4x18x18xf32, #tpu.memory_space<vmem>>, vector<1x1x16x16xf32>
    %15 = vector.shape_cast %14 : vector<1x1x16x16xf32> to vector<16x16xf32>
    %c1_9 = arith.constant 1 : index
    %16 = memref.load %arg1[%c1_9] : memref<72xf32, #tpu.memory_space<smem>>
    %17 = vector.broadcast %16 : f32 to vector<16x16xf32>
    %18 = arith.mulf %17, %15 : vector<16x16xf32>
    %19 = arith.addf %9, %18 : vector<16x16xf32>
    %c37 = arith.constant 37 : index
    %20 = memref.load %arg1[%c37] : memref<72xf32, #tpu.memory_space<smem>>
    %21 = vector.broadcast %20 : f32 to vector<16x16xf32>
    %22 = arith.mulf %21, %15 : vector<16x16xf32>
    %23 = arith.addf %13, %22 : vector<16x16xf32>
    %c0_10 = arith.constant 0 : index
    %c0_11 = arith.constant 0 : index
    %c0_12 = arith.constant 0 : index
    %c2 = arith.constant 2 : index
    %24 = vector.load %arg0[%c0_10, %c0_11, %c0_12, %c2] : memref<2x4x18x18xf32, #tpu.memory_space<vmem>>, vector<1x1x16x16xf32>
    %25 = vector.shape_cast %24 : vector<1x1x16x16xf32> to vector<16x16xf32>
    %c2_13 = arith.constant 2 : index
    %26 = memref.load %arg1[%c2_13] : memref<72xf32, #tpu.memory_space<smem>>
    %27 = vector.broadcast %26 : f32 to vector<16x16xf32>
    %28 = arith.mulf %27, %25 : vector<16x16xf32>
    %29 = arith.addf %19, %28 : vector<16x16xf32>
    %c38 = arith.constant 38 : index
    %30 = memref.load %arg1[%c38] : memref<72xf32, #tpu.memory_space<smem>>
    %31 = vector.broadcast %30 : f32 to vector<16x16xf32>
    %32 = arith.mulf %31, %25 : vector<16x16xf32>
    %33 = arith.addf %23, %32 : vector<16x16xf32>
    %c0_14 = arith.constant 0 : index
    %c0_15 = arith.constant 0 : index
    %c1_16 = arith.constant 1 : index
    %c0_17 = arith.constant 0 : index
    %34 = vector.load %arg0[%c0_14, %c0_15, %c1_16, %c0_17] : memref<2x4x18x18xf32, #tpu.memory_space<vmem>>, vector<1x1x16x16xf32>
    %35 = vector.shape_cast %34 : vector<1x1x16x16xf32> to vector<16x16xf32>
    %c3 = arith.constant 3 : index
    %36 = memref.load %arg1[%c3] : memref<72xf32, #tpu.memory_space<smem>>
    %37 = vector.broadcast %36 : f32 to vector<16x16xf32>
    %38 = arith.mulf %37, %35 : vector<16x16xf32>
    %39 = arith.addf %29, %38 : vector<16x16xf32>
    %c39 = arith.constant 39 : index
    %40 = memref.load %arg1[%c39] : memref<72xf32, #tpu.memory_space<smem>>
    %41 = vector.broadcast %40 : f32 to vector<16x16xf32>
    %42 = arith.mulf %41, %35 : vector<16x16xf32>
    %43 = arith.addf %33, %42 : vector<16x16xf32>
    %c0_18 = arith.constant 0 : index
    %c0_19 = arith.constant 0 : index
    %c1_20 = arith.constant 1 : index
    %c1_21 = arith.constant 1 : index
    %44 = vector.load %arg0[%c0_18, %c0_19, %c1_20, %c1_21] : memref<2x4x18x18xf32, #tpu.memory_space<vmem>>, vector<1x1x16x16xf32>
    %45 = vector.shape_cast %44 : vector<1x1x16x16xf32> to vector<16x16xf32>
    %c4 = arith.constant 4 : index
    %46 = memref.load %arg1[%c4] : memref<72xf32, #tpu.memory_space<smem>>
    %47 = vector.broadcast %46 : f32 to vector<16x16xf32>
    %48 = arith.mulf %47, %45 : vector<16x16xf32>
    %49 = arith.addf %39, %48 : vector<16x16xf32>
    %c40 = arith.constant 40 : index
    %50 = memref.load %arg1[%c40] : memref<72xf32, #tpu.memory_space<smem>>
    %51 = vector.broadcast %50 : f32 to vector<16x16xf32>
    %52 = arith.mulf %51, %45 : vector<16x16xf32>
    %53 = arith.addf %43, %52 : vector<16x16xf32>
    %c0_22 = arith.constant 0 : index
    %c0_23 = arith.constant 0 : index
    %c1_24 = arith.constant 1 : index
    %c2_25 = arith.constant 2 : index
    %54 = vector.load %arg0[%c0_22, %c0_23, %c1_24, %c2_25] : memref<2x4x18x18xf32, #tpu.memory_space<vmem>>, vector<1x1x16x16xf32>
    %55 = vector.shape_cast %54 : vector<1x1x16x16xf32> to vector<16x16xf32>
    %c5 = arith.constant 5 : index
    %56 = memref.load %arg1[%c5] : memref<72xf32, #tpu.memory_space<smem>>
    %57 = vector.broadcast %56 : f32 to vector<16x16xf32>
    %58 = arith.mulf %57, %55 : vector<16x16xf32>
    %59 = arith.addf %49, %58 : vector<16x16xf32>
    %c41 = arith.constant 41 : index
    %60 = memref.load %arg1[%c41] : memref<72xf32, #tpu.memory_space<smem>>
    %61 = vector.broadcast %60 : f32 to vector<16x16xf32>
    %62 = arith.mulf %61, %55 : vector<16x16xf32>
    %63 = arith.addf %53, %62 : vector<16x16xf32>
    %c0_26 = arith.constant 0 : index
    %c0_27 = arith.constant 0 : index
    %c2_28 = arith.constant 2 : index
    %c0_29 = arith.constant 0 : index
    %64 = vector.load %arg0[%c0_26, %c0_27, %c2_28, %c0_29] : memref<2x4x18x18xf32, #tpu.memory_space<vmem>>, vector<1x1x16x16xf32>
    %65 = vector.shape_cast %64 : vector<1x1x16x16xf32> to vector<16x16xf32>
    %c6 = arith.constant 6 : index
    %66 = memref.load %arg1[%c6] : memref<72xf32, #tpu.memory_space<smem>>
    %67 = vector.broadcast %66 : f32 to vector<16x16xf32>
    %68 = arith.mulf %67, %65 : vector<16x16xf32>
    %69 = arith.addf %59, %68 : vector<16x16xf32>
    %c42 = arith.constant 42 : index
    %70 = memref.load %arg1[%c42] : memref<72xf32, #tpu.memory_space<smem>>
    %71 = vector.broadcast %70 : f32 to vector<16x16xf32>
    %72 = arith.mulf %71, %65 : vector<16x16xf32>
    %73 = arith.addf %63, %72 : vector<16x16xf32>
    %c0_30 = arith.constant 0 : index
    %c0_31 = arith.constant 0 : index
    %c2_32 = arith.constant 2 : index
    %c1_33 = arith.constant 1 : index
    %74 = vector.load %arg0[%c0_30, %c0_31, %c2_32, %c1_33] : memref<2x4x18x18xf32, #tpu.memory_space<vmem>>, vector<1x1x16x16xf32>
    %75 = vector.shape_cast %74 : vector<1x1x16x16xf32> to vector<16x16xf32>
    %c7 = arith.constant 7 : index
    %76 = memref.load %arg1[%c7] : memref<72xf32, #tpu.memory_space<smem>>
    %77 = vector.broadcast %76 : f32 to vector<16x16xf32>
    %78 = arith.mulf %77, %75 : vector<16x16xf32>
    %79 = arith.addf %69, %78 : vector<16x16xf32>
    %c43 = arith.constant 43 : index
    %80 = memref.load %arg1[%c43] : memref<72xf32, #tpu.memory_space<smem>>
    %81 = vector.broadcast %80 : f32 to vector<16x16xf32>
    %82 = arith.mulf %81, %75 : vector<16x16xf32>
    %83 = arith.addf %73, %82 : vector<16x16xf32>
    %c0_34 = arith.constant 0 : index
    %c0_35 = arith.constant 0 : index
    %c2_36 = arith.constant 2 : index
    %c2_37 = arith.constant 2 : index
    %84 = vector.load %arg0[%c0_34, %c0_35, %c2_36, %c2_37] : memref<2x4x18x18xf32, #tpu.memory_space<vmem>>, vector<1x1x16x16xf32>
    %85 = vector.shape_cast %84 : vector<1x1x16x16xf32> to vector<16x16xf32>
    %c8 = arith.constant 8 : index
    %86 = memref.load %arg1[%c8] : memref<72xf32, #tpu.memory_space<smem>>
    %87 = vector.broadcast %86 : f32 to vector<16x16xf32>
    %88 = arith.mulf %87, %85 : vector<16x16xf32>
    %89 = arith.addf %79, %88 : vector<16x16xf32>
    %c44 = arith.constant 44 : index
    %90 = memref.load %arg1[%c44] : memref<72xf32, #tpu.memory_space<smem>>
    %91 = vector.broadcast %90 : f32 to vector<16x16xf32>
    %92 = arith.mulf %91, %85 : vector<16x16xf32>
    %93 = arith.addf %83, %92 : vector<16x16xf32>
    %c0_38 = arith.constant 0 : index
    %c1_39 = arith.constant 1 : index
    %c0_40 = arith.constant 0 : index
    %c0_41 = arith.constant 0 : index
    %94 = vector.load %arg0[%c0_38, %c1_39, %c0_40, %c0_41] : memref<2x4x18x18xf32, #tpu.memory_space<vmem>>, vector<1x1x16x16xf32>
    %95 = vector.shape_cast %94 : vector<1x1x16x16xf32> to vector<16x16xf32>
    %c9 = arith.constant 9 : index
    %96 = memref.load %arg1[%c9] : memref<72xf32, #tpu.memory_space<smem>>
    %97 = vector.broadcast %96 : f32 to vector<16x16xf32>
    %98 = arith.mulf %97, %95 : vector<16x16xf32>
    %99 = arith.addf %89, %98 : vector<16x16xf32>
    %c45 = arith.constant 45 : index
    %100 = memref.load %arg1[%c45] : memref<72xf32, #tpu.memory_space<smem>>
    %101 = vector.broadcast %100 : f32 to vector<16x16xf32>
    %102 = arith.mulf %101, %95 : vector<16x16xf32>
    %103 = arith.addf %93, %102 : vector<16x16xf32>
    %c0_42 = arith.constant 0 : index
    %c1_43 = arith.constant 1 : index
    %c0_44 = arith.constant 0 : index
    %c1_45 = arith.constant 1 : index
    %104 = vector.load %arg0[%c0_42, %c1_43, %c0_44, %c1_45] : memref<2x4x18x18xf32, #tpu.memory_space<vmem>>, vector<1x1x16x16xf32>
    %105 = vector.shape_cast %104 : vector<1x1x16x16xf32> to vector<16x16xf32>
    %c10 = arith.constant 10 : index
    %106 = memref.load %arg1[%c10] : memref<72xf32, #tpu.memory_space<smem>>
    %107 = vector.broadcast %106 : f32 to vector<16x16xf32>
    %108 = arith.mulf %107, %105 : vector<16x16xf32>
    %109 = arith.addf %99, %108 : vector<16x16xf32>
    %c46 = arith.constant 46 : index
    %110 = memref.load %arg1[%c46] : memref<72xf32, #tpu.memory_space<smem>>
    %111 = vector.broadcast %110 : f32 to vector<16x16xf32>
    %112 = arith.mulf %111, %105 : vector<16x16xf32>
    %113 = arith.addf %103, %112 : vector<16x16xf32>
    %c0_46 = arith.constant 0 : index
    %c1_47 = arith.constant 1 : index
    %c0_48 = arith.constant 0 : index
    %c2_49 = arith.constant 2 : index
    %114 = vector.load %arg0[%c0_46, %c1_47, %c0_48, %c2_49] : memref<2x4x18x18xf32, #tpu.memory_space<vmem>>, vector<1x1x16x16xf32>
    %115 = vector.shape_cast %114 : vector<1x1x16x16xf32> to vector<16x16xf32>
    %c11 = arith.constant 11 : index
    %116 = memref.load %arg1[%c11] : memref<72xf32, #tpu.memory_space<smem>>
    %117 = vector.broadcast %116 : f32 to vector<16x16xf32>
    %118 = arith.mulf %117, %115 : vector<16x16xf32>
    %119 = arith.addf %109, %118 : vector<16x16xf32>
    %c47 = arith.constant 47 : index
    %120 = memref.load %arg1[%c47] : memref<72xf32, #tpu.memory_space<smem>>
    %121 = vector.broadcast %120 : f32 to vector<16x16xf32>
    %122 = arith.mulf %121, %115 : vector<16x16xf32>
    %123 = arith.addf %113, %122 : vector<16x16xf32>
    %c0_50 = arith.constant 0 : index
    %c1_51 = arith.constant 1 : index
    %c1_52 = arith.constant 1 : index
    %c0_53 = arith.constant 0 : index
    %124 = vector.load %arg0[%c0_50, %c1_51, %c1_52, %c0_53] : memref<2x4x18x18xf32, #tpu.memory_space<vmem>>, vector<1x1x16x16xf32>
    %125 = vector.shape_cast %124 : vector<1x1x16x16xf32> to vector<16x16xf32>
    %c12 = arith.constant 12 : index
    %126 = memref.load %arg1[%c12] : memref<72xf32, #tpu.memory_space<smem>>
    %127 = vector.broadcast %126 : f32 to vector<16x16xf32>
    %128 = arith.mulf %127, %125 : vector<16x16xf32>
    %129 = arith.addf %119, %128 : vector<16x16xf32>
    %c48 = arith.constant 48 : index
    %130 = memref.load %arg1[%c48] : memref<72xf32, #tpu.memory_space<smem>>
    %131 = vector.broadcast %130 : f32 to vector<16x16xf32>
    %132 = arith.mulf %131, %125 : vector<16x16xf32>
    %133 = arith.addf %123, %132 : vector<16x16xf32>
    %c0_54 = arith.constant 0 : index
    %c1_55 = arith.constant 1 : index
    %c1_56 = arith.constant 1 : index
    %c1_57 = arith.constant 1 : index
    %134 = vector.load %arg0[%c0_54, %c1_55, %c1_56, %c1_57] : memref<2x4x18x18xf32, #tpu.memory_space<vmem>>, vector<1x1x16x16xf32>
    %135 = vector.shape_cast %134 : vector<1x1x16x16xf32> to vector<16x16xf32>
    %c13 = arith.constant 13 : index
    %136 = memref.load %arg1[%c13] : memref<72xf32, #tpu.memory_space<smem>>
    %137 = vector.broadcast %136 : f32 to vector<16x16xf32>
    %138 = arith.mulf %137, %135 : vector<16x16xf32>
    %139 = arith.addf %129, %138 : vector<16x16xf32>
    %c49 = arith.constant 49 : index
    %140 = memref.load %arg1[%c49] : memref<72xf32, #tpu.memory_space<smem>>
    %141 = vector.broadcast %140 : f32 to vector<16x16xf32>
    %142 = arith.mulf %141, %135 : vector<16x16xf32>
    %143 = arith.addf %133, %142 : vector<16x16xf32>
    %c0_58 = arith.constant 0 : index
    %c1_59 = arith.constant 1 : index
    %c1_60 = arith.constant 1 : index
    %c2_61 = arith.constant 2 : index
    %144 = vector.load %arg0[%c0_58, %c1_59, %c1_60, %c2_61] : memref<2x4x18x18xf32, #tpu.memory_space<vmem>>, vector<1x1x16x16xf32>
    %145 = vector.shape_cast %144 : vector<1x1x16x16xf32> to vector<16x16xf32>
    %c14 = arith.constant 14 : index
    %146 = memref.load %arg1[%c14] : memref<72xf32, #tpu.memory_space<smem>>
    %147 = vector.broadcast %146 : f32 to vector<16x16xf32>
    %148 = arith.mulf %147, %145 : vector<16x16xf32>
    %149 = arith.addf %139, %148 : vector<16x16xf32>
    %c50 = arith.constant 50 : index
    %150 = memref.load %arg1[%c50] : memref<72xf32, #tpu.memory_space<smem>>
    %151 = vector.broadcast %150 : f32 to vector<16x16xf32>
    %152 = arith.mulf %151, %145 : vector<16x16xf32>
    %153 = arith.addf %143, %152 : vector<16x16xf32>
    %c0_62 = arith.constant 0 : index
    %c1_63 = arith.constant 1 : index
    %c2_64 = arith.constant 2 : index
    %c0_65 = arith.constant 0 : index
    %154 = vector.load %arg0[%c0_62, %c1_63, %c2_64, %c0_65] : memref<2x4x18x18xf32, #tpu.memory_space<vmem>>, vector<1x1x16x16xf32>
    %155 = vector.shape_cast %154 : vector<1x1x16x16xf32> to vector<16x16xf32>
    %c15 = arith.constant 15 : index
    %156 = memref.load %arg1[%c15] : memref<72xf32, #tpu.memory_space<smem>>
    %157 = vector.broadcast %156 : f32 to vector<16x16xf32>
    %158 = arith.mulf %157, %155 : vector<16x16xf32>
    %159 = arith.addf %149, %158 : vector<16x16xf32>
    %c51 = arith.constant 51 : index
    %160 = memref.load %arg1[%c51] : memref<72xf32, #tpu.memory_space<smem>>
    %161 = vector.broadcast %160 : f32 to vector<16x16xf32>
    %162 = arith.mulf %161, %155 : vector<16x16xf32>
    %163 = arith.addf %153, %162 : vector<16x16xf32>
    %c0_66 = arith.constant 0 : index
    %c1_67 = arith.constant 1 : index
    %c2_68 = arith.constant 2 : index
    %c1_69 = arith.constant 1 : index
    %164 = vector.load %arg0[%c0_66, %c1_67, %c2_68, %c1_69] : memref<2x4x18x18xf32, #tpu.memory_space<vmem>>, vector<1x1x16x16xf32>
    %165 = vector.shape_cast %164 : vector<1x1x16x16xf32> to vector<16x16xf32>
    %c16 = arith.constant 16 : index
    %166 = memref.load %arg1[%c16] : memref<72xf32, #tpu.memory_space<smem>>
    %167 = vector.broadcast %166 : f32 to vector<16x16xf32>
    %168 = arith.mulf %167, %165 : vector<16x16xf32>
    %169 = arith.addf %159, %168 : vector<16x16xf32>
    %c52 = arith.constant 52 : index
    %170 = memref.load %arg1[%c52] : memref<72xf32, #tpu.memory_space<smem>>
    %171 = vector.broadcast %170 : f32 to vector<16x16xf32>
    %172 = arith.mulf %171, %165 : vector<16x16xf32>
    %173 = arith.addf %163, %172 : vector<16x16xf32>
    %c0_70 = arith.constant 0 : index
    %c1_71 = arith.constant 1 : index
    %c2_72 = arith.constant 2 : index
    %c2_73 = arith.constant 2 : index
    %174 = vector.load %arg0[%c0_70, %c1_71, %c2_72, %c2_73] : memref<2x4x18x18xf32, #tpu.memory_space<vmem>>, vector<1x1x16x16xf32>
    %175 = vector.shape_cast %174 : vector<1x1x16x16xf32> to vector<16x16xf32>
    %c17 = arith.constant 17 : index
    %176 = memref.load %arg1[%c17] : memref<72xf32, #tpu.memory_space<smem>>
    %177 = vector.broadcast %176 : f32 to vector<16x16xf32>
    %178 = arith.mulf %177, %175 : vector<16x16xf32>
    %179 = arith.addf %169, %178 : vector<16x16xf32>
    %c53 = arith.constant 53 : index
    %180 = memref.load %arg1[%c53] : memref<72xf32, #tpu.memory_space<smem>>
    %181 = vector.broadcast %180 : f32 to vector<16x16xf32>
    %182 = arith.mulf %181, %175 : vector<16x16xf32>
    %183 = arith.addf %173, %182 : vector<16x16xf32>
    %c0_74 = arith.constant 0 : index
    %c2_75 = arith.constant 2 : index
    %c0_76 = arith.constant 0 : index
    %c0_77 = arith.constant 0 : index
    %184 = vector.load %arg0[%c0_74, %c2_75, %c0_76, %c0_77] : memref<2x4x18x18xf32, #tpu.memory_space<vmem>>, vector<1x1x16x16xf32>
    %185 = vector.shape_cast %184 : vector<1x1x16x16xf32> to vector<16x16xf32>
    %c18 = arith.constant 18 : index
    %186 = memref.load %arg1[%c18] : memref<72xf32, #tpu.memory_space<smem>>
    %187 = vector.broadcast %186 : f32 to vector<16x16xf32>
    %188 = arith.mulf %187, %185 : vector<16x16xf32>
    %189 = arith.addf %179, %188 : vector<16x16xf32>
    %c54 = arith.constant 54 : index
    %190 = memref.load %arg1[%c54] : memref<72xf32, #tpu.memory_space<smem>>
    %191 = vector.broadcast %190 : f32 to vector<16x16xf32>
    %192 = arith.mulf %191, %185 : vector<16x16xf32>
    %193 = arith.addf %183, %192 : vector<16x16xf32>
    %c0_78 = arith.constant 0 : index
    %c2_79 = arith.constant 2 : index
    %c0_80 = arith.constant 0 : index
    %c1_81 = arith.constant 1 : index
    %194 = vector.load %arg0[%c0_78, %c2_79, %c0_80, %c1_81] : memref<2x4x18x18xf32, #tpu.memory_space<vmem>>, vector<1x1x16x16xf32>
    %195 = vector.shape_cast %194 : vector<1x1x16x16xf32> to vector<16x16xf32>
    %c19 = arith.constant 19 : index
    %196 = memref.load %arg1[%c19] : memref<72xf32, #tpu.memory_space<smem>>
    %197 = vector.broadcast %196 : f32 to vector<16x16xf32>
    %198 = arith.mulf %197, %195 : vector<16x16xf32>
    %199 = arith.addf %189, %198 : vector<16x16xf32>
    %c55 = arith.constant 55 : index
    %200 = memref.load %arg1[%c55] : memref<72xf32, #tpu.memory_space<smem>>
    %201 = vector.broadcast %200 : f32 to vector<16x16xf32>
    %202 = arith.mulf %201, %195 : vector<16x16xf32>
    %203 = arith.addf %193, %202 : vector<16x16xf32>
    %c0_82 = arith.constant 0 : index
    %c2_83 = arith.constant 2 : index
    %c0_84 = arith.constant 0 : index
    %c2_85 = arith.constant 2 : index
    %204 = vector.load %arg0[%c0_82, %c2_83, %c0_84, %c2_85] : memref<2x4x18x18xf32, #tpu.memory_space<vmem>>, vector<1x1x16x16xf32>
    %205 = vector.shape_cast %204 : vector<1x1x16x16xf32> to vector<16x16xf32>
    %c20 = arith.constant 20 : index
    %206 = memref.load %arg1[%c20] : memref<72xf32, #tpu.memory_space<smem>>
    %207 = vector.broadcast %206 : f32 to vector<16x16xf32>
    %208 = arith.mulf %207, %205 : vector<16x16xf32>
    %209 = arith.addf %199, %208 : vector<16x16xf32>
    %c56 = arith.constant 56 : index
    %210 = memref.load %arg1[%c56] : memref<72xf32, #tpu.memory_space<smem>>
    %211 = vector.broadcast %210 : f32 to vector<16x16xf32>
    %212 = arith.mulf %211, %205 : vector<16x16xf32>
    %213 = arith.addf %203, %212 : vector<16x16xf32>
    %c0_86 = arith.constant 0 : index
    %c2_87 = arith.constant 2 : index
    %c1_88 = arith.constant 1 : index
    %c0_89 = arith.constant 0 : index
    %214 = vector.load %arg0[%c0_86, %c2_87, %c1_88, %c0_89] : memref<2x4x18x18xf32, #tpu.memory_space<vmem>>, vector<1x1x16x16xf32>
    %215 = vector.shape_cast %214 : vector<1x1x16x16xf32> to vector<16x16xf32>
    %c21 = arith.constant 21 : index
    %216 = memref.load %arg1[%c21] : memref<72xf32, #tpu.memory_space<smem>>
    %217 = vector.broadcast %216 : f32 to vector<16x16xf32>
    %218 = arith.mulf %217, %215 : vector<16x16xf32>
    %219 = arith.addf %209, %218 : vector<16x16xf32>
    %c57 = arith.constant 57 : index
    %220 = memref.load %arg1[%c57] : memref<72xf32, #tpu.memory_space<smem>>
    %221 = vector.broadcast %220 : f32 to vector<16x16xf32>
    %222 = arith.mulf %221, %215 : vector<16x16xf32>
    %223 = arith.addf %213, %222 : vector<16x16xf32>
    %c0_90 = arith.constant 0 : index
    %c2_91 = arith.constant 2 : index
    %c1_92 = arith.constant 1 : index
    %c1_93 = arith.constant 1 : index
    %224 = vector.load %arg0[%c0_90, %c2_91, %c1_92, %c1_93] : memref<2x4x18x18xf32, #tpu.memory_space<vmem>>, vector<1x1x16x16xf32>
    %225 = vector.shape_cast %224 : vector<1x1x16x16xf32> to vector<16x16xf32>
    %c22 = arith.constant 22 : index
    %226 = memref.load %arg1[%c22] : memref<72xf32, #tpu.memory_space<smem>>
    %227 = vector.broadcast %226 : f32 to vector<16x16xf32>
    %228 = arith.mulf %227, %225 : vector<16x16xf32>
    %229 = arith.addf %219, %228 : vector<16x16xf32>
    %c58 = arith.constant 58 : index
    %230 = memref.load %arg1[%c58] : memref<72xf32, #tpu.memory_space<smem>>
    %231 = vector.broadcast %230 : f32 to vector<16x16xf32>
    %232 = arith.mulf %231, %225 : vector<16x16xf32>
    %233 = arith.addf %223, %232 : vector<16x16xf32>
    %c0_94 = arith.constant 0 : index
    %c2_95 = arith.constant 2 : index
    %c1_96 = arith.constant 1 : index
    %c2_97 = arith.constant 2 : index
    %234 = vector.load %arg0[%c0_94, %c2_95, %c1_96, %c2_97] : memref<2x4x18x18xf32, #tpu.memory_space<vmem>>, vector<1x1x16x16xf32>
    %235 = vector.shape_cast %234 : vector<1x1x16x16xf32> to vector<16x16xf32>
    %c23 = arith.constant 23 : index
    %236 = memref.load %arg1[%c23] : memref<72xf32, #tpu.memory_space<smem>>
    %237 = vector.broadcast %236 : f32 to vector<16x16xf32>
    %238 = arith.mulf %237, %235 : vector<16x16xf32>
    %239 = arith.addf %229, %238 : vector<16x16xf32>
    %c59 = arith.constant 59 : index
    %240 = memref.load %arg1[%c59] : memref<72xf32, #tpu.memory_space<smem>>
    %241 = vector.broadcast %240 : f32 to vector<16x16xf32>
    %242 = arith.mulf %241, %235 : vector<16x16xf32>
    %243 = arith.addf %233, %242 : vector<16x16xf32>
    %c0_98 = arith.constant 0 : index
    %c2_99 = arith.constant 2 : index
    %c2_100 = arith.constant 2 : index
    %c0_101 = arith.constant 0 : index
    %244 = vector.load %arg0[%c0_98, %c2_99, %c2_100, %c0_101] : memref<2x4x18x18xf32, #tpu.memory_space<vmem>>, vector<1x1x16x16xf32>
    %245 = vector.shape_cast %244 : vector<1x1x16x16xf32> to vector<16x16xf32>
    %c24 = arith.constant 24 : index
    %246 = memref.load %arg1[%c24] : memref<72xf32, #tpu.memory_space<smem>>
    %247 = vector.broadcast %246 : f32 to vector<16x16xf32>
    %248 = arith.mulf %247, %245 : vector<16x16xf32>
    %249 = arith.addf %239, %248 : vector<16x16xf32>
    %c60 = arith.constant 60 : index
    %250 = memref.load %arg1[%c60] : memref<72xf32, #tpu.memory_space<smem>>
    %251 = vector.broadcast %250 : f32 to vector<16x16xf32>
    %252 = arith.mulf %251, %245 : vector<16x16xf32>
    %253 = arith.addf %243, %252 : vector<16x16xf32>
    %c0_102 = arith.constant 0 : index
    %c2_103 = arith.constant 2 : index
    %c2_104 = arith.constant 2 : index
    %c1_105 = arith.constant 1 : index
    %254 = vector.load %arg0[%c0_102, %c2_103, %c2_104, %c1_105] : memref<2x4x18x18xf32, #tpu.memory_space<vmem>>, vector<1x1x16x16xf32>
    %255 = vector.shape_cast %254 : vector<1x1x16x16xf32> to vector<16x16xf32>
    %c25 = arith.constant 25 : index
    %256 = memref.load %arg1[%c25] : memref<72xf32, #tpu.memory_space<smem>>
    %257 = vector.broadcast %256 : f32 to vector<16x16xf32>
    %258 = arith.mulf %257, %255 : vector<16x16xf32>
    %259 = arith.addf %249, %258 : vector<16x16xf32>
    %c61 = arith.constant 61 : index
    %260 = memref.load %arg1[%c61] : memref<72xf32, #tpu.memory_space<smem>>
    %261 = vector.broadcast %260 : f32 to vector<16x16xf32>
    %262 = arith.mulf %261, %255 : vector<16x16xf32>
    %263 = arith.addf %253, %262 : vector<16x16xf32>
    %c0_106 = arith.constant 0 : index
    %c2_107 = arith.constant 2 : index
    %c2_108 = arith.constant 2 : index
    %c2_109 = arith.constant 2 : index
    %264 = vector.load %arg0[%c0_106, %c2_107, %c2_108, %c2_109] : memref<2x4x18x18xf32, #tpu.memory_space<vmem>>, vector<1x1x16x16xf32>
    %265 = vector.shape_cast %264 : vector<1x1x16x16xf32> to vector<16x16xf32>
    %c26 = arith.constant 26 : index
    %266 = memref.load %arg1[%c26] : memref<72xf32, #tpu.memory_space<smem>>
    %267 = vector.broadcast %266 : f32 to vector<16x16xf32>
    %268 = arith.mulf %267, %265 : vector<16x16xf32>
    %269 = arith.addf %259, %268 : vector<16x16xf32>
    %c62 = arith.constant 62 : index
    %270 = memref.load %arg1[%c62] : memref<72xf32, #tpu.memory_space<smem>>
    %271 = vector.broadcast %270 : f32 to vector<16x16xf32>
    %272 = arith.mulf %271, %265 : vector<16x16xf32>
    %273 = arith.addf %263, %272 : vector<16x16xf32>
    %c0_110 = arith.constant 0 : index
    %c3_111 = arith.constant 3 : index
    %c0_112 = arith.constant 0 : index
    %c0_113 = arith.constant 0 : index
    %274 = vector.load %arg0[%c0_110, %c3_111, %c0_112, %c0_113] : memref<2x4x18x18xf32, #tpu.memory_space<vmem>>, vector<1x1x16x16xf32>
    %275 = vector.shape_cast %274 : vector<1x1x16x16xf32> to vector<16x16xf32>
    %c27 = arith.constant 27 : index
    %276 = memref.load %arg1[%c27] : memref<72xf32, #tpu.memory_space<smem>>
    %277 = vector.broadcast %276 : f32 to vector<16x16xf32>
    %278 = arith.mulf %277, %275 : vector<16x16xf32>
    %279 = arith.addf %269, %278 : vector<16x16xf32>
    %c63 = arith.constant 63 : index
    %280 = memref.load %arg1[%c63] : memref<72xf32, #tpu.memory_space<smem>>
    %281 = vector.broadcast %280 : f32 to vector<16x16xf32>
    %282 = arith.mulf %281, %275 : vector<16x16xf32>
    %283 = arith.addf %273, %282 : vector<16x16xf32>
    %c0_114 = arith.constant 0 : index
    %c3_115 = arith.constant 3 : index
    %c0_116 = arith.constant 0 : index
    %c1_117 = arith.constant 1 : index
    %284 = vector.load %arg0[%c0_114, %c3_115, %c0_116, %c1_117] : memref<2x4x18x18xf32, #tpu.memory_space<vmem>>, vector<1x1x16x16xf32>
    %285 = vector.shape_cast %284 : vector<1x1x16x16xf32> to vector<16x16xf32>
    %c28 = arith.constant 28 : index
    %286 = memref.load %arg1[%c28] : memref<72xf32, #tpu.memory_space<smem>>
    %287 = vector.broadcast %286 : f32 to vector<16x16xf32>
    %288 = arith.mulf %287, %285 : vector<16x16xf32>
    %289 = arith.addf %279, %288 : vector<16x16xf32>
    %c64 = arith.constant 64 : index
    %290 = memref.load %arg1[%c64] : memref<72xf32, #tpu.memory_space<smem>>
    %291 = vector.broadcast %290 : f32 to vector<16x16xf32>
    %292 = arith.mulf %291, %285 : vector<16x16xf32>
    %293 = arith.addf %283, %292 : vector<16x16xf32>
    %c0_118 = arith.constant 0 : index
    %c3_119 = arith.constant 3 : index
    %c0_120 = arith.constant 0 : index
    %c2_121 = arith.constant 2 : index
    %294 = vector.load %arg0[%c0_118, %c3_119, %c0_120, %c2_121] : memref<2x4x18x18xf32, #tpu.memory_space<vmem>>, vector<1x1x16x16xf32>
    %295 = vector.shape_cast %294 : vector<1x1x16x16xf32> to vector<16x16xf32>
    %c29 = arith.constant 29 : index
    %296 = memref.load %arg1[%c29] : memref<72xf32, #tpu.memory_space<smem>>
    %297 = vector.broadcast %296 : f32 to vector<16x16xf32>
    %298 = arith.mulf %297, %295 : vector<16x16xf32>
    %299 = arith.addf %289, %298 : vector<16x16xf32>
    %c65 = arith.constant 65 : index
    %300 = memref.load %arg1[%c65] : memref<72xf32, #tpu.memory_space<smem>>
    %301 = vector.broadcast %300 : f32 to vector<16x16xf32>
    %302 = arith.mulf %301, %295 : vector<16x16xf32>
    %303 = arith.addf %293, %302 : vector<16x16xf32>
    %c0_122 = arith.constant 0 : index
    %c3_123 = arith.constant 3 : index
    %c1_124 = arith.constant 1 : index
    %c0_125 = arith.constant 0 : index
    %304 = vector.load %arg0[%c0_122, %c3_123, %c1_124, %c0_125] : memref<2x4x18x18xf32, #tpu.memory_space<vmem>>, vector<1x1x16x16xf32>
    %305 = vector.shape_cast %304 : vector<1x1x16x16xf32> to vector<16x16xf32>
    %c30 = arith.constant 30 : index
    %306 = memref.load %arg1[%c30] : memref<72xf32, #tpu.memory_space<smem>>
    %307 = vector.broadcast %306 : f32 to vector<16x16xf32>
    %308 = arith.mulf %307, %305 : vector<16x16xf32>
    %309 = arith.addf %299, %308 : vector<16x16xf32>
    %c66 = arith.constant 66 : index
    %310 = memref.load %arg1[%c66] : memref<72xf32, #tpu.memory_space<smem>>
    %311 = vector.broadcast %310 : f32 to vector<16x16xf32>
    %312 = arith.mulf %311, %305 : vector<16x16xf32>
    %313 = arith.addf %303, %312 : vector<16x16xf32>
    %c0_126 = arith.constant 0 : index
    %c3_127 = arith.constant 3 : index
    %c1_128 = arith.constant 1 : index
    %c1_129 = arith.constant 1 : index
    %314 = vector.load %arg0[%c0_126, %c3_127, %c1_128, %c1_129] : memref<2x4x18x18xf32, #tpu.memory_space<vmem>>, vector<1x1x16x16xf32>
    %315 = vector.shape_cast %314 : vector<1x1x16x16xf32> to vector<16x16xf32>
    %c31 = arith.constant 31 : index
    %316 = memref.load %arg1[%c31] : memref<72xf32, #tpu.memory_space<smem>>
    %317 = vector.broadcast %316 : f32 to vector<16x16xf32>
    %318 = arith.mulf %317, %315 : vector<16x16xf32>
    %319 = arith.addf %309, %318 : vector<16x16xf32>
    %c67 = arith.constant 67 : index
    %320 = memref.load %arg1[%c67] : memref<72xf32, #tpu.memory_space<smem>>
    %321 = vector.broadcast %320 : f32 to vector<16x16xf32>
    %322 = arith.mulf %321, %315 : vector<16x16xf32>
    %323 = arith.addf %313, %322 : vector<16x16xf32>
    %c0_130 = arith.constant 0 : index
    %c3_131 = arith.constant 3 : index
    %c1_132 = arith.constant 1 : index
    %c2_133 = arith.constant 2 : index
    %324 = vector.load %arg0[%c0_130, %c3_131, %c1_132, %c2_133] : memref<2x4x18x18xf32, #tpu.memory_space<vmem>>, vector<1x1x16x16xf32>
    %325 = vector.shape_cast %324 : vector<1x1x16x16xf32> to vector<16x16xf32>
    %c32 = arith.constant 32 : index
    %326 = memref.load %arg1[%c32] : memref<72xf32, #tpu.memory_space<smem>>
    %327 = vector.broadcast %326 : f32 to vector<16x16xf32>
    %328 = arith.mulf %327, %325 : vector<16x16xf32>
    %329 = arith.addf %319, %328 : vector<16x16xf32>
    %c68 = arith.constant 68 : index
    %330 = memref.load %arg1[%c68] : memref<72xf32, #tpu.memory_space<smem>>
    %331 = vector.broadcast %330 : f32 to vector<16x16xf32>
    %332 = arith.mulf %331, %325 : vector<16x16xf32>
    %333 = arith.addf %323, %332 : vector<16x16xf32>
    %c0_134 = arith.constant 0 : index
    %c3_135 = arith.constant 3 : index
    %c2_136 = arith.constant 2 : index
    %c0_137 = arith.constant 0 : index
    %334 = vector.load %arg0[%c0_134, %c3_135, %c2_136, %c0_137] : memref<2x4x18x18xf32, #tpu.memory_space<vmem>>, vector<1x1x16x16xf32>
    %335 = vector.shape_cast %334 : vector<1x1x16x16xf32> to vector<16x16xf32>
    %c33 = arith.constant 33 : index
    %336 = memref.load %arg1[%c33] : memref<72xf32, #tpu.memory_space<smem>>
    %337 = vector.broadcast %336 : f32 to vector<16x16xf32>
    %338 = arith.mulf %337, %335 : vector<16x16xf32>
    %339 = arith.addf %329, %338 : vector<16x16xf32>
    %c69 = arith.constant 69 : index
    %340 = memref.load %arg1[%c69] : memref<72xf32, #tpu.memory_space<smem>>
    %341 = vector.broadcast %340 : f32 to vector<16x16xf32>
    %342 = arith.mulf %341, %335 : vector<16x16xf32>
    %343 = arith.addf %333, %342 : vector<16x16xf32>
    %c0_138 = arith.constant 0 : index
    %c3_139 = arith.constant 3 : index
    %c2_140 = arith.constant 2 : index
    %c1_141 = arith.constant 1 : index
    %344 = vector.load %arg0[%c0_138, %c3_139, %c2_140, %c1_141] : memref<2x4x18x18xf32, #tpu.memory_space<vmem>>, vector<1x1x16x16xf32>
    %345 = vector.shape_cast %344 : vector<1x1x16x16xf32> to vector<16x16xf32>
    %c34 = arith.constant 34 : index
    %346 = memref.load %arg1[%c34] : memref<72xf32, #tpu.memory_space<smem>>
    %347 = vector.broadcast %346 : f32 to vector<16x16xf32>
    %348 = arith.mulf %347, %345 : vector<16x16xf32>
    %349 = arith.addf %339, %348 : vector<16x16xf32>
    %c70 = arith.constant 70 : index
    %350 = memref.load %arg1[%c70] : memref<72xf32, #tpu.memory_space<smem>>
    %351 = vector.broadcast %350 : f32 to vector<16x16xf32>
    %352 = arith.mulf %351, %345 : vector<16x16xf32>
    %353 = arith.addf %343, %352 : vector<16x16xf32>
    %c0_142 = arith.constant 0 : index
    %c3_143 = arith.constant 3 : index
    %c2_144 = arith.constant 2 : index
    %c2_145 = arith.constant 2 : index
    %354 = vector.load %arg0[%c0_142, %c3_143, %c2_144, %c2_145] : memref<2x4x18x18xf32, #tpu.memory_space<vmem>>, vector<1x1x16x16xf32>
    %355 = vector.shape_cast %354 : vector<1x1x16x16xf32> to vector<16x16xf32>
    %c35 = arith.constant 35 : index
    %356 = memref.load %arg1[%c35] : memref<72xf32, #tpu.memory_space<smem>>
    %357 = vector.broadcast %356 : f32 to vector<16x16xf32>
    %358 = arith.mulf %357, %355 : vector<16x16xf32>
    %359 = arith.addf %349, %358 : vector<16x16xf32>
    %c71 = arith.constant 71 : index
    %360 = memref.load %arg1[%c71] : memref<72xf32, #tpu.memory_space<smem>>
    %361 = vector.broadcast %360 : f32 to vector<16x16xf32>
    %362 = arith.mulf %361, %355 : vector<16x16xf32>
    %363 = arith.addf %353, %362 : vector<16x16xf32>
    %cst = arith.constant 0.000000e+00 : f32
    %364 = vector.broadcast %cst : f32 to vector<16x16xf32>
    %365 = arith.maximumf %359, %364 : vector<16x16xf32>
    %c0_146 = arith.constant 0 : index
    %c0_147 = arith.constant 0 : index
    %c0_148 = arith.constant 0 : index
    %c0_149 = arith.constant 0 : index
    %366 = vector.load %arg8[%c0_146, %c0_147, %c0_148, %c0_149] : memref<2x2x16x16xf32, #tpu.memory_space<vmem>>, vector<1x1x16x16xf32>
    %367 = vector.shape_cast %366 : vector<1x1x16x16xf32> to vector<16x16xf32>
    %368 = vector.shape_cast %365 : vector<16x16xf32> to vector<1x1x16x16xf32>
    tpu.vector_store %arg8[%c0_146, %c0_147, %c0_148, %c0_149], %368 {strides = array<i32>} : memref<2x2x16x16xf32, #tpu.memory_space<vmem>>, vector<1x1x16x16xf32>,
    %cst_150 = arith.constant 0.000000e+00 : f32
    %369 = vector.broadcast %cst_150 : f32 to vector<16x16xf32>
    %370 = arith.maximumf %363, %369 : vector<16x16xf32>
    %c0_151 = arith.constant 0 : index
    %c1_152 = arith.constant 1 : index
    %c0_153 = arith.constant 0 : index
    %c0_154 = arith.constant 0 : index
    %371 = vector.load %arg8[%c0_151, %c1_152, %c0_153, %c0_154] : memref<2x2x16x16xf32, #tpu.memory_space<vmem>>, vector<1x1x16x16xf32>
    %372 = vector.shape_cast %371 : vector<1x1x16x16xf32> to vector<16x16xf32>
    %373 = vector.shape_cast %370 : vector<16x16xf32> to vector<1x1x16x16xf32>
    tpu.vector_store %arg8[%c0_151, %c1_152, %c0_153, %c0_154], %373 {strides = array<i32>} : memref<2x2x16x16xf32, #tpu.memory_space<vmem>>, vector<1x1x16x16xf32>,
    %c0_155 = arith.constant 0 : index
    %374 = memref.load %arg2[%c0_155] : memref<2xf32, #tpu.memory_space<smem>>
    %375 = vector.broadcast %374 : f32 to vector<16x16xf32>
    %c1_156 = arith.constant 1 : index
    %376 = memref.load %arg2[%c1_156] : memref<2xf32, #tpu.memory_space<smem>>
    %377 = vector.broadcast %376 : f32 to vector<16x16xf32>
    %c1_157 = arith.constant 1 : index
    %c0_158 = arith.constant 0 : index
    %c0_159 = arith.constant 0 : index
    %c0_160 = arith.constant 0 : index
    %378 = vector.load %arg0[%c1_157, %c0_158, %c0_159, %c0_160] : memref<2x4x18x18xf32, #tpu.memory_space<vmem>>, vector<1x1x16x16xf32>
    %379 = vector.shape_cast %378 : vector<1x1x16x16xf32> to vector<16x16xf32>
    %c0_161 = arith.constant 0 : index
    %380 = memref.load %arg1[%c0_161] : memref<72xf32, #tpu.memory_space<smem>>
    %381 = vector.broadcast %380 : f32 to vector<16x16xf32>
    %382 = arith.mulf %381, %379 : vector<16x16xf32>
    %383 = arith.addf %375, %382 : vector<16x16xf32>
    %c36_162 = arith.constant 36 : index
    %384 = memref.load %arg1[%c36_162] : memref<72xf32, #tpu.memory_space<smem>>
    %385 = vector.broadcast %384 : f32 to vector<16x16xf32>
    %386 = arith.mulf %385, %379 : vector<16x16xf32>
    %387 = arith.addf %377, %386 : vector<16x16xf32>
    %c1_163 = arith.constant 1 : index
    %c0_164 = arith.constant 0 : index
    %c0_165 = arith.constant 0 : index
    %c1_166 = arith.constant 1 : index
    %388 = vector.load %arg0[%c1_163, %c0_164, %c0_165, %c1_166] : memref<2x4x18x18xf32, #tpu.memory_space<vmem>>, vector<1x1x16x16xf32>
    %389 = vector.shape_cast %388 : vector<1x1x16x16xf32> to vector<16x16xf32>
    %c1_167 = arith.constant 1 : index
    %390 = memref.load %arg1[%c1_167] : memref<72xf32, #tpu.memory_space<smem>>
    %391 = vector.broadcast %390 : f32 to vector<16x16xf32>
    %392 = arith.mulf %391, %389 : vector<16x16xf32>
    %393 = arith.addf %383, %392 : vector<16x16xf32>
    %c37_168 = arith.constant 37 : index
    %394 = memref.load %arg1[%c37_168] : memref<72xf32, #tpu.memory_space<smem>>
    %395 = vector.broadcast %394 : f32 to vector<16x16xf32>
    %396 = arith.mulf %395, %389 : vector<16x16xf32>
    %397 = arith.addf %387, %396 : vector<16x16xf32>
    %c1_169 = arith.constant 1 : index
    %c0_170 = arith.constant 0 : index
    %c0_171 = arith.constant 0 : index
    %c2_172 = arith.constant 2 : index
    %398 = vector.load %arg0[%c1_169, %c0_170, %c0_171, %c2_172] : memref<2x4x18x18xf32, #tpu.memory_space<vmem>>, vector<1x1x16x16xf32>
    %399 = vector.shape_cast %398 : vector<1x1x16x16xf32> to vector<16x16xf32>
    %c2_173 = arith.constant 2 : index
    %400 = memref.load %arg1[%c2_173] : memref<72xf32, #tpu.memory_space<smem>>
    %401 = vector.broadcast %400 : f32 to vector<16x16xf32>
    %402 = arith.mulf %401, %399 : vector<16x16xf32>
    %403 = arith.addf %393, %402 : vector<16x16xf32>
    %c38_174 = arith.constant 38 : index
    %404 = memref.load %arg1[%c38_174] : memref<72xf32, #tpu.memory_space<smem>>
    %405 = vector.broadcast %404 : f32 to vector<16x16xf32>
    %406 = arith.mulf %405, %399 : vector<16x16xf32>
    %407 = arith.addf %397, %406 : vector<16x16xf32>
    %c1_175 = arith.constant 1 : index
    %c0_176 = arith.constant 0 : index
    %c1_177 = arith.constant 1 : index
    %c0_178 = arith.constant 0 : index
    %408 = vector.load %arg0[%c1_175, %c0_176, %c1_177, %c0_178] : memref<2x4x18x18xf32, #tpu.memory_space<vmem>>, vector<1x1x16x16xf32>
    %409 = vector.shape_cast %408 : vector<1x1x16x16xf32> to vector<16x16xf32>
    %c3_179 = arith.constant 3 : index
    %410 = memref.load %arg1[%c3_179] : memref<72xf32, #tpu.memory_space<smem>>
    %411 = vector.broadcast %410 : f32 to vector<16x16xf32>
    %412 = arith.mulf %411, %409 : vector<16x16xf32>
    %413 = arith.addf %403, %412 : vector<16x16xf32>
    %c39_180 = arith.constant 39 : index
    %414 = memref.load %arg1[%c39_180] : memref<72xf32, #tpu.memory_space<smem>>
    %415 = vector.broadcast %414 : f32 to vector<16x16xf32>
    %416 = arith.mulf %415, %409 : vector<16x16xf32>
    %417 = arith.addf %407, %416 : vector<16x16xf32>
    %c1_181 = arith.constant 1 : index
    %c0_182 = arith.constant 0 : index
    %c1_183 = arith.constant 1 : index
    %c1_184 = arith.constant 1 : index
    %418 = vector.load %arg0[%c1_181, %c0_182, %c1_183, %c1_184] : memref<2x4x18x18xf32, #tpu.memory_space<vmem>>, vector<1x1x16x16xf32>
    %419 = vector.shape_cast %418 : vector<1x1x16x16xf32> to vector<16x16xf32>
    %c4_185 = arith.constant 4 : index
    %420 = memref.load %arg1[%c4_185] : memref<72xf32, #tpu.memory_space<smem>>
    %421 = vector.broadcast %420 : f32 to vector<16x16xf32>
    %422 = arith.mulf %421, %419 : vector<16x16xf32>
    %423 = arith.addf %413, %422 : vector<16x16xf32>
    %c40_186 = arith.constant 40 : index
    %424 = memref.load %arg1[%c40_186] : memref<72xf32, #tpu.memory_space<smem>>
    %425 = vector.broadcast %424 : f32 to vector<16x16xf32>
    %426 = arith.mulf %425, %419 : vector<16x16xf32>
    %427 = arith.addf %417, %426 : vector<16x16xf32>
    %c1_187 = arith.constant 1 : index
    %c0_188 = arith.constant 0 : index
    %c1_189 = arith.constant 1 : index
    %c2_190 = arith.constant 2 : index
    %428 = vector.load %arg0[%c1_187, %c0_188, %c1_189, %c2_190] : memref<2x4x18x18xf32, #tpu.memory_space<vmem>>, vector<1x1x16x16xf32>
    %429 = vector.shape_cast %428 : vector<1x1x16x16xf32> to vector<16x16xf32>
    %c5_191 = arith.constant 5 : index
    %430 = memref.load %arg1[%c5_191] : memref<72xf32, #tpu.memory_space<smem>>
    %431 = vector.broadcast %430 : f32 to vector<16x16xf32>
    %432 = arith.mulf %431, %429 : vector<16x16xf32>
    %433 = arith.addf %423, %432 : vector<16x16xf32>
    %c41_192 = arith.constant 41 : index
    %434 = memref.load %arg1[%c41_192] : memref<72xf32, #tpu.memory_space<smem>>
    %435 = vector.broadcast %434 : f32 to vector<16x16xf32>
    %436 = arith.mulf %435, %429 : vector<16x16xf32>
    %437 = arith.addf %427, %436 : vector<16x16xf32>
    %c1_193 = arith.constant 1 : index
    %c0_194 = arith.constant 0 : index
    %c2_195 = arith.constant 2 : index
    %c0_196 = arith.constant 0 : index
    %438 = vector.load %arg0[%c1_193, %c0_194, %c2_195, %c0_196] : memref<2x4x18x18xf32, #tpu.memory_space<vmem>>, vector<1x1x16x16xf32>
    %439 = vector.shape_cast %438 : vector<1x1x16x16xf32> to vector<16x16xf32>
    %c6_197 = arith.constant 6 : index
    %440 = memref.load %arg1[%c6_197] : memref<72xf32, #tpu.memory_space<smem>>
    %441 = vector.broadcast %440 : f32 to vector<16x16xf32>
    %442 = arith.mulf %441, %439 : vector<16x16xf32>
    %443 = arith.addf %433, %442 : vector<16x16xf32>
    %c42_198 = arith.constant 42 : index
    %444 = memref.load %arg1[%c42_198] : memref<72xf32, #tpu.memory_space<smem>>
    %445 = vector.broadcast %444 : f32 to vector<16x16xf32>
    %446 = arith.mulf %445, %439 : vector<16x16xf32>
    %447 = arith.addf %437, %446 : vector<16x16xf32>
    %c1_199 = arith.constant 1 : index
    %c0_200 = arith.constant 0 : index
    %c2_201 = arith.constant 2 : index
    %c1_202 = arith.constant 1 : index
    %448 = vector.load %arg0[%c1_199, %c0_200, %c2_201, %c1_202] : memref<2x4x18x18xf32, #tpu.memory_space<vmem>>, vector<1x1x16x16xf32>
    %449 = vector.shape_cast %448 : vector<1x1x16x16xf32> to vector<16x16xf32>
    %c7_203 = arith.constant 7 : index
    %450 = memref.load %arg1[%c7_203] : memref<72xf32, #tpu.memory_space<smem>>
    %451 = vector.broadcast %450 : f32 to vector<16x16xf32>
    %452 = arith.mulf %451, %449 : vector<16x16xf32>
    %453 = arith.addf %443, %452 : vector<16x16xf32>
    %c43_204 = arith.constant 43 : index
    %454 = memref.load %arg1[%c43_204] : memref<72xf32, #tpu.memory_space<smem>>
    %455 = vector.broadcast %454 : f32 to vector<16x16xf32>
    %456 = arith.mulf %455, %449 : vector<16x16xf32>
    %457 = arith.addf %447, %456 : vector<16x16xf32>
    %c1_205 = arith.constant 1 : index
    %c0_206 = arith.constant 0 : index
    %c2_207 = arith.constant 2 : index
    %c2_208 = arith.constant 2 : index
    %458 = vector.load %arg0[%c1_205, %c0_206, %c2_207, %c2_208] : memref<2x4x18x18xf32, #tpu.memory_space<vmem>>, vector<1x1x16x16xf32>
    %459 = vector.shape_cast %458 : vector<1x1x16x16xf32> to vector<16x16xf32>
    %c8_209 = arith.constant 8 : index
    %460 = memref.load %arg1[%c8_209] : memref<72xf32, #tpu.memory_space<smem>>
    %461 = vector.broadcast %460 : f32 to vector<16x16xf32>
    %462 = arith.mulf %461, %459 : vector<16x16xf32>
    %463 = arith.addf %453, %462 : vector<16x16xf32>
    %c44_210 = arith.constant 44 : index
    %464 = memref.load %arg1[%c44_210] : memref<72xf32, #tpu.memory_space<smem>>
    %465 = vector.broadcast %464 : f32 to vector<16x16xf32>
    %466 = arith.mulf %465, %459 : vector<16x16xf32>
    %467 = arith.addf %457, %466 : vector<16x16xf32>
    %c1_211 = arith.constant 1 : index
    %c1_212 = arith.constant 1 : index
    %c0_213 = arith.constant 0 : index
    %c0_214 = arith.constant 0 : index
    %468 = vector.load %arg0[%c1_211, %c1_212, %c0_213, %c0_214] : memref<2x4x18x18xf32, #tpu.memory_space<vmem>>, vector<1x1x16x16xf32>
    %469 = vector.shape_cast %468 : vector<1x1x16x16xf32> to vector<16x16xf32>
    %c9_215 = arith.constant 9 : index
    %470 = memref.load %arg1[%c9_215] : memref<72xf32, #tpu.memory_space<smem>>
    %471 = vector.broadcast %470 : f32 to vector<16x16xf32>
    %472 = arith.mulf %471, %469 : vector<16x16xf32>
    %473 = arith.addf %463, %472 : vector<16x16xf32>
    %c45_216 = arith.constant 45 : index
    %474 = memref.load %arg1[%c45_216] : memref<72xf32, #tpu.memory_space<smem>>
    %475 = vector.broadcast %474 : f32 to vector<16x16xf32>
    %476 = arith.mulf %475, %469 : vector<16x16xf32>
    %477 = arith.addf %467, %476 : vector<16x16xf32>
    %c1_217 = arith.constant 1 : index
    %c1_218 = arith.constant 1 : index
    %c0_219 = arith.constant 0 : index
    %c1_220 = arith.constant 1 : index
    %478 = vector.load %arg0[%c1_217, %c1_218, %c0_219, %c1_220] : memref<2x4x18x18xf32, #tpu.memory_space<vmem>>, vector<1x1x16x16xf32>
    %479 = vector.shape_cast %478 : vector<1x1x16x16xf32> to vector<16x16xf32>
    %c10_221 = arith.constant 10 : index
    %480 = memref.load %arg1[%c10_221] : memref<72xf32, #tpu.memory_space<smem>>
    %481 = vector.broadcast %480 : f32 to vector<16x16xf32>
    %482 = arith.mulf %481, %479 : vector<16x16xf32>
    %483 = arith.addf %473, %482 : vector<16x16xf32>
    %c46_222 = arith.constant 46 : index
    %484 = memref.load %arg1[%c46_222] : memref<72xf32, #tpu.memory_space<smem>>
    %485 = vector.broadcast %484 : f32 to vector<16x16xf32>
    %486 = arith.mulf %485, %479 : vector<16x16xf32>
    %487 = arith.addf %477, %486 : vector<16x16xf32>
    %c1_223 = arith.constant 1 : index
    %c1_224 = arith.constant 1 : index
    %c0_225 = arith.constant 0 : index
    %c2_226 = arith.constant 2 : index
    %488 = vector.load %arg0[%c1_223, %c1_224, %c0_225, %c2_226] : memref<2x4x18x18xf32, #tpu.memory_space<vmem>>, vector<1x1x16x16xf32>
    %489 = vector.shape_cast %488 : vector<1x1x16x16xf32> to vector<16x16xf32>
    %c11_227 = arith.constant 11 : index
    %490 = memref.load %arg1[%c11_227] : memref<72xf32, #tpu.memory_space<smem>>
    %491 = vector.broadcast %490 : f32 to vector<16x16xf32>
    %492 = arith.mulf %491, %489 : vector<16x16xf32>
    %493 = arith.addf %483, %492 : vector<16x16xf32>
    %c47_228 = arith.constant 47 : index
    %494 = memref.load %arg1[%c47_228] : memref<72xf32, #tpu.memory_space<smem>>
    %495 = vector.broadcast %494 : f32 to vector<16x16xf32>
    %496 = arith.mulf %495, %489 : vector<16x16xf32>
    %497 = arith.addf %487, %496 : vector<16x16xf32>
    %c1_229 = arith.constant 1 : index
    %c1_230 = arith.constant 1 : index
    %c1_231 = arith.constant 1 : index
    %c0_232 = arith.constant 0 : index
    %498 = vector.load %arg0[%c1_229, %c1_230, %c1_231, %c0_232] : memref<2x4x18x18xf32, #tpu.memory_space<vmem>>, vector<1x1x16x16xf32>
    %499 = vector.shape_cast %498 : vector<1x1x16x16xf32> to vector<16x16xf32>
    %c12_233 = arith.constant 12 : index
    %500 = memref.load %arg1[%c12_233] : memref<72xf32, #tpu.memory_space<smem>>
    %501 = vector.broadcast %500 : f32 to vector<16x16xf32>
    %502 = arith.mulf %501, %499 : vector<16x16xf32>
    %503 = arith.addf %493, %502 : vector<16x16xf32>
    %c48_234 = arith.constant 48 : index
    %504 = memref.load %arg1[%c48_234] : memref<72xf32, #tpu.memory_space<smem>>
    %505 = vector.broadcast %504 : f32 to vector<16x16xf32>
    %506 = arith.mulf %505, %499 : vector<16x16xf32>
    %507 = arith.addf %497, %506 : vector<16x16xf32>
    %c1_235 = arith.constant 1 : index
    %c1_236 = arith.constant 1 : index
    %c1_237 = arith.constant 1 : index
    %c1_238 = arith.constant 1 : index
    %508 = vector.load %arg0[%c1_235, %c1_236, %c1_237, %c1_238] : memref<2x4x18x18xf32, #tpu.memory_space<vmem>>, vector<1x1x16x16xf32>
    %509 = vector.shape_cast %508 : vector<1x1x16x16xf32> to vector<16x16xf32>
    %c13_239 = arith.constant 13 : index
    %510 = memref.load %arg1[%c13_239] : memref<72xf32, #tpu.memory_space<smem>>
    %511 = vector.broadcast %510 : f32 to vector<16x16xf32>
    %512 = arith.mulf %511, %509 : vector<16x16xf32>
    %513 = arith.addf %503, %512 : vector<16x16xf32>
    %c49_240 = arith.constant 49 : index
    %514 = memref.load %arg1[%c49_240] : memref<72xf32, #tpu.memory_space<smem>>
    %515 = vector.broadcast %514 : f32 to vector<16x16xf32>
    %516 = arith.mulf %515, %509 : vector<16x16xf32>
    %517 = arith.addf %507, %516 : vector<16x16xf32>
    %c1_241 = arith.constant 1 : index
    %c1_242 = arith.constant 1 : index
    %c1_243 = arith.constant 1 : index
    %c2_244 = arith.constant 2 : index
    %518 = vector.load %arg0[%c1_241, %c1_242, %c1_243, %c2_244] : memref<2x4x18x18xf32, #tpu.memory_space<vmem>>, vector<1x1x16x16xf32>
    %519 = vector.shape_cast %518 : vector<1x1x16x16xf32> to vector<16x16xf32>
    %c14_245 = arith.constant 14 : index
    %520 = memref.load %arg1[%c14_245] : memref<72xf32, #tpu.memory_space<smem>>
    %521 = vector.broadcast %520 : f32 to vector<16x16xf32>
    %522 = arith.mulf %521, %519 : vector<16x16xf32>
    %523 = arith.addf %513, %522 : vector<16x16xf32>
    %c50_246 = arith.constant 50 : index
    %524 = memref.load %arg1[%c50_246] : memref<72xf32, #tpu.memory_space<smem>>
    %525 = vector.broadcast %524 : f32 to vector<16x16xf32>
    %526 = arith.mulf %525, %519 : vector<16x16xf32>
    %527 = arith.addf %517, %526 : vector<16x16xf32>
    %c1_247 = arith.constant 1 : index
    %c1_248 = arith.constant 1 : index
    %c2_249 = arith.constant 2 : index
    %c0_250 = arith.constant 0 : index
    %528 = vector.load %arg0[%c1_247, %c1_248, %c2_249, %c0_250] : memref<2x4x18x18xf32, #tpu.memory_space<vmem>>, vector<1x1x16x16xf32>
    %529 = vector.shape_cast %528 : vector<1x1x16x16xf32> to vector<16x16xf32>
    %c15_251 = arith.constant 15 : index
    %530 = memref.load %arg1[%c15_251] : memref<72xf32, #tpu.memory_space<smem>>
    %531 = vector.broadcast %530 : f32 to vector<16x16xf32>
    %532 = arith.mulf %531, %529 : vector<16x16xf32>
    %533 = arith.addf %523, %532 : vector<16x16xf32>
    %c51_252 = arith.constant 51 : index
    %534 = memref.load %arg1[%c51_252] : memref<72xf32, #tpu.memory_space<smem>>
    %535 = vector.broadcast %534 : f32 to vector<16x16xf32>
    %536 = arith.mulf %535, %529 : vector<16x16xf32>
    %537 = arith.addf %527, %536 : vector<16x16xf32>
    %c1_253 = arith.constant 1 : index
    %c1_254 = arith.constant 1 : index
    %c2_255 = arith.constant 2 : index
    %c1_256 = arith.constant 1 : index
    %538 = vector.load %arg0[%c1_253, %c1_254, %c2_255, %c1_256] : memref<2x4x18x18xf32, #tpu.memory_space<vmem>>, vector<1x1x16x16xf32>
    %539 = vector.shape_cast %538 : vector<1x1x16x16xf32> to vector<16x16xf32>
    %c16_257 = arith.constant 16 : index
    %540 = memref.load %arg1[%c16_257] : memref<72xf32, #tpu.memory_space<smem>>
    %541 = vector.broadcast %540 : f32 to vector<16x16xf32>
    %542 = arith.mulf %541, %539 : vector<16x16xf32>
    %543 = arith.addf %533, %542 : vector<16x16xf32>
    %c52_258 = arith.constant 52 : index
    %544 = memref.load %arg1[%c52_258] : memref<72xf32, #tpu.memory_space<smem>>
    %545 = vector.broadcast %544 : f32 to vector<16x16xf32>
    %546 = arith.mulf %545, %539 : vector<16x16xf32>
    %547 = arith.addf %537, %546 : vector<16x16xf32>
    %c1_259 = arith.constant 1 : index
    %c1_260 = arith.constant 1 : index
    %c2_261 = arith.constant 2 : index
    %c2_262 = arith.constant 2 : index
    %548 = vector.load %arg0[%c1_259, %c1_260, %c2_261, %c2_262] : memref<2x4x18x18xf32, #tpu.memory_space<vmem>>, vector<1x1x16x16xf32>
    %549 = vector.shape_cast %548 : vector<1x1x16x16xf32> to vector<16x16xf32>
    %c17_263 = arith.constant 17 : index
    %550 = memref.load %arg1[%c17_263] : memref<72xf32, #tpu.memory_space<smem>>
    %551 = vector.broadcast %550 : f32 to vector<16x16xf32>
    %552 = arith.mulf %551, %549 : vector<16x16xf32>
    %553 = arith.addf %543, %552 : vector<16x16xf32>
    %c53_264 = arith.constant 53 : index
    %554 = memref.load %arg1[%c53_264] : memref<72xf32, #tpu.memory_space<smem>>
    %555 = vector.broadcast %554 : f32 to vector<16x16xf32>
    %556 = arith.mulf %555, %549 : vector<16x16xf32>
    %557 = arith.addf %547, %556 : vector<16x16xf32>
    %c1_265 = arith.constant 1 : index
    %c2_266 = arith.constant 2 : index
    %c0_267 = arith.constant 0 : index
    %c0_268 = arith.constant 0 : index
    %558 = vector.load %arg0[%c1_265, %c2_266, %c0_267, %c0_268] : memref<2x4x18x18xf32, #tpu.memory_space<vmem>>, vector<1x1x16x16xf32>
    %559 = vector.shape_cast %558 : vector<1x1x16x16xf32> to vector<16x16xf32>
    %c18_269 = arith.constant 18 : index
    %560 = memref.load %arg1[%c18_269] : memref<72xf32, #tpu.memory_space<smem>>
    %561 = vector.broadcast %560 : f32 to vector<16x16xf32>
    %562 = arith.mulf %561, %559 : vector<16x16xf32>
    %563 = arith.addf %553, %562 : vector<16x16xf32>
    %c54_270 = arith.constant 54 : index
    %564 = memref.load %arg1[%c54_270] : memref<72xf32, #tpu.memory_space<smem>>
    %565 = vector.broadcast %564 : f32 to vector<16x16xf32>
    %566 = arith.mulf %565, %559 : vector<16x16xf32>
    %567 = arith.addf %557, %566 : vector<16x16xf32>
    %c1_271 = arith.constant 1 : index
    %c2_272 = arith.constant 2 : index
    %c0_273 = arith.constant 0 : index
    %c1_274 = arith.constant 1 : index
    %568 = vector.load %arg0[%c1_271, %c2_272, %c0_273, %c1_274] : memref<2x4x18x18xf32, #tpu.memory_space<vmem>>, vector<1x1x16x16xf32>
    %569 = vector.shape_cast %568 : vector<1x1x16x16xf32> to vector<16x16xf32>
    %c19_275 = arith.constant 19 : index
    %570 = memref.load %arg1[%c19_275] : memref<72xf32, #tpu.memory_space<smem>>
    %571 = vector.broadcast %570 : f32 to vector<16x16xf32>
    %572 = arith.mulf %571, %569 : vector<16x16xf32>
    %573 = arith.addf %563, %572 : vector<16x16xf32>
    %c55_276 = arith.constant 55 : index
    %574 = memref.load %arg1[%c55_276] : memref<72xf32, #tpu.memory_space<smem>>
    %575 = vector.broadcast %574 : f32 to vector<16x16xf32>
    %576 = arith.mulf %575, %569 : vector<16x16xf32>
    %577 = arith.addf %567, %576 : vector<16x16xf32>
    %c1_277 = arith.constant 1 : index
    %c2_278 = arith.constant 2 : index
    %c0_279 = arith.constant 0 : index
    %c2_280 = arith.constant 2 : index
    %578 = vector.load %arg0[%c1_277, %c2_278, %c0_279, %c2_280] : memref<2x4x18x18xf32, #tpu.memory_space<vmem>>, vector<1x1x16x16xf32>
    %579 = vector.shape_cast %578 : vector<1x1x16x16xf32> to vector<16x16xf32>
    %c20_281 = arith.constant 20 : index
    %580 = memref.load %arg1[%c20_281] : memref<72xf32, #tpu.memory_space<smem>>
    %581 = vector.broadcast %580 : f32 to vector<16x16xf32>
    %582 = arith.mulf %581, %579 : vector<16x16xf32>
    %583 = arith.addf %573, %582 : vector<16x16xf32>
    %c56_282 = arith.constant 56 : index
    %584 = memref.load %arg1[%c56_282] : memref<72xf32, #tpu.memory_space<smem>>
    %585 = vector.broadcast %584 : f32 to vector<16x16xf32>
    %586 = arith.mulf %585, %579 : vector<16x16xf32>
    %587 = arith.addf %577, %586 : vector<16x16xf32>
    %c1_283 = arith.constant 1 : index
    %c2_284 = arith.constant 2 : index
    %c1_285 = arith.constant 1 : index
    %c0_286 = arith.constant 0 : index
    %588 = vector.load %arg0[%c1_283, %c2_284, %c1_285, %c0_286] : memref<2x4x18x18xf32, #tpu.memory_space<vmem>>, vector<1x1x16x16xf32>
    %589 = vector.shape_cast %588 : vector<1x1x16x16xf32> to vector<16x16xf32>
    %c21_287 = arith.constant 21 : index
    %590 = memref.load %arg1[%c21_287] : memref<72xf32, #tpu.memory_space<smem>>
    %591 = vector.broadcast %590 : f32 to vector<16x16xf32>
    %592 = arith.mulf %591, %589 : vector<16x16xf32>
    %593 = arith.addf %583, %592 : vector<16x16xf32>
    %c57_288 = arith.constant 57 : index
    %594 = memref.load %arg1[%c57_288] : memref<72xf32, #tpu.memory_space<smem>>
    %595 = vector.broadcast %594 : f32 to vector<16x16xf32>
    %596 = arith.mulf %595, %589 : vector<16x16xf32>
    %597 = arith.addf %587, %596 : vector<16x16xf32>
    %c1_289 = arith.constant 1 : index
    %c2_290 = arith.constant 2 : index
    %c1_291 = arith.constant 1 : index
    %c1_292 = arith.constant 1 : index
    %598 = vector.load %arg0[%c1_289, %c2_290, %c1_291, %c1_292] : memref<2x4x18x18xf32, #tpu.memory_space<vmem>>, vector<1x1x16x16xf32>
    %599 = vector.shape_cast %598 : vector<1x1x16x16xf32> to vector<16x16xf32>
    %c22_293 = arith.constant 22 : index
    %600 = memref.load %arg1[%c22_293] : memref<72xf32, #tpu.memory_space<smem>>
    %601 = vector.broadcast %600 : f32 to vector<16x16xf32>
    %602 = arith.mulf %601, %599 : vector<16x16xf32>
    %603 = arith.addf %593, %602 : vector<16x16xf32>
    %c58_294 = arith.constant 58 : index
    %604 = memref.load %arg1[%c58_294] : memref<72xf32, #tpu.memory_space<smem>>
    %605 = vector.broadcast %604 : f32 to vector<16x16xf32>
    %606 = arith.mulf %605, %599 : vector<16x16xf32>
    %607 = arith.addf %597, %606 : vector<16x16xf32>
    %c1_295 = arith.constant 1 : index
    %c2_296 = arith.constant 2 : index
    %c1_297 = arith.constant 1 : index
    %c2_298 = arith.constant 2 : index
    %608 = vector.load %arg0[%c1_295, %c2_296, %c1_297, %c2_298] : memref<2x4x18x18xf32, #tpu.memory_space<vmem>>, vector<1x1x16x16xf32>
    %609 = vector.shape_cast %608 : vector<1x1x16x16xf32> to vector<16x16xf32>
    %c23_299 = arith.constant 23 : index
    %610 = memref.load %arg1[%c23_299] : memref<72xf32, #tpu.memory_space<smem>>
    %611 = vector.broadcast %610 : f32 to vector<16x16xf32>
    %612 = arith.mulf %611, %609 : vector<16x16xf32>
    %613 = arith.addf %603, %612 : vector<16x16xf32>
    %c59_300 = arith.constant 59 : index
    %614 = memref.load %arg1[%c59_300] : memref<72xf32, #tpu.memory_space<smem>>
    %615 = vector.broadcast %614 : f32 to vector<16x16xf32>
    %616 = arith.mulf %615, %609 : vector<16x16xf32>
    %617 = arith.addf %607, %616 : vector<16x16xf32>
    %c1_301 = arith.constant 1 : index
    %c2_302 = arith.constant 2 : index
    %c2_303 = arith.constant 2 : index
    %c0_304 = arith.constant 0 : index
    %618 = vector.load %arg0[%c1_301, %c2_302, %c2_303, %c0_304] : memref<2x4x18x18xf32, #tpu.memory_space<vmem>>, vector<1x1x16x16xf32>
    %619 = vector.shape_cast %618 : vector<1x1x16x16xf32> to vector<16x16xf32>
    %c24_305 = arith.constant 24 : index
    %620 = memref.load %arg1[%c24_305] : memref<72xf32, #tpu.memory_space<smem>>
    %621 = vector.broadcast %620 : f32 to vector<16x16xf32>
    %622 = arith.mulf %621, %619 : vector<16x16xf32>
    %623 = arith.addf %613, %622 : vector<16x16xf32>
    %c60_306 = arith.constant 60 : index
    %624 = memref.load %arg1[%c60_306] : memref<72xf32, #tpu.memory_space<smem>>
    %625 = vector.broadcast %624 : f32 to vector<16x16xf32>
    %626 = arith.mulf %625, %619 : vector<16x16xf32>
    %627 = arith.addf %617, %626 : vector<16x16xf32>
    %c1_307 = arith.constant 1 : index
    %c2_308 = arith.constant 2 : index
    %c2_309 = arith.constant 2 : index
    %c1_310 = arith.constant 1 : index
    %628 = vector.load %arg0[%c1_307, %c2_308, %c2_309, %c1_310] : memref<2x4x18x18xf32, #tpu.memory_space<vmem>>, vector<1x1x16x16xf32>
    %629 = vector.shape_cast %628 : vector<1x1x16x16xf32> to vector<16x16xf32>
    %c25_311 = arith.constant 25 : index
    %630 = memref.load %arg1[%c25_311] : memref<72xf32, #tpu.memory_space<smem>>
    %631 = vector.broadcast %630 : f32 to vector<16x16xf32>
    %632 = arith.mulf %631, %629 : vector<16x16xf32>
    %633 = arith.addf %623, %632 : vector<16x16xf32>
    %c61_312 = arith.constant 61 : index
    %634 = memref.load %arg1[%c61_312] : memref<72xf32, #tpu.memory_space<smem>>
    %635 = vector.broadcast %634 : f32 to vector<16x16xf32>
    %636 = arith.mulf %635, %629 : vector<16x16xf32>
    %637 = arith.addf %627, %636 : vector<16x16xf32>
    %c1_313 = arith.constant 1 : index
    %c2_314 = arith.constant 2 : index
    %c2_315 = arith.constant 2 : index
    %c2_316 = arith.constant 2 : index
    %638 = vector.load %arg0[%c1_313, %c2_314, %c2_315, %c2_316] : memref<2x4x18x18xf32, #tpu.memory_space<vmem>>, vector<1x1x16x16xf32>
    %639 = vector.shape_cast %638 : vector<1x1x16x16xf32> to vector<16x16xf32>
    %c26_317 = arith.constant 26 : index
    %640 = memref.load %arg1[%c26_317] : memref<72xf32, #tpu.memory_space<smem>>
    %641 = vector.broadcast %640 : f32 to vector<16x16xf32>
    %642 = arith.mulf %641, %639 : vector<16x16xf32>
    %643 = arith.addf %633, %642 : vector<16x16xf32>
    %c62_318 = arith.constant 62 : index
    %644 = memref.load %arg1[%c62_318] : memref<72xf32, #tpu.memory_space<smem>>
    %645 = vector.broadcast %644 : f32 to vector<16x16xf32>
    %646 = arith.mulf %645, %639 : vector<16x16xf32>
    %647 = arith.addf %637, %646 : vector<16x16xf32>
    %c1_319 = arith.constant 1 : index
    %c3_320 = arith.constant 3 : index
    %c0_321 = arith.constant 0 : index
    %c0_322 = arith.constant 0 : index
    %648 = vector.load %arg0[%c1_319, %c3_320, %c0_321, %c0_322] : memref<2x4x18x18xf32, #tpu.memory_space<vmem>>, vector<1x1x16x16xf32>
    %649 = vector.shape_cast %648 : vector<1x1x16x16xf32> to vector<16x16xf32>
    %c27_323 = arith.constant 27 : index
    %650 = memref.load %arg1[%c27_323] : memref<72xf32, #tpu.memory_space<smem>>
    %651 = vector.broadcast %650 : f32 to vector<16x16xf32>
    %652 = arith.mulf %651, %649 : vector<16x16xf32>
    %653 = arith.addf %643, %652 : vector<16x16xf32>
    %c63_324 = arith.constant 63 : index
    %654 = memref.load %arg1[%c63_324] : memref<72xf32, #tpu.memory_space<smem>>
    %655 = vector.broadcast %654 : f32 to vector<16x16xf32>
    %656 = arith.mulf %655, %649 : vector<16x16xf32>
    %657 = arith.addf %647, %656 : vector<16x16xf32>
    %c1_325 = arith.constant 1 : index
    %c3_326 = arith.constant 3 : index
    %c0_327 = arith.constant 0 : index
    %c1_328 = arith.constant 1 : index
    %658 = vector.load %arg0[%c1_325, %c3_326, %c0_327, %c1_328] : memref<2x4x18x18xf32, #tpu.memory_space<vmem>>, vector<1x1x16x16xf32>
    %659 = vector.shape_cast %658 : vector<1x1x16x16xf32> to vector<16x16xf32>
    %c28_329 = arith.constant 28 : index
    %660 = memref.load %arg1[%c28_329] : memref<72xf32, #tpu.memory_space<smem>>
    %661 = vector.broadcast %660 : f32 to vector<16x16xf32>
    %662 = arith.mulf %661, %659 : vector<16x16xf32>
    %663 = arith.addf %653, %662 : vector<16x16xf32>
    %c64_330 = arith.constant 64 : index
    %664 = memref.load %arg1[%c64_330] : memref<72xf32, #tpu.memory_space<smem>>
    %665 = vector.broadcast %664 : f32 to vector<16x16xf32>
    %666 = arith.mulf %665, %659 : vector<16x16xf32>
    %667 = arith.addf %657, %666 : vector<16x16xf32>
    %c1_331 = arith.constant 1 : index
    %c3_332 = arith.constant 3 : index
    %c0_333 = arith.constant 0 : index
    %c2_334 = arith.constant 2 : index
    %668 = vector.load %arg0[%c1_331, %c3_332, %c0_333, %c2_334] : memref<2x4x18x18xf32, #tpu.memory_space<vmem>>, vector<1x1x16x16xf32>
    %669 = vector.shape_cast %668 : vector<1x1x16x16xf32> to vector<16x16xf32>
    %c29_335 = arith.constant 29 : index
    %670 = memref.load %arg1[%c29_335] : memref<72xf32, #tpu.memory_space<smem>>
    %671 = vector.broadcast %670 : f32 to vector<16x16xf32>
    %672 = arith.mulf %671, %669 : vector<16x16xf32>
    %673 = arith.addf %663, %672 : vector<16x16xf32>
    %c65_336 = arith.constant 65 : index
    %674 = memref.load %arg1[%c65_336] : memref<72xf32, #tpu.memory_space<smem>>
    %675 = vector.broadcast %674 : f32 to vector<16x16xf32>
    %676 = arith.mulf %675, %669 : vector<16x16xf32>
    %677 = arith.addf %667, %676 : vector<16x16xf32>
    %c1_337 = arith.constant 1 : index
    %c3_338 = arith.constant 3 : index
    %c1_339 = arith.constant 1 : index
    %c0_340 = arith.constant 0 : index
    %678 = vector.load %arg0[%c1_337, %c3_338, %c1_339, %c0_340] : memref<2x4x18x18xf32, #tpu.memory_space<vmem>>, vector<1x1x16x16xf32>
    %679 = vector.shape_cast %678 : vector<1x1x16x16xf32> to vector<16x16xf32>
    %c30_341 = arith.constant 30 : index
    %680 = memref.load %arg1[%c30_341] : memref<72xf32, #tpu.memory_space<smem>>
    %681 = vector.broadcast %680 : f32 to vector<16x16xf32>
    %682 = arith.mulf %681, %679 : vector<16x16xf32>
    %683 = arith.addf %673, %682 : vector<16x16xf32>
    %c66_342 = arith.constant 66 : index
    %684 = memref.load %arg1[%c66_342] : memref<72xf32, #tpu.memory_space<smem>>
    %685 = vector.broadcast %684 : f32 to vector<16x16xf32>
    %686 = arith.mulf %685, %679 : vector<16x16xf32>
    %687 = arith.addf %677, %686 : vector<16x16xf32>
    %c1_343 = arith.constant 1 : index
    %c3_344 = arith.constant 3 : index
    %c1_345 = arith.constant 1 : index
    %c1_346 = arith.constant 1 : index
    %688 = vector.load %arg0[%c1_343, %c3_344, %c1_345, %c1_346] : memref<2x4x18x18xf32, #tpu.memory_space<vmem>>, vector<1x1x16x16xf32>
    %689 = vector.shape_cast %688 : vector<1x1x16x16xf32> to vector<16x16xf32>
    %c31_347 = arith.constant 31 : index
    %690 = memref.load %arg1[%c31_347] : memref<72xf32, #tpu.memory_space<smem>>
    %691 = vector.broadcast %690 : f32 to vector<16x16xf32>
    %692 = arith.mulf %691, %689 : vector<16x16xf32>
    %693 = arith.addf %683, %692 : vector<16x16xf32>
    %c67_348 = arith.constant 67 : index
    %694 = memref.load %arg1[%c67_348] : memref<72xf32, #tpu.memory_space<smem>>
    %695 = vector.broadcast %694 : f32 to vector<16x16xf32>
    %696 = arith.mulf %695, %689 : vector<16x16xf32>
    %697 = arith.addf %687, %696 : vector<16x16xf32>
    %c1_349 = arith.constant 1 : index
    %c3_350 = arith.constant 3 : index
    %c1_351 = arith.constant 1 : index
    %c2_352 = arith.constant 2 : index
    %698 = vector.load %arg0[%c1_349, %c3_350, %c1_351, %c2_352] : memref<2x4x18x18xf32, #tpu.memory_space<vmem>>, vector<1x1x16x16xf32>
    %699 = vector.shape_cast %698 : vector<1x1x16x16xf32> to vector<16x16xf32>
    %c32_353 = arith.constant 32 : index
    %700 = memref.load %arg1[%c32_353] : memref<72xf32, #tpu.memory_space<smem>>
    %701 = vector.broadcast %700 : f32 to vector<16x16xf32>
    %702 = arith.mulf %701, %699 : vector<16x16xf32>
    %703 = arith.addf %693, %702 : vector<16x16xf32>
    %c68_354 = arith.constant 68 : index
    %704 = memref.load %arg1[%c68_354] : memref<72xf32, #tpu.memory_space<smem>>
    %705 = vector.broadcast %704 : f32 to vector<16x16xf32>
    %706 = arith.mulf %705, %699 : vector<16x16xf32>
    %707 = arith.addf %697, %706 : vector<16x16xf32>
    %c1_355 = arith.constant 1 : index
    %c3_356 = arith.constant 3 : index
    %c2_357 = arith.constant 2 : index
    %c0_358 = arith.constant 0 : index
    %708 = vector.load %arg0[%c1_355, %c3_356, %c2_357, %c0_358] : memref<2x4x18x18xf32, #tpu.memory_space<vmem>>, vector<1x1x16x16xf32>
    %709 = vector.shape_cast %708 : vector<1x1x16x16xf32> to vector<16x16xf32>
    %c33_359 = arith.constant 33 : index
    %710 = memref.load %arg1[%c33_359] : memref<72xf32, #tpu.memory_space<smem>>
    %711 = vector.broadcast %710 : f32 to vector<16x16xf32>
    %712 = arith.mulf %711, %709 : vector<16x16xf32>
    %713 = arith.addf %703, %712 : vector<16x16xf32>
    %c69_360 = arith.constant 69 : index
    %714 = memref.load %arg1[%c69_360] : memref<72xf32, #tpu.memory_space<smem>>
    %715 = vector.broadcast %714 : f32 to vector<16x16xf32>
    %716 = arith.mulf %715, %709 : vector<16x16xf32>
    %717 = arith.addf %707, %716 : vector<16x16xf32>
    %c1_361 = arith.constant 1 : index
    %c3_362 = arith.constant 3 : index
    %c2_363 = arith.constant 2 : index
    %c1_364 = arith.constant 1 : index
    %718 = vector.load %arg0[%c1_361, %c3_362, %c2_363, %c1_364] : memref<2x4x18x18xf32, #tpu.memory_space<vmem>>, vector<1x1x16x16xf32>
    %719 = vector.shape_cast %718 : vector<1x1x16x16xf32> to vector<16x16xf32>
    %c34_365 = arith.constant 34 : index
    %720 = memref.load %arg1[%c34_365] : memref<72xf32, #tpu.memory_space<smem>>
    %721 = vector.broadcast %720 : f32 to vector<16x16xf32>
    %722 = arith.mulf %721, %719 : vector<16x16xf32>
    %723 = arith.addf %713, %722 : vector<16x16xf32>
    %c70_366 = arith.constant 70 : index
    %724 = memref.load %arg1[%c70_366] : memref<72xf32, #tpu.memory_space<smem>>
    %725 = vector.broadcast %724 : f32 to vector<16x16xf32>
    %726 = arith.mulf %725, %719 : vector<16x16xf32>
    %727 = arith.addf %717, %726 : vector<16x16xf32>
    %c1_367 = arith.constant 1 : index
    %c3_368 = arith.constant 3 : index
    %c2_369 = arith.constant 2 : index
    %c2_370 = arith.constant 2 : index
    %728 = vector.load %arg0[%c1_367, %c3_368, %c2_369, %c2_370] : memref<2x4x18x18xf32, #tpu.memory_space<vmem>>, vector<1x1x16x16xf32>
    %729 = vector.shape_cast %728 : vector<1x1x16x16xf32> to vector<16x16xf32>
    %c35_371 = arith.constant 35 : index
    %730 = memref.load %arg1[%c35_371] : memref<72xf32, #tpu.memory_space<smem>>
    %731 = vector.broadcast %730 : f32 to vector<16x16xf32>
    %732 = arith.mulf %731, %729 : vector<16x16xf32>
    %733 = arith.addf %723, %732 : vector<16x16xf32>
    %c71_372 = arith.constant 71 : index
    %734 = memref.load %arg1[%c71_372] : memref<72xf32, #tpu.memory_space<smem>>
    %735 = vector.broadcast %734 : f32 to vector<16x16xf32>
    %736 = arith.mulf %735, %729 : vector<16x16xf32>
    %737 = arith.addf %727, %736 : vector<16x16xf32>
    %cst_373 = arith.constant 0.000000e+00 : f32
    %738 = vector.broadcast %cst_373 : f32 to vector<16x16xf32>
    %739 = arith.maximumf %733, %738 : vector<16x16xf32>
    %c1_374 = arith.constant 1 : index
    %c0_375 = arith.constant 0 : index
    %c0_376 = arith.constant 0 : index
    %c0_377 = arith.constant 0 : index
    %740 = vector.load %arg8[%c1_374, %c0_375, %c0_376, %c0_377] : memref<2x2x16x16xf32, #tpu.memory_space<vmem>>, vector<1x1x16x16xf32>
    %741 = vector.shape_cast %740 : vector<1x1x16x16xf32> to vector<16x16xf32>
    %742 = vector.shape_cast %739 : vector<16x16xf32> to vector<1x1x16x16xf32>
    tpu.vector_store %arg8[%c1_374, %c0_375, %c0_376, %c0_377], %742 {strides = array<i32>} : memref<2x2x16x16xf32, #tpu.memory_space<vmem>>, vector<1x1x16x16xf32>,
    %cst_378 = arith.constant 0.000000e+00 : f32
    %743 = vector.broadcast %cst_378 : f32 to vector<16x16xf32>
    %744 = arith.maximumf %737, %743 : vector<16x16xf32>
    %c1_379 = arith.constant 1 : index
    %c1_380 = arith.constant 1 : index
    %c0_381 = arith.constant 0 : index
    %c0_382 = arith.constant 0 : index
    %745 = vector.load %arg8[%c1_379, %c1_380, %c0_381, %c0_382] : memref<2x2x16x16xf32, #tpu.memory_space<vmem>>, vector<1x1x16x16xf32>
    %746 = vector.shape_cast %745 : vector<1x1x16x16xf32> to vector<16x16xf32>
    %747 = vector.shape_cast %744 : vector<16x16xf32> to vector<1x1x16x16xf32>
    tpu.vector_store %arg8[%c1_379, %c1_380, %c0_381, %c0_382], %747 {strides = array<i32>} : memref<2x2x16x16xf32, #tpu.memory_space<vmem>>, vector<1x1x16x16xf32>,
    %c0_383 = arith.constant 0 : index
    %c0_384 = arith.constant 0 : index
    %748 = vector.load %arg4[%c0_383, %c0_384] : memref<1x512xf32, #tpu.memory_space<vmem>>, vector<1x512xf32>
    %c0_385 = arith.constant 0 : index
    %c0_386 = arith.constant 0 : index
    %749 = vector.load %arg4[%c0_385, %c0_386] : memref<1x512xf32, #tpu.memory_space<vmem>>, vector<1x512xf32>
    %c0_387 = arith.constant 0 : index
    %c0_388 = arith.constant 0 : index
    %c0_389 = arith.constant 0 : index
    %750 = vector.load %arg3[%c0_387, %c0_388, %c0_389] : memref<32x16x512xf32, #tpu.memory_space<vmem>>, vector<1x16x512xf32>
    %751 = vector.shape_cast %750 : vector<1x16x512xf32> to vector<16x512xf32>
    %c0_390 = arith.constant 0 : index
    %c0_391 = arith.constant 0 : index
    %c0_392 = arith.constant 0 : index
    %c0_393 = arith.constant 0 : index
    %752 = vector.load %arg8[%c0_390, %c0_391, %c0_392, %c0_393] : memref<2x2x16x16xf32, #tpu.memory_space<vmem>>, vector<1x1x1x16xf32>
    %753 = vector.shape_cast %752 : vector<1x1x1x16xf32> to vector<1x16xf32>
    %cst_394 = arith.constant dense<0.000000e+00> : vector<1x512xf32>
    %754 = tpu.matmul %753, %751, %cst_394 {dimension_numbers = #tpu.dot_dimension_numbers<[1], [0], [0], [1], [0, 0, 1, 1], [], []>} : vector<1x16xf32>, vector<16x512xf32>, vector<1x512xf32> -> vector<1x512xf32>
    %755 = arith.addf %748, %754 : vector<1x512xf32>
    %c1_395 = arith.constant 1 : index
    %c0_396 = arith.constant 0 : index
    %c0_397 = arith.constant 0 : index
    %c0_398 = arith.constant 0 : index
    %756 = vector.load %arg8[%c1_395, %c0_396, %c0_397, %c0_398] : memref<2x2x16x16xf32, #tpu.memory_space<vmem>>, vector<1x1x1x16xf32>
    %757 = vector.shape_cast %756 : vector<1x1x1x16xf32> to vector<1x16xf32>
    %cst_399 = arith.constant dense<0.000000e+00> : vector<1x512xf32>
    %758 = tpu.matmul %757, %751, %cst_399 {dimension_numbers = #tpu.dot_dimension_numbers<[1], [0], [0], [1], [0, 0, 1, 1], [], []>} : vector<1x16xf32>, vector<16x512xf32>, vector<1x512xf32> -> vector<1x512xf32>
    %759 = arith.addf %749, %758 : vector<1x512xf32>
    %c1_400 = arith.constant 1 : index
    %c0_401 = arith.constant 0 : index
    %c0_402 = arith.constant 0 : index
    %760 = vector.load %arg3[%c1_400, %c0_401, %c0_402] : memref<32x16x512xf32, #tpu.memory_space<vmem>>, vector<1x16x512xf32>
    %761 = vector.shape_cast %760 : vector<1x16x512xf32> to vector<16x512xf32>
    %c0_403 = arith.constant 0 : index
    %c0_404 = arith.constant 0 : index
    %c1_405 = arith.constant 1 : index
    %c0_406 = arith.constant 0 : index
    %762 = vector.load %arg8[%c0_403, %c0_404, %c1_405, %c0_406] : memref<2x2x16x16xf32, #tpu.memory_space<vmem>>, vector<1x1x1x16xf32>
    %763 = vector.shape_cast %762 : vector<1x1x1x16xf32> to vector<1x16xf32>
    %cst_407 = arith.constant dense<0.000000e+00> : vector<1x512xf32>
    %764 = tpu.matmul %763, %761, %cst_407 {dimension_numbers = #tpu.dot_dimension_numbers<[1], [0], [0], [1], [0, 0, 1, 1], [], []>} : vector<1x16xf32>, vector<16x512xf32>, vector<1x512xf32> -> vector<1x512xf32>
    %765 = arith.addf %755, %764 : vector<1x512xf32>
    %c1_408 = arith.constant 1 : index
    %c0_409 = arith.constant 0 : index
    %c1_410 = arith.constant 1 : index
    %c0_411 = arith.constant 0 : index
    %766 = vector.load %arg8[%c1_408, %c0_409, %c1_410, %c0_411] : memref<2x2x16x16xf32, #tpu.memory_space<vmem>>, vector<1x1x1x16xf32>
    %767 = vector.shape_cast %766 : vector<1x1x1x16xf32> to vector<1x16xf32>
    %cst_412 = arith.constant dense<0.000000e+00> : vector<1x512xf32>
    %768 = tpu.matmul %767, %761, %cst_412 {dimension_numbers = #tpu.dot_dimension_numbers<[1], [0], [0], [1], [0, 0, 1, 1], [], []>} : vector<1x16xf32>, vector<16x512xf32>, vector<1x512xf32> -> vector<1x512xf32>
    %769 = arith.addf %759, %768 : vector<1x512xf32>
    %c2_413 = arith.constant 2 : index
    %c0_414 = arith.constant 0 : index
    %c0_415 = arith.constant 0 : index
    %770 = vector.load %arg3[%c2_413, %c0_414, %c0_415] : memref<32x16x512xf32, #tpu.memory_space<vmem>>, vector<1x16x512xf32>
    %771 = vector.shape_cast %770 : vector<1x16x512xf32> to vector<16x512xf32>
    %c0_416 = arith.constant 0 : index
    %c0_417 = arith.constant 0 : index
    %c2_418 = arith.constant 2 : index
    %c0_419 = arith.constant 0 : index
    %772 = vector.load %arg8[%c0_416, %c0_417, %c2_418, %c0_419] : memref<2x2x16x16xf32, #tpu.memory_space<vmem>>, vector<1x1x1x16xf32>
    %773 = vector.shape_cast %772 : vector<1x1x1x16xf32> to vector<1x16xf32>
    %cst_420 = arith.constant dense<0.000000e+00> : vector<1x512xf32>
    %774 = tpu.matmul %773, %771, %cst_420 {dimension_numbers = #tpu.dot_dimension_numbers<[1], [0], [0], [1], [0, 0, 1, 1], [], []>} : vector<1x16xf32>, vector<16x512xf32>, vector<1x512xf32> -> vector<1x512xf32>
    %775 = arith.addf %765, %774 : vector<1x512xf32>
    %c1_421 = arith.constant 1 : index
    %c0_422 = arith.constant 0 : index
    %c2_423 = arith.constant 2 : index
    %c0_424 = arith.constant 0 : index
    %776 = vector.load %arg8[%c1_421, %c0_422, %c2_423, %c0_424] : memref<2x2x16x16xf32, #tpu.memory_space<vmem>>, vector<1x1x1x16xf32>
    %777 = vector.shape_cast %776 : vector<1x1x1x16xf32> to vector<1x16xf32>
    %cst_425 = arith.constant dense<0.000000e+00> : vector<1x512xf32>
    %778 = tpu.matmul %777, %771, %cst_425 {dimension_numbers = #tpu.dot_dimension_numbers<[1], [0], [0], [1], [0, 0, 1, 1], [], []>} : vector<1x16xf32>, vector<16x512xf32>, vector<1x512xf32> -> vector<1x512xf32>
    %779 = arith.addf %769, %778 : vector<1x512xf32>
    %c3_426 = arith.constant 3 : index
    %c0_427 = arith.constant 0 : index
    %c0_428 = arith.constant 0 : index
    %780 = vector.load %arg3[%c3_426, %c0_427, %c0_428] : memref<32x16x512xf32, #tpu.memory_space<vmem>>, vector<1x16x512xf32>
    %781 = vector.shape_cast %780 : vector<1x16x512xf32> to vector<16x512xf32>
    %c0_429 = arith.constant 0 : index
    %c0_430 = arith.constant 0 : index
    %c3_431 = arith.constant 3 : index
    %c0_432 = arith.constant 0 : index
    %782 = vector.load %arg8[%c0_429, %c0_430, %c3_431, %c0_432] : memref<2x2x16x16xf32, #tpu.memory_space<vmem>>, vector<1x1x1x16xf32>
    %783 = vector.shape_cast %782 : vector<1x1x1x16xf32> to vector<1x16xf32>
    %cst_433 = arith.constant dense<0.000000e+00> : vector<1x512xf32>
    %784 = tpu.matmul %783, %781, %cst_433 {dimension_numbers = #tpu.dot_dimension_numbers<[1], [0], [0], [1], [0, 0, 1, 1], [], []>} : vector<1x16xf32>, vector<16x512xf32>, vector<1x512xf32> -> vector<1x512xf32>
    %785 = arith.addf %775, %784 : vector<1x512xf32>
    %c1_434 = arith.constant 1 : index
    %c0_435 = arith.constant 0 : index
    %c3_436 = arith.constant 3 : index
    %c0_437 = arith.constant 0 : index
    %786 = vector.load %arg8[%c1_434, %c0_435, %c3_436, %c0_437] : memref<2x2x16x16xf32, #tpu.memory_space<vmem>>, vector<1x1x1x16xf32>
    %787 = vector.shape_cast %786 : vector<1x1x1x16xf32> to vector<1x16xf32>
    %cst_438 = arith.constant dense<0.000000e+00> : vector<1x512xf32>
    %788 = tpu.matmul %787, %781, %cst_438 {dimension_numbers = #tpu.dot_dimension_numbers<[1], [0], [0], [1], [0, 0, 1, 1], [], []>} : vector<1x16xf32>, vector<16x512xf32>, vector<1x512xf32> -> vector<1x512xf32>
    %789 = arith.addf %779, %788 : vector<1x512xf32>
    %c4_439 = arith.constant 4 : index
    %c0_440 = arith.constant 0 : index
    %c0_441 = arith.constant 0 : index
    %790 = vector.load %arg3[%c4_439, %c0_440, %c0_441] : memref<32x16x512xf32, #tpu.memory_space<vmem>>, vector<1x16x512xf32>
    %791 = vector.shape_cast %790 : vector<1x16x512xf32> to vector<16x512xf32>
    %c0_442 = arith.constant 0 : index
    %c0_443 = arith.constant 0 : index
    %c4_444 = arith.constant 4 : index
    %c0_445 = arith.constant 0 : index
    %792 = vector.load %arg8[%c0_442, %c0_443, %c4_444, %c0_445] : memref<2x2x16x16xf32, #tpu.memory_space<vmem>>, vector<1x1x1x16xf32>
    %793 = vector.shape_cast %792 : vector<1x1x1x16xf32> to vector<1x16xf32>
    %cst_446 = arith.constant dense<0.000000e+00> : vector<1x512xf32>
    %794 = tpu.matmul %793, %791, %cst_446 {dimension_numbers = #tpu.dot_dimension_numbers<[1], [0], [0], [1], [0, 0, 1, 1], [], []>} : vector<1x16xf32>, vector<16x512xf32>, vector<1x512xf32> -> vector<1x512xf32>
    %795 = arith.addf %785, %794 : vector<1x512xf32>
    %c1_447 = arith.constant 1 : index
    %c0_448 = arith.constant 0 : index
    %c4_449 = arith.constant 4 : index
    %c0_450 = arith.constant 0 : index
    %796 = vector.load %arg8[%c1_447, %c0_448, %c4_449, %c0_450] : memref<2x2x16x16xf32, #tpu.memory_space<vmem>>, vector<1x1x1x16xf32>
    %797 = vector.shape_cast %796 : vector<1x1x1x16xf32> to vector<1x16xf32>
    %cst_451 = arith.constant dense<0.000000e+00> : vector<1x512xf32>
    %798 = tpu.matmul %797, %791, %cst_451 {dimension_numbers = #tpu.dot_dimension_numbers<[1], [0], [0], [1], [0, 0, 1, 1], [], []>} : vector<1x16xf32>, vector<16x512xf32>, vector<1x512xf32> -> vector<1x512xf32>
    %799 = arith.addf %789, %798 : vector<1x512xf32>
    %c5_452 = arith.constant 5 : index
    %c0_453 = arith.constant 0 : index
    %c0_454 = arith.constant 0 : index
    %800 = vector.load %arg3[%c5_452, %c0_453, %c0_454] : memref<32x16x512xf32, #tpu.memory_space<vmem>>, vector<1x16x512xf32>
    %801 = vector.shape_cast %800 : vector<1x16x512xf32> to vector<16x512xf32>
    %c0_455 = arith.constant 0 : index
    %c0_456 = arith.constant 0 : index
    %c5_457 = arith.constant 5 : index
    %c0_458 = arith.constant 0 : index
    %802 = vector.load %arg8[%c0_455, %c0_456, %c5_457, %c0_458] : memref<2x2x16x16xf32, #tpu.memory_space<vmem>>, vector<1x1x1x16xf32>
    %803 = vector.shape_cast %802 : vector<1x1x1x16xf32> to vector<1x16xf32>
    %cst_459 = arith.constant dense<0.000000e+00> : vector<1x512xf32>
    %804 = tpu.matmul %803, %801, %cst_459 {dimension_numbers = #tpu.dot_dimension_numbers<[1], [0], [0], [1], [0, 0, 1, 1], [], []>} : vector<1x16xf32>, vector<16x512xf32>, vector<1x512xf32> -> vector<1x512xf32>
    %805 = arith.addf %795, %804 : vector<1x512xf32>
    %c1_460 = arith.constant 1 : index
    %c0_461 = arith.constant 0 : index
    %c5_462 = arith.constant 5 : index
    %c0_463 = arith.constant 0 : index
    %806 = vector.load %arg8[%c1_460, %c0_461, %c5_462, %c0_463] : memref<2x2x16x16xf32, #tpu.memory_space<vmem>>, vector<1x1x1x16xf32>
    %807 = vector.shape_cast %806 : vector<1x1x1x16xf32> to vector<1x16xf32>
    %cst_464 = arith.constant dense<0.000000e+00> : vector<1x512xf32>
    %808 = tpu.matmul %807, %801, %cst_464 {dimension_numbers = #tpu.dot_dimension_numbers<[1], [0], [0], [1], [0, 0, 1, 1], [], []>} : vector<1x16xf32>, vector<16x512xf32>, vector<1x512xf32> -> vector<1x512xf32>
    %809 = arith.addf %799, %808 : vector<1x512xf32>
    %c6_465 = arith.constant 6 : index
    %c0_466 = arith.constant 0 : index
    %c0_467 = arith.constant 0 : index
    %810 = vector.load %arg3[%c6_465, %c0_466, %c0_467] : memref<32x16x512xf32, #tpu.memory_space<vmem>>, vector<1x16x512xf32>
    %811 = vector.shape_cast %810 : vector<1x16x512xf32> to vector<16x512xf32>
    %c0_468 = arith.constant 0 : index
    %c0_469 = arith.constant 0 : index
    %c6_470 = arith.constant 6 : index
    %c0_471 = arith.constant 0 : index
    %812 = vector.load %arg8[%c0_468, %c0_469, %c6_470, %c0_471] : memref<2x2x16x16xf32, #tpu.memory_space<vmem>>, vector<1x1x1x16xf32>
    %813 = vector.shape_cast %812 : vector<1x1x1x16xf32> to vector<1x16xf32>
    %cst_472 = arith.constant dense<0.000000e+00> : vector<1x512xf32>
    %814 = tpu.matmul %813, %811, %cst_472 {dimension_numbers = #tpu.dot_dimension_numbers<[1], [0], [0], [1], [0, 0, 1, 1], [], []>} : vector<1x16xf32>, vector<16x512xf32>, vector<1x512xf32> -> vector<1x512xf32>
    %815 = arith.addf %805, %814 : vector<1x512xf32>
    %c1_473 = arith.constant 1 : index
    %c0_474 = arith.constant 0 : index
    %c6_475 = arith.constant 6 : index
    %c0_476 = arith.constant 0 : index
    %816 = vector.load %arg8[%c1_473, %c0_474, %c6_475, %c0_476] : memref<2x2x16x16xf32, #tpu.memory_space<vmem>>, vector<1x1x1x16xf32>
    %817 = vector.shape_cast %816 : vector<1x1x1x16xf32> to vector<1x16xf32>
    %cst_477 = arith.constant dense<0.000000e+00> : vector<1x512xf32>
    %818 = tpu.matmul %817, %811, %cst_477 {dimension_numbers = #tpu.dot_dimension_numbers<[1], [0], [0], [1], [0, 0, 1, 1], [], []>} : vector<1x16xf32>, vector<16x512xf32>, vector<1x512xf32> -> vector<1x512xf32>
    %819 = arith.addf %809, %818 : vector<1x512xf32>
    %c7_478 = arith.constant 7 : index
    %c0_479 = arith.constant 0 : index
    %c0_480 = arith.constant 0 : index
    %820 = vector.load %arg3[%c7_478, %c0_479, %c0_480] : memref<32x16x512xf32, #tpu.memory_space<vmem>>, vector<1x16x512xf32>
    %821 = vector.shape_cast %820 : vector<1x16x512xf32> to vector<16x512xf32>
    %c0_481 = arith.constant 0 : index
    %c0_482 = arith.constant 0 : index
    %c7_483 = arith.constant 7 : index
    %c0_484 = arith.constant 0 : index
    %822 = vector.load %arg8[%c0_481, %c0_482, %c7_483, %c0_484] : memref<2x2x16x16xf32, #tpu.memory_space<vmem>>, vector<1x1x1x16xf32>
    %823 = vector.shape_cast %822 : vector<1x1x1x16xf32> to vector<1x16xf32>
    %cst_485 = arith.constant dense<0.000000e+00> : vector<1x512xf32>
    %824 = tpu.matmul %823, %821, %cst_485 {dimension_numbers = #tpu.dot_dimension_numbers<[1], [0], [0], [1], [0, 0, 1, 1], [], []>} : vector<1x16xf32>, vector<16x512xf32>, vector<1x512xf32> -> vector<1x512xf32>
    %825 = arith.addf %815, %824 : vector<1x512xf32>
    %c1_486 = arith.constant 1 : index
    %c0_487 = arith.constant 0 : index
    %c7_488 = arith.constant 7 : index
    %c0_489 = arith.constant 0 : index
    %826 = vector.load %arg8[%c1_486, %c0_487, %c7_488, %c0_489] : memref<2x2x16x16xf32, #tpu.memory_space<vmem>>, vector<1x1x1x16xf32>
    %827 = vector.shape_cast %826 : vector<1x1x1x16xf32> to vector<1x16xf32>
    %cst_490 = arith.constant dense<0.000000e+00> : vector<1x512xf32>
    %828 = tpu.matmul %827, %821, %cst_490 {dimension_numbers = #tpu.dot_dimension_numbers<[1], [0], [0], [1], [0, 0, 1, 1], [], []>} : vector<1x16xf32>, vector<16x512xf32>, vector<1x512xf32> -> vector<1x512xf32>
    %829 = arith.addf %819, %828 : vector<1x512xf32>
    %c8_491 = arith.constant 8 : index
    %c0_492 = arith.constant 0 : index
    %c0_493 = arith.constant 0 : index
    %830 = vector.load %arg3[%c8_491, %c0_492, %c0_493] : memref<32x16x512xf32, #tpu.memory_space<vmem>>, vector<1x16x512xf32>
    %831 = vector.shape_cast %830 : vector<1x16x512xf32> to vector<16x512xf32>
    %c0_494 = arith.constant 0 : index
    %c0_495 = arith.constant 0 : index
    %c8_496 = arith.constant 8 : index
    %c0_497 = arith.constant 0 : index
    %832 = vector.load %arg8[%c0_494, %c0_495, %c8_496, %c0_497] : memref<2x2x16x16xf32, #tpu.memory_space<vmem>>, vector<1x1x1x16xf32>
    %833 = vector.shape_cast %832 : vector<1x1x1x16xf32> to vector<1x16xf32>
    %cst_498 = arith.constant dense<0.000000e+00> : vector<1x512xf32>
    %834 = tpu.matmul %833, %831, %cst_498 {dimension_numbers = #tpu.dot_dimension_numbers<[1], [0], [0], [1], [0, 0, 1, 1], [], []>} : vector<1x16xf32>, vector<16x512xf32>, vector<1x512xf32> -> vector<1x512xf32>
    %835 = arith.addf %825, %834 : vector<1x512xf32>
    %c1_499 = arith.constant 1 : index
    %c0_500 = arith.constant 0 : index
    %c8_501 = arith.constant 8 : index
    %c0_502 = arith.constant 0 : index
    %836 = vector.load %arg8[%c1_499, %c0_500, %c8_501, %c0_502] : memref<2x2x16x16xf32, #tpu.memory_space<vmem>>, vector<1x1x1x16xf32>
    %837 = vector.shape_cast %836 : vector<1x1x1x16xf32> to vector<1x16xf32>
    %cst_503 = arith.constant dense<0.000000e+00> : vector<1x512xf32>
    %838 = tpu.matmul %837, %831, %cst_503 {dimension_numbers = #tpu.dot_dimension_numbers<[1], [0], [0], [1], [0, 0, 1, 1], [], []>} : vector<1x16xf32>, vector<16x512xf32>, vector<1x512xf32> -> vector<1x512xf32>
    %839 = arith.addf %829, %838 : vector<1x512xf32>
    %c9_504 = arith.constant 9 : index
    %c0_505 = arith.constant 0 : index
    %c0_506 = arith.constant 0 : index
    %840 = vector.load %arg3[%c9_504, %c0_505, %c0_506] : memref<32x16x512xf32, #tpu.memory_space<vmem>>, vector<1x16x512xf32>
    %841 = vector.shape_cast %840 : vector<1x16x512xf32> to vector<16x512xf32>
    %c0_507 = arith.constant 0 : index
    %c0_508 = arith.constant 0 : index
    %c9_509 = arith.constant 9 : index
    %c0_510 = arith.constant 0 : index
    %842 = vector.load %arg8[%c0_507, %c0_508, %c9_509, %c0_510] : memref<2x2x16x16xf32, #tpu.memory_space<vmem>>, vector<1x1x1x16xf32>
    %843 = vector.shape_cast %842 : vector<1x1x1x16xf32> to vector<1x16xf32>
    %cst_511 = arith.constant dense<0.000000e+00> : vector<1x512xf32>
    %844 = tpu.matmul %843, %841, %cst_511 {dimension_numbers = #tpu.dot_dimension_numbers<[1], [0], [0], [1], [0, 0, 1, 1], [], []>} : vector<1x16xf32>, vector<16x512xf32>, vector<1x512xf32> -> vector<1x512xf32>
    %845 = arith.addf %835, %844 : vector<1x512xf32>
    %c1_512 = arith.constant 1 : index
    %c0_513 = arith.constant 0 : index
    %c9_514 = arith.constant 9 : index
    %c0_515 = arith.constant 0 : index
    %846 = vector.load %arg8[%c1_512, %c0_513, %c9_514, %c0_515] : memref<2x2x16x16xf32, #tpu.memory_space<vmem>>, vector<1x1x1x16xf32>
    %847 = vector.shape_cast %846 : vector<1x1x1x16xf32> to vector<1x16xf32>
    %cst_516 = arith.constant dense<0.000000e+00> : vector<1x512xf32>
    %848 = tpu.matmul %847, %841, %cst_516 {dimension_numbers = #tpu.dot_dimension_numbers<[1], [0], [0], [1], [0, 0, 1, 1], [], []>} : vector<1x16xf32>, vector<16x512xf32>, vector<1x512xf32> -> vector<1x512xf32>
    %849 = arith.addf %839, %848 : vector<1x512xf32>
    %c10_517 = arith.constant 10 : index
    %c0_518 = arith.constant 0 : index
    %c0_519 = arith.constant 0 : index
    %850 = vector.load %arg3[%c10_517, %c0_518, %c0_519] : memref<32x16x512xf32, #tpu.memory_space<vmem>>, vector<1x16x512xf32>
    %851 = vector.shape_cast %850 : vector<1x16x512xf32> to vector<16x512xf32>
    %c0_520 = arith.constant 0 : index
    %c0_521 = arith.constant 0 : index
    %c10_522 = arith.constant 10 : index
    %c0_523 = arith.constant 0 : index
    %852 = vector.load %arg8[%c0_520, %c0_521, %c10_522, %c0_523] : memref<2x2x16x16xf32, #tpu.memory_space<vmem>>, vector<1x1x1x16xf32>
    %853 = vector.shape_cast %852 : vector<1x1x1x16xf32> to vector<1x16xf32>
    %cst_524 = arith.constant dense<0.000000e+00> : vector<1x512xf32>
    %854 = tpu.matmul %853, %851, %cst_524 {dimension_numbers = #tpu.dot_dimension_numbers<[1], [0], [0], [1], [0, 0, 1, 1], [], []>} : vector<1x16xf32>, vector<16x512xf32>, vector<1x512xf32> -> vector<1x512xf32>
    %855 = arith.addf %845, %854 : vector<1x512xf32>
    %c1_525 = arith.constant 1 : index
    %c0_526 = arith.constant 0 : index
    %c10_527 = arith.constant 10 : index
    %c0_528 = arith.constant 0 : index
    %856 = vector.load %arg8[%c1_525, %c0_526, %c10_527, %c0_528] : memref<2x2x16x16xf32, #tpu.memory_space<vmem>>, vector<1x1x1x16xf32>
    %857 = vector.shape_cast %856 : vector<1x1x1x16xf32> to vector<1x16xf32>
    %cst_529 = arith.constant dense<0.000000e+00> : vector<1x512xf32>
    %858 = tpu.matmul %857, %851, %cst_529 {dimension_numbers = #tpu.dot_dimension_numbers<[1], [0], [0], [1], [0, 0, 1, 1], [], []>} : vector<1x16xf32>, vector<16x512xf32>, vector<1x512xf32> -> vector<1x512xf32>
    %859 = arith.addf %849, %858 : vector<1x512xf32>
    %c11_530 = arith.constant 11 : index
    %c0_531 = arith.constant 0 : index
    %c0_532 = arith.constant 0 : index
    %860 = vector.load %arg3[%c11_530, %c0_531, %c0_532] : memref<32x16x512xf32, #tpu.memory_space<vmem>>, vector<1x16x512xf32>
    %861 = vector.shape_cast %860 : vector<1x16x512xf32> to vector<16x512xf32>
    %c0_533 = arith.constant 0 : index
    %c0_534 = arith.constant 0 : index
    %c11_535 = arith.constant 11 : index
    %c0_536 = arith.constant 0 : index
    %862 = vector.load %arg8[%c0_533, %c0_534, %c11_535, %c0_536] : memref<2x2x16x16xf32, #tpu.memory_space<vmem>>, vector<1x1x1x16xf32>
    %863 = vector.shape_cast %862 : vector<1x1x1x16xf32> to vector<1x16xf32>
    %cst_537 = arith.constant dense<0.000000e+00> : vector<1x512xf32>
    %864 = tpu.matmul %863, %861, %cst_537 {dimension_numbers = #tpu.dot_dimension_numbers<[1], [0], [0], [1], [0, 0, 1, 1], [], []>} : vector<1x16xf32>, vector<16x512xf32>, vector<1x512xf32> -> vector<1x512xf32>
    %865 = arith.addf %855, %864 : vector<1x512xf32>
    %c1_538 = arith.constant 1 : index
    %c0_539 = arith.constant 0 : index
    %c11_540 = arith.constant 11 : index
    %c0_541 = arith.constant 0 : index
    %866 = vector.load %arg8[%c1_538, %c0_539, %c11_540, %c0_541] : memref<2x2x16x16xf32, #tpu.memory_space<vmem>>, vector<1x1x1x16xf32>
    %867 = vector.shape_cast %866 : vector<1x1x1x16xf32> to vector<1x16xf32>
    %cst_542 = arith.constant dense<0.000000e+00> : vector<1x512xf32>
    %868 = tpu.matmul %867, %861, %cst_542 {dimension_numbers = #tpu.dot_dimension_numbers<[1], [0], [0], [1], [0, 0, 1, 1], [], []>} : vector<1x16xf32>, vector<16x512xf32>, vector<1x512xf32> -> vector<1x512xf32>
    %869 = arith.addf %859, %868 : vector<1x512xf32>
    %c12_543 = arith.constant 12 : index
    %c0_544 = arith.constant 0 : index
    %c0_545 = arith.constant 0 : index
    %870 = vector.load %arg3[%c12_543, %c0_544, %c0_545] : memref<32x16x512xf32, #tpu.memory_space<vmem>>, vector<1x16x512xf32>
    %871 = vector.shape_cast %870 : vector<1x16x512xf32> to vector<16x512xf32>
    %c0_546 = arith.constant 0 : index
    %c0_547 = arith.constant 0 : index
    %c12_548 = arith.constant 12 : index
    %c0_549 = arith.constant 0 : index
    %872 = vector.load %arg8[%c0_546, %c0_547, %c12_548, %c0_549] : memref<2x2x16x16xf32, #tpu.memory_space<vmem>>, vector<1x1x1x16xf32>
    %873 = vector.shape_cast %872 : vector<1x1x1x16xf32> to vector<1x16xf32>
    %cst_550 = arith.constant dense<0.000000e+00> : vector<1x512xf32>
    %874 = tpu.matmul %873, %871, %cst_550 {dimension_numbers = #tpu.dot_dimension_numbers<[1], [0], [0], [1], [0, 0, 1, 1], [], []>} : vector<1x16xf32>, vector<16x512xf32>, vector<1x512xf32> -> vector<1x512xf32>
    %875 = arith.addf %865, %874 : vector<1x512xf32>
    %c1_551 = arith.constant 1 : index
    %c0_552 = arith.constant 0 : index
    %c12_553 = arith.constant 12 : index
    %c0_554 = arith.constant 0 : index
    %876 = vector.load %arg8[%c1_551, %c0_552, %c12_553, %c0_554] : memref<2x2x16x16xf32, #tpu.memory_space<vmem>>, vector<1x1x1x16xf32>
    %877 = vector.shape_cast %876 : vector<1x1x1x16xf32> to vector<1x16xf32>
    %cst_555 = arith.constant dense<0.000000e+00> : vector<1x512xf32>
    %878 = tpu.matmul %877, %871, %cst_555 {dimension_numbers = #tpu.dot_dimension_numbers<[1], [0], [0], [1], [0, 0, 1, 1], [], []>} : vector<1x16xf32>, vector<16x512xf32>, vector<1x512xf32> -> vector<1x512xf32>
    %879 = arith.addf %869, %878 : vector<1x512xf32>
    %c13_556 = arith.constant 13 : index
    %c0_557 = arith.constant 0 : index
    %c0_558 = arith.constant 0 : index
    %880 = vector.load %arg3[%c13_556, %c0_557, %c0_558] : memref<32x16x512xf32, #tpu.memory_space<vmem>>, vector<1x16x512xf32>
    %881 = vector.shape_cast %880 : vector<1x16x512xf32> to vector<16x512xf32>
    %c0_559 = arith.constant 0 : index
    %c0_560 = arith.constant 0 : index
    %c13_561 = arith.constant 13 : index
    %c0_562 = arith.constant 0 : index
    %882 = vector.load %arg8[%c0_559, %c0_560, %c13_561, %c0_562] : memref<2x2x16x16xf32, #tpu.memory_space<vmem>>, vector<1x1x1x16xf32>
    %883 = vector.shape_cast %882 : vector<1x1x1x16xf32> to vector<1x16xf32>
    %cst_563 = arith.constant dense<0.000000e+00> : vector<1x512xf32>
    %884 = tpu.matmul %883, %881, %cst_563 {dimension_numbers = #tpu.dot_dimension_numbers<[1], [0], [0], [1], [0, 0, 1, 1], [], []>} : vector<1x16xf32>, vector<16x512xf32>, vector<1x512xf32> -> vector<1x512xf32>
    %885 = arith.addf %875, %884 : vector<1x512xf32>
    %c1_564 = arith.constant 1 : index
    %c0_565 = arith.constant 0 : index
    %c13_566 = arith.constant 13 : index
    %c0_567 = arith.constant 0 : index
    %886 = vector.load %arg8[%c1_564, %c0_565, %c13_566, %c0_567] : memref<2x2x16x16xf32, #tpu.memory_space<vmem>>, vector<1x1x1x16xf32>
    %887 = vector.shape_cast %886 : vector<1x1x1x16xf32> to vector<1x16xf32>
    %cst_568 = arith.constant dense<0.000000e+00> : vector<1x512xf32>
    %888 = tpu.matmul %887, %881, %cst_568 {dimension_numbers = #tpu.dot_dimension_numbers<[1], [0], [0], [1], [0, 0, 1, 1], [], []>} : vector<1x16xf32>, vector<16x512xf32>, vector<1x512xf32> -> vector<1x512xf32>
    %889 = arith.addf %879, %888 : vector<1x512xf32>
    %c14_569 = arith.constant 14 : index
    %c0_570 = arith.constant 0 : index
    %c0_571 = arith.constant 0 : index
    %890 = vector.load %arg3[%c14_569, %c0_570, %c0_571] : memref<32x16x512xf32, #tpu.memory_space<vmem>>, vector<1x16x512xf32>
    %891 = vector.shape_cast %890 : vector<1x16x512xf32> to vector<16x512xf32>
    %c0_572 = arith.constant 0 : index
    %c0_573 = arith.constant 0 : index
    %c14_574 = arith.constant 14 : index
    %c0_575 = arith.constant 0 : index
    %892 = vector.load %arg8[%c0_572, %c0_573, %c14_574, %c0_575] : memref<2x2x16x16xf32, #tpu.memory_space<vmem>>, vector<1x1x1x16xf32>
    %893 = vector.shape_cast %892 : vector<1x1x1x16xf32> to vector<1x16xf32>
    %cst_576 = arith.constant dense<0.000000e+00> : vector<1x512xf32>
    %894 = tpu.matmul %893, %891, %cst_576 {dimension_numbers = #tpu.dot_dimension_numbers<[1], [0], [0], [1], [0, 0, 1, 1], [], []>} : vector<1x16xf32>, vector<16x512xf32>, vector<1x512xf32> -> vector<1x512xf32>
    %895 = arith.addf %885, %894 : vector<1x512xf32>
    %c1_577 = arith.constant 1 : index
    %c0_578 = arith.constant 0 : index
    %c14_579 = arith.constant 14 : index
    %c0_580 = arith.constant 0 : index
    %896 = vector.load %arg8[%c1_577, %c0_578, %c14_579, %c0_580] : memref<2x2x16x16xf32, #tpu.memory_space<vmem>>, vector<1x1x1x16xf32>
    %897 = vector.shape_cast %896 : vector<1x1x1x16xf32> to vector<1x16xf32>
    %cst_581 = arith.constant dense<0.000000e+00> : vector<1x512xf32>
    %898 = tpu.matmul %897, %891, %cst_581 {dimension_numbers = #tpu.dot_dimension_numbers<[1], [0], [0], [1], [0, 0, 1, 1], [], []>} : vector<1x16xf32>, vector<16x512xf32>, vector<1x512xf32> -> vector<1x512xf32>
    %899 = arith.addf %889, %898 : vector<1x512xf32>
    %c15_582 = arith.constant 15 : index
    %c0_583 = arith.constant 0 : index
    %c0_584 = arith.constant 0 : index
    %900 = vector.load %arg3[%c15_582, %c0_583, %c0_584] : memref<32x16x512xf32, #tpu.memory_space<vmem>>, vector<1x16x512xf32>
    %901 = vector.shape_cast %900 : vector<1x16x512xf32> to vector<16x512xf32>
    %c0_585 = arith.constant 0 : index
    %c0_586 = arith.constant 0 : index
    %c15_587 = arith.constant 15 : index
    %c0_588 = arith.constant 0 : index
    %902 = vector.load %arg8[%c0_585, %c0_586, %c15_587, %c0_588] : memref<2x2x16x16xf32, #tpu.memory_space<vmem>>, vector<1x1x1x16xf32>
    %903 = vector.shape_cast %902 : vector<1x1x1x16xf32> to vector<1x16xf32>
    %cst_589 = arith.constant dense<0.000000e+00> : vector<1x512xf32>
    %904 = tpu.matmul %903, %901, %cst_589 {dimension_numbers = #tpu.dot_dimension_numbers<[1], [0], [0], [1], [0, 0, 1, 1], [], []>} : vector<1x16xf32>, vector<16x512xf32>, vector<1x512xf32> -> vector<1x512xf32>
    %905 = arith.addf %895, %904 : vector<1x512xf32>
    %c1_590 = arith.constant 1 : index
    %c0_591 = arith.constant 0 : index
    %c15_592 = arith.constant 15 : index
    %c0_593 = arith.constant 0 : index
    %906 = vector.load %arg8[%c1_590, %c0_591, %c15_592, %c0_593] : memref<2x2x16x16xf32, #tpu.memory_space<vmem>>, vector<1x1x1x16xf32>
    %907 = vector.shape_cast %906 : vector<1x1x1x16xf32> to vector<1x16xf32>
    %cst_594 = arith.constant dense<0.000000e+00> : vector<1x512xf32>
    %908 = tpu.matmul %907, %901, %cst_594 {dimension_numbers = #tpu.dot_dimension_numbers<[1], [0], [0], [1], [0, 0, 1, 1], [], []>} : vector<1x16xf32>, vector<16x512xf32>, vector<1x512xf32> -> vector<1x512xf32>
    %909 = arith.addf %899, %908 : vector<1x512xf32>
    %c16_595 = arith.constant 16 : index
    %c0_596 = arith.constant 0 : index
    %c0_597 = arith.constant 0 : index
    %910 = vector.load %arg3[%c16_595, %c0_596, %c0_597] : memref<32x16x512xf32, #tpu.memory_space<vmem>>, vector<1x16x512xf32>
    %911 = vector.shape_cast %910 : vector<1x16x512xf32> to vector<16x512xf32>
    %c0_598 = arith.constant 0 : index
    %c1_599 = arith.constant 1 : index
    %c0_600 = arith.constant 0 : index
    %c0_601 = arith.constant 0 : index
    %912 = vector.load %arg8[%c0_598, %c1_599, %c0_600, %c0_601] : memref<2x2x16x16xf32, #tpu.memory_space<vmem>>, vector<1x1x1x16xf32>
    %913 = vector.shape_cast %912 : vector<1x1x1x16xf32> to vector<1x16xf32>
    %cst_602 = arith.constant dense<0.000000e+00> : vector<1x512xf32>
    %914 = tpu.matmul %913, %911, %cst_602 {dimension_numbers = #tpu.dot_dimension_numbers<[1], [0], [0], [1], [0, 0, 1, 1], [], []>} : vector<1x16xf32>, vector<16x512xf32>, vector<1x512xf32> -> vector<1x512xf32>
    %915 = arith.addf %905, %914 : vector<1x512xf32>
    %c1_603 = arith.constant 1 : index
    %c1_604 = arith.constant 1 : index
    %c0_605 = arith.constant 0 : index
    %c0_606 = arith.constant 0 : index
    %916 = vector.load %arg8[%c1_603, %c1_604, %c0_605, %c0_606] : memref<2x2x16x16xf32, #tpu.memory_space<vmem>>, vector<1x1x1x16xf32>
    %917 = vector.shape_cast %916 : vector<1x1x1x16xf32> to vector<1x16xf32>
    %cst_607 = arith.constant dense<0.000000e+00> : vector<1x512xf32>
    %918 = tpu.matmul %917, %911, %cst_607 {dimension_numbers = #tpu.dot_dimension_numbers<[1], [0], [0], [1], [0, 0, 1, 1], [], []>} : vector<1x16xf32>, vector<16x512xf32>, vector<1x512xf32> -> vector<1x512xf32>
    %919 = arith.addf %909, %918 : vector<1x512xf32>
    %c17_608 = arith.constant 17 : index
    %c0_609 = arith.constant 0 : index
    %c0_610 = arith.constant 0 : index
    %920 = vector.load %arg3[%c17_608, %c0_609, %c0_610] : memref<32x16x512xf32, #tpu.memory_space<vmem>>, vector<1x16x512xf32>
    %921 = vector.shape_cast %920 : vector<1x16x512xf32> to vector<16x512xf32>
    %c0_611 = arith.constant 0 : index
    %c1_612 = arith.constant 1 : index
    %c1_613 = arith.constant 1 : index
    %c0_614 = arith.constant 0 : index
    %922 = vector.load %arg8[%c0_611, %c1_612, %c1_613, %c0_614] : memref<2x2x16x16xf32, #tpu.memory_space<vmem>>, vector<1x1x1x16xf32>
    %923 = vector.shape_cast %922 : vector<1x1x1x16xf32> to vector<1x16xf32>
    %cst_615 = arith.constant dense<0.000000e+00> : vector<1x512xf32>
    %924 = tpu.matmul %923, %921, %cst_615 {dimension_numbers = #tpu.dot_dimension_numbers<[1], [0], [0], [1], [0, 0, 1, 1], [], []>} : vector<1x16xf32>, vector<16x512xf32>, vector<1x512xf32> -> vector<1x512xf32>
    %925 = arith.addf %915, %924 : vector<1x512xf32>
    %c1_616 = arith.constant 1 : index
    %c1_617 = arith.constant 1 : index
    %c1_618 = arith.constant 1 : index
    %c0_619 = arith.constant 0 : index
    %926 = vector.load %arg8[%c1_616, %c1_617, %c1_618, %c0_619] : memref<2x2x16x16xf32, #tpu.memory_space<vmem>>, vector<1x1x1x16xf32>
    %927 = vector.shape_cast %926 : vector<1x1x1x16xf32> to vector<1x16xf32>
    %cst_620 = arith.constant dense<0.000000e+00> : vector<1x512xf32>
    %928 = tpu.matmul %927, %921, %cst_620 {dimension_numbers = #tpu.dot_dimension_numbers<[1], [0], [0], [1], [0, 0, 1, 1], [], []>} : vector<1x16xf32>, vector<16x512xf32>, vector<1x512xf32> -> vector<1x512xf32>
    %929 = arith.addf %919, %928 : vector<1x512xf32>
    %c18_621 = arith.constant 18 : index
    %c0_622 = arith.constant 0 : index
    %c0_623 = arith.constant 0 : index
    %930 = vector.load %arg3[%c18_621, %c0_622, %c0_623] : memref<32x16x512xf32, #tpu.memory_space<vmem>>, vector<1x16x512xf32>
    %931 = vector.shape_cast %930 : vector<1x16x512xf32> to vector<16x512xf32>
    %c0_624 = arith.constant 0 : index
    %c1_625 = arith.constant 1 : index
    %c2_626 = arith.constant 2 : index
    %c0_627 = arith.constant 0 : index
    %932 = vector.load %arg8[%c0_624, %c1_625, %c2_626, %c0_627] : memref<2x2x16x16xf32, #tpu.memory_space<vmem>>, vector<1x1x1x16xf32>
    %933 = vector.shape_cast %932 : vector<1x1x1x16xf32> to vector<1x16xf32>
    %cst_628 = arith.constant dense<0.000000e+00> : vector<1x512xf32>
    %934 = tpu.matmul %933, %931, %cst_628 {dimension_numbers = #tpu.dot_dimension_numbers<[1], [0], [0], [1], [0, 0, 1, 1], [], []>} : vector<1x16xf32>, vector<16x512xf32>, vector<1x512xf32> -> vector<1x512xf32>
    %935 = arith.addf %925, %934 : vector<1x512xf32>
    %c1_629 = arith.constant 1 : index
    %c1_630 = arith.constant 1 : index
    %c2_631 = arith.constant 2 : index
    %c0_632 = arith.constant 0 : index
    %936 = vector.load %arg8[%c1_629, %c1_630, %c2_631, %c0_632] : memref<2x2x16x16xf32, #tpu.memory_space<vmem>>, vector<1x1x1x16xf32>
    %937 = vector.shape_cast %936 : vector<1x1x1x16xf32> to vector<1x16xf32>
    %cst_633 = arith.constant dense<0.000000e+00> : vector<1x512xf32>
    %938 = tpu.matmul %937, %931, %cst_633 {dimension_numbers = #tpu.dot_dimension_numbers<[1], [0], [0], [1], [0, 0, 1, 1], [], []>} : vector<1x16xf32>, vector<16x512xf32>, vector<1x512xf32> -> vector<1x512xf32>
    %939 = arith.addf %929, %938 : vector<1x512xf32>
    %c19_634 = arith.constant 19 : index
    %c0_635 = arith.constant 0 : index
    %c0_636 = arith.constant 0 : index
    %940 = vector.load %arg3[%c19_634, %c0_635, %c0_636] : memref<32x16x512xf32, #tpu.memory_space<vmem>>, vector<1x16x512xf32>
    %941 = vector.shape_cast %940 : vector<1x16x512xf32> to vector<16x512xf32>
    %c0_637 = arith.constant 0 : index
    %c1_638 = arith.constant 1 : index
    %c3_639 = arith.constant 3 : index
    %c0_640 = arith.constant 0 : index
    %942 = vector.load %arg8[%c0_637, %c1_638, %c3_639, %c0_640] : memref<2x2x16x16xf32, #tpu.memory_space<vmem>>, vector<1x1x1x16xf32>
    %943 = vector.shape_cast %942 : vector<1x1x1x16xf32> to vector<1x16xf32>
    %cst_641 = arith.constant dense<0.000000e+00> : vector<1x512xf32>
    %944 = tpu.matmul %943, %941, %cst_641 {dimension_numbers = #tpu.dot_dimension_numbers<[1], [0], [0], [1], [0, 0, 1, 1], [], []>} : vector<1x16xf32>, vector<16x512xf32>, vector<1x512xf32> -> vector<1x512xf32>
    %945 = arith.addf %935, %944 : vector<1x512xf32>
    %c1_642 = arith.constant 1 : index
    %c1_643 = arith.constant 1 : index
    %c3_644 = arith.constant 3 : index
    %c0_645 = arith.constant 0 : index
    %946 = vector.load %arg8[%c1_642, %c1_643, %c3_644, %c0_645] : memref<2x2x16x16xf32, #tpu.memory_space<vmem>>, vector<1x1x1x16xf32>
    %947 = vector.shape_cast %946 : vector<1x1x1x16xf32> to vector<1x16xf32>
    %cst_646 = arith.constant dense<0.000000e+00> : vector<1x512xf32>
    %948 = tpu.matmul %947, %941, %cst_646 {dimension_numbers = #tpu.dot_dimension_numbers<[1], [0], [0], [1], [0, 0, 1, 1], [], []>} : vector<1x16xf32>, vector<16x512xf32>, vector<1x512xf32> -> vector<1x512xf32>
    %949 = arith.addf %939, %948 : vector<1x512xf32>
    %c20_647 = arith.constant 20 : index
    %c0_648 = arith.constant 0 : index
    %c0_649 = arith.constant 0 : index
    %950 = vector.load %arg3[%c20_647, %c0_648, %c0_649] : memref<32x16x512xf32, #tpu.memory_space<vmem>>, vector<1x16x512xf32>
    %951 = vector.shape_cast %950 : vector<1x16x512xf32> to vector<16x512xf32>
    %c0_650 = arith.constant 0 : index
    %c1_651 = arith.constant 1 : index
    %c4_652 = arith.constant 4 : index
    %c0_653 = arith.constant 0 : index
    %952 = vector.load %arg8[%c0_650, %c1_651, %c4_652, %c0_653] : memref<2x2x16x16xf32, #tpu.memory_space<vmem>>, vector<1x1x1x16xf32>
    %953 = vector.shape_cast %952 : vector<1x1x1x16xf32> to vector<1x16xf32>
    %cst_654 = arith.constant dense<0.000000e+00> : vector<1x512xf32>
    %954 = tpu.matmul %953, %951, %cst_654 {dimension_numbers = #tpu.dot_dimension_numbers<[1], [0], [0], [1], [0, 0, 1, 1], [], []>} : vector<1x16xf32>, vector<16x512xf32>, vector<1x512xf32> -> vector<1x512xf32>
    %955 = arith.addf %945, %954 : vector<1x512xf32>
    %c1_655 = arith.constant 1 : index
    %c1_656 = arith.constant 1 : index
    %c4_657 = arith.constant 4 : index
    %c0_658 = arith.constant 0 : index
    %956 = vector.load %arg8[%c1_655, %c1_656, %c4_657, %c0_658] : memref<2x2x16x16xf32, #tpu.memory_space<vmem>>, vector<1x1x1x16xf32>
    %957 = vector.shape_cast %956 : vector<1x1x1x16xf32> to vector<1x16xf32>
    %cst_659 = arith.constant dense<0.000000e+00> : vector<1x512xf32>
    %958 = tpu.matmul %957, %951, %cst_659 {dimension_numbers = #tpu.dot_dimension_numbers<[1], [0], [0], [1], [0, 0, 1, 1], [], []>} : vector<1x16xf32>, vector<16x512xf32>, vector<1x512xf32> -> vector<1x512xf32>
    %959 = arith.addf %949, %958 : vector<1x512xf32>
    %c21_660 = arith.constant 21 : index
    %c0_661 = arith.constant 0 : index
    %c0_662 = arith.constant 0 : index
    %960 = vector.load %arg3[%c21_660, %c0_661, %c0_662] : memref<32x16x512xf32, #tpu.memory_space<vmem>>, vector<1x16x512xf32>
    %961 = vector.shape_cast %960 : vector<1x16x512xf32> to vector<16x512xf32>
    %c0_663 = arith.constant 0 : index
    %c1_664 = arith.constant 1 : index
    %c5_665 = arith.constant 5 : index
    %c0_666 = arith.constant 0 : index
    %962 = vector.load %arg8[%c0_663, %c1_664, %c5_665, %c0_666] : memref<2x2x16x16xf32, #tpu.memory_space<vmem>>, vector<1x1x1x16xf32>
    %963 = vector.shape_cast %962 : vector<1x1x1x16xf32> to vector<1x16xf32>
    %cst_667 = arith.constant dense<0.000000e+00> : vector<1x512xf32>
    %964 = tpu.matmul %963, %961, %cst_667 {dimension_numbers = #tpu.dot_dimension_numbers<[1], [0], [0], [1], [0, 0, 1, 1], [], []>} : vector<1x16xf32>, vector<16x512xf32>, vector<1x512xf32> -> vector<1x512xf32>
    %965 = arith.addf %955, %964 : vector<1x512xf32>
    %c1_668 = arith.constant 1 : index
    %c1_669 = arith.constant 1 : index
    %c5_670 = arith.constant 5 : index
    %c0_671 = arith.constant 0 : index
    %966 = vector.load %arg8[%c1_668, %c1_669, %c5_670, %c0_671] : memref<2x2x16x16xf32, #tpu.memory_space<vmem>>, vector<1x1x1x16xf32>
    %967 = vector.shape_cast %966 : vector<1x1x1x16xf32> to vector<1x16xf32>
    %cst_672 = arith.constant dense<0.000000e+00> : vector<1x512xf32>
    %968 = tpu.matmul %967, %961, %cst_672 {dimension_numbers = #tpu.dot_dimension_numbers<[1], [0], [0], [1], [0, 0, 1, 1], [], []>} : vector<1x16xf32>, vector<16x512xf32>, vector<1x512xf32> -> vector<1x512xf32>
    %969 = arith.addf %959, %968 : vector<1x512xf32>
    %c22_673 = arith.constant 22 : index
    %c0_674 = arith.constant 0 : index
    %c0_675 = arith.constant 0 : index
    %970 = vector.load %arg3[%c22_673, %c0_674, %c0_675] : memref<32x16x512xf32, #tpu.memory_space<vmem>>, vector<1x16x512xf32>
    %971 = vector.shape_cast %970 : vector<1x16x512xf32> to vector<16x512xf32>
    %c0_676 = arith.constant 0 : index
    %c1_677 = arith.constant 1 : index
    %c6_678 = arith.constant 6 : index
    %c0_679 = arith.constant 0 : index
    %972 = vector.load %arg8[%c0_676, %c1_677, %c6_678, %c0_679] : memref<2x2x16x16xf32, #tpu.memory_space<vmem>>, vector<1x1x1x16xf32>
    %973 = vector.shape_cast %972 : vector<1x1x1x16xf32> to vector<1x16xf32>
    %cst_680 = arith.constant dense<0.000000e+00> : vector<1x512xf32>
    %974 = tpu.matmul %973, %971, %cst_680 {dimension_numbers = #tpu.dot_dimension_numbers<[1], [0], [0], [1], [0, 0, 1, 1], [], []>} : vector<1x16xf32>, vector<16x512xf32>, vector<1x512xf32> -> vector<1x512xf32>
    %975 = arith.addf %965, %974 : vector<1x512xf32>
    %c1_681 = arith.constant 1 : index
    %c1_682 = arith.constant 1 : index
    %c6_683 = arith.constant 6 : index
    %c0_684 = arith.constant 0 : index
    %976 = vector.load %arg8[%c1_681, %c1_682, %c6_683, %c0_684] : memref<2x2x16x16xf32, #tpu.memory_space<vmem>>, vector<1x1x1x16xf32>
    %977 = vector.shape_cast %976 : vector<1x1x1x16xf32> to vector<1x16xf32>
    %cst_685 = arith.constant dense<0.000000e+00> : vector<1x512xf32>
    %978 = tpu.matmul %977, %971, %cst_685 {dimension_numbers = #tpu.dot_dimension_numbers<[1], [0], [0], [1], [0, 0, 1, 1], [], []>} : vector<1x16xf32>, vector<16x512xf32>, vector<1x512xf32> -> vector<1x512xf32>
    %979 = arith.addf %969, %978 : vector<1x512xf32>
    %c23_686 = arith.constant 23 : index
    %c0_687 = arith.constant 0 : index
    %c0_688 = arith.constant 0 : index
    %980 = vector.load %arg3[%c23_686, %c0_687, %c0_688] : memref<32x16x512xf32, #tpu.memory_space<vmem>>, vector<1x16x512xf32>
    %981 = vector.shape_cast %980 : vector<1x16x512xf32> to vector<16x512xf32>
    %c0_689 = arith.constant 0 : index
    %c1_690 = arith.constant 1 : index
    %c7_691 = arith.constant 7 : index
    %c0_692 = arith.constant 0 : index
    %982 = vector.load %arg8[%c0_689, %c1_690, %c7_691, %c0_692] : memref<2x2x16x16xf32, #tpu.memory_space<vmem>>, vector<1x1x1x16xf32>
    %983 = vector.shape_cast %982 : vector<1x1x1x16xf32> to vector<1x16xf32>
    %cst_693 = arith.constant dense<0.000000e+00> : vector<1x512xf32>
    %984 = tpu.matmul %983, %981, %cst_693 {dimension_numbers = #tpu.dot_dimension_numbers<[1], [0], [0], [1], [0, 0, 1, 1], [], []>} : vector<1x16xf32>, vector<16x512xf32>, vector<1x512xf32> -> vector<1x512xf32>
    %985 = arith.addf %975, %984 : vector<1x512xf32>
    %c1_694 = arith.constant 1 : index
    %c1_695 = arith.constant 1 : index
    %c7_696 = arith.constant 7 : index
    %c0_697 = arith.constant 0 : index
    %986 = vector.load %arg8[%c1_694, %c1_695, %c7_696, %c0_697] : memref<2x2x16x16xf32, #tpu.memory_space<vmem>>, vector<1x1x1x16xf32>
    %987 = vector.shape_cast %986 : vector<1x1x1x16xf32> to vector<1x16xf32>
    %cst_698 = arith.constant dense<0.000000e+00> : vector<1x512xf32>
    %988 = tpu.matmul %987, %981, %cst_698 {dimension_numbers = #tpu.dot_dimension_numbers<[1], [0], [0], [1], [0, 0, 1, 1], [], []>} : vector<1x16xf32>, vector<16x512xf32>, vector<1x512xf32> -> vector<1x512xf32>
    %989 = arith.addf %979, %988 : vector<1x512xf32>
    %c24_699 = arith.constant 24 : index
    %c0_700 = arith.constant 0 : index
    %c0_701 = arith.constant 0 : index
    %990 = vector.load %arg3[%c24_699, %c0_700, %c0_701] : memref<32x16x512xf32, #tpu.memory_space<vmem>>, vector<1x16x512xf32>
    %991 = vector.shape_cast %990 : vector<1x16x512xf32> to vector<16x512xf32>
    %c0_702 = arith.constant 0 : index
    %c1_703 = arith.constant 1 : index
    %c8_704 = arith.constant 8 : index
    %c0_705 = arith.constant 0 : index
    %992 = vector.load %arg8[%c0_702, %c1_703, %c8_704, %c0_705] : memref<2x2x16x16xf32, #tpu.memory_space<vmem>>, vector<1x1x1x16xf32>
    %993 = vector.shape_cast %992 : vector<1x1x1x16xf32> to vector<1x16xf32>
    %cst_706 = arith.constant dense<0.000000e+00> : vector<1x512xf32>
    %994 = tpu.matmul %993, %991, %cst_706 {dimension_numbers = #tpu.dot_dimension_numbers<[1], [0], [0], [1], [0, 0, 1, 1], [], []>} : vector<1x16xf32>, vector<16x512xf32>, vector<1x512xf32> -> vector<1x512xf32>
    %995 = arith.addf %985, %994 : vector<1x512xf32>
    %c1_707 = arith.constant 1 : index
    %c1_708 = arith.constant 1 : index
    %c8_709 = arith.constant 8 : index
    %c0_710 = arith.constant 0 : index
    %996 = vector.load %arg8[%c1_707, %c1_708, %c8_709, %c0_710] : memref<2x2x16x16xf32, #tpu.memory_space<vmem>>, vector<1x1x1x16xf32>
    %997 = vector.shape_cast %996 : vector<1x1x1x16xf32> to vector<1x16xf32>
    %cst_711 = arith.constant dense<0.000000e+00> : vector<1x512xf32>
    %998 = tpu.matmul %997, %991, %cst_711 {dimension_numbers = #tpu.dot_dimension_numbers<[1], [0], [0], [1], [0, 0, 1, 1], [], []>} : vector<1x16xf32>, vector<16x512xf32>, vector<1x512xf32> -> vector<1x512xf32>
    %999 = arith.addf %989, %998 : vector<1x512xf32>
    %c25_712 = arith.constant 25 : index
    %c0_713 = arith.constant 0 : index
    %c0_714 = arith.constant 0 : index
    %1000 = vector.load %arg3[%c25_712, %c0_713, %c0_714] : memref<32x16x512xf32, #tpu.memory_space<vmem>>, vector<1x16x512xf32>
    %1001 = vector.shape_cast %1000 : vector<1x16x512xf32> to vector<16x512xf32>
    %c0_715 = arith.constant 0 : index
    %c1_716 = arith.constant 1 : index
    %c9_717 = arith.constant 9 : index
    %c0_718 = arith.constant 0 : index
    %1002 = vector.load %arg8[%c0_715, %c1_716, %c9_717, %c0_718] : memref<2x2x16x16xf32, #tpu.memory_space<vmem>>, vector<1x1x1x16xf32>
    %1003 = vector.shape_cast %1002 : vector<1x1x1x16xf32> to vector<1x16xf32>
    %cst_719 = arith.constant dense<0.000000e+00> : vector<1x512xf32>
    %1004 = tpu.matmul %1003, %1001, %cst_719 {dimension_numbers = #tpu.dot_dimension_numbers<[1], [0], [0], [1], [0, 0, 1, 1], [], []>} : vector<1x16xf32>, vector<16x512xf32>, vector<1x512xf32> -> vector<1x512xf32>
    %1005 = arith.addf %995, %1004 : vector<1x512xf32>
    %c1_720 = arith.constant 1 : index
    %c1_721 = arith.constant 1 : index
    %c9_722 = arith.constant 9 : index
    %c0_723 = arith.constant 0 : index
    %1006 = vector.load %arg8[%c1_720, %c1_721, %c9_722, %c0_723] : memref<2x2x16x16xf32, #tpu.memory_space<vmem>>, vector<1x1x1x16xf32>
    %1007 = vector.shape_cast %1006 : vector<1x1x1x16xf32> to vector<1x16xf32>
    %cst_724 = arith.constant dense<0.000000e+00> : vector<1x512xf32>
    %1008 = tpu.matmul %1007, %1001, %cst_724 {dimension_numbers = #tpu.dot_dimension_numbers<[1], [0], [0], [1], [0, 0, 1, 1], [], []>} : vector<1x16xf32>, vector<16x512xf32>, vector<1x512xf32> -> vector<1x512xf32>
    %1009 = arith.addf %999, %1008 : vector<1x512xf32>
    %c26_725 = arith.constant 26 : index
    %c0_726 = arith.constant 0 : index
    %c0_727 = arith.constant 0 : index
    %1010 = vector.load %arg3[%c26_725, %c0_726, %c0_727] : memref<32x16x512xf32, #tpu.memory_space<vmem>>, vector<1x16x512xf32>
    %1011 = vector.shape_cast %1010 : vector<1x16x512xf32> to vector<16x512xf32>
    %c0_728 = arith.constant 0 : index
    %c1_729 = arith.constant 1 : index
    %c10_730 = arith.constant 10 : index
    %c0_731 = arith.constant 0 : index
    %1012 = vector.load %arg8[%c0_728, %c1_729, %c10_730, %c0_731] : memref<2x2x16x16xf32, #tpu.memory_space<vmem>>, vector<1x1x1x16xf32>
    %1013 = vector.shape_cast %1012 : vector<1x1x1x16xf32> to vector<1x16xf32>
    %cst_732 = arith.constant dense<0.000000e+00> : vector<1x512xf32>
    %1014 = tpu.matmul %1013, %1011, %cst_732 {dimension_numbers = #tpu.dot_dimension_numbers<[1], [0], [0], [1], [0, 0, 1, 1], [], []>} : vector<1x16xf32>, vector<16x512xf32>, vector<1x512xf32> -> vector<1x512xf32>
    %1015 = arith.addf %1005, %1014 : vector<1x512xf32>
    %c1_733 = arith.constant 1 : index
    %c1_734 = arith.constant 1 : index
    %c10_735 = arith.constant 10 : index
    %c0_736 = arith.constant 0 : index
    %1016 = vector.load %arg8[%c1_733, %c1_734, %c10_735, %c0_736] : memref<2x2x16x16xf32, #tpu.memory_space<vmem>>, vector<1x1x1x16xf32>
    %1017 = vector.shape_cast %1016 : vector<1x1x1x16xf32> to vector<1x16xf32>
    %cst_737 = arith.constant dense<0.000000e+00> : vector<1x512xf32>
    %1018 = tpu.matmul %1017, %1011, %cst_737 {dimension_numbers = #tpu.dot_dimension_numbers<[1], [0], [0], [1], [0, 0, 1, 1], [], []>} : vector<1x16xf32>, vector<16x512xf32>, vector<1x512xf32> -> vector<1x512xf32>
    %1019 = arith.addf %1009, %1018 : vector<1x512xf32>
    %c27_738 = arith.constant 27 : index
    %c0_739 = arith.constant 0 : index
    %c0_740 = arith.constant 0 : index
    %1020 = vector.load %arg3[%c27_738, %c0_739, %c0_740] : memref<32x16x512xf32, #tpu.memory_space<vmem>>, vector<1x16x512xf32>
    %1021 = vector.shape_cast %1020 : vector<1x16x512xf32> to vector<16x512xf32>
    %c0_741 = arith.constant 0 : index
    %c1_742 = arith.constant 1 : index
    %c11_743 = arith.constant 11 : index
    %c0_744 = arith.constant 0 : index
    %1022 = vector.load %arg8[%c0_741, %c1_742, %c11_743, %c0_744] : memref<2x2x16x16xf32, #tpu.memory_space<vmem>>, vector<1x1x1x16xf32>
    %1023 = vector.shape_cast %1022 : vector<1x1x1x16xf32> to vector<1x16xf32>
    %cst_745 = arith.constant dense<0.000000e+00> : vector<1x512xf32>
    %1024 = tpu.matmul %1023, %1021, %cst_745 {dimension_numbers = #tpu.dot_dimension_numbers<[1], [0], [0], [1], [0, 0, 1, 1], [], []>} : vector<1x16xf32>, vector<16x512xf32>, vector<1x512xf32> -> vector<1x512xf32>
    %1025 = arith.addf %1015, %1024 : vector<1x512xf32>
    %c1_746 = arith.constant 1 : index
    %c1_747 = arith.constant 1 : index
    %c11_748 = arith.constant 11 : index
    %c0_749 = arith.constant 0 : index
    %1026 = vector.load %arg8[%c1_746, %c1_747, %c11_748, %c0_749] : memref<2x2x16x16xf32, #tpu.memory_space<vmem>>, vector<1x1x1x16xf32>
    %1027 = vector.shape_cast %1026 : vector<1x1x1x16xf32> to vector<1x16xf32>
    %cst_750 = arith.constant dense<0.000000e+00> : vector<1x512xf32>
    %1028 = tpu.matmul %1027, %1021, %cst_750 {dimension_numbers = #tpu.dot_dimension_numbers<[1], [0], [0], [1], [0, 0, 1, 1], [], []>} : vector<1x16xf32>, vector<16x512xf32>, vector<1x512xf32> -> vector<1x512xf32>
    %1029 = arith.addf %1019, %1028 : vector<1x512xf32>
    %c28_751 = arith.constant 28 : index
    %c0_752 = arith.constant 0 : index
    %c0_753 = arith.constant 0 : index
    %1030 = vector.load %arg3[%c28_751, %c0_752, %c0_753] : memref<32x16x512xf32, #tpu.memory_space<vmem>>, vector<1x16x512xf32>
    %1031 = vector.shape_cast %1030 : vector<1x16x512xf32> to vector<16x512xf32>
    %c0_754 = arith.constant 0 : index
    %c1_755 = arith.constant 1 : index
    %c12_756 = arith.constant 12 : index
    %c0_757 = arith.constant 0 : index
    %1032 = vector.load %arg8[%c0_754, %c1_755, %c12_756, %c0_757] : memref<2x2x16x16xf32, #tpu.memory_space<vmem>>, vector<1x1x1x16xf32>
    %1033 = vector.shape_cast %1032 : vector<1x1x1x16xf32> to vector<1x16xf32>
    %cst_758 = arith.constant dense<0.000000e+00> : vector<1x512xf32>
    %1034 = tpu.matmul %1033, %1031, %cst_758 {dimension_numbers = #tpu.dot_dimension_numbers<[1], [0], [0], [1], [0, 0, 1, 1], [], []>} : vector<1x16xf32>, vector<16x512xf32>, vector<1x512xf32> -> vector<1x512xf32>
    %1035 = arith.addf %1025, %1034 : vector<1x512xf32>
    %c1_759 = arith.constant 1 : index
    %c1_760 = arith.constant 1 : index
    %c12_761 = arith.constant 12 : index
    %c0_762 = arith.constant 0 : index
    %1036 = vector.load %arg8[%c1_759, %c1_760, %c12_761, %c0_762] : memref<2x2x16x16xf32, #tpu.memory_space<vmem>>, vector<1x1x1x16xf32>
    %1037 = vector.shape_cast %1036 : vector<1x1x1x16xf32> to vector<1x16xf32>
    %cst_763 = arith.constant dense<0.000000e+00> : vector<1x512xf32>
    %1038 = tpu.matmul %1037, %1031, %cst_763 {dimension_numbers = #tpu.dot_dimension_numbers<[1], [0], [0], [1], [0, 0, 1, 1], [], []>} : vector<1x16xf32>, vector<16x512xf32>, vector<1x512xf32> -> vector<1x512xf32>
    %1039 = arith.addf %1029, %1038 : vector<1x512xf32>
    %c29_764 = arith.constant 29 : index
    %c0_765 = arith.constant 0 : index
    %c0_766 = arith.constant 0 : index
    %1040 = vector.load %arg3[%c29_764, %c0_765, %c0_766] : memref<32x16x512xf32, #tpu.memory_space<vmem>>, vector<1x16x512xf32>
    %1041 = vector.shape_cast %1040 : vector<1x16x512xf32> to vector<16x512xf32>
    %c0_767 = arith.constant 0 : index
    %c1_768 = arith.constant 1 : index
    %c13_769 = arith.constant 13 : index
    %c0_770 = arith.constant 0 : index
    %1042 = vector.load %arg8[%c0_767, %c1_768, %c13_769, %c0_770] : memref<2x2x16x16xf32, #tpu.memory_space<vmem>>, vector<1x1x1x16xf32>
    %1043 = vector.shape_cast %1042 : vector<1x1x1x16xf32> to vector<1x16xf32>
    %cst_771 = arith.constant dense<0.000000e+00> : vector<1x512xf32>
    %1044 = tpu.matmul %1043, %1041, %cst_771 {dimension_numbers = #tpu.dot_dimension_numbers<[1], [0], [0], [1], [0, 0, 1, 1], [], []>} : vector<1x16xf32>, vector<16x512xf32>, vector<1x512xf32> -> vector<1x512xf32>
    %1045 = arith.addf %1035, %1044 : vector<1x512xf32>
    %c1_772 = arith.constant 1 : index
    %c1_773 = arith.constant 1 : index
    %c13_774 = arith.constant 13 : index
    %c0_775 = arith.constant 0 : index
    %1046 = vector.load %arg8[%c1_772, %c1_773, %c13_774, %c0_775] : memref<2x2x16x16xf32, #tpu.memory_space<vmem>>, vector<1x1x1x16xf32>
    %1047 = vector.shape_cast %1046 : vector<1x1x1x16xf32> to vector<1x16xf32>
    %cst_776 = arith.constant dense<0.000000e+00> : vector<1x512xf32>
    %1048 = tpu.matmul %1047, %1041, %cst_776 {dimension_numbers = #tpu.dot_dimension_numbers<[1], [0], [0], [1], [0, 0, 1, 1], [], []>} : vector<1x16xf32>, vector<16x512xf32>, vector<1x512xf32> -> vector<1x512xf32>
    %1049 = arith.addf %1039, %1048 : vector<1x512xf32>
    %c30_777 = arith.constant 30 : index
    %c0_778 = arith.constant 0 : index
    %c0_779 = arith.constant 0 : index
    %1050 = vector.load %arg3[%c30_777, %c0_778, %c0_779] : memref<32x16x512xf32, #tpu.memory_space<vmem>>, vector<1x16x512xf32>
    %1051 = vector.shape_cast %1050 : vector<1x16x512xf32> to vector<16x512xf32>
    %c0_780 = arith.constant 0 : index
    %c1_781 = arith.constant 1 : index
    %c14_782 = arith.constant 14 : index
    %c0_783 = arith.constant 0 : index
    %1052 = vector.load %arg8[%c0_780, %c1_781, %c14_782, %c0_783] : memref<2x2x16x16xf32, #tpu.memory_space<vmem>>, vector<1x1x1x16xf32>
    %1053 = vector.shape_cast %1052 : vector<1x1x1x16xf32> to vector<1x16xf32>
    %cst_784 = arith.constant dense<0.000000e+00> : vector<1x512xf32>
    %1054 = tpu.matmul %1053, %1051, %cst_784 {dimension_numbers = #tpu.dot_dimension_numbers<[1], [0], [0], [1], [0, 0, 1, 1], [], []>} : vector<1x16xf32>, vector<16x512xf32>, vector<1x512xf32> -> vector<1x512xf32>
    %1055 = arith.addf %1045, %1054 : vector<1x512xf32>
    %c1_785 = arith.constant 1 : index
    %c1_786 = arith.constant 1 : index
    %c14_787 = arith.constant 14 : index
    %c0_788 = arith.constant 0 : index
    %1056 = vector.load %arg8[%c1_785, %c1_786, %c14_787, %c0_788] : memref<2x2x16x16xf32, #tpu.memory_space<vmem>>, vector<1x1x1x16xf32>
    %1057 = vector.shape_cast %1056 : vector<1x1x1x16xf32> to vector<1x16xf32>
    %cst_789 = arith.constant dense<0.000000e+00> : vector<1x512xf32>
    %1058 = tpu.matmul %1057, %1051, %cst_789 {dimension_numbers = #tpu.dot_dimension_numbers<[1], [0], [0], [1], [0, 0, 1, 1], [], []>} : vector<1x16xf32>, vector<16x512xf32>, vector<1x512xf32> -> vector<1x512xf32>
    %1059 = arith.addf %1049, %1058 : vector<1x512xf32>
    %c31_790 = arith.constant 31 : index
    %c0_791 = arith.constant 0 : index
    %c0_792 = arith.constant 0 : index
    %1060 = vector.load %arg3[%c31_790, %c0_791, %c0_792] : memref<32x16x512xf32, #tpu.memory_space<vmem>>, vector<1x16x512xf32>
    %1061 = vector.shape_cast %1060 : vector<1x16x512xf32> to vector<16x512xf32>
    %c0_793 = arith.constant 0 : index
    %c1_794 = arith.constant 1 : index
    %c15_795 = arith.constant 15 : index
    %c0_796 = arith.constant 0 : index
    %1062 = vector.load %arg8[%c0_793, %c1_794, %c15_795, %c0_796] : memref<2x2x16x16xf32, #tpu.memory_space<vmem>>, vector<1x1x1x16xf32>
    %1063 = vector.shape_cast %1062 : vector<1x1x1x16xf32> to vector<1x16xf32>
    %cst_797 = arith.constant dense<0.000000e+00> : vector<1x512xf32>
    %1064 = tpu.matmul %1063, %1061, %cst_797 {dimension_numbers = #tpu.dot_dimension_numbers<[1], [0], [0], [1], [0, 0, 1, 1], [], []>} : vector<1x16xf32>, vector<16x512xf32>, vector<1x512xf32> -> vector<1x512xf32>
    %1065 = arith.addf %1055, %1064 : vector<1x512xf32>
    %c1_798 = arith.constant 1 : index
    %c1_799 = arith.constant 1 : index
    %c15_800 = arith.constant 15 : index
    %c0_801 = arith.constant 0 : index
    %1066 = vector.load %arg8[%c1_798, %c1_799, %c15_800, %c0_801] : memref<2x2x16x16xf32, #tpu.memory_space<vmem>>, vector<1x1x1x16xf32>
    %1067 = vector.shape_cast %1066 : vector<1x1x1x16xf32> to vector<1x16xf32>
    %cst_802 = arith.constant dense<0.000000e+00> : vector<1x512xf32>
    %1068 = tpu.matmul %1067, %1061, %cst_802 {dimension_numbers = #tpu.dot_dimension_numbers<[1], [0], [0], [1], [0, 0, 1, 1], [], []>} : vector<1x16xf32>, vector<16x512xf32>, vector<1x512xf32> -> vector<1x512xf32>
    %1069 = arith.addf %1059, %1068 : vector<1x512xf32>
    %cst_803 = arith.constant 0.000000e+00 : f32
    %1070 = vector.broadcast %cst_803 : f32 to vector<1x512xf32>
    %1071 = arith.maximumf %1065, %1070 : vector<1x512xf32>
    %c0_804 = arith.constant 0 : index
    %c0_805 = arith.constant 0 : index
    %1072 = vector.load %arg5[%c0_804, %c0_805] : memref<512x128xf32, #tpu.memory_space<vmem>>, vector<512x128xf32>
    %cst_806 = arith.constant dense<0.000000e+00> : vector<1x128xf32>
    %1073 = tpu.matmul %1071, %1072, %cst_806 {dimension_numbers = #tpu.dot_dimension_numbers<[1], [0], [0], [1], [0, 0, 1, 1], [], []>} : vector<1x512xf32>, vector<512x128xf32>, vector<1x128xf32> -> vector<1x128xf32>
    %c0_807 = arith.constant 0 : index
    %c0_808 = arith.constant 0 : index
    %1074 = vector.load %arg6[%c0_807, %c0_808] : memref<1x128xf32, #tpu.memory_space<vmem>>, vector<1x128xf32>
    %1075 = arith.addf %1073, %1074 : vector<1x128xf32>
    %c0_809 = arith.constant 0 : index
    %c0_810 = arith.constant 0 : index
    %1076 = vector.load %arg7[%c0_809, %c0_810] : memref<2x128xf32, #tpu.memory_space<vmem>>, vector<1x128xf32>
    tpu.vector_store %arg7[%c0_809, %c0_810], %1075 {strides = array<i32>} : memref<2x128xf32, #tpu.memory_space<vmem>>, vector<1x128xf32>,
    %cst_811 = arith.constant 0.000000e+00 : f32
    %1077 = vector.broadcast %cst_811 : f32 to vector<1x512xf32>
    %1078 = arith.maximumf %1069, %1077 : vector<1x512xf32>
    %c0_812 = arith.constant 0 : index
    %c0_813 = arith.constant 0 : index
    %1079 = vector.load %arg5[%c0_812, %c0_813] : memref<512x128xf32, #tpu.memory_space<vmem>>, vector<512x128xf32>
    %cst_814 = arith.constant dense<0.000000e+00> : vector<1x128xf32>
    %1080 = tpu.matmul %1078, %1079, %cst_814 {dimension_numbers = #tpu.dot_dimension_numbers<[1], [0], [0], [1], [0, 0, 1, 1], [], []>} : vector<1x512xf32>, vector<512x128xf32>, vector<1x128xf32> -> vector<1x128xf32>
    %c0_815 = arith.constant 0 : index
    %c0_816 = arith.constant 0 : index
    %1081 = vector.load %arg6[%c0_815, %c0_816] : memref<1x128xf32, #tpu.memory_space<vmem>>, vector<1x128xf32>
    %1082 = arith.addf %1080, %1081 : vector<1x128xf32>
    %c1_817 = arith.constant 1 : index
    %c0_818 = arith.constant 0 : index
    %1083 = vector.load %arg7[%c1_817, %c0_818] : memref<2x128xf32, #tpu.memory_space<vmem>>, vector<1x128xf32>
    tpu.vector_store %arg7[%c1_817, %c0_818], %1082 {strides = array<i32>} : memref<2x128xf32, #tpu.memory_space<vmem>>, vector<1x128xf32>,
    return
  }
}

</mosaic_0001>

<bundles_post_ra>
// kernel: cnn_forward.1
= control target key start
LH: loop header
LB: loop body
LE: loop exit
PB: predicated region body
PF: predicated region fallthrough
CT: control target
= control target key end

     0   :  { %12 = vsyncpa [#allocation6], 0  ;;  %s17158_s0 = inlined_call_operand.vmem [shape: f32[2,4,18,18], index: 0, kind: input, shape index: {}]   ;;  %s17159_s1 = inlined_call_operand.vmem [shape: f32[72], index: 1, kind: input, shape index: {}]   ;;  %s17160_s2 = inlined_call_operand.vmem [shape: f32[2], index: 2, kind: input, shape index: {}]   ;;  %s17161_s3 = inlined_call_operand.hbm [shape: f32[32,16,512], index: 3, kind: input, shape index: {}]   ;;  %s17162_s4 = inlined_call_operand.vmem [shape: f32[1,512], index: 4, kind: input, shape index: {}]   ;;  %s17163_s5 = inlined_call_operand.hbm [shape: f32[512,128], index: 5, kind: input, shape index: {}]   ;;  %s17164_s6 = inlined_call_operand.vmem [shape: f32[1,128], index: 6, kind: input, shape index: {}]   ;;  %s17165_s7 = inlined_call_operand.hbm [shape: f32[2,128], index: 7, kind: output, shape index: {}]  }
   0x1   :  { %13 = vsyncpa [#allocation8], 0 }
   0x2   :  { %14 = vsyncpa [#allocation4], 0 }
   0x3   :  { %15 = vsyncpa [#allocation11], 0 }
   0x4   :  { %16 = vsyncpa [#allocation5], 0  ;;  %s25_s26 = sshll.u32 %s17159_s1, 4  ;;  %s35_s29 = sshll.u32 %s17160_s2, 4  ;;  %s26_s26 = int_to_ptr.vmem [resolvable:$true] %s25_s26  ;;  %s36_s29 = int_to_ptr.vmem [resolvable:$true] %s35_s29 }
   0x5   :  { %s14375_s30 = scalar_lea.vmem %s26_s26, 16  ;;  %p14380_p1 = scmp.lt.s32.totalorder %s26_s26, %s26_s26 }
   0x6   :  { %p14376_p0 = scmp.ne.s32.totalorder %s26_s26, %s14375_s30  ;;  %p14381_p2 = scmp.lt.s32.totalorder %s14375_s30, %s14375_s30 }
   0x8   :  { %p14382_p3 = por %p14381_p2, %p14380_p1 }
   0xa   :  { %p14383_p4 = pnand %p14382_p3, %p14376_p0 }
   0xc   :  { %14386 = shalt.err (!%p14383_p4)
}
   0xd   :  { %s14469_s8 = smov [#allocation3]   ;;  %s14387_s9 = scalar_lea.vmem %s36_s29, 16 }
   0xe   :  { %28 = dma.vmem_to_smem %s26_s26, 16, %s14469_s8, [#allocation6]  }
   0xf   :  { %p14388_p5 = scmp.ne.s32.totalorder %s36_s29, %s14387_s9  ;;  %p14392_p6 = scmp.lt.s32.totalorder %s36_s29, %s36_s29 }
  0x10   :  { %p14393_p7 = scmp.lt.s32.totalorder %s14387_s9, %s14387_s9 }
  0x12   :  { %p14394_p8 = por %p14393_p7, %p14392_p6 }
  0x14   :  { %p14395_p9 = pnand %p14394_p8, %p14388_p5 }
  0x16   :  { %14398 = shalt.err (!%p14395_p9)
}
  0x17   :  { %s14470_s1 = smov [#allocation7]   ;;  %s14471_s2 = smov [#allocation9]  }
  0x18   :  { %38 = dma.vmem_to_smem %s36_s29, 16, %s14470_s1, [#allocation8]  }
  0x19   :  { %s44_s10 = sshll.u32 %s14471_s2, 4  ;;  %s45_s10 = int_to_ptr.vmem [resolvable:$true] %s44_s10 }
  0x1a   :  { %s14407_s11 = scalar_lea.vmem %s45_s10, 32768  ;;  %p14412_p11 = scmp.lt.s32.totalorder %s45_s10, %s45_s10 }
  0x1b   :  { %p14408_p10 = scmp.ne.s32.totalorder %s45_s10, %s14407_s11  ;;  %p14413_p12 = scmp.lt.s32.totalorder %s14407_s11, %s14407_s11 }
  0x1d   :  { %p14414_p13 = por %p14413_p12, %p14412_p11 }
  0x1f   :  { %p14415_p0 = pnand %p14414_p13, %p14408_p10 }
  0x21   :  { %14418 = shalt.err (!%p14415_p0)
}
  0x22   :  { %s14472_s12 = smov 512   ;;  %s14473_s13 = smov 32  }
  0x23   :  { %50 = dma.hbm_to_vmem [thread:$0]  %s17161_s3, 32768, %s45_s10, [#allocation4], %s14472_s12, %s14472_s12, %s14473_s13  }
  0x24   :  { %s14474_s16 = smov [#allocation10]  }
  0x25   :  { %s58_s17 = sshll.u32 %s14474_s16, 4  ;;  %s59_s17 = int_to_ptr.vmem [resolvable:$true] %s58_s17 }
  0x26   :  { %s14427_s18 = scalar_lea.vmem %s59_s17, 8192  ;;  %p14432_p2 = scmp.lt.s32.totalorder %s59_s17, %s59_s17 }
  0x27   :  { %p14428_p1 = scmp.ne.s32.totalorder %s59_s17, %s14427_s18  ;;  %p14433_p3 = scmp.lt.s32.totalorder %s14427_s18, %s14427_s18 }
  0x29   :  { %p14434_p4 = por %p14433_p3, %p14432_p2 }
  0x2b   :  { %p14435_p5 = pnand %p14434_p4, %p14428_p1 }
  0x2d   :  { %14438 = shalt.err (!%p14435_p5)
}
  0x2e   :  { %s14475_s19 = smov 128   ;;  %s14476_s20 = smov 8  }
  0x2f   :  { %64 = dma.hbm_to_vmem [thread:$0]  %s17163_s5, 8192, %s59_s17, [#allocation11], %s14475_s19, %s14475_s19, %s14476_s20  }
  0x30   :  { %14459 = dma.done.wait [#allocation6], 16  }
  0x31   :  { %14460 = vsyncadd [#allocation6], 4294967280 }
  0x32   :  { %14461 = dma.done.wait [#allocation8], 16  }
  0x33   :  { %14462 = vsyncadd [#allocation8], 4294967280 }
  0x34   :  { %14463 = dma.done.wait [#allocation4], 32768  }
  0x35   :  { %14464 = vsyncadd [#allocation4], 4294934528 }
  0x36   :  { %14465 = dma.done.wait [#allocation11], 8192  }
  0x37   :  { %14466 = vsyncadd [#allocation11], 4294959104 }
  0x38   :  { %79 = sfence }
  0x39   :  { %s13915_s3 = sld [smem:[#allocation3 + $0x1]]  ;;  %v14537_v0 = vld [vmem:[%s17158_s0 + $0x60] sm:$0xff]  ;;  %s14477_s9 = smov 127   ;;  %v14602_v21 = vld [vmem:[%s17158_s0 + $0x18] sm:$0xff]  ;;  %v14680_v45 = vld [vmem:[%s17158_s0 + $0x30] sm:$0xff]  ;;  %vm929_vm0 = vcmask 130048  }
  0x3a   :  { %s13829_s23 = sld [smem:[#allocation3 + $0x4]]  ;;  %v14542_v1 = vld [vmem:[%s17158_s0] sm:$0xff]  ;;  %s14478_s2 = smov 126   ;;  %v14635_v31 = vld [vmem:[%s17158_s0 + $0x78] sm:$0xff]  ;;  %v14713_v55 = vld [vmem:[%s17158_s0 + $0x90] sm:$0xff] }
  0x3b   :  { %s13825_s24 = sld [smem:[#allocation3 + $0x2]]  ;;  %v14549_v3 = vld [vmem:[%s17158_s0 + $0x1] sm:$0xff]  ;;  %v14628_v29 = vld [vmem:[%s17158_s0 + $0x19] sm:$0xff]  ;;  %v14706_v53 = vld [vmem:[%s17158_s0 + $0x31] sm:$0xff] }
  0x3c   :  { %s13831_s25 = sld [smem:[#allocation3 + $0x5]]  ;;  %v14576_v13 = vld [vmem:[%s17158_s0 + $0x2] sm:$0xff]  ;;  %v14654_v37 = vld [vmem:[%s17158_s0 + $0x1a] sm:$0xff]  ;;  %v14732_v61 = vld [vmem:[%s17158_s0 + $0x32] sm:$0xff] }
  0x3d   :  { %s13835_s8 = sld [smem:[#allocation3 + $0x7]]  ;;  %v14583_v15 = vld [vmem:[%s17158_s0 + $0x61] sm:$0xff]  ;;  %v14661_v39 = vld [vmem:[%s17158_s0 + $0x79] sm:$0xff]  ;;  %v14739_v63 = vld [vmem:[%s17158_s0 + $0x91] sm:$0xff] }
  0x3e   :  { %s13837_s1 = sld [smem:[#allocation3 + $0x8]]  ;;  %v14609_v23 = vld [vmem:[%s17158_s0 + $0x62] sm:$0xff]  ;;  %v14687_v47 = vld [vmem:[%s17158_s0 + $0x7a] sm:$0xff] }
  0x3f   :  { %v14544_v2 = vstv %s13915_s3  ;;  %s13843_s14 = sld [smem:[#allocation3 + $0xa]] }
  0x40   :  { %v958_v4 = vmul.f32 %v14537_v0, %v14544_v2  ;;  %v100_v5 = vmul.f32 %v14544_v2, %v14542_v1  ;;  %v14555_v6 = vstv %s13829_s23  ;;  %s13845_s15 = sld [smem:[#allocation3 + $0xb]] }
  0x41   :  { %v14557_v7 = vstv %s13825_s24  ;;  %v170_v8 = vmul.f32 %v14555_v6, %v14549_v3  ;;  %v1028_v17 = vmul.f32 %v14583_v15, %v14555_v6  ;;  %s13851_s20 = sld [smem:[#allocation3 + $0xd]] }
  0x42   :  { %962 = vrot.lane.b32.xlu1 %v958_v4, %s14477_s9  ;;  %104 = vrot.lane.b32.xlu0 %v100_v5, %s14477_s9  ;;  %v128_v9 = vmul.f32 %v14557_v7, %v14542_v1  ;;  %v14565_v10 = vstv %s13831_s25  ;;  %v986_v12 = vmul.f32 %v14537_v0, %v14557_v7  ;;  %s13853_s21 = sld [smem:[#allocation3 + $0xe]] }
  0x43   :  { %v198_v11 = vmul.f32 %v14565_v10, %v14549_v3  ;;  %v14578_v14 = vstv %s13835_s8  ;;  %v1056_v20 = vmul.f32 %v14583_v15, %v14565_v10  ;;  %s13859_s25 = sld [smem:[#allocation3 + $0x10]] }
  0x44   :  { %v240_v16 = vmul.f32 %v14578_v14, %v14576_v13  ;;  %v14591_v18 = vstv %s13837_s1  ;;  %v1098_v25 = vmul.f32 %v14609_v23, %v14578_v14  ;;  %s13861_s26 = sld [smem:[#allocation3 + $0x11]] }
  0x45   :  { %v268_v19 = vmul.f32 %v14591_v18, %v14576_v13  ;;  %v14604_v22 = vstv %s13843_s14  ;;  %v1126_v28 = vmul.f32 %v14609_v23, %v14591_v18  ;;  %s13867_s30 = sld [smem:[#allocation3 + $0x13]] }
  0x46   :  { %174 = vrot.lane.b32.xlu1 %v170_v8, %s14477_s9  ;;  %132 = vrot.lane.b32.xlu0 %v128_v9, %s14478_s2  ;;  %v311_v24 = vmul.f32 %v14602_v21, %v14604_v22  ;;  %v14617_v26 = vstv %s13845_s15  ;;  %v1169_v33 = vmul.f32 %v14635_v31, %v14604_v22  ;;  %s13869_s8 = sld [smem:[#allocation3 + $0x14]] }
  0x47   :  { %v339_v27 = vmul.f32 %v14602_v21, %v14617_v26  ;;  %v14630_v30 = vstv %s13851_s20  ;;  %v1197_v36 = vmul.f32 %v14635_v31, %v14617_v26  ;;  %s13875_s13 = sld [smem:[#allocation3 + $0x16]] }
  0x48   :  { %v381_v32 = vmul.f32 %v14628_v29, %v14630_v30  ;;  %v14643_v34 = vstv %s13853_s21  ;;  %v1239_v41 = vmul.f32 %v14661_v39, %v14630_v30  ;;  %s13877_s14 = sld [smem:[#allocation3 + $0x17]] }
  0x49   :  { %v409_v35 = vmul.f32 %v14628_v29, %v14643_v34  ;;  %v14656_v38 = vstv %s13859_s25  ;;  %v1267_v44 = vmul.f32 %v14661_v39, %v14643_v34  ;;  %s13883_s19 = sld [smem:[#allocation3 + $0x19]] }
  0x4a   :  { %202 = vrot.lane.b32.xlu1 %v198_v11, %s14478_s2  ;;  %990 = vrot.lane.b32.xlu0 %v986_v12, %s14478_s2  ;;  %v451_v40 = vmul.f32 %v14654_v37, %v14656_v38  ;;  %v14669_v42 = vstv %s13861_s26  ;;  %v1309_v49 = vmul.f32 %v14687_v47, %v14656_v38  ;;  %s13885_s20 = sld [smem:[#allocation3 + $0x1a]]  ;;  %v14758_v12 = vld [vmem:[%s17158_s0 + $0x48] sm:$0xff] }
  0x4b   :  { %v479_v43 = vmul.f32 %v14654_v37, %v14669_v42  ;;  %v14682_v46 = vstv %s13867_s30  ;;  %v1337_v52 = vmul.f32 %v14687_v47, %v14669_v42  ;;  %s13891_s24 = sld [smem:[#allocation3 + $0x1c]] }
  0x4c   :  { %v522_v48 = vmul.f32 %v14680_v45, %v14682_v46  ;;  %v14695_v50 = vstv %s13869_s8  ;;  %v1380_v57 = vmul.f32 %v14713_v55, %v14682_v46  ;;  %s13893_s25 = sld [smem:[#allocation3 + $0x1d]] }
  0x4d   :  { %v550_v51 = vmul.f32 %v14680_v45, %v14695_v50  ;;  %v14708_v54 = vstv %s13875_s13  ;;  %v1408_v60 = vmul.f32 %v14713_v55, %v14695_v50  ;;  %s944_s26 = sld [smem:[#allocation3]] }
  0x4e   :  { %244 = vrot.lane.b32.xlu1 %v240_v16, %s14477_s9  ;;  %1032 = vrot.lane.b32.xlu0 %v1028_v17, %s14477_s9  ;;  %v592_v56 = vmul.f32 %v14706_v53, %v14708_v54  ;;  %v14721_v58 = vstv %s13877_s14  ;;  %v1450_v5 = vmul.f32 %v14739_v63, %v14708_v54  ;;  %s937_s27 = sld [smem:[#allocation7]]  ;;  %v14765_v17 = vld [vmem:[%s17158_s0 + $0x92] sm:$0xff] }
  0x4f   :  { %v620_v59 = vmul.f32 %v14706_v53, %v14721_v58  ;;  %v14734_v62 = vstv %s13883_s19  ;;  %v1478_v11 = vmul.f32 %v14739_v63, %v14721_v58  ;;  %s13899_s8 = sld [smem:[#allocation3 + $0x1f]] }
  0x50   :  { %v662_v4 = vmul.f32 %v14732_v61, %v14734_v62  ;;  %v14747_v8 = vstv %s13885_s20  ;;  %s13901_s1 = sld [smem:[#allocation3 + $0x20]] }
  0x51   :  { %v690_v9 = vmul.f32 %v14732_v61, %v14747_v8  ;;  %v14760_v16 = vstv %s13891_s24  ;;  %s13907_s16 = sld [smem:[#allocation3 + $0x22]] }
  0x52   :  { %272 = vrot.lane.b32.xlu1 %v268_v19, %s14478_s2  ;;  %1060 = vrot.lane.b32.xlu0 %v1056_v20, %s14478_s2  ;;  %v733_v19 = vmul.f32 %v14758_v12, %v14760_v16  ;;  %v1520_v20 = vmul.f32 %v14765_v17, %v14734_v62  ;;  %s13909_s19 = sld [smem:[#allocation3 + $0x23]] }
  0x53   :  { %s13827_s30 = sld [smem:[#allocation3 + $0x3]] }
  0x54   :  { %s13833_s12 = sld [smem:[#allocation3 + $0x6]] }
  0x55   :  { %s13841_s17 = sld [smem:[#allocation3 + $0x9]] }
  0x56   :  { %315 = vrot.lane.b32.xlu1 %v311_v24, %s14477_s9  ;;  %1102 = vrot.lane.b32.xlu0 %v1098_v25, %s14477_s9  ;;  %v14773_v24 = vstv %s13893_s25  ;;  %v85_v25 = vld [vmem:[%s17158_s0 + $0x8] sm:$0xff]  ;;  %s13849_s22 = sld [smem:[#allocation3 + $0xc]] }
  0x57   :  { %s13889_s3 = sld [smem:[#allocation3 + $0x1b]] }
  0x58   :  { %s13826_s23 = sld [smem:[#allocation3 + $0x26]] }
  0x59   :  { %s13830_s28 = sld [smem:[#allocation3 + $0x28]] }
  0x5a   :  { %343 = vrot.lane.b32.xlu1 %v339_v27, %s14478_s2  ;;  %1130 = vrot.lane.b32.xlu0 %v1126_v28, %s14478_s2  ;;  %v14778_v27 = vstv %s944_s26  ;;  %s13857_s26 = sld [smem:[#allocation3 + $0xf]] }
  0x5b   :  { %v89_v28 = vmul.f32 %v14778_v27, %v85_v25  ;;  %s13897_s5 = sld [smem:[#allocation3 + $0x1e]] }
  0x5c   :  { %s13832_s29 = sld [smem:[#allocation3 + $0x29]] }
  0x5d   :  { %s13836_s10 = sld [smem:[#allocation3 + $0x2b]] }
  0x5e   :  { %385 = vrot.lane.b32.xlu1 %v381_v32, %s14477_s9  ;;  %1173 = vrot.lane.b32.xlu0 %v1169_v33, %s14477_s9  ;;  %v761_v32 = vmul.f32 %v14758_v12, %v14773_v24  ;;  %v1548_v33 = vmul.f32 %v14765_v17, %v14747_v8  ;;  %s13838_s11 = sld [smem:[#allocation3 + $0x2c]] }
  0x5f   :  { %s13846_s13 = sld [smem:[#allocation3 + $0x2f]] }
  0x60   :  { %s13852_s14 = sld [smem:[#allocation3 + $0x31]] }
  0x61   :  { %s13854_s15 = sld [smem:[#allocation3 + $0x32]] }
  0x62   :  { %413 = vrot.lane.b32.xlu1 %v409_v35, %s14478_s2  ;;  %1201 = vrot.lane.b32.xlu0 %v1197_v36, %s14478_s2  ;;  %v14787_v35 = vstv %s937_s27  ;;  %v14792_v36 = vld [vmem:[%s17158_s0 + $0x49] sm:$0xff]  ;;  %s15304_s18 = sld [smem:[#allocation3 + $0x37]] }
  0x63   :  { %s15356_s27 = sld [smem:[#allocation3 + $0x3a]] }
  0x64   :  { %s15474_s21 = sld [smem:[#allocation3 + $0x43]] }
  0x65   :  { %s15866_s20 = sld [smem:[#allocation3 + $0x39]] }
  0x66   :  { %455 = vrot.lane.b32.xlu1 %v451_v40, %s14477_s9  ;;  %1243 = vrot.lane.b32.xlu0 %v1239_v41, %s14477_s9  ;;  %v14794_v40 = vstv %s13899_s8  ;;  %v14799_v41 = vld [vmem:[%s17158_s0 + $0xa8] sm:$0xff]  ;;  %s15562_s8 = sld [smem:[#allocation3 + $0x24]] }
  0x6a   :  { %483 = vrot.lane.b32.xlu1 %v479_v43, %s14478_s2  ;;  %1271 = vrot.lane.b32.xlu0 %v1267_v44, %s14478_s2  ;;  %v14802_v43 = vadd.f32 %v14787_v35, %v89_v28  ;;  %v803_v44 = vmul.f32 %v14792_v36, %v14794_v40  ;;  %v14847_v28 = vstv %s13909_s19  ;;  %s15634_s19 = sld [smem:[#allocation3 + $0x2a]] }
  0x6e   :  { %526 = vrot.lane.b32.xlu1 %v522_v48, %s14477_s9  ;;  %1313 = vrot.lane.b32.xlu0 %v1309_v49, %s14477_s9  ;;  %v1591_v48 = vmul.f32 %v14799_v41, %v14760_v16  ;;  %v14810_v49 = vstv %s13901_s1  ;;  %s15398_s1 = sld [smem:[#allocation3 + $0x3d]] }
  0x72   :  { %554 = vrot.lane.b32.xlu1 %v550_v51, %s14478_s2  ;;  %1341 = vrot.lane.b32.xlu0 %v1337_v52, %s14478_s2  ;;  %v831_v51 = vmul.f32 %v14792_v36, %v14810_v49  ;;  %v1619_v52 = vmul.f32 %v14799_v41, %v14773_v24 }
  0x76   :  { %596 = vrot.lane.b32.xlu1 %v592_v56, %s14477_s9  ;;  %1384 = vrot.lane.b32.xlu0 %v1380_v57, %s14477_s9  ;;  %v14821_v56 = vld [vmem:[%s17158_s0 + $0xa9] sm:$0xff] }
  0x77   :  { %v13913_v57 = vld [vmem:[%s17158_s0 + $0x68] sm:$0xff] }
  0x7a   :  { %624 = vrot.lane.b32.xlu1 %v620_v59, %s14478_s2  ;;  %1412 = vrot.lane.b32.xlu0 %v1408_v60, %s14478_s2  ;;  %v947_v59 = vmul.f32 %v13913_v57, %v14778_v27  ;;  %v101_v60 = vmul.f32 %v14544_v2, %v85_v25 }
  0x7e   :  { %666 = vrot.lane.b32.xlu1 %v662_v4, %s14477_s9  ;;  %1454 = vrot.lane.b32.xlu0 %v1450_v5, %s14477_s9  ;;  %v1661_v4 = vmul.f32 %v14821_v56, %v14794_v40  ;;  %v14835_v5 = vld [vmem:[%s17158_s0 + $0x4a] sm:$0xff] }
  0x82   :  { %694 = vrot.lane.b32.xlu1 %v690_v9, %s14478_s2  ;;  %1482 = vrot.lane.b32.xlu0 %v1478_v11, %s14478_s2  ;;  %v14837_v9 = vstv %s13907_s16  ;;  %v14840_v11 = vadd.f32 %v947_v59, %v14787_v35  ;;  %v14861_v59 = vld [vmem:[#allocation9 + $0x18] sm:$0xff]  ;;  %s13860_s16 = sld [smem:[#allocation3 + $0x34]] }
  0x83   :  { %17248 = vst [vmem:[#allocation22_spill] sm:$0xff] %v14861_v59 }
  0x84   :  { %17244 = vst [vmem:[#allocation18_spill] sm:$0xff] %v14840_v11  ;;  %v959_v11 = vmul.f32 %v13913_v57, %v14544_v2 }
  0x86   :  { %737 = vrot.lane.b32.xlu1 %v733_v19, %s14477_s9  ;;  %1524 = vrot.lane.b32.xlu0 %v1520_v20, %s14477_s9  ;;  %v873_v19 = vmul.f32 %v14835_v5, %v14837_v9  ;;  %v129_v20 = vmul.f32 %v14557_v7, %v85_v25  ;;  %v1689_v25 = vmul.f32 %v14821_v56, %v14810_v49 }
  0x8a   :  { %765 = vrot.lane.b32.xlu1 %v761_v32, %s14478_s2  ;;  %1552 = vrot.lane.b32.xlu0 %v1548_v33, %s14478_s2  ;;  %v1801_v32 = vld [vmem:[#allocation9 + $0x28] sm:$0xff]  ;;  %v1803_v33 = vld [vmem:[#allocation9 + $0x38] sm:$0xff] }
  0x8b   :  { %1836 = vmatprep.subr.mxu0 %v1801_v32  ;;  %1907 = vmatprep.subr.mxu1 %v1803_v33 }
  0x8e   :  { %807 = vrot.lane.b32.xlu1 %v803_v44, %s14477_s9  ;;  %1595 = vrot.lane.b32.xlu0 %v1591_v48, %s14477_s9  ;;  %v14849_v44 = vld [vmem:[#allocation9 + $0x20] sm:$0xff]  ;;  %v14851_v48 = vld [vmem:[#allocation9 + $0x30] sm:$0xff] }
  0x8f   :  { %17245 = vst [vmem:[#allocation19_spill] sm:$0xff] %v14849_v44  ;;  %17246 = vst [vmem:[#allocation20_spill] sm:$0xff] %v14851_v48  ;;  %1837 = vmatpush1.msra.mxu0 %v14849_v44  ;;  %1908 = vmatpush1.msra.mxu1 %v14851_v48 }
  0x90   :  { %1909 = vmatprep.subr.mxu1 %v14861_v59  ;;  %v14886_v59 = vld [vmem:[%s17158_s0 + $0xaa] sm:$0xff] }
  0x91   :  { %v1731_v2 = vmul.f32 %v14886_v59, %v14837_v9 }
  0x92   :  { %835 = vrot.lane.b32.xlu1 %v831_v51, %s14478_s2  ;;  %1623 = vrot.lane.b32.xlu0 %v1619_v52, %s14478_s2  ;;  %v901_v51 = vmul.f32 %v14835_v5, %v14847_v28  ;;  %v14859_v52 = vld [vmem:[#allocation9 + $0x8] sm:$0xff] }
  0x93   :  { %17247 = vst [vmem:[#allocation21_spill] sm:$0xff] %v14859_v52  ;;  %1838 = vmatprep.subr.mxu0 %v14859_v52 }
  0x96   :  { %1665 = vrot.lane.b32.xlu1 %v1661_v4, %s14477_s9  ;;  %106 = vrot.lane.b32.xlu0 %v101_v60, %s14477_s9  ;;  %v14863_v60 = vld [vmem:[#allocation9] sm:$0xff]  ;;  %v14868_v4 = vld [vmem:[%s17158_s0 + $0x9] sm:$0xff] }
  0x97   :  { %17249 = vst [vmem:[#allocation23_spill] sm:$0xff] %v14863_v60  ;;  %1839 = vmatpush1.msra.mxu0 %v14863_v60  ;;  %v171_v48 = vmul.f32 %v14555_v6, %v14868_v4  ;;  %v14944_v60 = vstv %s13827_s30  ;;  %s13865_s30 = sld [smem:[#allocation3 + $0x12]] }
  0x98   :  { %2012 = vmatprep.subr.mxu0 %v1801_v32  ;;  %v199_v32 = vmul.f32 %v14565_v10, %v14868_v4  ;;  %v1016_v44 = vmul.f32 %v14583_v15, %v14944_v60 }
  0x9a   :  { %877 = vrot.lane.b32.xlu1 %v873_v19, %s14477_s9  ;;  %134 = vrot.lane.b32.xlu0 %v129_v20, %s14478_s2  ;;  %v14874_v19 = vld [vmem:[#allocation9 + $0x10] sm:$0xff]  ;;  %v17168_v20 = vmov 0.0  }
  0x9b   :  { %17250 = vst [vmem:[#allocation24_spill] sm:$0xff] %v14874_v19  ;;  %1872 = vmatprep.mubr.f32.mxu0 %v17168_v20  ;;  %1910 = vmatpush1.msra.mxu1 %v14874_v19 }
  0x9c   :  { %1943 = vmatprep.mubr.f32.mxu1 %v17168_v20  ;;  %2083 = vmatprep.subr.mxu1 %v1803_v33  ;;  %v14904_v33 = vld [vmem:[%s17158_s0 + $0xa] sm:$0xff] }
  0x9d   :  { %17251 = vst [vmem:[#allocation25_spill] sm:$0xff] %v14904_v33 }
  0x9e   :  { %905 = vrot.lane.b32.xlu1 %v901_v51, %s14478_s2  ;;  %1693 = vrot.lane.b32.xlu0 %v1689_v25, %s14478_s2  ;;  %v987_v51 = vmul.f32 %v13913_v57, %v14557_v7  ;;  %v1759_v25 = vmul.f32 %v14886_v59, %v14847_v28  ;;  %v241_v7 = vmul.f32 %v14578_v14, %v14904_v33 }
  0xa2   :  { %176 = vrot.lane.b32.xlu1 %v171_v48, %s14477_s9  ;;  %964 = vrot.lane.b32.xlu0 %v959_v11, %s14477_s9  ;;  %v14909_v11 = vld [vmem:[%s17158_s0 + $0x69] sm:$0xff]  ;;  %v269_v48 = vmul.f32 %v14591_v18, %v14904_v33 }
  0xa3   :  { %17252 = vst [vmem:[#allocation26_spill] sm:$0xff] %v14909_v11  ;;  %v1029_v57 = vmul.f32 %v14909_v11, %v14555_v6  ;;  %v14933_v6 = vld [vmem:[%s17158_s0 + $0x6a] sm:$0xff] }
  0xa4   :  { %17254 = vst [vmem:[#allocation28_spill] sm:$0xff] %v14933_v6 }
  0xa6   :  { %1735 = vrot.lane.b32.xlu1 %v1731_v2, %s14477_s9  ;;  %992 = vrot.lane.b32.xlu0 %v987_v51, %s14478_s2  ;;  %v1057_v2 = vmul.f32 %v14909_v11, %v14565_v10  ;;  %v88_v51 = vmul.f32 %v14778_v27, %v14542_v1 }
  0xaa   :  { %1763 = vrot.lane.b32.xlu1 %v1759_v25, %s14478_s2  ;;  %204 = vrot.lane.b32.xlu0 %v199_v32, %s14478_s2  ;;  %v14928_v25 = vld [vmem:[%s17158_s0 + $0x20] sm:$0xff]  ;;  %v1099_v32 = vmul.f32 %v14933_v6, %v14578_v14  ;;  %v1127_v14 = vmul.f32 %v14933_v6, %v14591_v18 }
  0xab   :  { %17253 = vst [vmem:[#allocation27_spill] sm:$0xff] %v14928_v25  ;;  %v312_v10 = vmul.f32 %v14928_v25, %v14604_v22 }
  0xae   :  { %246 = vrot.lane.b32.xlu1 %v241_v7, %s14477_s9  ;;  %1034 = vrot.lane.b32.xlu0 %v1029_v57, %s14477_s9  ;;  %v946_v7 = vmul.f32 %v14537_v0, %v14778_v27  ;;  %v90_v57 = vadd.f32 %v14787_v35, %v88_v51  ;;  %v158_v27 = vmul.f32 %v14944_v60, %v14549_v3  ;;  %v14958_v51 = vld [vmem:[%s17158_s0 + $0x21] sm:$0xff] }
  0xb2   :  { %274 = vrot.lane.b32.xlu1 %v269_v48, %s14478_s2  ;;  %1062 = vrot.lane.b32.xlu0 %v1057_v2, %s14478_s2  ;;  %v340_v48 = vmul.f32 %v14928_v25, %v14617_v26  ;;  %v948_v2 = vadd.f32 %v946_v7, %v14787_v35  ;;  %v382_v35 = vmul.f32 %v14958_v51, %v14630_v30  ;;  %v14971_v7 = vstv %s13833_s12  ;;  %s13873_s12 = sld [smem:[#allocation3 + $0x15]] }
  0xb4   :  { %v963_v20 = vpop.permute.xlu1 %962  ;;  %v105_v19 = vpop.permute.xlu0 %104 }
  0xb5   :  { %v110_v52 = vadd.f32 %v105_v19, %v90_v57  ;;  %v968_v57 = vadd.f32 %v963_v20, %v948_v2 }
  0xb6   :  { %317 = vrot.lane.b32.xlu1 %v312_v10, %s14477_s9  ;;  %1104 = vrot.lane.b32.xlu0 %v1099_v32, %s14477_s9  ;;  %v14963_v10 = vld [vmem:[%s17158_s0 + $0x80] sm:$0xff] }
  0xb7   :  { %v1170_v19 = vmul.f32 %v14963_v10, %v14604_v22  ;;  %v410_v22 = vmul.f32 %v14958_v51, %v14643_v34  ;;  %v1198_v20 = vmul.f32 %v14963_v10, %v14617_v26 }
  0xb8   :  { %v175_v32 = vpop.permute.xlu1 %174  ;;  %v133_v25 = vpop.permute.xlu0 %132 }
  0xb9   :  { %v138_v18 = vadd.f32 %v133_v25, %v110_v52 }
  0xba   :  { %345 = vrot.lane.b32.xlu1 %v340_v48, %s14478_s2  ;;  %1132 = vrot.lane.b32.xlu0 %v1127_v14, %s14478_s2  ;;  %v228_v48 = vmul.f32 %v14971_v7, %v14576_v13 }
  0xbb   :  { %v160_v6 = vadd.f32 %v158_v27, %v138_v18  ;;  %v14993_v18 = vstv %s13841_s17  ;;  %s13881_s17 = sld [smem:[#allocation3 + $0x18]] }
  0xbc   :  { %v203_v33 = vpop.permute.xlu1 %202  ;;  %v991_v11 = vpop.permute.xlu0 %990 }
  0xbd   :  { %v180_v52 = vadd.f32 %v175_v32, %v160_v6  ;;  %v996_v25 = vadd.f32 %v991_v11, %v968_v57  ;;  %v14986_v6 = vld [vmem:[%s17158_s0 + $0x22] sm:$0xff]  ;;  %v299_v57 = vmul.f32 %v14602_v21, %v14993_v18 }
  0xbe   :  { %387 = vrot.lane.b32.xlu1 %v382_v35, %s14477_s9  ;;  %1175 = vrot.lane.b32.xlu0 %v1170_v19, %s14477_s9  ;;  %v14991_v11 = vld [vmem:[%s17158_s0 + $0x81] sm:$0xff]  ;;  %v452_v26 = vmul.f32 %v14986_v6, %v14656_v38 }
  0xbf   :  { %v208_v14 = vadd.f32 %v203_v33, %v180_v52  ;;  %v1018_v2 = vadd.f32 %v1016_v44, %v996_v25  ;;  %17255 = vst [vmem:[#allocation29_spill] sm:$0xff] %v14991_v11  ;;  %v1240_v44 = vmul.f32 %v14991_v11, %v14630_v30  ;;  %v1086_v52 = vmul.f32 %v14609_v23, %v14971_v7 }
  0xc0   :  { %v245_v27 = vpop.permute.xlu1 %244  ;;  %v1033_v32 = vpop.permute.xlu0 %1032  ;;  %v1268_v30 = vmul.f32 %v14991_v11, %v14643_v34 }
  0xc1   :  { %v230_v35 = vadd.f32 %v228_v48, %v208_v14  ;;  %v1038_v19 = vadd.f32 %v1033_v32, %v1018_v2  ;;  %v15014_v32 = vld [vmem:[%s17158_s0 + $0x38] sm:$0xff] }
  0xc2   :  { %415 = vrot.lane.b32.xlu1 %v410_v22, %s14478_s2  ;;  %1203 = vrot.lane.b32.xlu0 %v1198_v20, %s14478_s2  ;;  %v480_v20 = vmul.f32 %v14986_v6, %v14669_v42  ;;  %v523_v34 = vmul.f32 %v15014_v32, %v14682_v46 }
  0xc3   :  { %v250_v33 = vadd.f32 %v245_v27, %v230_v35  ;;  %v15019_v35 = vld [vmem:[%s17158_s0 + $0x82] sm:$0xff] }
  0xc4   :  { %v273_v25 = vpop.permute.xlu1 %272  ;;  %v1061_v48 = vpop.permute.xlu0 %1060  ;;  %17256 = vst [vmem:[#allocation30_spill] sm:$0xff] %v15019_v35 }
  0xc5   :  { %v278_v14 = vadd.f32 %v273_v25, %v250_v33  ;;  %v1066_v22 = vadd.f32 %v1061_v48, %v1038_v19  ;;  %v15021_v33 = vstv %s13849_s22  ;;  %v1310_v19 = vmul.f32 %v15019_v35, %v14656_v38  ;;  %s13824_s22 = sld [smem:[#allocation3 + $0x25]] }
  0xc6   :  { %457 = vrot.lane.b32.xlu1 %v452_v26, %s14477_s9  ;;  %1245 = vrot.lane.b32.xlu0 %v1240_v44, %s14477_s9  ;;  %v369_v25 = vmul.f32 %v14628_v29, %v15021_v33  ;;  %v1157_v48 = vmul.f32 %v14635_v31, %v14993_v18  ;;  %v1338_v38 = vmul.f32 %v15019_v35, %v14669_v42 }
  0xc7   :  { %v301_v2 = vadd.f32 %v299_v57, %v278_v14  ;;  %v1088_v27 = vadd.f32 %v1086_v52, %v1066_v22 }
  0xc8   :  { %v316_v26 = vpop.permute.xlu1 %315  ;;  %v1103_v44 = vpop.permute.xlu0 %1102 }
  0xc9   :  { %v321_v57 = vadd.f32 %v316_v26, %v301_v2  ;;  %v1108_v52 = vadd.f32 %v1103_v44, %v1088_v27  ;;  %v15042_v26 = vld [vmem:[%s17158_s0 + $0x39] sm:$0xff] }
  0xca   :  { %485 = vrot.lane.b32.xlu1 %v480_v20, %s14478_s2  ;;  %1273 = vrot.lane.b32.xlu0 %v1268_v30, %s14478_s2  ;;  %v551_v30 = vmul.f32 %v15014_v32, %v14695_v50  ;;  %v15047_v44 = vld [vmem:[%s17158_s0 + $0x98] sm:$0xff]  ;;  %v593_v42 = vmul.f32 %v15042_v26, %v14708_v54 }
  0xcc   :  { %v344_v14 = vpop.permute.xlu1 %343  ;;  %v1131_v22 = vpop.permute.xlu0 %1130 }
  0xcd   :  { %v349_v11 = vadd.f32 %v344_v14, %v321_v57  ;;  %v1136_v20 = vadd.f32 %v1131_v22, %v1108_v52  ;;  %v15049_v57 = vstv %s13857_s26  ;;  %v1227_v14 = vmul.f32 %v14661_v39, %v15021_v33  ;;  %v15075_v39 = vld [vmem:[%s17158_s0 + $0x99] sm:$0xff]  ;;  %s15529_s26 = sld [smem:[#allocation3 + $0x46]] }
  0xce   :  { %528 = vrot.lane.b32.xlu1 %v523_v34, %s14477_s9  ;;  %1315 = vrot.lane.b32.xlu0 %v1310_v19, %s14477_s9 }
  0xcf   :  { %v371_v2 = vadd.f32 %v369_v25, %v349_v11  ;;  %v1159_v27 = vadd.f32 %v1157_v48, %v1136_v20  ;;  %v1381_v11 = vmul.f32 %v15047_v44, %v14682_v46  ;;  %v439_v48 = vmul.f32 %v14654_v37, %v15049_v57  ;;  %v15070_v37 = vld [vmem:[%s17158_s0 + $0x3a] sm:$0xff] }
  0xd0   :  { %v386_v34 = vpop.permute.xlu1 %385  ;;  %v1174_v19 = vpop.permute.xlu0 %1173  ;;  %v1409_v46 = vmul.f32 %v15047_v44, %v14695_v50  ;;  %v663_v50 = vmul.f32 %v15070_v37, %v14734_v62 }
  0xd1   :  { %v391_v52 = vadd.f32 %v386_v34, %v371_v2  ;;  %v1179_v25 = vadd.f32 %v1174_v19, %v1159_v27 }
  0xd2   :  { %556 = vrot.lane.b32.xlu1 %v551_v30, %s14478_s2  ;;  %1343 = vrot.lane.b32.xlu0 %v1338_v38, %s14478_s2  ;;  %v621_v38 = vmul.f32 %v15042_v26, %v14721_v58 }
  0xd4   :  { %v414_v22 = vpop.permute.xlu1 %413  ;;  %v1202_v20 = vpop.permute.xlu0 %1201 }
  0xd5   :  { %v419_v35 = vadd.f32 %v414_v22, %v391_v52  ;;  %v1207_v30 = vadd.f32 %v1202_v20, %v1179_v25 }
  0xd6   :  { %598 = vrot.lane.b32.xlu1 %v593_v42, %s14477_s9  ;;  %1386 = vrot.lane.b32.xlu0 %v1381_v11, %s14477_s9  ;;  %v15077_v42 = vstv %s13865_s30  ;;  %s13905_s30 = sld [smem:[#allocation3 + $0x21]] }
  0xd7   :  { %v441_v2 = vadd.f32 %v439_v48, %v419_v35  ;;  %v1229_v27 = vadd.f32 %v1227_v14, %v1207_v30  ;;  %v1451_v35 = vmul.f32 %v15075_v39, %v14708_v54  ;;  %v510_v25 = vmul.f32 %v14680_v45, %v15077_v42  ;;  %v15098_v45 = vld [vmem:[%s17158_s0 + $0x50] sm:$0xff] }
  0xd8   :  { %v456_v34 = vpop.permute.xlu1 %455  ;;  %v1244_v19 = vpop.permute.xlu0 %1243  ;;  %v1297_v48 = vmul.f32 %v14687_v47, %v15049_v57  ;;  %v1479_v54 = vmul.f32 %v15075_v39, %v14721_v58  ;;  %v15103_v47 = vld [vmem:[%s17158_s0 + $0x9a] sm:$0xff]  ;;  %v734_v58 = vmul.f32 %v15098_v45, %v14760_v16 }
  0xd9   :  { %v461_v11 = vadd.f32 %v456_v34, %v441_v2  ;;  %v1249_v52 = vadd.f32 %v1244_v19, %v1229_v27  ;;  %v15105_v19 = vstv %s13873_s12  ;;  %s13844_s12 = sld [smem:[#allocation3 + $0x2e]] }
  0xda   :  { %626 = vrot.lane.b32.xlu1 %v621_v38, %s14478_s2  ;;  %1414 = vrot.lane.b32.xlu0 %v1409_v46, %s14478_s2  ;;  %v691_v38 = vmul.f32 %v15070_v37, %v14747_v8 }
  0xdc   :  { %v484_v14 = vpop.permute.xlu1 %483  ;;  %v1272_v22 = vpop.permute.xlu0 %1271 }
  0xdd   :  { %v489_v20 = vadd.f32 %v484_v14, %v461_v11  ;;  %v1277_v30 = vadd.f32 %v1272_v22, %v1249_v52  ;;  %v580_v52 = vmul.f32 %v14706_v53, %v15105_v19  ;;  %v15126_v53 = vld [vmem:[%s17158_s0 + $0x51] sm:$0xff] }
  0xde   :  { %668 = vrot.lane.b32.xlu1 %v663_v50, %s14477_s9  ;;  %1456 = vrot.lane.b32.xlu0 %v1451_v35, %s14477_s9  ;;  %v1521_v50 = vmul.f32 %v15103_v47, %v14734_v62  ;;  %v1549_v62 = vmul.f32 %v15103_v47, %v14747_v8  ;;  %v804_v8 = vmul.f32 %v15126_v53, %v14794_v40 }
  0xdf   :  { %v512_v46 = vadd.f32 %v510_v25, %v489_v20  ;;  %v1299_v2 = vadd.f32 %v1297_v48, %v1277_v30  ;;  %v1368_v25 = vmul.f32 %v14713_v55, %v15077_v42  ;;  %v762_v30 = vmul.f32 %v15098_v45, %v14773_v24  ;;  %v15131_v55 = vld [vmem:[%s17158_s0 + $0xb0] sm:$0xff] }
  0xe0   :  { %v527_v27 = vpop.permute.xlu1 %526  ;;  %v1314_v34 = vpop.permute.xlu0 %1313 }
  0xe1   :  { %v532_v35 = vadd.f32 %v527_v27, %v512_v46  ;;  %v1319_v11 = vadd.f32 %v1314_v34, %v1299_v2  ;;  %v15133_v27 = vstv %s13881_s17  ;;  %v1592_v34 = vmul.f32 %v15131_v55, %v14760_v16  ;;  %s15281_s17 = sld [smem:[#allocation3 + $0x35]] }
  0xe2   :  { %696 = vrot.lane.b32.xlu1 %v691_v38, %s14478_s2  ;;  %1484 = vrot.lane.b32.xlu0 %v1479_v54, %s14478_s2  ;;  %v832_v16 = vmul.f32 %v15126_v53, %v14810_v49 }
  0xe4   :  { %v555_v48 = vpop.permute.xlu1 %554  ;;  %v1342_v14 = vpop.permute.xlu0 %1341 }
  0xe5   :  { %v560_v22 = vadd.f32 %v555_v48, %v532_v35  ;;  %v1347_v20 = vadd.f32 %v1342_v14, %v1319_v11  ;;  %v650_v35 = vmul.f32 %v14732_v61, %v15133_v27  ;;  %v1438_v14 = vmul.f32 %v14739_v63, %v15105_v19  ;;  %v15154_v61 = vld [vmem:[%s17158_s0 + $0xb1] sm:$0xff] }
  0xe6   :  { %739 = vrot.lane.b32.xlu1 %v734_v58, %s14477_s9  ;;  %1526 = vrot.lane.b32.xlu0 %v1521_v50, %s14477_s9 }
  0xe7   :  { %v582_v38 = vadd.f32 %v580_v52, %v560_v22  ;;  %v1370_v54 = vadd.f32 %v1368_v25, %v1347_v20  ;;  %v1620_v22 = vmul.f32 %v15131_v55, %v14773_v24 }
  0xe8   :  { %v597_v46 = vpop.permute.xlu1 %596  ;;  %v1385_v2 = vpop.permute.xlu0 %1384 }
  0xe9   :  { %v602_v58 = vadd.f32 %v597_v46, %v582_v38  ;;  %v1390_v50 = vadd.f32 %v1385_v2, %v1370_v54  ;;  %v1662_v54 = vmul.f32 %v15154_v61, %v14794_v40  ;;  %v15164_v46 = vstv %s13889_s3  ;;  %s15336_s3 = sld [smem:[#allocation3 + $0x38]] }
  0xea   :  { %767 = vrot.lane.b32.xlu1 %v762_v30, %s14478_s2  ;;  %1554 = vrot.lane.b32.xlu0 %v1549_v62, %s14478_s2  ;;  %v15156_v30 = vstv %s13824_s22  ;;  %v721_v40 = vmul.f32 %v14758_v12, %v15164_v46  ;;  %s15489_s22 = sld [smem:[#allocation3 + $0x44]] }
  0xeb   :  { %v114_v24 = vmul.f32 %v15156_v30, %v14542_v1 }
  0xec   :  { %v625_v11 = vpop.permute.xlu1 %624  ;;  %v1413_v52 = vpop.permute.xlu0 %1412 }
  0xed   :  { %v630_v25 = vadd.f32 %v625_v11, %v602_v58  ;;  %v1418_v48 = vadd.f32 %v1413_v52, %v1390_v50 }
  0xee   :  { %809 = vrot.lane.b32.xlu1 %v804_v8, %s14477_s9  ;;  %1597 = vrot.lane.b32.xlu0 %v1592_v34, %s14477_s9  ;;  %v15169_v8 = vld [vmem:[%s17158_s0 + $0x52] sm:$0xff]  ;;  %v15171_v34 = vstv %s13826_s23 }
  0xef   :  { %v652_v20 = vadd.f32 %v650_v35, %v630_v25  ;;  %v1440_v38 = vadd.f32 %v1438_v14, %v1418_v48  ;;  %v874_v52 = vmul.f32 %v15169_v8, %v14837_v9  ;;  %v142_v25 = vmul.f32 %v15171_v34, %v14542_v1 }
  0xf0   :  { %v667_v62 = vpop.permute.xlu1 %666  ;;  %v1455_v63 = vpop.permute.xlu0 %1454  ;;  %v1508_v14 = vmul.f32 %v14765_v17, %v15133_v27  ;;  %v902_v12 = vmul.f32 %v15169_v8, %v14847_v28  ;;  %v15191_v17 = vstv %s13897_s5  ;;  %s15680_s5 = sld [smem:[#allocation3 + $0x2d]] }
  0xf1   :  { %v672_v2 = vadd.f32 %v667_v62, %v652_v20  ;;  %v1460_v35 = vadd.f32 %v1455_v63, %v1440_v38  ;;  %v1690_v62 = vmul.f32 %v15154_v61, %v14810_v49  ;;  %v15189_v38 = vstv %s13830_s28  ;;  %v15202_v49 = vld [vmem:[%s17158_s0 + $0xb2] sm:$0xff]  ;;  %s15378_s28 = sld [smem:[#allocation3 + $0x3b]] }
  0xf2   :  { %837 = vrot.lane.b32.xlu1 %v832_v16, %s14478_s2  ;;  %1625 = vrot.lane.b32.xlu0 %v1620_v22, %s14478_s2 }
  0xf4   :  { %v695_v58 = vpop.permute.xlu1 %694  ;;  %v1483_v50 = vpop.permute.xlu0 %1482 }
  0xf5   :  { %v700_v11 = vadd.f32 %v695_v58, %v672_v2  ;;  %v1488_v48 = vadd.f32 %v1483_v50, %v1460_v35  ;;  %v184_v2 = vmul.f32 %v15189_v38, %v14549_v3  ;;  %v972_v58 = vmul.f32 %v14537_v0, %v15156_v30 }
  0xf6   :  { %1667 = vrot.lane.b32.xlu1 %v1662_v54, %s14477_s9  ;;  %118 = vrot.lane.b32.xlu0 %v114_v24, %s14477_s9 }
  0xf7   :  { %v723_v20 = vadd.f32 %v721_v40, %v700_v11  ;;  %v1510_v63 = vadd.f32 %v1508_v14, %v1488_v48  ;;  %v791_v11 = vmul.f32 %v14792_v36, %v15191_v17  ;;  %v1579_v48 = vmul.f32 %v14799_v41, %v15164_v46 }
  0xf8   :  { %v738_v16 = vpop.permute.xlu1 %737  ;;  %v1525_v22 = vpop.permute.xlu0 %1524  ;;  %v1732_v14 = vmul.f32 %v15202_v49, %v14837_v9  ;;  %v1760_v41 = vmul.f32 %v15202_v49, %v14847_v28 }
  0xf9   :  { %v743_v24 = vadd.f32 %v738_v16, %v723_v20  ;;  %v1530_v50 = vadd.f32 %v1525_v22, %v1510_v63  ;;  %v1000_v16 = vmul.f32 %v14537_v0, %v15171_v34  ;;  %v15214_v20 = vstv %s13832_s29 }
  0xfa   :  { %879 = vrot.lane.b32.xlu1 %v874_v52, %s14477_s9  ;;  %146 = vrot.lane.b32.xlu0 %v142_v25, %s14478_s2  ;;  %v212_v9 = vmul.f32 %v15214_v20, %v14549_v3  ;;  %v15222_v63 = vstv %s13905_s30  ;;  %s15555_s30 = sld [smem:[#allocation3 + $0x47]] }
  0xfb   :  { %v861_v28 = vmul.f32 %v14835_v5, %v15222_v63  ;;  %v159_v5 = vmul.f32 %v14944_v60, %v14868_v4 }
  0xfc   :  { %v766_v1 = vpop.permute.xlu1 %765  ;;  %v1553_v54 = vpop.permute.xlu0 %1552 }
  0xfd   :  { %v771_v35 = vadd.f32 %v766_v1, %v743_v24  ;;  %v1558_v25 = vadd.f32 %v1553_v54, %v1530_v50  ;;  %v15224_v1 = vstv %s13836_s10  ;;  %v1649_v50 = vmul.f32 %v14821_v56, %v15191_v17  ;;  %s15415_s10 = sld [smem:[#allocation3 + $0x3e]] }
  0xfe   :  { %907 = vrot.lane.b32.xlu1 %v902_v12, %s14478_s2  ;;  %1695 = vrot.lane.b32.xlu0 %v1690_v62, %s14478_s2  ;;  %v254_v3 = vmul.f32 %v15224_v1, %v14576_v13 }
  0xff   :  { %v793_v22 = vadd.f32 %v791_v11, %v771_v35  ;;  %v1581_v62 = vadd.f32 %v1579_v48, %v1558_v25  ;;  %v1042_v35 = vmul.f32 %v14583_v15, %v15189_v38 }
 0x100   :  { %v808_v40 = vpop.permute.xlu1 %807  ;;  %v1596_v52 = vpop.permute.xlu0 %1595 }
 0x101   :  { %v813_v0 = vadd.f32 %v808_v40, %v793_v22 }
 0x102   :  { %188 = vrot.lane.b32.xlu1 %v184_v2, %s14477_s9  ;;  %976 = vrot.lane.b32.xlu0 %v972_v58, %s14477_s9  ;;  %v1601_v2 = vadd.f32 %v1596_v52, %v1581_v62  ;;  %v15237_v52 = vstv %s13838_s11  ;;  %v15247_v62 = vstv %s13844_s12  ;;  %s15575_s11 = sld [smem:[#allocation7 + $0x1]] }
 0x103   :  { %s15597_s12 = sld [smem:[#allocation3 + $0x27]] }
 0x104   :  { %v836_v36 = vpop.permute.xlu1 %835  ;;  %v1624_v12 = vpop.permute.xlu0 %1623 }
 0x105   :  { %v841_v58 = vadd.f32 %v836_v36, %v813_v0  ;;  %v1629_v11 = vadd.f32 %v1624_v12, %v1601_v2  ;;  %v15255_v2 = vstv %s13846_s13  ;;  %s15950_s13 = sld [smem:[#allocation3 + $0x3f]] }
 0x106   :  { %1737 = vrot.lane.b32.xlu1 %v1732_v14, %s14477_s9  ;;  %1004 = vrot.lane.b32.xlu0 %v1000_v16, %s14478_s2  ;;  %v282_v16 = vmul.f32 %v15237_v52, %v14576_v13  ;;  %v325_v13 = vmul.f32 %v14602_v21, %v15247_v62 }
 0x107   :  { %v863_v48 = vadd.f32 %v861_v28, %v841_v58  ;;  %v1651_v22 = vadd.f32 %v1649_v50, %v1629_v11  ;;  %v17257_v11 = vld [vmem:[#allocation18_spill] sm:$0xff] }
 0x108   :  { %v1666_v54 = vpop.permute.xlu1 %1665  ;;  %v107_v24 = vpop.permute.xlu0 %106 }
 0x109   :  { %v111_v40 = vadd.f32 %v107_v24, %v14802_v43  ;;  %v1070_v43 = vmul.f32 %v14583_v15, %v15214_v20  ;;  %v1112_v15 = vmul.f32 %v14609_v23, %v15224_v1  ;;  %v1671_v0 = vadd.f32 %v1666_v54, %v1651_v22 }
 0x10a   :  { %1765 = vrot.lane.b32.xlu1 %v1760_v41, %s14478_s2  ;;  %216 = vrot.lane.b32.xlu0 %v212_v9, %s14478_s2  ;;  %v1140_v54 = vmul.f32 %v14609_v23, %v15237_v52  ;;  %v1183_v23 = vmul.f32 %v14635_v31, %v15247_v62 }
 0x10c   :  { %v878_v56 = vpop.permute.xlu1 %877  ;;  %v135_v25 = vpop.permute.xlu0 %134 }
 0x10d   :  { %v139_v14 = vadd.f32 %v135_v25, %v111_v40  ;;  %v883_v36 = vadd.f32 %v878_v56, %v863_v48  ;;  %v17258_v56 = vld [vmem:[#allocation26_spill] sm:$0xff] }
 0x10e   :  { %258 = vrot.lane.b32.xlu1 %v254_v3, %s14477_s9  ;;  %1046 = vrot.lane.b32.xlu0 %v1042_v35, %s14477_s9  ;;  %v1719_v3 = vmul.f32 %v14886_v59, %v15222_v63  ;;  %v353_v35 = vmul.f32 %v14602_v21, %v15255_v2  ;;  %v1017_v25 = vmul.f32 %v17258_v56, %v14944_v60  ;;  %v17262_v56 = vld [vmem:[#allocation21_spill] sm:$0xff] }
 0x10f   :  { %v161_v12 = vadd.f32 %v159_v5, %v139_v14  ;;  %v15267_v5 = vstv %s13852_s14  ;;  %s15724_s14 = sld [smem:[#allocation3 + $0x30]] }
 0x110   :  { %v906_v4 = vpop.permute.xlu1 %905  ;;  %v1694_v41 = vpop.permute.xlu0 %1693  ;;  %v395_v21 = vmul.f32 %v14628_v29, %v15267_v5 }
 0x111   :  { %v911_v9 = vadd.f32 %v906_v4, %v883_v36  ;;  %v1699_v50 = vadd.f32 %v1694_v41, %v1671_v0  ;;  %v15279_v41 = vstv %s13854_s15  ;;  %s15434_s15 = sld [smem:[#allocation3 + $0x40]] }
 0x112   :  { %286 = vrot.lane.b32.xlu1 %v282_v16, %s14478_s2  ;;  %1074 = vrot.lane.b32.xlu0 %v1070_v43, %s14478_s2  ;;  %v17259_v43 = vld [vmem:[#allocation25_spill] sm:$0xff] }
 0x113   :  { %v927_v24 = vmax.f32 %v911_v9, 0.0  ;;  %v1721_v14 = vadd.f32 %v1719_v3, %v1699_v50  ;;  %v229_v22 = vmul.f32 %v14971_v7, %v17259_v43  ;;  %v15291_v3 = vstv %s13860_s16  ;;  %v17266_v43 = vld [vmem:[#allocation27_spill] sm:$0xff]  ;;  %s15454_s16 = sld [smem:[#allocation3 + $0x41]] }
 0x114   :  { %v177_v58 = vpop.permute.xlu1 %176  ;;  %v965_v28 = vpop.permute.xlu0 %964 }
 0x115   :  { %930 = vst.msk [vmem:[#allocation2] sm:$0xff] %vm929_vm0, %v927_v24  ;;  %v969_v40 = vadd.f32 %v965_v28, %v17257_v11  ;;  %v181_v36 = vadd.f32 %v177_v58, %v161_v12  ;;  %v423_v12 = vmul.f32 %v14628_v29, %v15279_v41  ;;  %v1211_v58 = vmul.f32 %v14635_v31, %v15255_v2  ;;  %v17264_v29 = vld [vmem:[#allocation23_spill] sm:$0xff] }
 0x116   :  { %329 = vrot.lane.b32.xlu1 %v325_v13, %s14477_s9  ;;  %1116 = vrot.lane.b32.xlu0 %v1112_v15, %s14477_s9  ;;  %v15300_v31 = vld [vmem:[#allocation9 + $0x68] sm:$0xff] }
 0x118   :  { %v1736_v48 = vpop.permute.xlu1 %1735  ;;  %v993_v59 = vpop.permute.xlu0 %992 }
 0x119   :  { %v997_v16 = vadd.f32 %v993_v59, %v969_v40  ;;  %v1741_v60 = vadd.f32 %v1736_v48, %v1721_v14  ;;  %v17265_v48 = vmov 0.0   ;;  %v15302_v59 = vld [vmem:[#allocation9 + $0x78] sm:$0xff] }
 0x11a   :  { %357 = vrot.lane.b32.xlu1 %v353_v35, %s14478_s2  ;;  %1144 = vrot.lane.b32.xlu0 %v1140_v54, %s14478_s2  ;;  %v17260_v35 = vld [vmem:[#allocation19_spill] sm:$0xff]  ;;  %v17261_v54 = vld [vmem:[#allocation20_spill] sm:$0xff]  ;;  %v14288_v14 = vld [vmem:[%s17158_s0 + $0x1a] sm:$0xff] }
 0x11b   :  { %v1019_v4 = vadd.f32 %v1017_v25, %v997_v16  ;;  %v17263_v25 = vld [vmem:[#allocation22_spill] sm:$0xff]  ;;  %v465_v16 = vmul.f32 %v14288_v14, %v15291_v3 }
 0x11c   :  { %v1764_v9 = vpop.permute.xlu1 %1763  ;;  %v205_v13 = vpop.permute.xlu0 %204  ;;  %v1804_v15 = vld [vmem:[#allocation2] sm:$0x1] }
 0x11d   :  { %v1769_v0 = vadd.f32 %v1764_v9, %v1741_v60  ;;  %v209_v24 = vadd.f32 %v205_v13, %v181_v36  ;;  %14007 = vmatmul.mubr.msk.f32.vlgmr.msra.gmra.mxu0 %vm929_vm0, %v1804_v15  ;;  %14008 = vmatmul.mubr.msk.f32.vlgmr.msra.gmra.mxu1 %vm929_vm0, %v1804_v15  ;;  %v17267_v9 = vld [vmem:[#allocation28_spill] sm:$0xff] }
 0x11e   :  { %399 = vrot.lane.b32.xlu1 %v395_v21, %s14477_s9  ;;  %1187 = vrot.lane.b32.xlu0 %v1183_v23, %s14477_s9  ;;  %v14289_v21 = vld [vmem:[%s17158_s0 + $0x79] sm:$0xff]  ;;  %v1087_v13 = vmul.f32 %v17267_v9, %v14971_v7 }
 0x11f   :  { %v1785_v28 = vmax.f32 %v1769_v0, 0.0  ;;  %v231_v50 = vadd.f32 %v229_v22, %v209_v24  ;;  %2013 = vmatpush1.msra.mxu0 %v17260_v35  ;;  %2084 = vmatpush1.msra.mxu1 %v17261_v54  ;;  %v1253_v23 = vmul.f32 %v14289_v21, %v15267_v5  ;;  %v300_v22 = vmul.f32 %v17266_v43, %v14993_v18  ;;  %v17268_v15 = vld [vmem:[#allocation24_spill] sm:$0xff] }
 0x120   :  { %v247_v11 = vpop.permute.xlu1 %246  ;;  %v1035_v40 = vpop.permute.xlu0 %1034  ;;  %2014 = vmatprep.subr.mxu0 %v17262_v56  ;;  %2085 = vmatprep.subr.mxu1 %v17263_v25  ;;  %v15323_v0 = vstv %s15281_s17  ;;  %v2161_v56 = vld [vmem:[#allocation9 + $0x60] sm:$0xff]  ;;  %v2163_v25 = vld [vmem:[#allocation9 + $0x70] sm:$0xff]  ;;  %v2160_v43 = vld [vmem:[#allocation9 + $0x58] sm:$0xff] }
 0x121   :  { %1788 = vst.msk [vmem:[#allocation2 + $0x20] sm:$0xff] %vm929_vm0, %v1785_v28  ;;  %2015 = vmatpush1.msra.mxu0 %v17264_v29  ;;  %2048 = vmatprep.mubr.f32.mxu0 %v17265_v48  ;;  %v251_v36 = vadd.f32 %v247_v11, %v231_v50  ;;  %v1039_v60 = vadd.f32 %v1035_v40, %v1019_v4  ;;  %v2158_v29 = vld [vmem:[#allocation9 + $0x48] sm:$0xff] }
 0x122   :  { %427 = vrot.lane.b32.xlu1 %v423_v12, %s14478_s2  ;;  %1215 = vrot.lane.b32.xlu0 %v1211_v58, %s14478_s2  ;;  %v493_v7 = vmul.f32 %v14288_v14, %v15323_v0  ;;  %v1281_v4 = vmul.f32 %v14289_v21, %v15279_v41  ;;  %v2157_v14 = vld [vmem:[#allocation9 + $0x40] sm:$0xff]  ;;  %v370_v21 = vmul.f32 %v14958_v51, %v15021_v33 }
 0x123   :  { %2086 = vmatpush1.msra.mxu1 %v17268_v15  ;;  %2119 = vmatprep.mubr.f32.mxu1 %v17265_v48  ;;  %v14290_v15 = vld [vmem:[%s17158_s0 + $0x30] sm:$0xff] }
 0x124   :  { %v275_v24 = vpop.permute.xlu1 %274  ;;  %v1063_v12 = vpop.permute.xlu0 %1062  ;;  %2197 = vmatprep.subr.mxu0 %v15300_v31  ;;  %2268 = vmatprep.subr.mxu1 %v15302_v59 }
 0x125   :  { %v279_v58 = vadd.f32 %v275_v24, %v251_v36  ;;  %v1067_v28 = vadd.f32 %v1063_v12, %v1039_v60  ;;  %v2159_v36 = vld [vmem:[#allocation9 + $0x50] sm:$0xff]  ;;  %v1158_v60 = vmul.f32 %v14963_v10, %v14993_v18  ;;  %v2165_v18 = vld [vmem:[#allocation2 + $0x1] sm:$0x1] }
 0x126   :  { %469 = vrot.lane.b32.xlu1 %v465_v16, %s14477_s9  ;;  %1257 = vrot.lane.b32.xlu0 %v1253_v23, %s14477_s9  ;;  %v15334_v16 = vstv %s15304_s18  ;;  %s15987_s18 = sld [smem:[#allocation3 + $0x42]] }
 0x127   :  { %v302_v50 = vadd.f32 %v300_v22, %v279_v58  ;;  %v1089_v35 = vadd.f32 %v1087_v13, %v1067_v28  ;;  %v536_v24 = vmul.f32 %v14290_v15, %v15334_v16  ;;  %v14291_v58 = vld [vmem:[%s17158_s0 + $0x7a] sm:$0xff] }
 0x128   :  { %v318_v54 = vpop.permute.xlu1 %317  ;;  %v1105_v11 = vpop.permute.xlu0 %1104  ;;  %v1980_v40 = vld [vmem:[#allocation2 + $0x20] sm:$0x1]  ;;  %v1323_v10 = vmul.f32 %v14291_v58, %v15291_v3 }
 0x129   :  { %14009 = vmatmul.mubr.msk.f32.vlgmr.msra.gmra.mxu0 %vm929_vm0, %v1980_v40  ;;  %14010 = vmatmul.mubr.msk.f32.vlgmr.msra.gmra.mxu1 %vm929_vm0, %v1980_v40  ;;  %v322_v23 = vadd.f32 %v318_v54, %v302_v50  ;;  %v1109_v22 = vadd.f32 %v1105_v11, %v1089_v35  ;;  %v15363_v35 = vstv %s15336_s3  ;;  %v440_v54 = vmul.f32 %v14986_v6, %v15049_v57  ;;  %v2341_v6 = vld [vmem:[#allocation2 + $0x21] sm:$0x1]  ;;  %s15771_s3 = sld [smem:[#allocation3 + $0x33]] }
 0x12a   :  { %497 = vrot.lane.b32.xlu1 %v493_v7, %s14478_s2  ;;  %1285 = vrot.lane.b32.xlu0 %v1281_v4, %s14478_s2 }
 0x12b   :  { %2198 = vmatpush1.msra.mxu0 %v2161_v56  ;;  %2269 = vmatpush1.msra.mxu1 %v2163_v25 }
 0x12c   :  { %2199 = vmatprep.subr.mxu0 %v2158_v29  ;;  %2270 = vmatprep.subr.mxu1 %v2160_v43  ;;  %v346_v9 = vpop.permute.xlu1 %345  ;;  %v1133_v13 = vpop.permute.xlu0 %1132 }
 0x12d   :  { %v350_v12 = vadd.f32 %v346_v9, %v322_v23  ;;  %v1137_v51 = vadd.f32 %v1133_v13, %v1109_v22  ;;  %2200 = vmatpush1.msra.mxu0 %v2157_v14  ;;  %2233 = vmatprep.mubr.f32.mxu0 %v17265_v48  ;;  %v2525_v23 = vld [vmem:[#allocation9 + $0xb8] sm:$0xff]  ;;  %v564_v22 = vmul.f32 %v14290_v15, %v15363_v35  ;;  %v2519_v9 = vld [vmem:[#allocation9 + $0x88] sm:$0xff]  ;;  %v15376_v15 = vstv %s15356_s27 }
 0x12e   :  { %2271 = vmatpush1.msra.mxu1 %v2159_v36  ;;  %2304 = vmatprep.mubr.f32.mxu1 %v17265_v48  ;;  %v2521_v13 = vld [vmem:[#allocation9 + $0x98] sm:$0xff] }
 0x12f   :  { %14011 = vmatmul.mubr.msk.f32.vlgmr.msra.gmra.mxu0 %vm929_vm0, %v2165_v18  ;;  %14012 = vmatmul.mubr.msk.f32.vlgmr.msra.gmra.mxu1 %vm929_vm0, %v2165_v18  ;;  %v372_v28 = vadd.f32 %v370_v21, %v350_v12  ;;  %v1160_v7 = vadd.f32 %v1158_v60, %v1137_v51  ;;  %v2523_v21 = vld [vmem:[#allocation9 + $0xa8] sm:$0xff]  ;;  %v14292_v18 = vld [vmem:[%s17158_s0 + $0x31] sm:$0xff] }
 0x130   :  { %2373 = vmatprep.subr.mxu0 %v15300_v31  ;;  %2444 = vmatprep.subr.mxu1 %v15302_v59  ;;  %v388_v4 = vpop.permute.xlu1 %387  ;;  %v1176_v50 = vpop.permute.xlu0 %1175  ;;  %v17269_v31 = vld [vmem:[#allocation29_spill] sm:$0xff] }
 0x131   :  { %540 = vrot.lane.b32.xlu1 %v536_v24, %s14477_s9  ;;  %1327 = vrot.lane.b32.xlu0 %v1323_v10, %s14477_s9  ;;  %v392_v11 = vadd.f32 %v388_v4, %v372_v28  ;;  %v1180_v40 = vadd.f32 %v1176_v50, %v1160_v7  ;;  %v1228_v59 = vmul.f32 %v17269_v31, %v15021_v33  ;;  %v2522_v33 = vld [vmem:[#allocation9 + $0xa0] sm:$0xff]  ;;  %v2520_v10 = vld [vmem:[#allocation9 + $0x90] sm:$0xff] }
 0x132   :  { %2374 = vmatpush1.msra.mxu0 %v2161_v56  ;;  %2445 = vmatpush1.msra.mxu1 %v2163_v25  ;;  %v1351_v56 = vmul.f32 %v14291_v58, %v15323_v0  ;;  %v606_v28 = vmul.f32 %v14292_v18, %v15376_v15  ;;  %v14293_v7 = vld [vmem:[%s17158_s0 + $0x90] sm:$0xff]  ;;  %v511_v50 = vmul.f32 %v15014_v32, %v15077_v42 }
 0x133   :  { %2375 = vmatprep.subr.mxu0 %v2158_v29  ;;  %2446 = vmatprep.subr.mxu1 %v2160_v43  ;;  %v1394_v4 = vmul.f32 %v14293_v7, %v15334_v16 }
 0x134   :  { %2376 = vmatpush1.msra.mxu0 %v2157_v14  ;;  %2409 = vmatprep.mubr.f32.mxu0 %v17265_v48  ;;  %v416_v25 = vpop.permute.xlu1 %415  ;;  %v1204_v60 = vpop.permute.xlu0 %1203  ;;  %v2524_v14 = vld [vmem:[#allocation9 + $0xb0] sm:$0xff] }
 0x135   :  { %2447 = vmatpush1.msra.mxu1 %v2159_v36  ;;  %2480 = vmatprep.mubr.f32.mxu1 %v17265_v48  ;;  %v420_v29 = vadd.f32 %v416_v25, %v392_v11  ;;  %v1208_v43 = vadd.f32 %v1204_v60, %v1180_v40  ;;  %v2518_v36 = vld [vmem:[#allocation9 + $0x80] sm:$0xff] }
 0x136   :  { %14013 = vmatmul.mubr.msk.f32.vlgmr.msra.gmra.mxu0 %vm929_vm0, %v2341_v6  ;;  %14014 = vmatmul.mubr.msk.f32.vlgmr.msra.gmra.mxu1 %vm929_vm0, %v2341_v6  ;;  %v17270_v40 = vld [vmem:[#allocation30_spill] sm:$0xff] }
 0x137   :  { %2558 = vmatprep.subr.mxu0 %v2523_v21  ;;  %2629 = vmatprep.subr.mxu1 %v2525_v23  ;;  %v442_v24 = vadd.f32 %v440_v54, %v420_v29  ;;  %v1230_v12 = vadd.f32 %v1228_v59, %v1208_v43  ;;  %v1298_v31 = vmul.f32 %v17270_v40, %v15049_v57  ;;  %v2526_v59 = vld [vmem:[#allocation2 + $0x2] sm:$0x1]  ;;  %v15403_v57 = vstv %s15378_s28  ;;  %s15909_s28 = sld [smem:[#allocation3 + $0x3c]] }
 0x138   :  { %568 = vrot.lane.b32.xlu1 %v564_v22, %s14478_s2  ;;  %1355 = vrot.lane.b32.xlu0 %v1351_v56, %s14478_s2  ;;  %v458_v51 = vpop.permute.xlu1 %457  ;;  %v1246_v58 = vpop.permute.xlu0 %1245 }
 0x139   :  { %2559 = vmatpush1.msra.mxu0 %v2522_v33  ;;  %2630 = vmatpush1.msra.mxu1 %v2524_v14  ;;  %v462_v54 = vadd.f32 %v458_v51, %v442_v24  ;;  %v1250_v11 = vadd.f32 %v1246_v58, %v1230_v12  ;;  %v634_v24 = vmul.f32 %v14292_v18, %v15403_v57 }
 0x13a   :  { %2560 = vmatprep.subr.mxu0 %v2519_v9  ;;  %2631 = vmatprep.subr.mxu1 %v2521_v13  ;;  %v1422_v12 = vmul.f32 %v14293_v7, %v15363_v35  ;;  %v581_v51 = vmul.f32 %v15042_v26, %v15105_v19  ;;  %v2880_v26 = vld [vmem:[#allocation9 + $0xc8] sm:$0xff] }
 0x13b   :  { %2561 = vmatpush1.msra.mxu0 %v2518_v36  ;;  %2594 = vmatprep.mubr.f32.mxu0 %v17265_v48 }
 0x13c   :  { %2632 = vmatpush1.msra.mxu1 %v2520_v10  ;;  %2665 = vmatprep.mubr.f32.mxu1 %v17265_v48  ;;  %v486_v22 = vpop.permute.xlu1 %485  ;;  %v1274_v56 = vpop.permute.xlu0 %1273 }
 0x13d   :  { %14015 = vmatmul.mubr.msk.f32.vlgmr.msra.gmra.mxu0 %vm929_vm0, %v2526_v59  ;;  %14016 = vmatmul.mubr.msk.f32.vlgmr.msra.gmra.mxu1 %vm929_vm0, %v2526_v59  ;;  %v490_v32 = vadd.f32 %v486_v22, %v462_v54  ;;  %v1278_v25 = vadd.f32 %v1274_v56, %v1250_v11  ;;  %v14294_v59 = vld [vmem:[%s17158_s0 + $0x32] sm:$0xff] }
 0x13e   :  { %2734 = vmatprep.subr.mxu0 %v2523_v21  ;;  %2805 = vmatprep.subr.mxu1 %v2525_v23  ;;  %v2884_v21 = vld [vmem:[#allocation9 + $0xe8] sm:$0xff]  ;;  %v2886_v23 = vld [vmem:[#allocation9 + $0xf8] sm:$0xff] }
 0x13f   :  { %610 = vrot.lane.b32.xlu1 %v606_v28, %s14477_s9  ;;  %1398 = vrot.lane.b32.xlu0 %v1394_v4, %s14477_s9  ;;  %v513_v60 = vadd.f32 %v511_v50, %v490_v32  ;;  %v1300_v6 = vadd.f32 %v1298_v31, %v1278_v25  ;;  %v2881_v50 = vld [vmem:[#allocation9 + $0xd0] sm:$0xff]  ;;  %v2887_v25 = vld [vmem:[#allocation2 + $0x3] sm:$0x1] }
 0x140   :  { %2735 = vmatpush1.msra.mxu0 %v2522_v33  ;;  %2806 = vmatpush1.msra.mxu1 %v2524_v14  ;;  %v529_v29 = vpop.permute.xlu1 %528  ;;  %v1316_v43 = vpop.permute.xlu0 %1315  ;;  %v2702_v33 = vld [vmem:[#allocation2 + $0x22] sm:$0x1]  ;;  %v14295_v56 = vld [vmem:[%s17158_s0 + $0x91] sm:$0xff] }
 0x141   :  { %2736 = vmatprep.subr.mxu0 %v2519_v9  ;;  %2807 = vmatprep.subr.mxu1 %v2521_v13  ;;  %v533_v14 = vadd.f32 %v529_v29, %v513_v60  ;;  %v1320_v58 = vadd.f32 %v1316_v43, %v1300_v6  ;;  %v1369_v9 = vmul.f32 %v15047_v44, %v15077_v42  ;;  %v2883_v13 = vld [vmem:[#allocation9 + $0xe0] sm:$0xff]  ;;  %v15420_v42 = vstv %s15398_s1  ;;  %s15817_s1 = sld [smem:[#allocation3 + $0x36]] }
 0x142   :  { %2737 = vmatpush1.msra.mxu0 %v2518_v36  ;;  %2770 = vmatprep.mubr.f32.mxu0 %v17265_v48  ;;  %v2885_v36 = vld [vmem:[#allocation9 + $0xf0] sm:$0xff]  ;;  %v2879_v44 = vld [vmem:[#allocation9 + $0xc0] sm:$0xff]  ;;  %v676_v22 = vmul.f32 %v14294_v59, %v15420_v42  ;;  %v1464_v32 = vmul.f32 %v14295_v56, %v15376_v15  ;;  %v651_v29 = vmul.f32 %v15070_v37, %v15133_v27 }
 0x143   :  { %2808 = vmatpush1.msra.mxu1 %v2520_v10  ;;  %2841 = vmatprep.mubr.f32.mxu1 %v17265_v48  ;;  %v2882_v10 = vld [vmem:[#allocation9 + $0xd8] sm:$0xff] }
 0x144   :  { %14017 = vmatmul.mubr.msk.f32.vlgmr.msra.gmra.mxu0 %vm929_vm0, %v2702_v33  ;;  %14018 = vmatmul.mubr.msk.f32.vlgmr.msra.gmra.mxu1 %vm929_vm0, %v2702_v33  ;;  %v557_v18 = vpop.permute.xlu1 %556  ;;  %v1344_v28 = vpop.permute.xlu0 %1343 }
 0x145   :  { %2919 = vmatprep.subr.mxu0 %v2884_v21  ;;  %2990 = vmatprep.subr.mxu1 %v2886_v23  ;;  %v561_v7 = vadd.f32 %v557_v18, %v533_v14  ;;  %v1348_v4 = vadd.f32 %v1344_v28, %v1320_v58  ;;  %v1439_v14 = vmul.f32 %v15075_v39, %v15105_v19  ;;  %v3063_v39 = vld [vmem:[#allocation2 + $0x23] sm:$0x1] }
 0x146   :  { %638 = vrot.lane.b32.xlu1 %v634_v24, %s14478_s2  ;;  %1426 = vrot.lane.b32.xlu0 %v1422_v12, %s14478_s2  ;;  %v15441_v12 = vstv %s15415_s10 }
 0x147   :  { %2920 = vmatpush1.msra.mxu0 %v2883_v13  ;;  %2991 = vmatpush1.msra.mxu1 %v2885_v36  ;;  %v583_v54 = vadd.f32 %v581_v51, %v561_v7  ;;  %v1371_v11 = vadd.f32 %v1369_v9, %v1348_v4  ;;  %v704_v58 = vmul.f32 %v14294_v59, %v15441_v12  ;;  %v15452_v7 = vstv %s15434_s15 }
 0x148   :  { %2921 = vmatprep.subr.mxu0 %v2880_v26  ;;  %2992 = vmatprep.subr.mxu1 %v2882_v10  ;;  %v599_v40 = vpop.permute.xlu1 %598  ;;  %v1387_v31 = vpop.permute.xlu0 %1386  ;;  %v1492_v9 = vmul.f32 %v14295_v56, %v15403_v57  ;;  %v722_v59 = vmul.f32 %v15098_v45, %v15164_v46  ;;  %v1509_v45 = vmul.f32 %v15103_v47, %v15133_v27  ;;  %v15479_v47 = vstv %s15454_s16  ;;  %s14481_s16 = smov [#allocation12]  }
 0x149   :  { %2922 = vmatpush1.msra.mxu0 %v2879_v44  ;;  %2955 = vmatprep.mubr.f32.mxu0 %v17265_v48  ;;  %v603_v60 = vadd.f32 %v599_v40, %v583_v54  ;;  %v1391_v6 = vadd.f32 %v1387_v31, %v1371_v11  ;;  %v3242_v11 = vld [vmem:[#allocation9 + $0x110] sm:$0xff]  ;;  %s13809_s17 = sshll.u32 %s14481_s16, 4  ;;  %s13810_s17 = int_to_ptr.vmem [resolvable:$true] %s13809_s17 }
 0x14a   :  { %2993 = vmatpush1.msra.mxu1 %v2881_v50  ;;  %3026 = vmatprep.mubr.f32.mxu1 %v17265_v48  ;;  %p14444_p7 = scmp.lt.s32.totalorder %s13810_s17, %s13810_s17 }
 0x14b   :  { %14019 = vmatmul.mubr.msk.f32.vlgmr.msra.gmra.mxu0 %vm929_vm0, %v2887_v25  ;;  %14020 = vmatmul.mubr.msk.f32.vlgmr.msra.gmra.mxu1 %vm929_vm0, %v2887_v25 }
 0x14c   :  { %3095 = vmatprep.subr.mxu0 %v2884_v21  ;;  %3166 = vmatprep.subr.mxu1 %v2886_v23  ;;  %v627_v43 = vpop.permute.xlu1 %626  ;;  %v1415_v24 = vpop.permute.xlu0 %1414  ;;  %v3245_v21 = vld [vmem:[#allocation9 + $0x128] sm:$0xff]  ;;  %v3247_v23 = vld [vmem:[#allocation9 + $0x138] sm:$0xff] }
 0x14d   :  { %680 = vrot.lane.b32.xlu1 %v676_v22, %s14477_s9  ;;  %1468 = vrot.lane.b32.xlu0 %v1464_v32, %s14477_s9  ;;  %v631_v51 = vadd.f32 %v627_v43, %v603_v60  ;;  %v1419_v33 = vadd.f32 %v1415_v24, %v1391_v6  ;;  %v14296_v22 = vld [vmem:[%s17158_s0 + $0x48] sm:$0xff]  ;;  %v14297_v32 = vld [vmem:[%s17158_s0 + $0x92] sm:$0xff]  ;;  %v3248_v6 = vld [vmem:[#allocation2 + $0x4] sm:$0x1] }
 0x14e   :  { %3096 = vmatpush1.msra.mxu0 %v2883_v13  ;;  %3167 = vmatpush1.msra.mxu1 %v2885_v36  ;;  %v3244_v13 = vld [vmem:[#allocation9 + $0x120] sm:$0xff]  ;;  %v3246_v36 = vld [vmem:[#allocation9 + $0x130] sm:$0xff]  ;;  %v747_v56 = vmul.f32 %v14296_v22, %v15452_v7  ;;  %v1534_v25 = vmul.f32 %v14297_v32, %v15420_v42 }
 0x14f   :  { %3097 = vmatprep.subr.mxu0 %v2880_v26  ;;  %3168 = vmatprep.subr.mxu1 %v2882_v10  ;;  %v653_v37 = vadd.f32 %v651_v29, %v631_v51  ;;  %v1441_v19 = vadd.f32 %v1439_v14, %v1419_v33  ;;  %v3241_v26 = vld [vmem:[#allocation9 + $0x108] sm:$0xff]  ;;  %v3243_v10 = vld [vmem:[#allocation9 + $0x118] sm:$0xff] }
 0x150   :  { %3098 = vmatpush1.msra.mxu0 %v2879_v44  ;;  %3131 = vmatprep.mubr.f32.mxu0 %v17265_v48  ;;  %v669_v18 = vpop.permute.xlu1 %668  ;;  %v1457_v28 = vpop.permute.xlu0 %1456  ;;  %v3240_v44 = vld [vmem:[#allocation9 + $0x100] sm:$0xff] }
 0x151   :  { %3169 = vmatpush1.msra.mxu1 %v2881_v50  ;;  %3202 = vmatprep.mubr.f32.mxu1 %v17265_v48  ;;  %v673_v4 = vadd.f32 %v669_v18, %v653_v37  ;;  %v1461_v40 = vadd.f32 %v1457_v28, %v1441_v19  ;;  %v3606_v37 = vld [vmem:[#allocation9 + $0x168] sm:$0xff]  ;;  %v3605_v19 = vld [vmem:[#allocation9 + $0x160] sm:$0xff] }
 0x152   :  { %14021 = vmatmul.mubr.msk.f32.vlgmr.msra.gmra.mxu0 %vm929_vm0, %v3063_v39  ;;  %14022 = vmatmul.mubr.msk.f32.vlgmr.msra.gmra.mxu1 %vm929_vm0, %v3063_v39  ;;  %v792_v39 = vmul.f32 %v15126_v53, %v15191_v17  ;;  %v3601_v53 = vld [vmem:[#allocation9 + $0x140] sm:$0xff] }
 0x153   :  { %3280 = vmatprep.subr.mxu0 %v3245_v21  ;;  %3351 = vmatprep.subr.mxu1 %v3247_v23 }
 0x154   :  { %708 = vrot.lane.b32.xlu1 %v704_v58, %s14478_s2  ;;  %1496 = vrot.lane.b32.xlu0 %v1492_v9, %s14478_s2  ;;  %v697_v50 = vpop.permute.xlu1 %696  ;;  %v1485_v54 = vpop.permute.xlu0 %1484  ;;  %v1562_v58 = vmul.f32 %v14297_v32, %v15441_v12  ;;  %v3424_v9 = vld [vmem:[#allocation2 + $0x24] sm:$0x1] }
 0x155   :  { %3281 = vmatpush1.msra.mxu0 %v3244_v13  ;;  %3352 = vmatpush1.msra.mxu1 %v3246_v36  ;;  %v701_v31 = vadd.f32 %v697_v50, %v673_v4  ;;  %v1489_v60 = vadd.f32 %v1485_v54, %v1461_v40  ;;  %v3604_v4 = vld [vmem:[#allocation9 + $0x158] sm:$0xff]  ;;  %v1580_v50 = vmul.f32 %v15131_v55, %v15164_v46  ;;  %v15496_v54 = vstv %s15474_s21  ;;  %v14298_v55 = vld [vmem:[%s17158_s0 + $0x49] sm:$0xff] }
 0x156   :  { %3282 = vmatprep.subr.mxu0 %v3241_v26  ;;  %3353 = vmatprep.subr.mxu1 %v3243_v10  ;;  %v817_v46 = vmul.f32 %v14298_v55, %v15496_v54 }
 0x157   :  { %3283 = vmatpush1.msra.mxu0 %v3240_v44  ;;  %3316 = vmatprep.mubr.f32.mxu0 %v17265_v48  ;;  %v724_v24 = vadd.f32 %v722_v59, %v701_v31  ;;  %v1511_v27 = vadd.f32 %v1509_v45, %v1489_v60 }
 0x158   :  { %3354 = vmatpush1.msra.mxu1 %v3242_v11  ;;  %3387 = vmatprep.mubr.f32.mxu1 %v17265_v48  ;;  %v740_v29 = vpop.permute.xlu1 %739  ;;  %v1527_v43 = vpop.permute.xlu0 %1526 }
 0x159   :  { %14023 = vmatmul.mubr.msk.f32.vlgmr.msra.gmra.mxu0 %vm929_vm0, %v3248_v6  ;;  %14024 = vmatmul.mubr.msk.f32.vlgmr.msra.gmra.mxu1 %vm929_vm0, %v3248_v6  ;;  %v744_v14 = vadd.f32 %v740_v29, %v724_v24  ;;  %v1531_v18 = vadd.f32 %v1527_v43, %v1511_v27  ;;  %v15515_v29 = vstv %s15489_s22  ;;  %v862_v27 = vmul.f32 %v15169_v8, %v15222_v63  ;;  %v3785_v8 = vld [vmem:[#allocation2 + $0x25] sm:$0x1] }
 0x15a   :  { %3456 = vmatprep.subr.mxu0 %v3245_v21  ;;  %3527 = vmatprep.subr.mxu1 %v3247_v23  ;;  %v3608_v21 = vld [vmem:[#allocation9 + $0x178] sm:$0xff]  ;;  %v775_v23 = vmul.f32 %v14296_v22, %v15479_v47  ;;  %v14299_v22 = vld [vmem:[%s17158_s0 + $0xa8] sm:$0xff] }
 0x15b   :  { %751 = vrot.lane.b32.xlu1 %v747_v56, %s14477_s9  ;;  %1538 = vrot.lane.b32.xlu0 %v1534_v25, %s14477_s9  ;;  %v1605_v56 = vmul.f32 %v14299_v22, %v15452_v7  ;;  %v3609_v25 = vld [vmem:[#allocation2 + $0x5] sm:$0x1] }
 0x15c   :  { %3457 = vmatpush1.msra.mxu0 %v3244_v13  ;;  %3528 = vmatpush1.msra.mxu1 %v3246_v36  ;;  %v768_v51 = vpop.permute.xlu1 %767  ;;  %v1555_v33 = vpop.permute.xlu0 %1554  ;;  %v3607_v13 = vld [vmem:[#allocation9 + $0x170] sm:$0xff] }
 0x15d   :  { %3458 = vmatprep.subr.mxu0 %v3241_v26  ;;  %3529 = vmatprep.subr.mxu1 %v3243_v10  ;;  %v772_v28 = vadd.f32 %v768_v51, %v744_v14  ;;  %v3602_v10 = vld [vmem:[#allocation9 + $0x148] sm:$0xff] }
 0x15e   :  { %3459 = vmatpush1.msra.mxu0 %v3240_v44  ;;  %3492 = vmatprep.mubr.f32.mxu0 %v17265_v48  ;;  %v1559_v44 = vadd.f32 %v1555_v33, %v1531_v18  ;;  %v1650_v33 = vmul.f32 %v15154_v61, %v15191_v17  ;;  %v3967_v14 = vld [vmem:[#allocation9 + $0x1a8] sm:$0xff]  ;;  %v3966_v61 = vld [vmem:[#allocation9 + $0x1a0] sm:$0xff]  ;;  %v3968_v17 = vld [vmem:[#allocation9 + $0x1b0] sm:$0xff] }
 0x15f   :  { %3530 = vmatpush1.msra.mxu1 %v3242_v11  ;;  %3563 = vmatprep.mubr.f32.mxu1 %v17265_v48  ;;  %v3603_v11 = vld [vmem:[#allocation9 + $0x150] sm:$0xff]  ;;  %v794_v40 = vadd.f32 %v792_v39, %v772_v28  ;;  %v3963_v28 = vld [vmem:[#allocation9 + $0x188] sm:$0xff]  ;;  %v3965_v39 = vld [vmem:[#allocation9 + $0x198] sm:$0xff] }
 0x160   :  { %14025 = vmatmul.mubr.msk.f32.vlgmr.msra.gmra.mxu0 %vm929_vm0, %v3424_v9  ;;  %14026 = vmatmul.mubr.msk.f32.vlgmr.msra.gmra.mxu1 %vm929_vm0, %v3424_v9  ;;  %v810_v36 = vpop.permute.xlu1 %809  ;;  %v1598_v26 = vpop.permute.xlu0 %1597  ;;  %v1582_v32 = vadd.f32 %v1580_v50, %v1559_v44  ;;  %v14300_v50 = vld [vmem:[%s17158_s0 + $0x8] sm:$0xff] }
 0x161   :  { %3641 = vmatprep.subr.mxu0 %v3606_v37  ;;  %3712 = vmatprep.subr.mxu1 %v3608_v21  ;;  %v814_v60 = vadd.f32 %v810_v36, %v794_v40  ;;  %v3962_v36 = vld [vmem:[#allocation9 + $0x180] sm:$0xff] }
 0x162   :  { %779 = vrot.lane.b32.xlu1 %v775_v23, %s14478_s2  ;;  %1566 = vrot.lane.b32.xlu0 %v1562_v58, %s14478_s2  ;;  %v1602_v43 = vadd.f32 %v1598_v26, %v1582_v32  ;;  %v1633_v23 = vmul.f32 %v14299_v22, %v15479_v47  ;;  %v1720_v32 = vmul.f32 %v15202_v49, %v15222_v63 }
 0x163   :  { %3642 = vmatpush1.msra.mxu0 %v3605_v19  ;;  %3713 = vmatpush1.msra.mxu1 %v3607_v13  ;;  %v143_v63 = vmul.f32 %v14300_v50, %v15171_v34 }
 0x164   :  { %3643 = vmatprep.subr.mxu0 %v3602_v10  ;;  %3714 = vmatprep.subr.mxu1 %v3604_v4  ;;  %v838_v31 = vpop.permute.xlu1 %837  ;;  %v1626_v59 = vpop.permute.xlu0 %1625 }
 0x165   :  { %3644 = vmatpush1.msra.mxu0 %v3601_v53  ;;  %3677 = vmatprep.mubr.f32.mxu0 %v17265_v48  ;;  %v842_v24 = vadd.f32 %v838_v31, %v814_v60  ;;  %v1630_v51 = vadd.f32 %v1626_v59, %v1602_v43  ;;  %v4328_v43 = vld [vmem:[#allocation9 + $0x1e8] sm:$0xff] }
 0x166   :  { %3715 = vmatpush1.msra.mxu1 %v3603_v11  ;;  %3748 = vmatprep.mubr.f32.mxu1 %v17265_v48 }
 0x167   :  { %14027 = vmatmul.mubr.msk.f32.vlgmr.msra.gmra.mxu0 %vm929_vm0, %v3609_v25  ;;  %14028 = vmatmul.mubr.msk.f32.vlgmr.msra.gmra.mxu1 %vm929_vm0, %v3609_v25  ;;  %v864_v18 = vadd.f32 %v862_v27, %v842_v24  ;;  %v15560_v25 = vstv %s15529_s26  ;;  %v4330_v24 = vld [vmem:[#allocation9 + $0x1f8] sm:$0xff]  ;;  %v14302_v27 = vld [vmem:[%s17158_s0 + $0x4a] sm:$0xff]  ;;  %s16037_s26 = sld [smem:[#allocation3 + $0x45]] }
 0x168   :  { %3817 = vmatprep.subr.mxu0 %v3606_v37  ;;  %3888 = vmatprep.subr.mxu1 %v3608_v21  ;;  %v1668_v45 = vpop.permute.xlu1 %1667  ;;  %v15510_v6 = vpop.permute.xlu0 %118  ;;  %v3969_v37 = vld [vmem:[#allocation9 + $0x1b8] sm:$0xff]  ;;  %v845_v21 = vmul.f32 %v14298_v55, %v15515_v29  ;;  %v3970_v55 = vld [vmem:[#allocation2 + $0x6] sm:$0x1] }
 0x169   :  { %821 = vrot.lane.b32.xlu1 %v817_v46, %s14477_s9  ;;  %1609 = vrot.lane.b32.xlu0 %v1605_v56, %s14477_s9 }
 0x16a   :  { %3818 = vmatpush1.msra.mxu0 %v3605_v19  ;;  %3889 = vmatpush1.msra.mxu1 %v3607_v13  ;;  %v1652_v19 = vadd.f32 %v1650_v33, %v1630_v51  ;;  %v887_v51 = vmul.f32 %v14302_v27, %v15560_v25  ;;  %v4146_v33 = vld [vmem:[#allocation2 + $0x26] sm:$0x1] }
 0x16b   :  { %3819 = vmatprep.subr.mxu0 %v3602_v10  ;;  %3890 = vmatprep.subr.mxu1 %v3604_v4  ;;  %v3964_v4 = vld [vmem:[#allocation9 + $0x190] sm:$0xff] }
 0x16c   :  { %3820 = vmatpush1.msra.mxu0 %v3601_v53  ;;  %3853 = vmatprep.mubr.f32.mxu0 %v17265_v48  ;;  %v880_v58 = vpop.permute.xlu1 %879  ;;  %v15524_v9 = vpop.permute.xlu0 %146  ;;  %v115_v53 = vmul.f32 %v14300_v50, %v15156_v30  ;;  %v1672_v31 = vadd.f32 %v1668_v45, %v1652_v19  ;;  %v14303_v50 = vld [vmem:[%s17158_s0] sm:$0xff] }
 0x16d   :  { %3891 = vmatpush1.msra.mxu1 %v3603_v11  ;;  %3924 = vmatprep.mubr.f32.mxu1 %v17265_v48  ;;  %v884_v13 = vadd.f32 %v880_v58, %v864_v18  ;;  %v15541_v11 = vld [vmem:[%s17158_s0 + $0xa9] sm:$0xff]  ;;  %v4326_v18 = vld [vmem:[#allocation9 + $0x1d8] sm:$0xff] }
 0x16e   :  { %14029 = vmatmul.mubr.msk.f32.vlgmr.msra.gmra.mxu0 %vm929_vm0, %v3785_v8  ;;  %14030 = vmatmul.mubr.msk.f32.vlgmr.msra.gmra.mxu1 %vm929_vm0, %v3785_v8  ;;  %v1675_v40 = vmul.f32 %v15541_v11, %v15496_v54  ;;  %v4324_v8 = vld [vmem:[#allocation9 + $0x1c8] sm:$0xff] }
 0x16f   :  { %4002 = vmatprep.subr.mxu0 %v3967_v14  ;;  %4073 = vmatprep.subr.mxu1 %v3969_v37 }
 0x170   :  { %849 = vrot.lane.b32.xlu1 %v845_v21, %s14478_s2  ;;  %1637 = vrot.lane.b32.xlu0 %v1633_v23, %s14478_s2  ;;  %v908_v26 = vpop.permute.xlu1 %907  ;;  %v1696_v10 = vpop.permute.xlu0 %1695  ;;  %v4329_v21 = vld [vmem:[#allocation9 + $0x1f0] sm:$0xff] }
 0x171   :  { %4003 = vmatpush1.msra.mxu0 %v3966_v61  ;;  %4074 = vmatpush1.msra.mxu1 %v3968_v17  ;;  %v912_v44 = vadd.f32 %v908_v26, %v884_v13  ;;  %v1700_v56 = vadd.f32 %v1696_v10, %v1672_v31  ;;  %v15585_v13 = vstv %s15562_s8 }
 0x172   :  { %4004 = vmatprep.subr.mxu0 %v3963_v28  ;;  %4075 = vmatprep.subr.mxu1 %v3965_v39 }
 0x173   :  { %4005 = vmatpush1.msra.mxu0 %v3962_v36  ;;  %4038 = vmatprep.mubr.f32.mxu0 %v17265_v48  ;;  %v928_v59 = vmax.f32 %v912_v44, 0.0  ;;  %v1722_v49 = vadd.f32 %v1720_v32, %v1700_v56  ;;  %v4331_v44 = vld [vmem:[#allocation2 + $0x7] sm:$0x1]  ;;  %v14305_v56 = vld [vmem:[%s17158_s0 + $0x68] sm:$0xff] }
 0x174   :  { %4076 = vmatpush1.msra.mxu1 %v3964_v4  ;;  %4109 = vmatprep.mubr.f32.mxu1 %v17265_v48  ;;  %v15546_v46 = vpop.permute.xlu1 %188  ;;  %v15548_v22 = vpop.permute.xlu0 %976  ;;  %v973_v32 = vmul.f32 %v14305_v56, %v15156_v30  ;;  %v15632_v30 = vstv %s15597_s12 }
 0x175   :  { %14031 = vmatmul.mubr.msk.f32.vlgmr.msra.gmra.mxu0 %vm929_vm0, %v3970_v55  ;;  %14032 = vmatmul.mubr.msk.f32.vlgmr.msra.gmra.mxu1 %vm929_vm0, %v3970_v55  ;;  %931 = vst.msk [vmem:[#allocation2 + $0x8] sm:$0xff] %vm929_vm0, %v928_v59  ;;  %v14304_v59 = vld [vmem:[%s17158_s0 + $0x9] sm:$0xff] }
 0x176   :  { %4178 = vmatprep.subr.mxu0 %v3967_v14  ;;  %4249 = vmatprep.subr.mxu1 %v3969_v37  ;;  %v4327_v37 = vld [vmem:[#allocation9 + $0x1e0] sm:$0xff]  ;;  %v185_v55 = vmul.f32 %v14304_v59, %v15189_v38 }
 0x177   :  { %1679 = vrot.lane.b32.xlu1 %v1675_v40, %s14477_s9  ;;  %120 = vrot.lane.b32.xlu0 %v115_v53, %s14477_s9  ;;  %v94_v53 = vmul.f32 %v14303_v50, %v15585_v13  ;;  %v14308_v50 = vld [vmem:[%s17158_s0 + $0x60] sm:$0xff] }
 0x178   :  { %4179 = vmatpush1.msra.mxu0 %v3966_v61  ;;  %4250 = vmatpush1.msra.mxu1 %v3968_v17  ;;  %v1738_v60 = vpop.permute.xlu1 %1737  ;;  %v15564_v45 = vpop.permute.xlu0 %1004  ;;  %v4323_v17 = vld [vmem:[#allocation9 + $0x1c0] sm:$0xff] }
 0x179   :  { %4180 = vmatprep.subr.mxu0 %v3963_v28  ;;  %4251 = vmatprep.subr.mxu1 %v3965_v39  ;;  %v1742_v14 = vadd.f32 %v1738_v60, %v1722_v49  ;;  %v15582_v28 = vstv %s15555_s30  ;;  %v4325_v39 = vld [vmem:[#allocation9 + $0x1d0] sm:$0xff] }
 0x17a   :  { %4181 = vmatpush1.msra.mxu0 %v3962_v36  ;;  %4214 = vmatprep.mubr.f32.mxu0 %v17265_v48  ;;  %v915_v10 = vmul.f32 %v14302_v27, %v15582_v28  ;;  %v4691_v27 = vld [vmem:[#allocation9 + $0x238] sm:$0xff] }
 0x17b   :  { %4252 = vmatpush1.msra.mxu1 %v3964_v4  ;;  %4285 = vmatprep.mubr.f32.mxu1 %v17265_v48  ;;  %v1703_v4 = vmul.f32 %v15541_v11, %v15515_v29  ;;  %v15606_v11 = vstv %s15575_s11 }
 0x17c   :  { %14033 = vmatmul.mubr.msk.f32.vlgmr.msra.gmra.mxu0 %vm929_vm0, %v4146_v33  ;;  %14034 = vmatmul.mubr.msk.f32.vlgmr.msra.gmra.mxu1 %vm929_vm0, %v4146_v33  ;;  %v1766_v23 = vpop.permute.xlu1 %1765  ;;  %v15577_v58 = vpop.permute.xlu0 %216  ;;  %v96_v60 = vadd.f32 %v94_v53, %v15606_v11  ;;  %v4690_v33 = vld [vmem:[#allocation9 + $0x230] sm:$0xff]  ;;  %v952_v53 = vmul.f32 %v14308_v50, %v15585_v13 }
 0x17d   :  { %4363 = vmatprep.subr.mxu0 %v4328_v43  ;;  %4434 = vmatprep.subr.mxu1 %v4330_v24  ;;  %v1770_v61 = vadd.f32 %v1766_v23, %v1742_v14  ;;  %v14306_v14 = vld [vmem:[%s17158_s0 + $0xaa] sm:$0xff] }
 0x17e   :  { %891 = vrot.lane.b32.xlu1 %v887_v51, %s14477_s9  ;;  %148 = vrot.lane.b32.xlu0 %v143_v63, %s14478_s2  ;;  %v4688_v51 = vld [vmem:[#allocation9 + $0x220] sm:$0xff]  ;;  %v124_v23 = vadd.f32 %v15510_v6, %v96_v60  ;;  %v14310_v60 = vld [vmem:[%s17158_s0 + $0x69] sm:$0xff] }
 0x17f   :  { %4364 = vmatpush1.msra.mxu0 %v4327_v37  ;;  %4435 = vmatpush1.msra.mxu1 %v4329_v21  ;;  %v1786_v19 = vmax.f32 %v1770_v61, 0.0 }
 0x180   :  { %4365 = vmatprep.subr.mxu0 %v4324_v8  ;;  %4436 = vmatprep.subr.mxu1 %v4326_v18  ;;  %v15587_v36 = vpop.permute.xlu1 %258  ;;  %v15589_v26 = vpop.permute.xlu0 %1046  ;;  %v152_v61 = vadd.f32 %v15524_v9, %v124_v23  ;;  %v1773_v9 = vmul.f32 %v14306_v14, %v15582_v28 }
 0x181   :  { %4366 = vmatpush1.msra.mxu0 %v4323_v17  ;;  %4399 = vmatprep.mubr.f32.mxu0 %v17265_v48  ;;  %1789 = vst.msk [vmem:[#allocation2 + $0x28] sm:$0xff] %vm929_vm0, %v1786_v19  ;;  %v4684_v19 = vld [vmem:[#allocation9 + $0x200] sm:$0xff] }
 0x182   :  { %4437 = vmatpush1.msra.mxu1 %v4325_v39  ;;  %4470 = vmatprep.mubr.f32.mxu1 %v17265_v48 }
 0x183   :  { %14035 = vmatmul.mubr.msk.f32.vlgmr.msra.gmra.mxu0 %vm929_vm0, %v4331_v44  ;;  %14036 = vmatmul.mubr.msk.f32.vlgmr.msra.gmra.mxu1 %vm929_vm0, %v4331_v44  ;;  %v4692_v44 = vld [vmem:[#allocation2 + $0x8] sm:$0x1] }
 0x184   :  { %4539 = vmatprep.subr.mxu0 %v4328_v43  ;;  %4610 = vmatprep.subr.mxu1 %v4330_v24  ;;  %v15608_v40 = vpop.permute.xlu1 %286  ;;  %v15610_v31 = vpop.permute.xlu0 %1074  ;;  %v4507_v43 = vld [vmem:[#allocation2 + $0x27] sm:$0x1]  ;;  %v4689_v24 = vld [vmem:[#allocation9 + $0x228] sm:$0xff] }
 0x185   :  { %919 = vrot.lane.b32.xlu1 %v915_v10, %s14478_s2  ;;  %1707 = vrot.lane.b32.xlu0 %v1703_v4, %s14478_s2  ;;  %v213_v4 = vmul.f32 %v14304_v59, %v15214_v20  ;;  %v14309_v59 = vld [vmem:[%s17158_s0 + $0xa] sm:$0xff] }
 0x186   :  { %4540 = vmatpush1.msra.mxu0 %v4327_v37  ;;  %4611 = vmatpush1.msra.mxu1 %v4329_v21  ;;  %v1745_v37 = vmul.f32 %v14306_v14, %v15560_v25  ;;  %v1001_v21 = vmul.f32 %v14305_v56, %v15171_v34  ;;  %v4686_v34 = vld [vmem:[#allocation9 + $0x210] sm:$0xff]  ;;  %v15666_v56 = vstv %s15634_s19 }
 0x187   :  { %4541 = vmatprep.subr.mxu0 %v4324_v8  ;;  %4612 = vmatprep.subr.mxu1 %v4326_v18  ;;  %v4685_v8 = vld [vmem:[#allocation9 + $0x208] sm:$0xff]  ;;  %v4687_v18 = vld [vmem:[#allocation9 + $0x218] sm:$0xff] }
 0x188   :  { %4542 = vmatpush1.msra.mxu0 %v4323_v17  ;;  %4575 = vmatprep.mubr.f32.mxu0 %v17265_v48  ;;  %v15624_v49 = vpop.permute.xlu1 %329  ;;  %v15626_v63 = vpop.permute.xlu0 %1116  ;;  %v14307_v17 = vld [vmem:[%s17158_s0 + $0x1] sm:$0xff] }
 0x189   :  { %4613 = vmatpush1.msra.mxu1 %v4325_v39  ;;  %4646 = vmatprep.mubr.f32.mxu1 %v17265_v48  ;;  %v164_v39 = vmul.f32 %v14307_v17, %v15632_v30  ;;  %v14311_v17 = vld [vmem:[%s17158_s0 + $0x2] sm:$0xff] }
 0x18a   :  { %14037 = vmatmul.mubr.msk.f32.vlgmr.msra.gmra.mxu0 %vm929_vm0, %v4507_v43  ;;  %14038 = vmatmul.mubr.msk.f32.vlgmr.msra.gmra.mxu1 %vm929_vm0, %v4507_v43  ;;  %v1043_v43 = vmul.f32 %v14310_v60, %v15189_v38  ;;  %v234_v38 = vmul.f32 %v14311_v17, %v15666_v56 }
 0x18b   :  { %190 = vrot.lane.b32.xlu1 %v185_v55, %s14477_s9  ;;  %978 = vrot.lane.b32.xlu0 %v973_v32, %s14477_s9  ;;  %v166_v55 = vadd.f32 %v164_v39, %v152_v61  ;;  %v255_v32 = vmul.f32 %v14309_v59, %v15224_v1 }
 0x18c   :  { %4724 = vmatprep.subr.mxu0 %v4689_v24  ;;  %4795 = vmatprep.subr.mxu1 %v4691_v27  ;;  %v15649_v10 = vpop.permute.xlu1 %357  ;;  %v15651_v6 = vpop.permute.xlu0 %1144 }
 0x18d   :  { %4725 = vmatpush1.msra.mxu0 %v4688_v51  ;;  %4796 = vmatpush1.msra.mxu1 %v4690_v33  ;;  %v194_v14 = vadd.f32 %v15546_v46, %v166_v55  ;;  %v283_v46 = vmul.f32 %v14309_v59, %v15237_v52  ;;  %v5048_v55 = vld [vmem:[#allocation9 + $0x258] sm:$0xff]  ;;  %v15720_v59 = vstv %s15680_s5 }
 0x18e   :  { %4726 = vmatprep.subr.mxu0 %v4685_v8  ;;  %4797 = vmatprep.subr.mxu1 %v4687_v18 }
 0x18f   :  { %1749 = vrot.lane.b32.xlu1 %v1745_v37, %s14477_s9  ;;  %1006 = vrot.lane.b32.xlu0 %v1001_v21, %s14478_s2  ;;  %v954_v37 = vadd.f32 %v952_v53, %v15606_v11  ;;  %v222_v61 = vadd.f32 %v15577_v58, %v194_v14  ;;  %v5046_v53 = vld [vmem:[#allocation9 + $0x248] sm:$0xff] }
 0x190   :  { %4727 = vmatpush1.msra.mxu0 %v4684_v19  ;;  %4760 = vmatprep.mubr.f32.mxu0 %v17265_v48  ;;  %v15682_v21 = vpop.permute.xlu1 %399  ;;  %v15684_v23 = vpop.permute.xlu0 %1187 }
 0x191   :  { %4798 = vmatpush1.msra.mxu1 %v4686_v34  ;;  %4831 = vmatprep.mubr.f32.mxu1 %v17265_v48  ;;  %v982_v58 = vadd.f32 %v15548_v22, %v954_v37  ;;  %v236_v39 = vadd.f32 %v234_v38, %v222_v61  ;;  %v5049_v22 = vld [vmem:[#allocation9 + $0x260] sm:$0xff]  ;;  %v5047_v37 = vld [vmem:[#allocation9 + $0x250] sm:$0xff] }
 0x192   :  { %14039 = vmatmul.mubr.msk.f32.vlgmr.msra.gmra.mxu0 %vm929_vm0, %v4692_v44  ;;  %14040 = vmatmul.mubr.msk.f32.vlgmr.msra.gmra.mxu1 %vm929_vm0, %v4692_v44  ;;  %v14314_v44 = vld [vmem:[%s17158_s0 + $0x6a] sm:$0xff] }
 0x193   :  { %1777 = vrot.lane.b32.xlu1 %v1773_v9, %s14478_s2  ;;  %218 = vrot.lane.b32.xlu0 %v213_v4, %s14478_s2  ;;  %v1113_v50 = vmul.f32 %v14314_v44, %v15224_v1  ;;  %v1141_v1 = vmul.f32 %v14314_v44, %v15237_v52  ;;  %v5053_v52 = vld [vmem:[#allocation2 + $0x9] sm:$0x1] }
 0x194   :  { %4900 = vmatprep.subr.mxu0 %v4689_v24  ;;  %4971 = vmatprep.subr.mxu1 %v4691_v27  ;;  %v1071_v24 = vmul.f32 %v14310_v60, %v15214_v20  ;;  %v4868_v27 = vld [vmem:[#allocation2 + $0x28] sm:$0x1]  ;;  %v15707_v9 = vpop.permute.xlu0 %1215  ;;  %v5045_v60 = vld [vmem:[#allocation9 + $0x240] sm:$0xff] }
 0x195   :  { %4901 = vmatpush1.msra.mxu0 %v4688_v51  ;;  %4972 = vmatpush1.msra.mxu1 %v4690_v33  ;;  %v5050_v51 = vld [vmem:[#allocation9 + $0x268] sm:$0xff]  ;;  %v5052_v33 = vld [vmem:[#allocation9 + $0x278] sm:$0xff] }
 0x196   :  { %4902 = vmatprep.subr.mxu0 %v4685_v8  ;;  %4973 = vmatprep.subr.mxu1 %v4687_v18  ;;  %v1010_v8 = vadd.f32 %v15564_v45, %v982_v58  ;;  %v14312_v18 = vld [vmem:[%s17158_s0 + $0x61] sm:$0xff] }
 0x197   :  { %260 = vrot.lane.b32.xlu1 %v255_v32, %s14477_s9  ;;  %1048 = vrot.lane.b32.xlu0 %v1043_v43, %s14477_s9  ;;  %v1022_v20 = vmul.f32 %v14312_v18, %v15632_v30  ;;  %v14313_v45 = vld [vmem:[%s17158_s0 + $0x20] sm:$0xff]  ;;  %v264_v32 = vadd.f32 %v15587_v36, %v236_v39  ;;  %v14315_v36 = vld [vmem:[%s17158_s0 + $0x18] sm:$0xff] }
 0x198   :  { %4903 = vmatpush1.msra.mxu0 %v4684_v19  ;;  %4936 = vmatprep.mubr.f32.mxu0 %v17265_v48  ;;  %v5051_v19 = vld [vmem:[#allocation9 + $0x270] sm:$0xff]  ;;  %v326_v4 = vmul.f32 %v14313_v45, %v15247_v62  ;;  %v354_v43 = vmul.f32 %v14313_v45, %v15255_v2  ;;  %v305_v17 = vmul.f32 %v14315_v36, %v15720_v59  ;;  %v14318_v39 = vld [vmem:[%s17158_s0 + $0x80] sm:$0xff]  ;;  %v15759_v45 = vstv %s15724_s14  ;;  %v14322_v36 = vld [vmem:[%s17158_s0 + $0x78] sm:$0xff] }
 0x199   :  { %4974 = vmatpush1.msra.mxu1 %v4686_v34  ;;  %5007 = vmatprep.mubr.f32.mxu1 %v17265_v48  ;;  %v15705_v34 = vpop.permute.xlu1 %427  ;;  %v1024_v14 = vadd.f32 %v1022_v20, %v1010_v8  ;;  %v292_v61 = vadd.f32 %v15608_v40, %v264_v32  ;;  %v1184_v8 = vmul.f32 %v14318_v39, %v15247_v62  ;;  %v5410_v32 = vld [vmem:[#allocation9 + $0x2a0] sm:$0xff] }
 0x19a   :  { %14041 = vmatmul.mubr.msk.f32.vlgmr.msra.gmra.mxu0 %vm929_vm0, %v4868_v27  ;;  %14042 = vmatmul.mubr.msk.f32.vlgmr.msra.gmra.mxu1 %vm929_vm0, %v4868_v27  ;;  %v14316_v27 = vld [vmem:[%s17158_s0 + $0x62] sm:$0xff] }
 0x19b   :  { %288 = vrot.lane.b32.xlu1 %v283_v46, %s14478_s2  ;;  %1076 = vrot.lane.b32.xlu0 %v1071_v24, %s14478_s2  ;;  %v1052_v38 = vadd.f32 %v15589_v26, %v1024_v14  ;;  %v15738_v24 = vpop.permute.xlu0 %1257  ;;  %v1092_v58 = vmul.f32 %v14316_v27, %v15666_v56  ;;  %v14317_v26 = vld [vmem:[%s17158_s0 + $0x21] sm:$0xff]  ;;  %v307_v18 = vadd.f32 %v305_v17, %v292_v61 }
 0x19c   :  { %5085 = vmatprep.subr.mxu0 %v5050_v51  ;;  %5156 = vmatprep.subr.mxu1 %v5052_v33  ;;  %v424_v62 = vmul.f32 %v14317_v26, %v15279_v41  ;;  %v1163_v17 = vmul.f32 %v14322_v36, %v15720_v59 }
 0x19d   :  { %5086 = vmatpush1.msra.mxu0 %v5049_v22  ;;  %5157 = vmatpush1.msra.mxu1 %v5051_v19  ;;  %v15736_v46 = vpop.permute.xlu1 %469  ;;  %v1080_v40 = vadd.f32 %v15610_v31, %v1052_v38  ;;  %v396_v31 = vmul.f32 %v14317_v26, %v15267_v5 }
 0x19e   :  { %5087 = vmatprep.subr.mxu0 %v5046_v53  ;;  %5158 = vmatprep.subr.mxu1 %v5048_v55 }
 0x19f   :  { %331 = vrot.lane.b32.xlu1 %v326_v4, %s14477_s9  ;;  %1118 = vrot.lane.b32.xlu0 %v1113_v50, %s14477_s9  ;;  %v1094_v20 = vadd.f32 %v1092_v58, %v1080_v40  ;;  %v15763_v44 = vpop.permute.xlu0 %1285 }
 0x1a0   :  { %5088 = vmatpush1.msra.mxu0 %v5045_v60  ;;  %5121 = vmatprep.mubr.f32.mxu0 %v17265_v48 }
 0x1a1   :  { %5159 = vmatpush1.msra.mxu1 %v5047_v37  ;;  %5192 = vmatprep.mubr.f32.mxu1 %v17265_v48  ;;  %v15761_v4 = vpop.permute.xlu1 %497 }
 0x1a2   :  { %14043 = vmatmul.mubr.msk.f32.vlgmr.msra.gmra.mxu0 %vm929_vm0, %v5053_v52  ;;  %14044 = vmatmul.mubr.msk.f32.vlgmr.msra.gmra.mxu1 %vm929_vm0, %v5053_v52 }
 0x1a3   :  { %359 = vrot.lane.b32.xlu1 %v354_v43, %s14478_s2  ;;  %1146 = vrot.lane.b32.xlu0 %v1141_v1, %s14478_s2  ;;  %v5409_v1 = vld [vmem:[#allocation9 + $0x298] sm:$0xff]  ;;  %v15799_v52 = vpop.permute.xlu0 %1327 }
 0x1a4   :  { %5261 = vmatprep.subr.mxu0 %v5050_v51  ;;  %5332 = vmatprep.subr.mxu1 %v5052_v33  ;;  %v1212_v51 = vmul.f32 %v14318_v39, %v15255_v2  ;;  %v335_v33 = vadd.f32 %v15624_v49, %v307_v18  ;;  %v5411_v2 = vld [vmem:[#allocation9 + $0x2a8] sm:$0xff]  ;;  %v1122_v49 = vadd.f32 %v15626_v63, %v1094_v20  ;;  %v14323_v18 = vld [vmem:[%s17158_s0 + $0x38] sm:$0xff] }
 0x1a5   :  { %5262 = vmatpush1.msra.mxu0 %v5049_v22  ;;  %5333 = vmatpush1.msra.mxu1 %v5051_v19  ;;  %v14319_v19 = vld [vmem:[%s17158_s0 + $0x19] sm:$0xff]  ;;  %v14321_v63 = vld [vmem:[%s17158_s0 + $0x81] sm:$0xff]  ;;  %v15797_v38 = vpop.permute.xlu1 %540  ;;  %v537_v20 = vmul.f32 %v14323_v18, %v15334_v16 }
 0x1a6   :  { %5263 = vmatprep.subr.mxu0 %v5046_v53  ;;  %5334 = vmatprep.subr.mxu1 %v5048_v55  ;;  %v363_v22 = vadd.f32 %v15649_v10, %v335_v33  ;;  %v375_v50 = vmul.f32 %v14319_v19, %v15759_v45  ;;  %v5229_v53 = vld [vmem:[#allocation2 + $0x29] sm:$0x1]  ;;  %v5413_v55 = vld [vmem:[#allocation9 + $0x2b8] sm:$0xff]  ;;  %v5412_v10 = vld [vmem:[#allocation9 + $0x2b0] sm:$0xff]  ;;  %v1254_v14 = vmul.f32 %v14321_v63, %v15267_v5 }
 0x1a7   :  { %401 = vrot.lane.b32.xlu1 %v396_v31, %s14477_s9  ;;  %1189 = vrot.lane.b32.xlu0 %v1184_v8, %s14477_s9  ;;  %v1150_v61 = vadd.f32 %v15651_v6, %v1122_v49  ;;  %v5406_v5 = vld [vmem:[#allocation9 + $0x280] sm:$0xff]  ;;  %v5408_v6 = vld [vmem:[#allocation9 + $0x290] sm:$0xff]  ;;  %v1282_v58 = vmul.f32 %v14321_v63, %v15279_v41  ;;  %v15807_v31 = vstv %s15771_s3  ;;  %v5414_v8 = vld [vmem:[#allocation2 + $0xa] sm:$0x1] }
 0x1a8   :  { %5264 = vmatpush1.msra.mxu0 %v5045_v60  ;;  %5297 = vmatprep.mubr.f32.mxu0 %v17265_v48  ;;  %v14320_v60 = vld [vmem:[%s17158_s0 + $0x22] sm:$0xff]  ;;  %v377_v40 = vadd.f32 %v375_v50, %v363_v22  ;;  %v14325_v22 = vld [vmem:[%s17158_s0 + $0x1a] sm:$0xff]  ;;  %v5773_v63 = vld [vmem:[#allocation9 + $0x2f0] sm:$0xff] }
 0x1a9   :  { %5335 = vmatpush1.msra.mxu1 %v5047_v37  ;;  %5368 = vmatprep.mubr.f32.mxu1 %v17265_v48  ;;  %v466_v43 = vmul.f32 %v14320_v60, %v15291_v3  ;;  %v5407_v37 = vld [vmem:[#allocation9 + $0x288] sm:$0xff]  ;;  %v494_v27 = vmul.f32 %v14320_v60, %v15323_v0  ;;  %v1165_v26 = vadd.f32 %v1163_v17, %v1150_v61  ;;  %v5774_v60 = vld [vmem:[#allocation9 + $0x2f8] sm:$0xff] }
 0x1aa   :  { %14045 = vmatmul.mubr.msk.f32.vlgmr.msra.gmra.mxu0 %vm929_vm0, %v5229_v53  ;;  %14046 = vmatmul.mubr.msk.f32.vlgmr.msra.gmra.mxu1 %vm929_vm0, %v5229_v53  ;;  %v405_v39 = vadd.f32 %v15682_v21, %v377_v40  ;;  %v15819_v41 = vpop.permute.xlu1 %568  ;;  %v14324_v21 = vld [vmem:[%s17158_s0 + $0x82] sm:$0xff]  ;;  %v445_v19 = vmul.f32 %v14325_v22, %v15807_v31  ;;  %v14328_v61 = vld [vmem:[%s17158_s0 + $0x98] sm:$0xff] }
 0x1ab   :  { %429 = vrot.lane.b32.xlu1 %v424_v62, %s14478_s2  ;;  %1217 = vrot.lane.b32.xlu0 %v1212_v51, %s14478_s2  ;;  %v15821_v62 = vpop.permute.xlu0 %1355  ;;  %v1324_v51 = vmul.f32 %v14324_v21, %v15291_v3  ;;  %v1193_v50 = vadd.f32 %v15684_v23, %v1165_v26  ;;  %v14326_v3 = vld [vmem:[%s17158_s0 + $0x79] sm:$0xff]  ;;  %v565_v23 = vmul.f32 %v14323_v18, %v15363_v35  ;;  %v5768_v40 = vld [vmem:[#allocation9 + $0x2c8] sm:$0xff] }
 0x1ac   :  { %5446 = vmatprep.subr.mxu0 %v5411_v2  ;;  %5517 = vmatprep.subr.mxu1 %v5413_v55  ;;  %v433_v33 = vadd.f32 %v15705_v34, %v405_v39  ;;  %v1233_v34 = vmul.f32 %v14326_v3, %v15759_v45  ;;  %v1395_v36 = vmul.f32 %v14328_v61, %v15334_v16  ;;  %v14332_v22 = vld [vmem:[%s17158_s0 + $0x99] sm:$0xff] }
 0x1ad   :  { %5447 = vmatpush1.msra.mxu0 %v5410_v32  ;;  %5518 = vmatpush1.msra.mxu1 %v5412_v10  ;;  %v1221_v53 = vadd.f32 %v15707_v9, %v1193_v50  ;;  %v1423_v18 = vmul.f32 %v14328_v61, %v15363_v35  ;;  %v14331_v35 = vld [vmem:[%s17158_s0 + $0x3a] sm:$0xff] }
 0x1ae   :  { %5448 = vmatprep.subr.mxu0 %v5407_v37  ;;  %5519 = vmatprep.subr.mxu1 %v5409_v1 }
 0x1af   :  { %471 = vrot.lane.b32.xlu1 %v466_v43, %s14477_s9  ;;  %1259 = vrot.lane.b32.xlu0 %v1254_v14, %s14477_s9  ;;  %v1235_v43 = vadd.f32 %v1233_v34, %v1221_v53  ;;  %v15853_v14 = vstv %s15817_s1  ;;  %v15902_v53 = vstv %s15866_s20 }
 0x1b0   :  { %5449 = vmatpush1.msra.mxu0 %v5406_v5  ;;  %5482 = vmatprep.mubr.f32.mxu0 %v17265_v48 }
 0x1b1   :  { %5520 = vmatpush1.msra.mxu1 %v5408_v6  ;;  %5553 = vmatprep.mubr.f32.mxu1 %v17265_v48  ;;  %v15845_v9 = vpop.permute.xlu1 %610  ;;  %v15847_v49 = vpop.permute.xlu0 %1398  ;;  %v1263_v16 = vadd.f32 %v15738_v24, %v1235_v43  ;;  %v14330_v24 = vld [vmem:[%s17158_s0 + $0x7a] sm:$0xff]  ;;  %v1493_v43 = vmul.f32 %v14332_v22, %v15403_v57 }
 0x1b2   :  { %14047 = vmatmul.mubr.msk.f32.vlgmr.msra.gmra.mxu0 %vm929_vm0, %v5414_v8  ;;  %14048 = vmatmul.mubr.msk.f32.vlgmr.msra.gmra.mxu1 %vm929_vm0, %v5414_v8 }
 0x1b3   :  { %499 = vrot.lane.b32.xlu1 %v494_v27, %s14478_s2  ;;  %1287 = vrot.lane.b32.xlu0 %v1282_v58, %s14478_s2  ;;  %v5767_v27 = vld [vmem:[#allocation9 + $0x2c0] sm:$0xff]  ;;  %v14329_v58 = vld [vmem:[%s17158_s0 + $0x30] sm:$0xff] }
 0x1b4   :  { %5622 = vmatprep.subr.mxu0 %v5411_v2  ;;  %5693 = vmatprep.subr.mxu1 %v5413_v55  ;;  %v1352_v2 = vmul.f32 %v14324_v21, %v15323_v0  ;;  %v447_v55 = vadd.f32 %v445_v19, %v433_v33  ;;  %v5771_v0 = vld [vmem:[#allocation9 + $0x2e0] sm:$0xff]  ;;  %v516_v26 = vmul.f32 %v14329_v58, %v15853_v14  ;;  %v14335_v58 = vld [vmem:[%s17158_s0 + $0x50] sm:$0xff] }
 0x1b5   :  { %5623 = vmatpush1.msra.mxu0 %v5410_v32  ;;  %5694 = vmatpush1.msra.mxu1 %v5412_v10  ;;  %v5590_v32 = vld [vmem:[#allocation2 + $0x2a] sm:$0x1]  ;;  %v1303_v21 = vmul.f32 %v14330_v24, %v15807_v31  ;;  %v1465_v19 = vmul.f32 %v14332_v22, %v15376_v15  ;;  %v6496_v22 = vld [vmem:[#allocation9 + $0x378] sm:$0xff] }
 0x1b6   :  { %5624 = vmatprep.subr.mxu0 %v5407_v37  ;;  %5695 = vmatprep.subr.mxu1 %v5409_v1  ;;  %v5772_v10 = vld [vmem:[#allocation9 + $0x2e8] sm:$0xff]  ;;  %v14327_v37 = vld [vmem:[%s17158_s0 + $0x39] sm:$0xff]  ;;  %v475_v17 = vadd.f32 %v15736_v46, %v447_v55  ;;  %v5769_v46 = vld [vmem:[#allocation9 + $0x2d0] sm:$0xff] }
 0x1b7   :  { %542 = vrot.lane.b32.xlu1 %v537_v20, %s14477_s9  ;;  %1329 = vrot.lane.b32.xlu0 %v1324_v51, %s14477_s9  ;;  %v607_v1 = vmul.f32 %v14327_v37, %v15376_v15  ;;  %v1291_v20 = vadd.f32 %v15763_v44, %v1263_v16  ;;  %v5775_v51 = vld [vmem:[#allocation2 + $0xb] sm:$0x1]  ;;  %v677_v44 = vmul.f32 %v14331_v35, %v15420_v42  ;;  %v14336_v16 = vld [vmem:[%s17158_s0 + $0x9a] sm:$0xff] }
 0x1b8   :  { %5625 = vmatpush1.msra.mxu0 %v5406_v5  ;;  %5658 = vmatprep.mubr.f32.mxu0 %v17265_v48  ;;  %v5770_v5 = vld [vmem:[#allocation9 + $0x2d8] sm:$0xff]  ;;  %v15874_v39 = vpop.permute.xlu1 %638  ;;  %v15876_v8 = vpop.permute.xlu0 %1426 }
 0x1b9   :  { %5696 = vmatpush1.msra.mxu1 %v5408_v6  ;;  %5729 = vmatprep.mubr.f32.mxu1 %v17265_v48  ;;  %v503_v6 = vadd.f32 %v15761_v4, %v475_v17  ;;  %v635_v4 = vmul.f32 %v14327_v37, %v15403_v57  ;;  %v1305_v50 = vadd.f32 %v1303_v21, %v1291_v20  ;;  %v14334_v37 = vld [vmem:[%s17158_s0 + $0x90] sm:$0xff]  ;;  %v6131_v17 = vld [vmem:[#allocation9 + $0x318] sm:$0xff] }
 0x1ba   :  { %14049 = vmatmul.mubr.msk.f32.vlgmr.msra.gmra.mxu0 %vm929_vm0, %v5590_v32  ;;  %14050 = vmatmul.mubr.msk.f32.vlgmr.msra.gmra.mxu1 %vm929_vm0, %v5590_v32 }
 0x1bb   :  { %570 = vrot.lane.b32.xlu1 %v565_v23, %s14478_s2  ;;  %1357 = vrot.lane.b32.xlu0 %v1352_v2, %s14478_s2  ;;  %v518_v33 = vadd.f32 %v516_v26, %v503_v6  ;;  %v14333_v2 = vld [vmem:[%s17158_s0 + $0x31] sm:$0xff]  ;;  %v1333_v32 = vadd.f32 %v15799_v52, %v1305_v50  ;;  %v748_v26 = vmul.f32 %v14335_v58, %v15452_v7 }
 0x1bc   :  { %5807 = vmatprep.subr.mxu0 %v5772_v10  ;;  %5878 = vmatprep.subr.mxu1 %v5774_v60  ;;  %v586_v55 = vmul.f32 %v14333_v2, %v15902_v53  ;;  %v1563_v50 = vmul.f32 %v14336_v16, %v15441_v12 }
 0x1bd   :  { %5808 = vmatpush1.msra.mxu0 %v5771_v0  ;;  %5879 = vmatpush1.msra.mxu1 %v5773_v63  ;;  %v546_v23 = vadd.f32 %v15797_v38, %v518_v33  ;;  %v6133_v38 = vld [vmem:[#allocation9 + $0x328] sm:$0xff]  ;;  %v1361_v52 = vadd.f32 %v15821_v62, %v1333_v32  ;;  %v6128_v62 = vld [vmem:[#allocation9 + $0x300] sm:$0xff] }
 0x1be   :  { %5809 = vmatprep.subr.mxu0 %v5768_v40  ;;  %5880 = vmatprep.subr.mxu1 %v5770_v5  ;;  %v6312_v32 = vld [vmem:[#allocation2 + $0x2c] sm:$0x1] }
 0x1bf   :  { %612 = vrot.lane.b32.xlu1 %v607_v1, %s14477_s9  ;;  %1400 = vrot.lane.b32.xlu0 %v1395_v36, %s14477_s9  ;;  %v15904_v3 = vpop.permute.xlu1 %680  ;;  %v15906_v34 = vpop.permute.xlu0 %1468  ;;  %v574_v15 = vadd.f32 %v15819_v41, %v546_v23  ;;  %v5951_v41 = vld [vmem:[#allocation2 + $0x2b] sm:$0x1]  ;;  %v1374_v1 = vmul.f32 %v14334_v37, %v15853_v14 }
 0x1c0   :  { %5810 = vmatpush1.msra.mxu0 %v5767_v27  ;;  %5843 = vmatprep.mubr.f32.mxu0 %v17265_v48  ;;  %v6129_v36 = vld [vmem:[#allocation9 + $0x308] sm:$0xff] }
 0x1c1   :  { %5881 = vmatpush1.msra.mxu1 %v5769_v46  ;;  %5914 = vmatprep.mubr.f32.mxu1 %v17265_v48  ;;  %v1376_v6 = vadd.f32 %v1374_v1, %v1361_v52  ;;  %v6491_v1 = vld [vmem:[#allocation9 + $0x350] sm:$0xff] }
 0x1c2   :  { %14051 = vmatmul.mubr.msk.f32.vlgmr.msra.gmra.mxu0 %vm929_vm0, %v5775_v51  ;;  %14052 = vmatmul.mubr.msk.f32.vlgmr.msra.gmra.mxu1 %vm929_vm0, %v5775_v51 }
 0x1c3   :  { %640 = vrot.lane.b32.xlu1 %v635_v4, %s14478_s2  ;;  %1428 = vrot.lane.b32.xlu0 %v1423_v18, %s14478_s2  ;;  %v6136_v18 = vld [vmem:[#allocation2 + $0xc] sm:$0x1]  ;;  %v1404_v51 = vadd.f32 %v15847_v49, %v1376_v6 }
 0x1c4   :  { %5983 = vmatprep.subr.mxu0 %v5772_v10  ;;  %6054 = vmatprep.subr.mxu1 %v5774_v60  ;;  %v6135_v10 = vld [vmem:[#allocation9 + $0x338] sm:$0xff]  ;;  %v705_v60 = vmul.f32 %v14331_v35, %v15441_v12  ;;  %v6494_v49 = vld [vmem:[#allocation9 + $0x368] sm:$0xff] }
 0x1c5   :  { %5984 = vmatpush1.msra.mxu0 %v5771_v0  ;;  %6055 = vmatpush1.msra.mxu1 %v5773_v63  ;;  %v6132_v0 = vld [vmem:[#allocation9 + $0x320] sm:$0xff]  ;;  %v6134_v63 = vld [vmem:[#allocation9 + $0x330] sm:$0xff]  ;;  %v1432_v33 = vadd.f32 %v15876_v8, %v1404_v51  ;;  %v6490_v12 = vld [vmem:[#allocation9 + $0x348] sm:$0xff] }
 0x1c6   :  { %5985 = vmatprep.subr.mxu0 %v5768_v40  ;;  %6056 = vmatprep.subr.mxu1 %v5770_v5  ;;  %v15930_v61 = vpop.permute.xlu1 %708  ;;  %v15932_v57 = vpop.permute.xlu0 %1496  ;;  %v588_v40 = vadd.f32 %v586_v55, %v574_v15  ;;  %v6130_v5 = vld [vmem:[#allocation9 + $0x310] sm:$0xff]  ;;  %v14480_v15 = vmov 1966171168   ;;  %v1959_v55 = vlaneseq }
 0x1c7   :  { %682 = vrot.lane.b32.xlu1 %v677_v44, %s14477_s9  ;;  %1470 = vrot.lane.b32.xlu0 %v1465_v19, %s14477_s9  ;;  %v776_v19 = vmul.f32 %v14335_v58, %v15479_v47  ;;  %v1957_v2 = vunpack.c.l.s4 %v14480_v15  ;;  %v14341_v58 = vld [vmem:[%s17158_s0 + $0xb0] sm:$0xff]  ;;  %v6855_v15 = vld [vmem:[#allocation9 + $0x3a8] sm:$0xff] }
 0x1c8   :  { %5986 = vmatpush1.msra.mxu0 %v5767_v27  ;;  %6019 = vmatprep.mubr.f32.mxu0 %v17265_v48  ;;  %v15937_v27 = vstv %s15909_s28  ;;  %v616_v4 = vadd.f32 %v15845_v9, %v588_v40  ;;  %v15989_v37 = vshrl.u32 %v1959_v55, 7 }
 0x1c9   :  { %6057 = vmatpush1.msra.mxu1 %v5769_v46  ;;  %6090 = vmatprep.mubr.f32.mxu1 %v17265_v48  ;;  %v1535_v46 = vmul.f32 %v14336_v16, %v15420_v42  ;;  %v14337_v42 = vld [vmem:[%s17158_s0 + $0x32] sm:$0xff]  ;;  %v1958_v52 = vunpack.c.0.s8 %v1957_v2 }
 0x1ca   :  { %14053 = vmatmul.mubr.msk.f32.vlgmr.msra.gmra.mxu0 %vm929_vm0, %v5951_v41  ;;  %14054 = vmatmul.mubr.msk.f32.vlgmr.msra.gmra.mxu1 %vm929_vm0, %v5951_v41  ;;  %v644_v21 = vadd.f32 %v15874_v39, %v616_v4  ;;  %v656_v9 = vmul.f32 %v14337_v42, %v15937_v27  ;;  %v14338_v39 = vld [vmem:[%s17158_s0 + $0x91] sm:$0xff]  ;;  %17271 = vst [vmem:[#allocation18_spill] sm:$0xff] %v15989_v37 }
 0x1cb   :  { %6168 = vmatprep.subr.mxu0 %v6133_v38  ;;  %6239 = vmatprep.subr.mxu1 %v6135_v10  ;;  %v1444_v35 = vmul.f32 %v14338_v39, %v15902_v53  ;;  %v6492_v41 = vld [vmem:[#allocation9 + $0x358] sm:$0xff]  ;;  %v16017_v42 = vsub.s32 %v1958_v52, %v15989_v37 }
 0x1cc   :  { %710 = vrot.lane.b32.xlu1 %v705_v60, %s14478_s2  ;;  %1498 = vrot.lane.b32.xlu0 %v1493_v43, %s14478_s2  ;;  %v658_v44 = vadd.f32 %v656_v9, %v644_v21  ;;  %v15982_v43 = vstv %s15950_s13  ;;  %v6857_v2 = vld [vmem:[#allocation9 + $0x3b8] sm:$0xff] }
 0x1cd   :  { %6169 = vmatpush1.msra.mxu0 %v6132_v0  ;;  %6240 = vmatpush1.msra.mxu1 %v6134_v63  ;;  %v15952_v20 = vpop.permute.xlu1 %751  ;;  %v15954_v24 = vpop.permute.xlu0 %1538  ;;  %v1446_v60 = vadd.f32 %v1444_v35, %v1432_v33  ;;  %v16024_v35 = vstv %s15987_s18  ;;  %v6853_v52 = vld [vmem:[#allocation9 + $0x398] sm:$0xff]  ;;  %s14439_s18 = scalar_lea.vmem %s13810_s17, 32 }
 0x1ce   :  { %6170 = vmatprep.subr.mxu0 %v6129_v36  ;;  %6241 = vmatprep.subr.mxu1 %v6131_v17  ;;  %p14440_p6 = scmp.ne.s32.totalorder %s13810_s17, %s14439_s18  ;;  %p14445_p8 = scmp.lt.s32.totalorder %s14439_s18, %s14439_s18 }
 0x1cf   :  { %6171 = vmatpush1.msra.mxu0 %v6128_v62  ;;  %6204 = vmatprep.mubr.f32.mxu0 %v17265_v48  ;;  %v1474_v40 = vadd.f32 %v15906_v34, %v1446_v60  ;;  %v14343_v60 = vld [vmem:[%s17158_s0 + $0x49] sm:$0xff] }
 0x1d0   :  { %6242 = vmatpush1.msra.mxu1 %v6130_v5  ;;  %6275 = vmatprep.mubr.f32.mxu1 %v17265_v48  ;;  %p14446_p9 = por %p14445_p8, %p14444_p7 }
 0x1d1   :  { %14055 = vmatmul.mubr.msk.f32.vlgmr.msra.gmra.mxu0 %vm929_vm0, %v6136_v18  ;;  %14056 = vmatmul.mubr.msk.f32.vlgmr.msra.gmra.mxu1 %vm929_vm0, %v6136_v18  ;;  %v1502_v4 = vadd.f32 %v15932_v57, %v1474_v40  ;;  %v14342_v18 = vld [vmem:[%s17158_s0 + $0x92] sm:$0xff] }
 0x1d2   :  { %6344 = vmatprep.subr.mxu0 %v6133_v38  ;;  %6415 = vmatprep.subr.mxu1 %v6135_v10  ;;  %v6493_v38 = vld [vmem:[#allocation9 + $0x360] sm:$0xff]  ;;  %v6495_v10 = vld [vmem:[#allocation9 + $0x370] sm:$0xff]  ;;  %v1514_v21 = vmul.f32 %v14342_v18, %v15937_v27  ;;  %p14447_p10 = pnand %p14446_p9, %p14440_p6 }
 0x1d3   :  { %753 = vrot.lane.b32.xlu1 %v748_v26, %s14477_s9  ;;  %1540 = vrot.lane.b32.xlu0 %v1535_v46, %s14477_s9  ;;  %v1606_v26 = vmul.f32 %v14341_v58, %v15452_v7  ;;  %v6497_v46 = vld [vmem:[#allocation2 + $0xd] sm:$0x1] }
 0x1d4   :  { %6345 = vmatpush1.msra.mxu0 %v6132_v0  ;;  %6416 = vmatpush1.msra.mxu1 %v6134_v63  ;;  %v15974_v8 = vpop.permute.xlu1 %779  ;;  %v15976_v23 = vpop.permute.xlu0 %1566  ;;  %v686_v0 = vadd.f32 %v15904_v3, %v658_v44  ;;  %v6489_v63 = vld [vmem:[#allocation9 + $0x340] sm:$0xff]  ;;  %v1516_v39 = vadd.f32 %v1514_v21, %v1502_v4  ;;  %v6858_v4 = vld [vmem:[#allocation2 + $0xe] sm:$0x1] }
 0x1d5   :  { %6346 = vmatprep.subr.mxu0 %v6129_v36  ;;  %6417 = vmatprep.subr.mxu1 %v6131_v17  ;;  %v14339_v17 = vld [vmem:[%s17158_s0 + $0x48] sm:$0xff] }
 0x1d6   :  { %6347 = vmatpush1.msra.mxu0 %v6128_v62  ;;  %6380 = vmatprep.mubr.f32.mxu0 %v17265_v48  ;;  %v714_v36 = vadd.f32 %v15930_v61, %v686_v0  ;;  %v727_v3 = vmul.f32 %v14339_v17, %v15982_v43  ;;  %v14340_v61 = vld [vmem:[%s17158_s0 + $0x51] sm:$0xff]  ;;  %v1544_v0 = vadd.f32 %v15954_v24, %v1516_v39 }
 0x1d7   :  { %6418 = vmatpush1.msra.mxu1 %v6130_v5  ;;  %6451 = vmatprep.mubr.f32.mxu1 %v17265_v48  ;;  %v818_v6 = vmul.f32 %v14340_v61, %v15496_v54  ;;  %v846_v55 = vmul.f32 %v14340_v61, %v15515_v29  ;;  %v6852_v24 = vld [vmem:[#allocation9 + $0x390] sm:$0xff] }
 0x1d8   :  { %14057 = vmatmul.mubr.msk.f32.vlgmr.msra.gmra.mxu0 %vm929_vm0, %v6312_v32  ;;  %14058 = vmatmul.mubr.msk.f32.vlgmr.msra.gmra.mxu1 %vm929_vm0, %v6312_v32  ;;  %v729_v7 = vadd.f32 %v727_v3, %v714_v36  ;;  %v1634_v32 = vmul.f32 %v14341_v58, %v15479_v47  ;;  %v6854_v47 = vld [vmem:[#allocation9 + $0x3a0] sm:$0xff]  ;;  %v14344_v36 = vld [vmem:[%s17158_s0 + $0xa8] sm:$0xff] }
 0x1d9   :  { %6529 = vmatprep.subr.mxu0 %v6494_v49  ;;  %6600 = vmatprep.subr.mxu1 %v6496_v22  ;;  %v1585_v17 = vmul.f32 %v14344_v36, %v15982_v43 }
 0x1da   :  { %781 = vrot.lane.b32.xlu1 %v776_v19, %s14478_s2  ;;  %1568 = vrot.lane.b32.xlu0 %v1563_v50, %s14478_s2 }
 0x1db   :  { %6530 = vmatpush1.msra.mxu0 %v6493_v38  ;;  %6601 = vmatpush1.msra.mxu1 %v6495_v10  ;;  %v15997_v62 = vpop.permute.xlu1 %821  ;;  %v15999_v5 = vpop.permute.xlu0 %1609 }
 0x1dc   :  { %6531 = vmatprep.subr.mxu0 %v6490_v12  ;;  %6602 = vmatprep.subr.mxu1 %v6492_v41 }
 0x1dd   :  { %6532 = vmatpush1.msra.mxu0 %v6489_v63  ;;  %6565 = vmatprep.mubr.f32.mxu0 %v17265_v48  ;;  %v1874_v34 = vpop.f32.mrf.mxu0  ;;  %v1945_v16 = vpop.f32.mrf.mxu1 }
 0x1de   :  { %6603 = vmatpush1.msra.mxu1 %v6491_v1  ;;  %6636 = vmatprep.mubr.f32.mxu1 %v17265_v48 }
 0x1df   :  { %14059 = vmatmul.mubr.msk.f32.vlgmr.msra.gmra.mxu0 %vm929_vm0, %v6497_v46  ;;  %14060 = vmatmul.mubr.msk.f32.vlgmr.msra.gmra.mxu1 %vm929_vm0, %v6497_v46  ;;  %v1876_v9 = vpop.f32.mrf.mxu0  ;;  %v1947_v51 = vpop.f32.mrf.mxu1  ;;  %v16074_v46 = vstv %s16037_s26 }
 0x1e0   :  { %6705 = vmatprep.subr.mxu0 %v6494_v49  ;;  %6776 = vmatprep.subr.mxu1 %v6496_v22  ;;  %v1954_v57 = vcombine.low %v1874_v34, %v1876_v9  ;;  %v1955_v33 = vcombine.low %v1945_v16, %v1947_v51  ;;  %v757_v49 = vadd.f32 %v15952_v20, %v729_v7  ;;  %v6673_v20 = vld [vmem:[#allocation2 + $0x2d] sm:$0x1]  ;;  %v14346_v34 = vld [vmem:[%s17158_s0 + $0xb1] sm:$0xff] }
 0x1e1   :  { %823 = vrot.lane.b32.xlu1 %v818_v6, %s14477_s9  ;;  %1611 = vrot.lane.b32.xlu0 %v1606_v26, %s14477_s9  ;;  %v1676_v16 = vmul.f32 %v14346_v34, %v15496_v54  ;;  %v14347_v54 = vld [vmem:[%s17158_s0 + $0x4a] sm:$0xff] }
 0x1e2   :  { %6706 = vmatpush1.msra.mxu0 %v6493_v38  ;;  %6777 = vmatpush1.msra.mxu1 %v6495_v10  ;;  %v16027_v44 = vrot.slane %v1954_v57, %v16017_v42  ;;  %v16030_v19 = vrot.slane %v1955_v33, %v16017_v42  ;;  %v16033_v22 = vpop.permute.xlu1 %849  ;;  %v16035_v50 = vpop.permute.xlu0 %1637  ;;  %v785_v10 = vadd.f32 %v15974_v8, %v757_v49  ;;  %v6850_v8 = vld [vmem:[#allocation9 + $0x380] sm:$0xff] }
 0x1e3   :  { %6707 = vmatprep.subr.mxu0 %v6490_v12  ;;  %6778 = vmatprep.subr.mxu1 %v6492_v41  ;;  %v797_v12 = vmul.f32 %v14343_v60, %v16024_v35  ;;  %v6856_v41 = vld [vmem:[#allocation9 + $0x3b0] sm:$0xff]  ;;  %v867_v33 = vmul.f32 %v14347_v54, %v16074_v46 }
 0x1e4   :  { %6708 = vmatpush1.msra.mxu0 %v6489_v63  ;;  %6741 = vmatprep.mubr.f32.mxu0 %v17265_v48  ;;  %v1970_v38 = vcombine.low %v16027_v44, %v16030_v19  ;;  %v6851_v63 = vld [vmem:[#allocation9 + $0x388] sm:$0xff]  ;;  %v7211_v44 = vld [vmem:[#allocation9 + $0x3c0] sm:$0xff] }
 0x1e5   :  { %6779 = vmatpush1.msra.mxu1 %v6491_v1  ;;  %6812 = vmatprep.mubr.f32.mxu1 %v17265_v48  ;;  %v1572_v1 = vadd.f32 %v15976_v23, %v1544_v0  ;;  %v799_v3 = vadd.f32 %v797_v12, %v785_v10  ;;  %v14345_v23 = vld [vmem:[%s17158_s0 + $0x52] sm:$0xff]  ;;  %v1704_v10 = vmul.f32 %v14346_v34, %v15515_v29 }
 0x1e6   :  { %14061 = vmatmul.mubr.msk.f32.vlgmr.msra.gmra.mxu0 %vm929_vm0, %v6673_v20  ;;  %14062 = vmatmul.mubr.msk.f32.vlgmr.msra.gmra.mxu1 %vm929_vm0, %v6673_v20  ;;  %v888_v26 = vmul.f32 %v14345_v23, %v15560_v25  ;;  %v7214_v34 = vld [vmem:[#allocation9 + $0x3d8] sm:$0xff] }
 0x1e7   :  { %6890 = vmatprep.subr.mxu0 %v6855_v15  ;;  %6961 = vmatprep.subr.mxu1 %v6857_v2  ;;  %v1587_v18 = vadd.f32 %v1585_v17, %v1572_v1  ;;  %v827_v9 = vadd.f32 %v15997_v62, %v799_v3 }
 0x1e8   :  { %851 = vrot.lane.b32.xlu1 %v846_v55, %s14478_s2  ;;  %1639 = vrot.lane.b32.xlu0 %v1634_v32, %s14478_s2  ;;  %v916_v55 = vmul.f32 %v14345_v23, %v15582_v28 }
 0x1e9   :  { %6891 = vmatpush1.msra.mxu0 %v6854_v47  ;;  %6962 = vmatpush1.msra.mxu1 %v6856_v41  ;;  %v16060_v40 = vpop.permute.xlu1 %1679  ;;  %v16062_v61 = vpop.permute.xlu0 %120  ;;  %v855_v39 = vadd.f32 %v16033_v22, %v827_v9  ;;  %v1615_v22 = vadd.f32 %v15999_v5, %v1587_v18  ;;  %v7034_v5 = vld [vmem:[#allocation2 + $0x2e] sm:$0x1] }
 0x1ea   :  { %6892 = vmatprep.subr.mxu0 %v6851_v63  ;;  %6963 = vmatprep.subr.mxu1 %v6853_v52  ;;  %v2050_v6 = vpop.f32.mrf.mxu0  ;;  %v2121_v58 = vpop.f32.mrf.mxu1 }
 0x1eb   :  { %6893 = vmatpush1.msra.mxu0 %v6850_v8  ;;  %6926 = vmatprep.mubr.f32.mxu0 %v17265_v48  ;;  %v1643_v36 = vadd.f32 %v16035_v50, %v1615_v22  ;;  %v869_v3 = vadd.f32 %v867_v33, %v855_v39 }
 0x1ec   :  { %6964 = vmatpush1.msra.mxu1 %v6852_v24  ;;  %6997 = vmatprep.mubr.f32.mxu1 %v17265_v48  ;;  %v2052_v21 = vpop.f32.mrf.mxu0  ;;  %v2123_v7 = vpop.f32.mrf.mxu1 }
 0x1ed   :  { %14063 = vmatmul.mubr.msk.f32.vlgmr.msra.gmra.mxu0 %vm929_vm0, %v6858_v4  ;;  %14064 = vmatmul.mubr.msk.f32.vlgmr.msra.gmra.mxu1 %vm929_vm0, %v6858_v4  ;;  %v2130_v51 = vcombine.low %v2050_v6, %v2052_v21  ;;  %v2131_v57 = vcombine.low %v2121_v58, %v2123_v7  ;;  %v7215_v6 = vld [vmem:[#allocation9 + $0x3e0] sm:$0xff]  ;;  %v7217_v58 = vld [vmem:[#allocation9 + $0x3f0] sm:$0xff] }
 0x1ee   :  { %7066 = vmatprep.subr.mxu0 %v6855_v15  ;;  %7137 = vmatprep.subr.mxu1 %v6857_v2  ;;  %v7213_v21 = vld [vmem:[#allocation9 + $0x3d0] sm:$0xff] }
 0x1ef   :  { %893 = vrot.lane.b32.xlu1 %v888_v26, %s14477_s9  ;;  %1681 = vrot.lane.b32.xlu0 %v1676_v16, %s14477_s9  ;;  %v16088_v49 = vrot.slane %v2130_v51, %v16017_v42  ;;  %v16091_v62 = vrot.slane %v2131_v57, %v16017_v42  ;;  %v2235_v15 = vpop.f32.mrf.mxu0  ;;  %v2306_v2 = vpop.f32.mrf.mxu1  ;;  %v7212_v26 = vld [vmem:[#allocation9 + $0x3c8] sm:$0xff]  ;;  %v16125_v16 = vld [vmem:[%s17162_s4] sm:$0xf] }
 0x1f0   :  { %7067 = vmatpush1.msra.mxu0 %v6854_v47  ;;  %7138 = vmatpush1.msra.mxu1 %v6856_v41  ;;  %v892_v32 = vpop.permute.xlu1 %891  ;;  %v16094_v20 = vpop.permute.xlu0 %148  ;;  %v16101_v47 = vld [vmem:[#allocation9 + $0x3e8] sm:$0xff]  ;;  %v7218_v41 = vld [vmem:[#allocation9 + $0x3f8] sm:$0xff] }
 0x1f1   :  { %7068 = vmatprep.subr.mxu0 %v6851_v63  ;;  %7139 = vmatprep.subr.mxu1 %v6853_v52  ;;  %v2146_v60 = vcombine.low %v16088_v49, %v16091_v62  ;;  %v2237_v12 = vpop.f32.mrf.mxu0  ;;  %v2308_v0 = vpop.f32.mrf.mxu1  ;;  %v14348_v63 = vld [vmem:[%s17158_s0 + $0xa9] sm:$0xff]  ;;  %v897_v19 = vadd.f32 %v892_v32, %v869_v3 }
 0x1f2   :  { %7069 = vmatpush1.msra.mxu0 %v6850_v8  ;;  %7102 = vmatprep.mubr.f32.mxu0 %v17265_v48  ;;  %v1655_v52 = vmul.f32 %v14348_v63, %v16024_v35  ;;  %v2315_v29 = vcombine.low %v2235_v15, %v2237_v12  ;;  %v2316_v1 = vcombine.low %v2306_v2, %v2308_v0  ;;  %v14349_v8 = vld [vmem:[%s17158_s0 + $0x8] sm:$0xff] }
 0x1f3   :  { %7140 = vmatpush1.msra.mxu1 %v6852_v24  ;;  %7173 = vmatprep.mubr.f32.mxu1 %v17265_v48  ;;  %v95_v17 = vmul.f32 %v14349_v8, %v15585_v13  ;;  %v1977_v24 = vrot.slane %v1970_v38, %v16017_v42  ;;  %v7219_v12 = vld [vmem:[#allocation2 + $0xf] sm:$0x1] }
 0x1f4   :  { %14065 = vmatmul.mubr.msk.f32.vlgmr.msra.gmra.mxu0 %vm929_vm0, %v7034_v5  ;;  %14066 = vmatmul.mubr.msk.f32.vlgmr.msra.gmra.mxu1 %vm929_vm0, %v7034_v5  ;;  %v2323_v50 = vrot.slane %v2315_v29, %v16017_v42  ;;  %v2330_v23 = vrot.slane %v2316_v1, %v16017_v42  ;;  %v1657_v7 = vadd.f32 %v1655_v52, %v1643_v36  ;;  %v14351_v36 = vld [vmem:[%s17158_s0 + $0x68] sm:$0xff] }
 0x1f5   :  { %7251 = vmatprep.subr.mxu0 %v16101_v47  ;;  %7322 = vmatprep.subr.mxu1 %v7218_v41  ;;  %v97_v9 = vadd.f32 %v95_v17, %v15606_v11  ;;  %v1979_v33 = vadd.f32 %v1977_v24, %v16125_v16  ;;  %v953_v49 = vmul.f32 %v14351_v36, %v15585_v13  ;;  %v14352_v62 = vld [vmem:[%s17158_s0 + $0x9] sm:$0xff] }
 0x1f6   :  { %921 = vrot.lane.b32.xlu1 %v916_v55, %s14478_s2  ;;  %1709 = vrot.lane.b32.xlu0 %v1704_v10, %s14478_s2  ;;  %v2331_v38 = vcombine.low %v2323_v50, %v2330_v23  ;;  %v2411_v4 = vpop.f32.mrf.mxu0  ;;  %v2482_v18 = vpop.f32.mrf.mxu1  ;;  %v14350_v55 = vld [vmem:[%s17158_s0 + $0xb2] sm:$0xff]  ;;  %v14353_v13 = vld [vmem:[%s17158_s0 + $0xaa] sm:$0xff] }
 0x1f7   :  { %7252 = vmatpush1.msra.mxu0 %v7215_v6  ;;  %7323 = vmatpush1.msra.mxu1 %v7217_v58  ;;  %v920_v51 = vpop.permute.xlu1 %919  ;;  %v1708_v57 = vpop.permute.xlu0 %1707  ;;  %v1746_v32 = vmul.f32 %v14350_v55, %v15560_v25  ;;  %v1774_v0 = vmul.f32 %v14350_v55, %v15582_v28  ;;  %v2153_v25 = vrot.slane %v2146_v60, %v16017_v42  ;;  %v7579_v23 = vld [vmem:[#allocation9 + $0x438] sm:$0xff] }
 0x1f8   :  { %7253 = vmatprep.subr.mxu0 %v7212_v26  ;;  %7324 = vmatprep.subr.mxu1 %v7214_v34  ;;  %v925_v54 = vadd.f32 %v920_v51, %v897_v19  ;;  %v2338_v39 = vrot.slane %v2331_v38, %v16017_v42  ;;  %v2413_v15 = vpop.f32.mrf.mxu0  ;;  %v2484_v2 = vpop.f32.mrf.mxu1  ;;  %v1685_v28 = vadd.f32 %v16060_v40, %v1657_v7  ;;  %v7395_v38 = vld [vmem:[#allocation2 + $0x2f] sm:$0x1]  ;;  %v7578_v7 = vld [vmem:[#allocation9 + $0x430] sm:$0xff] }
 0x1f9   :  { %7254 = vmatpush1.msra.mxu0 %v7211_v44  ;;  %7287 = vmatprep.mubr.f32.mxu0 %v17265_v48  ;;  %v2491_v10 = vcombine.low %v2411_v4, %v2413_v15  ;;  %v2492_v22 = vcombine.low %v2482_v18, %v2484_v2  ;;  %v125_v5 = vadd.f32 %v16062_v61, %v97_v9  ;;  %v7576_v18 = vld [vmem:[#allocation9 + $0x420] sm:$0xff] }
 0x1fa   :  { %7325 = vmatpush1.msra.mxu1 %v7213_v21  ;;  %7358 = vmatprep.mubr.f32.mxu1 %v17265_v48  ;;  %v932_v63 = vmax.f32 %v925_v54, 0.0  ;;  %v16139_v52 = vadd.f32 %v2338_v39, %v1979_v33  ;;  %v165_v60 = vmul.f32 %v14352_v62, %v15632_v30  ;;  %v1713_v8 = vadd.f32 %v1708_v57, %v1685_v28  ;;  %v7573_v57 = vld [vmem:[#allocation9 + $0x408] sm:$0xff]  ;;  %v7575_v54 = vld [vmem:[#allocation9 + $0x418] sm:$0xff] }
 0x1fb   :  { %14067 = vmatmul.mubr.msk.f32.vlgmr.msra.gmra.mxu0 %vm929_vm0, %v7219_v12  ;;  %14068 = vmatmul.mubr.msk.f32.vlgmr.msra.gmra.mxu1 %vm929_vm0, %v7219_v12  ;;  %v2499_v29 = vrot.slane %v2491_v10, %v16017_v42  ;;  %v2506_v1 = vrot.slane %v2492_v22, %v16017_v42  ;;  %v1725_v17 = vmul.f32 %v14353_v13, %v16074_v46  ;;  %v14354_v33 = vld [vmem:[%s17158_s0 + $0xa] sm:$0xff] }
 0x1fc   :  { %7427 = vmatprep.subr.mxu0 %v16101_v47  ;;  %7498 = vmatprep.subr.mxu1 %v7218_v41  ;;  %935 = vst.msk [vmem:[#allocation2 + $0x10] sm:$0xff] %vm929_vm0, %v932_v63  ;;  %v153_v41 = vadd.f32 %v16094_v20, %v125_v5  ;;  %v2155_v24 = vadd.f32 %v2153_v25, %v16125_v16  ;;  %v7574_v22 = vld [vmem:[#allocation9 + $0x410] sm:$0xff] }
 0x1fd   :  { %1751 = vrot.lane.b32.xlu0 %v1746_v32, %s14477_s9  ;;  %7428 = vmatpush1.msra.mxu0 %v7215_v6  ;;  %v191_v40 = vpop.permute.xlu1 %190  ;;  %v979_v47 = vpop.permute.xlu0 %978  ;;  %v2507_v61 = vcombine.low %v2499_v29, %v2506_v1  ;;  %v955_v20 = vadd.f32 %v953_v49, %v15606_v11  ;;  %v1727_v51 = vadd.f32 %v1725_v17, %v1713_v8  ;;  %v14355_v1 = vld [vmem:[%s17158_s0 + $0x69] sm:$0xff] }
 0x1fe   :  { %7499 = vmatpush1.msra.mxu1 %v7217_v58  ;;  %7429 = vmatprep.subr.mxu0 %v7212_v26  ;;  %v2596_v3 = vpop.f32.mrf.mxu0  ;;  %v2667_v6 = vpop.f32.mrf.mxu1  ;;  %v7577_v58 = vld [vmem:[#allocation9 + $0x428] sm:$0xff]  ;;  %v167_v11 = vadd.f32 %v165_v60, %v153_v41  ;;  %v235_v39 = vmul.f32 %v14354_v33, %v15666_v56  ;;  %v1023_v28 = vmul.f32 %v14355_v1, %v15632_v30 }
 0x1ff   :  { %7500 = vmatprep.subr.mxu1 %v7214_v34  ;;  %1779 = vrot.lane.b32.xlu1 %v1774_v0, %s14478_s2  ;;  %v2514_v50 = vrot.slane %v2507_v61, %v16017_v42  ;;  %v983_v32 = vadd.f32 %v979_v47, %v955_v20  ;;  %v16198_v20 = vld [vmem:[#allocation9 + $0x468] sm:$0xff] }
 0x200   :  { %7430 = vmatpush1.msra.mxu0 %v7211_v44  ;;  %7463 = vmatprep.mubr.f32.mxu0 %v17265_v48  ;;  %v2598_v26 = vpop.f32.mrf.mxu0  ;;  %v2669_v19 = vpop.f32.mrf.mxu1  ;;  %v195_v55 = vadd.f32 %v191_v40, %v167_v11 }
 0x201   :  { %7501 = vmatpush1.msra.mxu1 %v7213_v21  ;;  %7534 = vmatprep.mubr.f32.mxu1 %v17265_v48  ;;  %v1750_v34 = vpop.permute.xlu1 %1749  ;;  %v1007_v4 = vpop.permute.xlu0 %1006  ;;  %v16173_v16 = vadd.f32 %v2514_v50, %v2155_v24  ;;  %v2676_v9 = vcombine.low %v2596_v3, %v2598_v26  ;;  %v2677_v44 = vcombine.low %v2667_v6, %v2669_v19  ;;  %v7572_v21 = vld [vmem:[#allocation9 + $0x400] sm:$0xff]  ;;  %v16200_v26 = vld [vmem:[#allocation9 + $0x478] sm:$0xff] }
 0x202   :  { %14069 = vmatmul.mubr.msk.f32.vlgmr.msra.gmra.mxu0 %vm929_vm0, %v7395_v38  ;;  %14070 = vmatmul.mubr.msk.f32.vlgmr.msra.gmra.mxu1 %vm929_vm0, %v7395_v38  ;;  %v1755_v10 = vadd.f32 %v1750_v34, %v1727_v51  ;;  %v1011_v36 = vadd.f32 %v1007_v4, %v983_v32  ;;  %v14357_v51 = vld [vmem:[%s17158_s0 + $0x6a] sm:$0xff] }
 0x203   :  { %7612 = vmatprep.subr.mxu0 %v7577_v58  ;;  %7683 = vmatprep.subr.mxu1 %v7579_v23  ;;  %v2684_v15 = vrot.slane %v2676_v9, %v16017_v42  ;;  %v2691_v2 = vrot.slane %v2677_v44, %v16017_v42  ;;  %v7580_v29 = vld [vmem:[#allocation2 + $0x10] sm:$0x1] }
 0x204   :  { %7613 = vmatpush1.msra.mxu0 %v7576_v18  ;;  %7684 = vmatpush1.msra.mxu1 %v7578_v7  ;;  %v2772_v12 = vpop.f32.mrf.mxu0  ;;  %v2843_v0 = vpop.f32.mrf.mxu1  ;;  %v1025_v50 = vadd.f32 %v1023_v28, %v1011_v36 }
 0x205   :  { %7614 = vmatprep.subr.mxu0 %v7573_v57  ;;  %7685 = vmatprep.subr.mxu1 %v7575_v54  ;;  %v1778_v63 = vpop.permute.xlu1 %1777  ;;  %v219_v25 = vpop.permute.xlu0 %218  ;;  %v2692_v5 = vcombine.low %v2684_v15, %v2691_v2  ;;  %v7937_v2 = vld [vmem:[#allocation9 + $0x460] sm:$0xff] }
 0x206   :  { %v1783_v49 = vadd.f32 %v1778_v63, %v1755_v10  ;;  %v223_v62 = vadd.f32 %v219_v25, %v195_v55  ;;  %7615 = vmatpush1.msra.mxu0 %v7572_v21  ;;  %7648 = vmatprep.mubr.f32.mxu0 %v17265_v48  ;;  %v2774_v60 = vpop.f32.mrf.mxu0  ;;  %v2845_v40 = vpop.f32.mrf.mxu1  ;;  %v7939_v55 = vld [vmem:[#allocation9 + $0x470] sm:$0xff] }
 0x207   :  { %7686 = vmatpush1.msra.mxu1 %v7574_v22  ;;  %7719 = vmatprep.mubr.f32.mxu1 %v17265_v48  ;;  %v2699_v47 = vrot.slane %v2692_v5, %v16017_v42  ;;  %v2852_v61 = vcombine.low %v2772_v12, %v2774_v60  ;;  %v2853_v41 = vcombine.low %v2843_v0, %v2845_v40  ;;  %v7934_v12 = vld [vmem:[#allocation9 + $0x448] sm:$0xff]  ;;  %v7936_v0 = vld [vmem:[#allocation9 + $0x458] sm:$0xff]  ;;  %v7935_v5 = vld [vmem:[#allocation9 + $0x450] sm:$0xff] }
 0x208   :  { %v1790_v8 = vmax.f32 %v1783_v49, 0.0  ;;  %14071 = vmatmul.mubr.msk.f32.vlgmr.msra.gmra.mxu0 %vm929_vm0, %v7580_v29  ;;  %14072 = vmatmul.mubr.msk.f32.vlgmr.msra.gmra.mxu1 %vm929_vm0, %v7580_v29  ;;  %v237_v30 = vadd.f32 %v235_v39, %v223_v62 }
 0x209   :  { %v261_v13 = vpop.permute.xlu1 %260  ;;  %v1049_v17 = vpop.permute.xlu0 %1048  ;;  %7788 = vmatprep.subr.mxu0 %v7577_v58  ;;  %7859 = vmatprep.subr.mxu1 %v7579_v23  ;;  %v16193_v3 = vadd.f32 %v2699_v47, %v16139_v52  ;;  %v2860_v6 = vrot.slane %v2852_v61, %v16017_v42  ;;  %v2867_v24 = vrot.slane %v2853_v41, %v16017_v42 }
 0x20a   :  { %1793 = vst.msk [vmem:[#allocation2 + $0x30] sm:$0xff] %vm929_vm0, %v1790_v8  ;;  %7789 = vmatpush1.msra.mxu0 %v7576_v18  ;;  %7860 = vmatpush1.msra.mxu1 %v7578_v7  ;;  %v265_v52 = vadd.f32 %v261_v13, %v237_v30  ;;  %v1053_v38 = vadd.f32 %v1049_v17, %v1025_v50  ;;  %v14356_v18 = vld [vmem:[%s17158_s0 + $0x20] sm:$0xff]  ;;  %v7941_v13 = vld [vmem:[#allocation2 + $0x11] sm:$0x1] }
 0x20b   :  { %7790 = vmatprep.subr.mxu0 %v7573_v57  ;;  %7861 = vmatprep.subr.mxu1 %v7575_v54  ;;  %v2868_v58 = vcombine.low %v2860_v6, %v2867_v24  ;;  %v2957_v23 = vpop.f32.mrf.mxu0  ;;  %v3028_v19 = vpop.f32.mrf.mxu1  ;;  %v306_v7 = vmul.f32 %v14356_v18, %v15720_v59  ;;  %v1093_v57 = vmul.f32 %v14357_v51, %v15666_v56  ;;  %v14358_v17 = vld [vmem:[%s17158_s0 + $0x21] sm:$0xff] }
 0x20c   :  { %7791 = vmatpush1.msra.mxu0 %v7572_v21  ;;  %7824 = vmatprep.mubr.f32.mxu0 %v17265_v48  ;;  %v376_v6 = vmul.f32 %v14358_v17, %v15759_v45  ;;  %v8298_v51 = vld [vmem:[#allocation9 + $0x4a0] sm:$0xff] }
 0x20d   :  { %v289_v34 = vpop.permute.xlu1 %288  ;;  %v1077_v4 = vpop.permute.xlu0 %1076  ;;  %7862 = vmatpush1.msra.mxu1 %v7574_v22  ;;  %7895 = vmatprep.mubr.f32.mxu1 %v17265_v48  ;;  %v2875_v9 = vrot.slane %v2868_v58, %v16017_v42 }
 0x20e   :  { %v293_v44 = vadd.f32 %v289_v34, %v265_v52  ;;  %v1081_v11 = vadd.f32 %v1077_v4, %v1053_v38  ;;  %7973 = vmatprep.subr.mxu0 %v16198_v20  ;;  %8044 = vmatprep.subr.mxu1 %v16200_v26  ;;  %v2959_v54 = vpop.f32.mrf.mxu0  ;;  %v3030_v21 = vpop.f32.mrf.mxu1  ;;  %v14359_v52 = vld [vmem:[%s17158_s0 + $0x80] sm:$0xff] }
 0x20f   :  { %v16216_v33 = vadd.f32 %v2875_v9, %v16173_v16  ;;  %v3037_v39 = vcombine.low %v2957_v23, %v2959_v54  ;;  %v3038_v15 = vcombine.low %v3028_v19, %v3030_v21  ;;  %v7933_v16 = vld [vmem:[#allocation9 + $0x440] sm:$0xff]  ;;  %v1164_v38 = vmul.f32 %v14359_v52, %v15720_v59 }
 0x210   :  { %v308_v25 = vadd.f32 %v306_v7, %v293_v44  ;;  %v1095_v29 = vadd.f32 %v1093_v57, %v1081_v11  ;;  %v8300_v57 = vld [vmem:[#allocation9 + $0x4b0] sm:$0xff] }
 0x211   :  { %v332_v32 = vpop.permute.xlu1 %331  ;;  %v1119_v10 = vpop.permute.xlu0 %1118  ;;  %v7756_v22 = vld [vmem:[#allocation2 + $0x30] sm:$0x1]  ;;  %v3045_v56 = vrot.slane %v3037_v39, %v16017_v42  ;;  %v3052_v63 = vrot.slane %v3038_v15, %v16017_v42  ;;  %v8117_v59 = vld [vmem:[#allocation2 + $0x31] sm:$0x1]  ;;  %v8295_v39 = vld [vmem:[#allocation9 + $0x488] sm:$0xff] }
 0x212   :  { %14073 = vmatmul.mubr.msk.f32.vlgmr.msra.gmra.mxu0 %vm929_vm0, %v7756_v22  ;;  %14074 = vmatmul.mubr.msk.f32.vlgmr.msra.gmra.mxu1 %vm929_vm0, %v7756_v22  ;;  %v3133_v1 = vpop.f32.mrf.mxu0  ;;  %v3204_v28 = vpop.f32.mrf.mxu1  ;;  %v336_v8 = vadd.f32 %v332_v32, %v308_v25  ;;  %v1123_v30 = vadd.f32 %v1119_v10, %v1095_v29  ;;  %v8297_v15 = vld [vmem:[#allocation9 + $0x498] sm:$0xff] }
 0x213   :  { %7974 = vmatpush1.msra.mxu0 %v7937_v2  ;;  %8045 = vmatpush1.msra.mxu1 %v7939_v55  ;;  %v3053_v36 = vcombine.low %v3045_v56, %v3052_v63 }
 0x214   :  { %7975 = vmatprep.subr.mxu0 %v7934_v12  ;;  %8046 = vmatprep.subr.mxu1 %v7936_v0  ;;  %v3135_v49 = vpop.f32.mrf.mxu0  ;;  %v3206_v62 = vpop.f32.mrf.mxu1 }
 0x215   :  { %v360_v60 = vpop.permute.xlu1 %359  ;;  %v1147_v40 = vpop.permute.xlu0 %1146  ;;  %7976 = vmatpush1.msra.mxu0 %v7933_v16  ;;  %8009 = vmatprep.mubr.f32.mxu0 %v17265_v48  ;;  %v3060_v47 = vrot.slane %v3053_v36, %v16017_v42  ;;  %v3213_v61 = vcombine.low %v3133_v1, %v3135_v49  ;;  %v3214_v41 = vcombine.low %v3204_v28, %v3206_v62 }
 0x216   :  { %8047 = vmatpush1.msra.mxu1 %v7935_v5  ;;  %8080 = vmatprep.mubr.f32.mxu1 %v17265_v48  ;;  %v364_v23 = vadd.f32 %v360_v60, %v336_v8  ;;  %v1151_v19 = vadd.f32 %v1147_v40, %v1123_v30  ;;  %v8302_v40 = vld [vmem:[#allocation2 + $0x12] sm:$0x1] }
 0x217   :  { %14075 = vmatmul.mubr.msk.f32.vlgmr.msra.gmra.mxu0 %vm929_vm0, %v7941_v13  ;;  %14076 = vmatmul.mubr.msk.f32.vlgmr.msra.gmra.mxu1 %vm929_vm0, %v7941_v13  ;;  %v16232_v24 = vadd.f32 %v3060_v47, %v16193_v3  ;;  %v3221_v50 = vrot.slane %v3213_v61, %v16017_v42  ;;  %v3228_v58 = vrot.slane %v3214_v41, %v16017_v42  ;;  %v14361_v47 = vld [vmem:[%s17158_s0 + $0x81] sm:$0xff] }
 0x218   :  { %8149 = vmatprep.subr.mxu0 %v16198_v20  ;;  %8220 = vmatprep.subr.mxu1 %v16200_v26  ;;  %v8299_v20 = vld [vmem:[#allocation9 + $0x4a8] sm:$0xff]  ;;  %v8301_v26 = vld [vmem:[#allocation9 + $0x4b8] sm:$0xff]  ;;  %v378_v44 = vadd.f32 %v376_v6, %v364_v23  ;;  %v1166_v11 = vadd.f32 %v1164_v38, %v1151_v19  ;;  %v1234_v61 = vmul.f32 %v14361_v47, %v15759_v45 }
 0x219   :  { %8150 = vmatpush1.msra.mxu0 %v7937_v2  ;;  %8221 = vmatpush1.msra.mxu1 %v7939_v55  ;;  %v402_v3 = vpop.permute.xlu1 %401  ;;  %v1190_v34 = vpop.permute.xlu0 %1189  ;;  %v3229_v4 = vcombine.low %v3221_v50, %v3228_v58  ;;  %v8660_v38 = vld [vmem:[#allocation9 + $0x4e8] sm:$0xff] }
 0x21a   :  { %8151 = vmatprep.subr.mxu0 %v7934_v12  ;;  %8222 = vmatprep.subr.mxu1 %v7936_v0  ;;  %v3318_v18 = vpop.f32.mrf.mxu0  ;;  %v3389_v7 = vpop.f32.mrf.mxu1  ;;  %v8294_v12 = vld [vmem:[#allocation9 + $0x480] sm:$0xff]  ;;  %v8296_v0 = vld [vmem:[#allocation9 + $0x490] sm:$0xff]  ;;  %v406_v25 = vadd.f32 %v402_v3, %v378_v44  ;;  %v1194_v29 = vadd.f32 %v1190_v34, %v1166_v11  ;;  %v8662_v3 = vld [vmem:[#allocation9 + $0x4f8] sm:$0xff] }
 0x21b   :  { %8152 = vmatpush1.msra.mxu0 %v7933_v16  ;;  %8185 = vmatprep.mubr.f32.mxu0 %v17265_v48  ;;  %v3236_v9 = vrot.slane %v3229_v4, %v16017_v42 }
 0x21c   :  { %8223 = vmatpush1.msra.mxu1 %v7935_v5  ;;  %8256 = vmatprep.mubr.f32.mxu1 %v17265_v48  ;;  %v3320_v54 = vpop.f32.mrf.mxu0  ;;  %v3391_v21 = vpop.f32.mrf.mxu1 }
 0x21d   :  { %14077 = vmatmul.mubr.msk.f32.vlgmr.msra.gmra.mxu0 %vm929_vm0, %v8117_v59  ;;  %14078 = vmatmul.mubr.msk.f32.vlgmr.msra.gmra.mxu1 %vm929_vm0, %v8117_v59  ;;  %v430_v2 = vpop.permute.xlu1 %429  ;;  %v1218_v55 = vpop.permute.xlu0 %1217  ;;  %v16248_v32 = vadd.f32 %v3236_v9, %v16216_v33  ;;  %v3398_v10 = vcombine.low %v3318_v18, %v3320_v54  ;;  %v3399_v22 = vcombine.low %v3389_v7, %v3391_v21  ;;  %v14360_v33 = vld [vmem:[%s17158_s0 + $0x22] sm:$0xff]  ;;  %v8658_v9 = vld [vmem:[#allocation9 + $0x4d8] sm:$0xff] }
 0x21e   :  { %8334 = vmatprep.subr.mxu0 %v8299_v20  ;;  %8405 = vmatprep.subr.mxu1 %v8301_v26  ;;  %v446_v28 = vmul.f32 %v14360_v33, %v15807_v31  ;;  %v434_v62 = vadd.f32 %v430_v2, %v406_v25  ;;  %v1222_v60 = vadd.f32 %v1218_v55, %v1194_v29  ;;  %v8659_v7 = vld [vmem:[#allocation9 + $0x4e0] sm:$0xff]  ;;  %v14362_v21 = vld [vmem:[%s17158_s0 + $0x38] sm:$0xff]  ;;  %v8657_v55 = vld [vmem:[#allocation9 + $0x4d0] sm:$0xff] }
 0x21f   :  { %8335 = vmatpush1.msra.mxu0 %v8298_v51  ;;  %8406 = vmatpush1.msra.mxu1 %v8300_v57  ;;  %v3406_v56 = vrot.slane %v3398_v10, %v16017_v42  ;;  %v3413_v63 = vrot.slane %v3399_v22, %v16017_v42  ;;  %v8655_v54 = vld [vmem:[#allocation9 + $0x4c0] sm:$0xff]  ;;  %v8663_v33 = vld [vmem:[#allocation2 + $0x13] sm:$0x1] }
 0x220   :  { %8336 = vmatprep.subr.mxu0 %v8295_v39  ;;  %8407 = vmatprep.subr.mxu1 %v8297_v15  ;;  %v3494_v16 = vpop.f32.mrf.mxu0  ;;  %v3565_v1 = vpop.f32.mrf.mxu1  ;;  %v448_v19 = vadd.f32 %v446_v28, %v434_v62  ;;  %v1236_v52 = vadd.f32 %v1234_v61, %v1222_v60 }
 0x221   :  { %8337 = vmatpush1.msra.mxu0 %v8294_v12  ;;  %8370 = vmatprep.mubr.f32.mxu0 %v17265_v48  ;;  %v472_v5 = vpop.permute.xlu1 %471  ;;  %v1260_v36 = vpop.permute.xlu0 %1259  ;;  %v3414_v49 = vcombine.low %v3406_v56, %v3413_v63  ;;  %v14363_v63 = vld [vmem:[%s17158_s0 + $0x82] sm:$0xff] }
 0x222   :  { %8408 = vmatpush1.msra.mxu1 %v8296_v0  ;;  %8441 = vmatprep.mubr.f32.mxu1 %v17265_v48  ;;  %v3496_v41 = vpop.f32.mrf.mxu0  ;;  %v3567_v8 = vpop.f32.mrf.mxu1  ;;  %v1304_v25 = vmul.f32 %v14363_v63, %v15807_v31 }
 0x223   :  { %14079 = vmatmul.mubr.msk.f32.vlgmr.msra.gmra.mxu0 %vm929_vm0, %v8302_v40  ;;  %14080 = vmatmul.mubr.msk.f32.vlgmr.msra.gmra.mxu1 %vm929_vm0, %v8302_v40  ;;  %v3421_v30 = vrot.slane %v3414_v49, %v16017_v42  ;;  %v3574_v13 = vcombine.low %v3494_v16, %v3496_v41  ;;  %v3575_v17 = vcombine.low %v3565_v1, %v3567_v8 }
 0x224   :  { %8510 = vmatprep.subr.mxu0 %v8299_v20  ;;  %8581 = vmatprep.subr.mxu1 %v8301_v26  ;;  %v8661_v20 = vld [vmem:[#allocation9 + $0x4f0] sm:$0xff]  ;;  %v8656_v26 = vld [vmem:[#allocation9 + $0x4c8] sm:$0xff] }
 0x225   :  { %8511 = vmatpush1.msra.mxu0 %v8298_v51  ;;  %8582 = vmatpush1.msra.mxu1 %v8300_v57  ;;  %v500_v6 = vpop.permute.xlu1 %499  ;;  %v1288_v50 = vpop.permute.xlu0 %1287  ;;  %v16266_v58 = vadd.f32 %v3421_v30, %v16232_v24  ;;  %v3582_v45 = vrot.slane %v3574_v13, %v16017_v42  ;;  %v3589_v23 = vrot.slane %v3575_v17, %v16017_v42  ;;  %v8478_v24 = vld [vmem:[#allocation2 + $0x32] sm:$0x1]  ;;  %v9021_v30 = vld [vmem:[#allocation9 + $0x528] sm:$0xff]  ;;  %v9023_v13 = vld [vmem:[#allocation9 + $0x538] sm:$0xff] }
 0x226   :  { %8512 = vmatprep.subr.mxu0 %v8295_v39  ;;  %8583 = vmatprep.subr.mxu1 %v8297_v15  ;;  %v476_v51 = vadd.f32 %v472_v5, %v448_v19  ;;  %v1264_v57 = vadd.f32 %v1260_v36, %v1236_v52  ;;  %v517_v39 = vmul.f32 %v14362_v21, %v15853_v14  ;;  %v9020_v19 = vld [vmem:[#allocation9 + $0x520] sm:$0xff]  ;;  %v9022_v52 = vld [vmem:[#allocation9 + $0x530] sm:$0xff] }
 0x227   :  { %8513 = vmatpush1.msra.mxu0 %v8294_v12  ;;  %8546 = vmatprep.mubr.f32.mxu0 %v17265_v48  ;;  %v3590_v34 = vcombine.low %v3582_v45, %v3589_v23  ;;  %v3679_v4 = vpop.f32.mrf.mxu0  ;;  %v3750_v18 = vpop.f32.mrf.mxu1  ;;  %v8839_v23 = vld [vmem:[#allocation2 + $0x33] sm:$0x1] }
 0x228   :  { %8584 = vmatpush1.msra.mxu1 %v8296_v0  ;;  %8617 = vmatprep.mubr.f32.mxu1 %v17265_v48  ;;  %v504_v0 = vadd.f32 %v500_v6, %v476_v51  ;;  %v1292_v56 = vadd.f32 %v1288_v50, %v1264_v57  ;;  %v14365_v51 = vld [vmem:[%s17158_s0 + $0x98] sm:$0xff] }
 0x229   :  { %14081 = vmatmul.mubr.msk.f32.vlgmr.msra.gmra.mxu0 %vm929_vm0, %v8478_v24  ;;  %14082 = vmatmul.mubr.msk.f32.vlgmr.msra.gmra.mxu1 %vm929_vm0, %v8478_v24  ;;  %v543_v44 = vpop.permute.xlu1 %542  ;;  %v16274_v11 = vpop.permute.xlu0 %1329  ;;  %v3597_v59 = vrot.slane %v3590_v34, %v16017_v42  ;;  %v1375_v57 = vmul.f32 %v14365_v51, %v15853_v14  ;;  %v9024_v14 = vld [vmem:[#allocation2 + $0x14] sm:$0x1] }
 0x22a   :  { %8695 = vmatprep.subr.mxu0 %v8660_v38  ;;  %8766 = vmatprep.subr.mxu1 %v8662_v3  ;;  %v3681_v15 = vpop.f32.mrf.mxu0  ;;  %v3752_v2 = vpop.f32.mrf.mxu1  ;;  %v519_v36 = vadd.f32 %v517_v39, %v504_v0  ;;  %v1306_v49 = vadd.f32 %v1304_v25, %v1292_v56 }
 0x22b   :  { %8696 = vmatpush1.msra.mxu0 %v8659_v7  ;;  %8767 = vmatpush1.msra.mxu1 %v8661_v20  ;;  %v16282_v10 = vadd.f32 %v3597_v59, %v16248_v32  ;;  %v3759_v22 = vcombine.low %v3679_v4, %v3681_v15  ;;  %v3760_v12 = vcombine.low %v3750_v18, %v3752_v2  ;;  %v9018_v59 = vld [vmem:[#allocation9 + $0x510] sm:$0xff] }
 0x22c   :  { %8697 = vmatprep.subr.mxu0 %v8656_v26  ;;  %8768 = vmatprep.subr.mxu1 %v8658_v9  ;;  %v547_v45 = vadd.f32 %v543_v44, %v519_v36  ;;  %v14366_v36 = vld [vmem:[%s17158_s0 + $0x3a] sm:$0xff] }
 0x22d   :  { %8698 = vmatpush1.msra.mxu0 %v8655_v54  ;;  %8731 = vmatprep.mubr.f32.mxu0 %v17265_v48  ;;  %v571_v29 = vpop.permute.xlu1 %570  ;;  %v1358_v16 = vpop.permute.xlu0 %1357  ;;  %v3767_v32 = vrot.slane %v3759_v22, %v16017_v42  ;;  %v3774_v1 = vrot.slane %v3760_v12, %v16017_v42 }
 0x22e   :  { %8769 = vmatpush1.msra.mxu1 %v8657_v55  ;;  %8802 = vmatprep.mubr.f32.mxu1 %v17265_v48  ;;  %v3855_v28 = vpop.f32.mrf.mxu0  ;;  %v3926_v5 = vpop.f32.mrf.mxu1  ;;  %v575_v24 = vadd.f32 %v571_v29, %v547_v45 }
 0x22f   :  { %14083 = vmatmul.mubr.msk.f32.vlgmr.msra.gmra.mxu0 %vm929_vm0, %v8663_v33  ;;  %14084 = vmatmul.mubr.msk.f32.vlgmr.msra.gmra.mxu1 %vm929_vm0, %v8663_v33  ;;  %v3775_v31 = vcombine.low %v3767_v32, %v3774_v1 }
 0x230   :  { %8871 = vmatprep.subr.mxu0 %v8660_v38  ;;  %8942 = vmatprep.subr.mxu1 %v8662_v3  ;;  %v3857_v62 = vpop.f32.mrf.mxu0  ;;  %v3928_v60 = vpop.f32.mrf.mxu1  ;;  %v1334_v38 = vadd.f32 %v16274_v11, %v1306_v49  ;;  %v9017_v3 = vld [vmem:[#allocation9 + $0x508] sm:$0xff]  ;;  %v657_v49 = vmul.f32 %v14366_v36, %v15937_v27 }
 0x231   :  { %8872 = vmatpush1.msra.mxu0 %v8659_v7  ;;  %8943 = vmatpush1.msra.mxu1 %v8661_v20  ;;  %v16294_v40 = vpop.permute.xlu1 %612  ;;  %v16296_v47 = vpop.permute.xlu0 %1400  ;;  %v3782_v61 = vrot.slane %v3775_v31, %v16017_v42  ;;  %v3935_v41 = vcombine.low %v3855_v28, %v3857_v62  ;;  %v3936_v8 = vcombine.low %v3926_v5, %v3928_v60  ;;  %v9016_v7 = vld [vmem:[#allocation9 + $0x500] sm:$0xff]  ;;  %v9382_v5 = vld [vmem:[#allocation9 + $0x568] sm:$0xff]  ;;  %v9384_v31 = vld [vmem:[#allocation9 + $0x578] sm:$0xff] }
 0x232   :  { %8873 = vmatprep.subr.mxu0 %v8656_v26  ;;  %8944 = vmatprep.subr.mxu1 %v8658_v9  ;;  %v14364_v20 = vld [vmem:[%s17158_s0 + $0x39] sm:$0xff]  ;;  %v1362_v11 = vadd.f32 %v1358_v16, %v1334_v38 }
 0x233   :  { %8874 = vmatpush1.msra.mxu0 %v8655_v54  ;;  %8907 = vmatprep.mubr.f32.mxu0 %v17265_v48  ;;  %v16301_v17 = vadd.f32 %v3782_v61, %v16266_v58  ;;  %v3943_v6 = vrot.slane %v3935_v41, %v16017_v42  ;;  %v3950_v50 = vrot.slane %v3936_v8, %v16017_v42  ;;  %v9019_v58 = vld [vmem:[#allocation9 + $0x518] sm:$0xff]  ;;  %v9200_v61 = vld [vmem:[#allocation2 + $0x34] sm:$0x1]  ;;  %v9377_v38 = vld [vmem:[#allocation9 + $0x540] sm:$0xff] }
 0x234   :  { %8945 = vmatpush1.msra.mxu1 %v8657_v55  ;;  %8978 = vmatprep.mubr.f32.mxu1 %v17265_v48  ;;  %v587_v26 = vmul.f32 %v14364_v20, %v15902_v53  ;;  %v1377_v56 = vadd.f32 %v1375_v57, %v1362_v11  ;;  %v9383_v41 = vld [vmem:[#allocation9 + $0x570] sm:$0xff] }
 0x235   :  { %14085 = vmatmul.mubr.msk.f32.vlgmr.msra.gmra.mxu0 %vm929_vm0, %v8839_v23  ;;  %14086 = vmatmul.mubr.msk.f32.vlgmr.msra.gmra.mxu1 %vm929_vm0, %v8839_v23  ;;  %v16309_v34 = vpop.permute.xlu1 %640  ;;  %v16311_v4 = vpop.permute.xlu0 %1428  ;;  %v3951_v18 = vcombine.low %v3943_v6, %v3950_v50  ;;  %v9378_v6 = vld [vmem:[#allocation9 + $0x548] sm:$0xff]  ;;  %v9380_v50 = vld [vmem:[#allocation9 + $0x558] sm:$0xff] }
 0x236   :  { %9056 = vmatprep.subr.mxu0 %v9021_v30  ;;  %9127 = vmatprep.subr.mxu1 %v9023_v13  ;;  %v4040_v9 = vpop.f32.mrf.mxu0  ;;  %v4111_v44 = vpop.f32.mrf.mxu1  ;;  %v589_v0 = vadd.f32 %v587_v26, %v575_v24  ;;  %v1405_v28 = vadd.f32 %v16296_v47, %v1377_v56  ;;  %v9381_v47 = vld [vmem:[#allocation9 + $0x560] sm:$0xff]  ;;  %v9385_v26 = vld [vmem:[#allocation2 + $0x15] sm:$0x1]  ;;  %v9745_v56 = vld [vmem:[#allocation9 + $0x5b8] sm:$0xff] }
 0x237   :  { %9057 = vmatpush1.msra.mxu0 %v9020_v19  ;;  %9128 = vmatpush1.msra.mxu1 %v9022_v52  ;;  %v3958_v54 = vrot.slane %v3951_v18, %v16017_v42  ;;  %v14367_v23 = vld [vmem:[%s17158_s0 + $0x99] sm:$0xff] }
 0x238   :  { %9058 = vmatprep.subr.mxu0 %v9017_v3  ;;  %9129 = vmatprep.subr.mxu1 %v9019_v58  ;;  %v4042_v21 = vpop.f32.mrf.mxu0  ;;  %v4113_v39 = vpop.f32.mrf.mxu1  ;;  %v617_v32 = vadd.f32 %v16294_v40, %v589_v0  ;;  %v1433_v45 = vadd.f32 %v16311_v4, %v1405_v28 }
 0x239   :  { %9059 = vmatpush1.msra.mxu0 %v9016_v7  ;;  %9092 = vmatprep.mubr.f32.mxu0 %v17265_v48  ;;  %v16323_v15 = vpop.permute.xlu1 %682  ;;  %v16325_v2 = vpop.permute.xlu0 %1470  ;;  %v16328_v55 = vadd.f32 %v3958_v54, %v16282_v10  ;;  %v4120_v22 = vcombine.low %v4040_v9, %v4042_v21  ;;  %v4121_v12 = vcombine.low %v4111_v44, %v4113_v39 }
 0x23a   :  { %9130 = vmatpush1.msra.mxu1 %v9018_v59  ;;  %9163 = vmatprep.mubr.f32.mxu1 %v17265_v48  ;;  %v645_v8 = vadd.f32 %v16309_v34, %v617_v32  ;;  %v9379_v34 = vld [vmem:[#allocation9 + $0x550] sm:$0xff]  ;;  %v9742_v32 = vld [vmem:[#allocation9 + $0x5a0] sm:$0xff] }
 0x23b   :  { %14087 = vmatmul.mubr.msk.f32.vlgmr.msra.gmra.mxu0 %vm929_vm0, %v9024_v14  ;;  %14088 = vmatmul.mubr.msk.f32.vlgmr.msra.gmra.mxu1 %vm929_vm0, %v9024_v14  ;;  %v4128_v63 = vrot.slane %v4120_v22, %v16017_v42  ;;  %v4135_v25 = vrot.slane %v4121_v12, %v16017_v42  ;;  %v14368_v14 = vld [vmem:[%s17158_s0 + $0x50] sm:$0xff] }
 0x23c   :  { %9232 = vmatprep.subr.mxu0 %v9021_v30  ;;  %9303 = vmatprep.subr.mxu1 %v9023_v13  ;;  %v4216_v10 = vpop.f32.mrf.mxu0  ;;  %v4287_v29 = vpop.f32.mrf.mxu1  ;;  %v659_v24 = vadd.f32 %v657_v49, %v645_v8 }
 0x23d   :  { %9233 = vmatpush1.msra.mxu0 %v9020_v19  ;;  %9304 = vmatpush1.msra.mxu1 %v9022_v52  ;;  %v4136_v16 = vcombine.low %v4128_v63, %v4135_v25  ;;  %v1445_v19 = vmul.f32 %v14367_v23, %v15902_v53  ;;  %v14369_v25 = vld [vmem:[%s17158_s0 + $0x9a] sm:$0xff] }
 0x23e   :  { %9234 = vmatprep.subr.mxu0 %v9017_v3  ;;  %9305 = vmatprep.subr.mxu1 %v9019_v58  ;;  %v16336_v1 = vpop.permute.xlu1 %710  ;;  %v16338_v33 = vpop.permute.xlu0 %1498  ;;  %v687_v57 = vadd.f32 %v16323_v15, %v659_v24  ;;  %v728_v15 = vmul.f32 %v14368_v14, %v15982_v43 }
 0x23f   :  { %9235 = vmatpush1.msra.mxu0 %v9016_v7  ;;  %9268 = vmatprep.mubr.f32.mxu0 %v17265_v48  ;;  %v4143_v62 = vrot.slane %v4136_v16, %v16017_v42  ;;  %v4218_v60 = vpop.f32.mrf.mxu0  ;;  %v4289_v40 = vpop.f32.mrf.mxu1  ;;  %v1447_v53 = vadd.f32 %v1445_v19, %v1433_v45  ;;  %v9561_v16 = vld [vmem:[#allocation2 + $0x35] sm:$0x1] }
 0x240   :  { %9306 = vmatpush1.msra.mxu1 %v9018_v59  ;;  %9339 = vmatprep.mubr.f32.mxu1 %v17265_v48  ;;  %v4296_v30 = vcombine.low %v4216_v10, %v4218_v60  ;;  %v4297_v13 = vcombine.low %v4287_v29, %v4289_v40  ;;  %v715_v12 = vadd.f32 %v16336_v1, %v687_v57  ;;  %v9744_v1 = vld [vmem:[#allocation9 + $0x5b0] sm:$0xff] }
 0x241   :  { %14089 = vmatmul.mubr.msk.f32.vlgmr.msra.gmra.mxu0 %vm929_vm0, %v9200_v61  ;;  %14090 = vmatmul.mubr.msk.f32.vlgmr.msra.gmra.mxu1 %vm929_vm0, %v9200_v61  ;;  %v16357_v52 = vadd.f32 %v4143_v62, %v16301_v17  ;;  %v1475_v21 = vadd.f32 %v16325_v2, %v1447_v53  ;;  %v9743_v2 = vld [vmem:[#allocation9 + $0x5a8] sm:$0xff]  ;;  %v1515_v10 = vmul.f32 %v14369_v25, %v15937_v27  ;;  %v9738_v27 = vld [vmem:[#allocation9 + $0x580] sm:$0xff]  ;;  %v9922_v57 = vld [vmem:[#allocation2 + $0x36] sm:$0x1] }
 0x242   :  { %9417 = vmatprep.subr.mxu0 %v9382_v5  ;;  %9488 = vmatprep.subr.mxu1 %v9384_v31  ;;  %v4304_v3 = vrot.slane %v4296_v30, %v16017_v42  ;;  %v4311_v58 = vrot.slane %v4297_v13, %v16017_v42  ;;  %v730_v60 = vadd.f32 %v728_v15, %v715_v12  ;;  %v10102_v12 = vld [vmem:[#allocation9 + $0x5d8] sm:$0xff] }
 0x243   :  { %9418 = vmatpush1.msra.mxu0 %v9381_v47  ;;  %9489 = vmatpush1.msra.mxu1 %v9383_v41  ;;  %v4401_v4 = vpop.f32.mrf.mxu0  ;;  %v4472_v18 = vpop.f32.mrf.mxu1  ;;  %v1503_v63 = vadd.f32 %v16338_v33, %v1475_v21  ;;  %v9739_v33 = vld [vmem:[#allocation9 + $0x588] sm:$0xff]  ;;  %v10103_v21 = vld [vmem:[#allocation9 + $0x5e0] sm:$0xff] }
 0x244   :  { %9419 = vmatprep.subr.mxu0 %v9378_v6  ;;  %9490 = vmatprep.subr.mxu1 %v9380_v50  ;;  %v4312_v7 = vcombine.low %v4304_v3, %v4311_v58 }
 0x245   :  { %9420 = vmatpush1.msra.mxu0 %v9377_v38  ;;  %9453 = vmatprep.mubr.f32.mxu0 %v17265_v48  ;;  %v16362_v17 = vpop.permute.xlu1 %753  ;;  %v16364_v20 = vpop.permute.xlu0 %1540 }
 0x246   :  { %9491 = vmatpush1.msra.mxu1 %v9379_v34  ;;  %9524 = vmatprep.mubr.f32.mxu1 %v17265_v48  ;;  %v4319_v9 = vrot.slane %v4312_v7, %v16017_v42  ;;  %v4403_v44 = vpop.f32.mrf.mxu0  ;;  %v4474_v11 = vpop.f32.mrf.mxu1 }
 0x247   :  { %14091 = vmatmul.mubr.msk.f32.vlgmr.msra.gmra.mxu0 %vm929_vm0, %v9385_v26  ;;  %14092 = vmatmul.mubr.msk.f32.vlgmr.msra.gmra.mxu1 %vm929_vm0, %v9385_v26  ;;  %v4481_v59 = vcombine.low %v4401_v4, %v4403_v44  ;;  %v4482_v51 = vcombine.low %v4472_v18, %v4474_v11  ;;  %v14371_v18 = vld [vmem:[%s17158_s0 + $0xb0] sm:$0xff]  ;;  %v10104_v11 = vld [vmem:[#allocation9 + $0x5e8] sm:$0xff] }
 0x248   :  { %9593 = vmatprep.subr.mxu0 %v9382_v5  ;;  %9664 = vmatprep.subr.mxu1 %v9384_v31  ;;  %v16372_v54 = vadd.f32 %v4319_v9, %v16328_v55  ;;  %v9741_v31 = vld [vmem:[#allocation9 + $0x598] sm:$0xff]  ;;  %v1586_v24 = vmul.f32 %v14371_v18, %v15982_v43 }
 0x249   :  { %9594 = vmatpush1.msra.mxu0 %v9381_v47  ;;  %9665 = vmatpush1.msra.mxu1 %v9383_v41  ;;  %v4489_v39 = vrot.slane %v4481_v59, %v16017_v42  ;;  %v4496_v22 = vrot.slane %v4482_v51, %v16017_v42  ;;  %v9740_v47 = vld [vmem:[#allocation9 + $0x590] sm:$0xff]  ;;  %v1517_v41 = vadd.f32 %v1515_v10, %v1503_v63  ;;  %v10106_v59 = vld [vmem:[#allocation9 + $0x5f8] sm:$0xff] }
 0x24a   :  { %9595 = vmatprep.subr.mxu0 %v9378_v6  ;;  %9666 = vmatprep.subr.mxu1 %v9380_v50  ;;  %v4577_v55 = vpop.f32.mrf.mxu0  ;;  %v4648_v0 = vpop.f32.mrf.mxu1  ;;  %v9746_v6 = vld [vmem:[#allocation2 + $0x16] sm:$0x1]  ;;  %v758_v50 = vadd.f32 %v16362_v17, %v730_v60  ;;  %v10463_v18 = vld [vmem:[#allocation9 + $0x618] sm:$0xff] }
 0x24b   :  { %9596 = vmatpush1.msra.mxu0 %v9377_v38  ;;  %9629 = vmatprep.mubr.f32.mxu0 %v17265_v48  ;;  %v4497_v29 = vcombine.low %v4489_v39, %v4496_v22  ;;  %v14370_v38 = vld [vmem:[%s17158_s0 + $0x51] sm:$0xff] }
 0x24c   :  { %9667 = vmatpush1.msra.mxu1 %v9379_v34  ;;  %9700 = vmatprep.mubr.f32.mxu1 %v17265_v48  ;;  %v782_v28 = vpop.permute.xlu1 %781  ;;  %v1569_v5 = vpop.permute.xlu0 %1568  ;;  %v798_v3 = vmul.f32 %v14370_v38, %v16024_v35  ;;  %v10105_v39 = vld [vmem:[#allocation9 + $0x5f0] sm:$0xff] }
 0x24d   :  { %14093 = vmatmul.mubr.msk.f32.vlgmr.msra.gmra.mxu0 %vm929_vm0, %v9561_v16  ;;  %14094 = vmatmul.mubr.msk.f32.vlgmr.msra.gmra.mxu1 %vm929_vm0, %v9561_v16  ;;  %v4504_v36 = vrot.slane %v4497_v29, %v16017_v42  ;;  %v4579_v49 = vpop.f32.mrf.mxu0  ;;  %v4650_v62 = vpop.f32.mrf.mxu1  ;;  %v786_v4 = vadd.f32 %v782_v28, %v758_v50  ;;  %v14373_v60 = vld [vmem:[%s17158_s0 + $0xb1] sm:$0xff] }
 0x24e   :  { %9778 = vmatprep.subr.mxu0 %v9743_v2  ;;  %9849 = vmatprep.subr.mxu1 %v9745_v56  ;;  %v4657_v40 = vcombine.low %v4577_v55, %v4579_v49  ;;  %v4658_v61 = vcombine.low %v4648_v0, %v4650_v62  ;;  %v10099_v55 = vld [vmem:[#allocation9 + $0x5c0] sm:$0xff]  ;;  %v16443_v38 = vld [vmem:[#allocation9 + $0x630] sm:$0xff] }
 0x24f   :  { %9779 = vmatpush1.msra.mxu0 %v9742_v32  ;;  %9850 = vmatpush1.msra.mxu1 %v9744_v1  ;;  %v16393_v8 = vadd.f32 %v4504_v36, %v16357_v52  ;;  %v1545_v52 = vadd.f32 %v16364_v20, %v1517_v41  ;;  %v800_v22 = vadd.f32 %v798_v3, %v786_v4  ;;  %v10461_v4 = vld [vmem:[#allocation9 + $0x608] sm:$0xff] }
 0x250   :  { %9780 = vmatprep.subr.mxu0 %v9739_v33  ;;  %9851 = vmatprep.subr.mxu1 %v9741_v31  ;;  %v4665_v30 = vrot.slane %v4657_v40, %v16017_v42  ;;  %v4672_v13 = vrot.slane %v4658_v61, %v16017_v42  ;;  %v1656_v40 = vmul.f32 %v14373_v60, %v16024_v35 }
 0x251   :  { %9781 = vmatpush1.msra.mxu0 %v9738_v27  ;;  %9814 = vmatprep.mubr.f32.mxu0 %v17265_v48  ;;  %v1573_v20 = vadd.f32 %v1569_v5, %v1545_v52  ;;  %v16441_v52 = vld [vmem:[#allocation9 + $0x620] sm:$0xff] }
 0x252   :  { %9852 = vmatpush1.msra.mxu1 %v9740_v47  ;;  %9885 = vmatprep.mubr.f32.mxu1 %v17265_v48  ;;  %v4673_v45 = vcombine.low %v4665_v30, %v4672_v13  ;;  %v4762_v23 = vpop.f32.mrf.mxu0  ;;  %v4833_v19 = vpop.f32.mrf.mxu1 }
 0x253   :  { %14095 = vmatmul.mubr.msk.f32.vlgmr.msra.gmra.mxu0 %vm929_vm0, %v9746_v6  ;;  %14096 = vmatmul.mubr.msk.f32.vlgmr.msra.gmra.mxu1 %vm929_vm0, %v9746_v6  ;;  %v824_v58 = vpop.permute.xlu1 %823  ;;  %v1612_v34 = vpop.permute.xlu0 %1611  ;;  %v1588_v14 = vadd.f32 %v1586_v24, %v1573_v20 }
 0x254   :  { %9954 = vmatprep.subr.mxu0 %v9743_v2  ;;  %10025 = vmatprep.subr.mxu1 %v9745_v56  ;;  %v4680_v7 = vrot.slane %v4673_v45, %v16017_v42  ;;  %v4764_v53 = vpop.f32.mrf.mxu0  ;;  %v4835_v17 = vpop.f32.mrf.mxu1  ;;  %v10101_v56 = vld [vmem:[#allocation9 + $0x5d0] sm:$0xff]  ;;  %v828_v29 = vadd.f32 %v824_v58, %v800_v22  ;;  %v10465_v45 = vld [vmem:[#allocation9 + $0x628] sm:$0xff] }
 0x255   :  { %9955 = vmatpush1.msra.mxu0 %v9742_v32  ;;  %10026 = vmatpush1.msra.mxu1 %v9744_v1  ;;  %v4842_v26 = vcombine.low %v4762_v23, %v4764_v53  ;;  %v4843_v9 = vcombine.low %v4833_v19, %v4835_v17  ;;  %v1616_v16 = vadd.f32 %v1612_v34, %v1588_v14  ;;  %v14372_v32 = vld [vmem:[%s17158_s0 + $0x52] sm:$0xff]  ;;  %v10460_v17 = vld [vmem:[#allocation9 + $0x600] sm:$0xff] }
 0x256   :  { %9956 = vmatprep.subr.mxu0 %v9739_v33  ;;  %10027 = vmatprep.subr.mxu1 %v9741_v31  ;;  %v16413_v44 = vadd.f32 %v4680_v7, %v16372_v54  ;;  %v10100_v54 = vld [vmem:[#allocation9 + $0x5c8] sm:$0xff]  ;;  %v868_v1 = vmul.f32 %v14372_v32, %v16074_v46  ;;  %v10107_v31 = vld [vmem:[#allocation2 + $0x17] sm:$0x1]  ;;  %v10467_v23 = vld [vmem:[#allocation9 + $0x638] sm:$0xff] }
 0x257   :  { %9957 = vmatpush1.msra.mxu0 %v9738_v27  ;;  %9990 = vmatprep.mubr.f32.mxu0 %v17265_v48  ;;  %v4850_v43 = vrot.slane %v4842_v26, %v16017_v42  ;;  %v4857_v51 = vrot.slane %v4843_v9, %v16017_v42  ;;  %v10283_v19 = vld [vmem:[#allocation2 + $0x37] sm:$0x1] }
 0x258   :  { %10028 = vmatpush1.msra.mxu1 %v9740_v47  ;;  %10061 = vmatprep.mubr.f32.mxu1 %v17265_v48  ;;  %v10462_v9 = vld [vmem:[#allocation9 + $0x610] sm:$0xff] }
 0x259   :  { %14097 = vmatmul.mubr.msk.f32.vlgmr.msra.gmra.mxu0 %vm929_vm0, %v9922_v57  ;;  %14098 = vmatmul.mubr.msk.f32.vlgmr.msra.gmra.mxu1 %vm929_vm0, %v9922_v57  ;;  %v4858_v15 = vcombine.low %v4850_v43, %v4857_v51  ;;  %v14374_v57 = vld [vmem:[%s17158_s0 + $0xb2] sm:$0xff] }
 0x25a   :  { %10139 = vmatprep.subr.mxu0 %v10104_v11  ;;  %10210 = vmatprep.subr.mxu1 %v10106_v59  ;;  %v852_v0 = vpop.permute.xlu1 %851  ;;  %v1640_v2 = vpop.permute.xlu0 %1639 }
 0x25b   :  { %10140 = vmatpush1.msra.mxu0 %v10103_v21  ;;  %10211 = vmatpush1.msra.mxu1 %v10105_v39  ;;  %v4865_v63 = vrot.slane %v4858_v15, %v16017_v42  ;;  %v4938_v25 = vpop.f32.mrf.mxu0  ;;  %v5009_v10 = vpop.f32.mrf.mxu1  ;;  %v856_v36 = vadd.f32 %v852_v0, %v828_v29  ;;  %v1644_v27 = vadd.f32 %v1640_v2, %v1616_v16 }
 0x25c   :  { %10141 = vmatprep.subr.mxu0 %v10100_v54  ;;  %10212 = vmatprep.subr.mxu1 %v10102_v12 }
 0x25d   :  { %10142 = vmatpush1.msra.mxu0 %v10099_v55  ;;  %10175 = vmatprep.mubr.f32.mxu0 %v17265_v48  ;;  %v16428_v28 = vadd.f32 %v4865_v63, %v16393_v8  ;;  %v4940_v5 = vpop.f32.mrf.mxu0  ;;  %v5011_v33 = vpop.f32.mrf.mxu1  ;;  %v870_v30 = vadd.f32 %v868_v1, %v856_v36  ;;  %v1658_v35 = vadd.f32 %v1656_v40, %v1644_v27 }
 0x25e   :  { %10213 = vmatpush1.msra.mxu1 %v10101_v56  ;;  %10246 = vmatprep.mubr.f32.mxu1 %v17265_v48  ;;  %v5018_v49 = vcombine.low %v4938_v25, %v4940_v5  ;;  %v5019_v62 = vcombine.low %v5009_v10, %v5011_v33 }
 0x25f   :  { %14099 = vmatmul.mubr.msk.f32.vlgmr.msra.gmra.mxu0 %vm929_vm0, %v10107_v31  ;;  %14100 = vmatmul.mubr.msk.f32.vlgmr.msra.gmra.mxu1 %vm929_vm0, %v10107_v31 }
 0x260   :  { %10315 = vmatprep.subr.mxu0 %v10104_v11  ;;  %10386 = vmatprep.subr.mxu1 %v10106_v59  ;;  %v5026_v61 = vrot.slane %v5018_v49, %v16017_v42  ;;  %v5033_v47 = vrot.slane %v5019_v62, %v16017_v42 }
 0x261   :  { %10316 = vmatpush1.msra.mxu0 %v10103_v21  ;;  %10387 = vmatpush1.msra.mxu1 %v10105_v39  ;;  %v894_v41 = vpop.permute.xlu1 %893  ;;  %v1682_v8 = vpop.permute.xlu0 %1681  ;;  %v1726_v21 = vmul.f32 %v14374_v57, %v16074_v46 }
 0x262   :  { %10317 = vmatprep.subr.mxu0 %v10100_v54  ;;  %10388 = vmatprep.subr.mxu1 %v10102_v12  ;;  %v5034_v13 = vcombine.low %v5026_v61, %v5033_v47  ;;  %v5123_v6 = vpop.f32.mrf.mxu0  ;;  %v5194_v50 = vpop.f32.mrf.mxu1  ;;  %v898_v53 = vadd.f32 %v894_v41, %v870_v30  ;;  %v1686_v26 = vadd.f32 %v1682_v8, %v1658_v35  ;;  %v10826_v47 = vld [vmem:[#allocation9 + $0x668] sm:$0xff]  ;;  %v10828_v41 = vld [vmem:[#allocation9 + $0x678] sm:$0xff] }
 0x263   :  { %10318 = vmatpush1.msra.mxu0 %v10099_v55  ;;  %10351 = vmatprep.mubr.f32.mxu0 %v17265_v48 }
 0x264   :  { %10389 = vmatpush1.msra.mxu1 %v10101_v56  ;;  %10422 = vmatprep.mubr.f32.mxu1 %v17265_v48  ;;  %v5041_v3 = vrot.slane %v5034_v13, %v16017_v42  ;;  %v5125_v58 = vpop.f32.mrf.mxu0  ;;  %v5196_v34 = vpop.f32.mrf.mxu1 }
 0x265   :  { %14101 = vmatmul.mubr.msk.f32.vlgmr.msra.gmra.mxu0 %vm929_vm0, %v10283_v19  ;;  %14102 = vmatmul.mubr.msk.f32.vlgmr.msra.gmra.mxu1 %vm929_vm0, %v10283_v19  ;;  %v5203_v24 = vcombine.low %v5123_v6, %v5125_v58  ;;  %v5204_v7 = vcombine.low %v5194_v50, %v5196_v34  ;;  %v10824_v58 = vld [vmem:[#allocation9 + $0x658] sm:$0xff] }
 0x266   :  { %10500 = vmatprep.subr.mxu0 %v10465_v45  ;;  %10571 = vmatprep.subr.mxu1 %v10467_v23  ;;  %v5043_v20 = vadd.f32 %v5041_v3, %v16413_v44  ;;  %v10822_v3 = vld [vmem:[#allocation9 + $0x648] sm:$0xff] }
 0x267   :  { %10501 = vmatpush1.msra.mxu0 %v16441_v52  ;;  %10572 = vmatpush1.msra.mxu1 %v16443_v38  ;;  %v5211_v11 = vrot.slane %v5203_v24, %v16017_v42  ;;  %v5218_v59 = vrot.slane %v5204_v7, %v16017_v42  ;;  %v10821_v24 = vld [vmem:[#allocation9 + $0x640] sm:$0xff]  ;;  %v10823_v7 = vld [vmem:[#allocation9 + $0x650] sm:$0xff] }
 0x268   :  { %v922_v43 = vpop.permute.xlu1 %921  ;;  %v1710_v51 = vpop.permute.xlu0 %1709  ;;  %10502 = vmatprep.subr.mxu0 %v10461_v4  ;;  %10573 = vmatprep.subr.mxu1 %v10463_v18 }
 0x269   :  { %v926_v44 = vadd.f32 %v922_v43, %v898_v53  ;;  %v1714_v39 = vadd.f32 %v1710_v51, %v1686_v26  ;;  %10503 = vmatpush1.msra.mxu0 %v10460_v17  ;;  %10536 = vmatprep.mubr.f32.mxu0 %v17265_v48  ;;  %v5219_v22 = vcombine.low %v5211_v11, %v5218_v59 }
 0x26a   :  { %10574 = vmatpush1.msra.mxu1 %v10462_v9  ;;  %10607 = vmatprep.mubr.f32.mxu1 %v17265_v48  ;;  %v5299_v54 = vpop.f32.mrf.mxu0  ;;  %v5370_v12 = vpop.f32.mrf.mxu1 }
 0x26b   :  { %v933_v14 = vmax.f32 %v926_v44, 0.0  ;;  %10676 = vmatprep.subr.mxu0 %v10465_v45  ;;  %10747 = vmatprep.subr.mxu1 %v10467_v23  ;;  %v5226_v15 = vrot.slane %v5219_v22, %v16017_v42  ;;  %v1728_v55 = vadd.f32 %v1726_v21, %v1714_v39  ;;  %v10825_v45 = vld [vmem:[#allocation9 + $0x660] sm:$0xff]  ;;  %v10827_v23 = vld [vmem:[#allocation9 + $0x670] sm:$0xff]  ;;  %v11187_v39 = vld [vmem:[#allocation9 + $0x6a8] sm:$0xff] }
 0x26c   :  { %v5301_v46 = vpop.f32.mrf.mxu0  ;;  %v5372_v0 = vpop.f32.mrf.mxu1  ;;  %v11189_v22 = vld [vmem:[#allocation9 + $0x6b8] sm:$0xff] }
 0x26d   :  { %936 = vst.msk [vmem:[#allocation2 + $0x18] sm:$0xff] %vm929_vm0, %v933_v14  ;;  %v5228_v2 = vadd.f32 %v5226_v15, %v16428_v28  ;;  %v5379_v56 = vcombine.low %v5299_v54, %v5301_v46  ;;  %v5380_v63 = vcombine.low %v5370_v12, %v5372_v0  ;;  %v11186_v14 = vld [vmem:[#allocation9 + $0x6a0] sm:$0xff]  ;;  %v11188_v15 = vld [vmem:[#allocation9 + $0x6b0] sm:$0xff]  ;;  %v11183_v46 = vld [vmem:[#allocation9 + $0x688] sm:$0xff] }
 0x26e   :  { %v11185_v0 = vld [vmem:[#allocation9 + $0x698] sm:$0xff] }
 0x26f   :  { %v1752_v25 = vpop.permute.xlu0 %1751  ;;  %v5387_v10 = vrot.slane %v5379_v56, %v16017_v42  ;;  %v5394_v29 = vrot.slane %v5380_v63, %v16017_v42  ;;  %v11182_v56 = vld [vmem:[#allocation9 + $0x680] sm:$0xff]  ;;  %v11184_v63 = vld [vmem:[#allocation9 + $0x690] sm:$0xff] }
 0x270   :  { %v1756_v16 = vadd.f32 %v1752_v25, %v1728_v55 }
 0x271   :  { %v1780_v32 = vpop.permute.xlu1 %1779  ;;  %v5395_v1 = vcombine.low %v5387_v10, %v5394_v29 }
 0x272   :  { %v1784_v5 = vadd.f32 %v1780_v32, %v1756_v16  ;;  %v5484_v33 = vpop.f32.mrf.mxu0  ;;  %v5555_v31 = vpop.f32.mrf.mxu1 }
 0x273   :  { %v5402_v36 = vrot.slane %v5395_v1, %v16017_v42 }
 0x274   :  { %v1791_v49 = vmax.f32 %v1784_v5, 0.0  ;;  %v10468_v62 = vld [vmem:[#allocation2 + $0x18] sm:$0x1]  ;;  %v5486_v27 = vpop.f32.mrf.mxu0  ;;  %v5557_v60 = vpop.f32.mrf.mxu1  ;;  %v10829_v11 = vld [vmem:[#allocation2 + $0x19] sm:$0x1] }
 0x275   :  { %14103 = vmatmul.mubr.msk.f32.vlgmr.msra.gmra.mxu0 %vm929_vm0, %v10468_v62  ;;  %14104 = vmatmul.mubr.msk.f32.vlgmr.msra.gmra.mxu1 %vm929_vm0, %v10468_v62  ;;  %v5404_v28 = vadd.f32 %v5402_v36, %v5043_v20  ;;  %v5564_v40 = vcombine.low %v5484_v33, %v5486_v27  ;;  %v5565_v61 = vcombine.low %v5555_v31, %v5557_v60  ;;  %v11190_v31 = vld [vmem:[#allocation2 + $0x1a] sm:$0x1] }
 0x276   :  { %1794 = vst.msk [vmem:[#allocation2 + $0x38] sm:$0xff] %vm929_vm0, %v1791_v49  ;;  %10677 = vmatpush1.msra.mxu0 %v16441_v52  ;;  %10748 = vmatpush1.msra.mxu1 %v16443_v38 }
 0x277   :  { %10678 = vmatprep.subr.mxu0 %v10461_v4  ;;  %10749 = vmatprep.subr.mxu1 %v10463_v18  ;;  %v5572_v8 = vrot.slane %v5564_v40, %v16017_v42  ;;  %v5579_v30 = vrot.slane %v5565_v61, %v16017_v42  ;;  %v11550_v40 = vld [vmem:[#allocation9 + $0x6f8] sm:$0xff] }
 0x278   :  { %10679 = vmatpush1.msra.mxu0 %v10460_v17  ;;  %10750 = vmatpush1.msra.mxu1 %v10462_v9 }
 0x279   :  { %10712 = vmatprep.mubr.f32.mxu0 %v17265_v48  ;;  %10783 = vmatprep.mubr.f32.mxu1 %v17265_v48  ;;  %v5580_v13 = vcombine.low %v5572_v8, %v5579_v30  ;;  %v11547_v8 = vld [vmem:[#allocation9 + $0x6e0] sm:$0xff]  ;;  %v11549_v30 = vld [vmem:[#allocation9 + $0x6f0] sm:$0xff] }
 0x27a   :  { %10861 = vmatprep.subr.mxu0 %v10826_v47  ;;  %10932 = vmatprep.subr.mxu1 %v10828_v41  ;;  %v5660_v6 = vpop.f32.mrf.mxu0  ;;  %v5731_v50 = vpop.f32.mrf.mxu1 }
 0x27b   :  { %v5587_v35 = vrot.slane %v5580_v13, %v16017_v42 }
 0x27c   :  { %v5662_v19 = vpop.f32.mrf.mxu0  ;;  %v5733_v52 = vpop.f32.mrf.mxu1 }
 0x27d   :  { %v10644_v38 = vld [vmem:[#allocation2 + $0x38] sm:$0x1]  ;;  %v16475_v34 = vadd.f32 %v5587_v35, %v5228_v2  ;;  %v5740_v4 = vcombine.low %v5660_v6, %v5662_v19  ;;  %v5741_v18 = vcombine.low %v5731_v50, %v5733_v52  ;;  %v11005_v55 = vld [vmem:[#allocation2 + $0x39] sm:$0x1]  ;;  %v11366_v50 = vld [vmem:[#allocation2 + $0x3a] sm:$0x1] }
 0x27e   :  { %14105 = vmatmul.mubr.msk.f32.vlgmr.msra.gmra.mxu0 %vm929_vm0, %v10644_v38  ;;  %14106 = vmatmul.mubr.msk.f32.vlgmr.msra.gmra.mxu1 %vm929_vm0, %v10644_v38  ;;  %v11544_v35 = vld [vmem:[#allocation9 + $0x6c8] sm:$0xff]  ;;  %v11543_v19 = vld [vmem:[#allocation9 + $0x6c0] sm:$0xff]  ;;  %v11545_v52 = vld [vmem:[#allocation9 + $0x6d0] sm:$0xff] }
 0x27f   :  { %10862 = vmatpush1.msra.mxu0 %v10825_v45  ;;  %10933 = vmatpush1.msra.mxu1 %v10827_v23  ;;  %v5748_v53 = vrot.slane %v5740_v4, %v16017_v42  ;;  %v5755_v17 = vrot.slane %v5741_v18, %v16017_v42 }
 0x280   :  { %10863 = vmatprep.subr.mxu0 %v10822_v3  ;;  %10934 = vmatprep.subr.mxu1 %v10824_v58 }
 0x281   :  { %10864 = vmatpush1.msra.mxu0 %v10821_v24  ;;  %10935 = vmatpush1.msra.mxu1 %v10823_v7  ;;  %v5756_v20 = vcombine.low %v5748_v53, %v5755_v17  ;;  %v11551_v53 = vld [vmem:[#allocation2 + $0x1b] sm:$0x1] }
 0x282   :  { %10897 = vmatprep.mubr.f32.mxu0 %v17265_v48  ;;  %10968 = vmatprep.mubr.f32.mxu1 %v17265_v48  ;;  %v5845_v26 = vpop.f32.mrf.mxu0  ;;  %v5916_v9 = vpop.f32.mrf.mxu1 }
 0x283   :  { %11037 = vmatprep.subr.mxu0 %v10826_v47  ;;  %11108 = vmatprep.subr.mxu1 %v10828_v41  ;;  %v5763_v59 = vrot.slane %v5756_v20, %v16017_v42 }
 0x284   :  { %14107 = vmatmul.mubr.msk.f32.vlgmr.msra.gmra.mxu0 %vm929_vm0, %v10829_v11  ;;  %14108 = vmatmul.mubr.msk.f32.vlgmr.msra.gmra.mxu1 %vm929_vm0, %v10829_v11  ;;  %v5847_v43 = vpop.f32.mrf.mxu0  ;;  %v5918_v51 = vpop.f32.mrf.mxu1 }
 0x285   :  { %11038 = vmatpush1.msra.mxu0 %v10825_v45  ;;  %11109 = vmatpush1.msra.mxu1 %v10827_v23  ;;  %v16486_v57 = vadd.f32 %v5763_v59, %v5404_v28  ;;  %v5925_v21 = vcombine.low %v5845_v26, %v5847_v43  ;;  %v5926_v44 = vcombine.low %v5916_v9, %v5918_v51  ;;  %v11548_v28 = vld [vmem:[#allocation9 + $0x6e8] sm:$0xff]  ;;  %v11546_v45 = vld [vmem:[#allocation9 + $0x6d8] sm:$0xff] }
 0x286   :  { %11039 = vmatprep.subr.mxu0 %v10822_v3  ;;  %11110 = vmatprep.subr.mxu1 %v10824_v58  ;;  %v11909_v59 = vld [vmem:[#allocation9 + $0x728] sm:$0xff]  ;;  %v11911_v43 = vld [vmem:[#allocation9 + $0x738] sm:$0xff] }
 0x287   :  { %11040 = vmatpush1.msra.mxu0 %v10821_v24  ;;  %11111 = vmatpush1.msra.mxu1 %v10823_v7  ;;  %v5933_v54 = vrot.slane %v5925_v21, %v16017_v42  ;;  %v5940_v12 = vrot.slane %v5926_v44, %v16017_v42  ;;  %v11908_v44 = vld [vmem:[#allocation9 + $0x720] sm:$0xff] }
 0x288   :  { %11073 = vmatprep.mubr.f32.mxu0 %v17265_v48  ;;  %11144 = vmatprep.mubr.f32.mxu1 %v17265_v48 }
 0x289   :  { %11222 = vmatprep.subr.mxu0 %v11187_v39  ;;  %11293 = vmatprep.subr.mxu1 %v11189_v22  ;;  %v5941_v2 = vcombine.low %v5933_v54, %v5940_v12  ;;  %v11905_v54 = vld [vmem:[#allocation9 + $0x708] sm:$0xff]  ;;  %v11907_v12 = vld [vmem:[#allocation9 + $0x718] sm:$0xff] }
 0x28a   :  { %14109 = vmatmul.mubr.msk.f32.vlgmr.msra.gmra.mxu0 %vm929_vm0, %v11005_v55  ;;  %14110 = vmatmul.mubr.msk.f32.vlgmr.msra.gmra.mxu1 %vm929_vm0, %v11005_v55  ;;  %v6021_v25 = vpop.f32.mrf.mxu0  ;;  %v6092_v10 = vpop.f32.mrf.mxu1 }
 0x28b   :  { %11223 = vmatpush1.msra.mxu0 %v11186_v14  ;;  %11294 = vmatpush1.msra.mxu1 %v11188_v15  ;;  %v5948_v29 = vrot.slane %v5941_v2, %v16017_v42 }
 0x28c   :  { %11224 = vmatprep.subr.mxu0 %v11183_v46  ;;  %11295 = vmatprep.subr.mxu1 %v11185_v0  ;;  %v6023_v16 = vpop.f32.mrf.mxu0  ;;  %v6094_v32 = vpop.f32.mrf.mxu1 }
 0x28d   :  { %11225 = vmatpush1.msra.mxu0 %v11182_v56  ;;  %11296 = vmatpush1.msra.mxu1 %v11184_v63  ;;  %v16496_v1 = vadd.f32 %v5948_v29, %v16475_v34  ;;  %v6101_v5 = vcombine.low %v6021_v25, %v6023_v16  ;;  %v6102_v33 = vcombine.low %v6092_v10, %v6094_v32 }
 0x28e   :  { %11258 = vmatprep.mubr.f32.mxu0 %v17265_v48  ;;  %11329 = vmatprep.mubr.f32.mxu1 %v17265_v48 }
 0x28f   :  { %11398 = vmatprep.subr.mxu0 %v11187_v39  ;;  %11469 = vmatprep.subr.mxu1 %v11189_v22  ;;  %v6109_v36 = vrot.slane %v6101_v5, %v16017_v42  ;;  %v6116_v49 = vrot.slane %v6102_v33, %v16017_v42  ;;  %v11910_v39 = vld [vmem:[#allocation9 + $0x730] sm:$0xff]  ;;  %v11727_v22 = vld [vmem:[#allocation2 + $0x3b] sm:$0x1] }
 0x290   :  { %14111 = vmatmul.mubr.msk.f32.vlgmr.msra.gmra.mxu0 %vm929_vm0, %v11190_v31  ;;  %14112 = vmatmul.mubr.msk.f32.vlgmr.msra.gmra.mxu1 %vm929_vm0, %v11190_v31 }
 0x291   :  { %11399 = vmatpush1.msra.mxu0 %v11186_v14  ;;  %11470 = vmatpush1.msra.mxu1 %v11188_v15  ;;  %v6117_v62 = vcombine.low %v6109_v36, %v6116_v49  ;;  %v6206_v27 = vpop.f32.mrf.mxu0  ;;  %v6277_v60 = vpop.f32.mrf.mxu1 }
 0x292   :  { %11400 = vmatprep.subr.mxu0 %v11183_v46  ;;  %11471 = vmatprep.subr.mxu1 %v11185_v0  ;;  %v11904_v46 = vld [vmem:[#allocation9 + $0x700] sm:$0xff]  ;;  %v11906_v0 = vld [vmem:[#allocation9 + $0x710] sm:$0xff] }
 0x293   :  { %11401 = vmatpush1.msra.mxu0 %v11182_v56  ;;  %11472 = vmatpush1.msra.mxu1 %v11184_v63  ;;  %v6124_v61 = vrot.slane %v6117_v62, %v16017_v42  ;;  %v6208_v47 = vpop.f32.mrf.mxu0  ;;  %v6279_v41 = vpop.f32.mrf.mxu1  ;;  %v12270_v62 = vld [vmem:[#allocation9 + $0x768] sm:$0xff] }
 0x294   :  { %11434 = vmatprep.mubr.f32.mxu0 %v17265_v48  ;;  %11505 = vmatprep.mubr.f32.mxu1 %v17265_v48  ;;  %v6286_v13 = vcombine.low %v6206_v27, %v6208_v47  ;;  %v6287_v6 = vcombine.low %v6277_v60, %v6279_v41  ;;  %v12272_v27 = vld [vmem:[#allocation9 + $0x778] sm:$0xff]  ;;  %v12271_v47 = vld [vmem:[#allocation9 + $0x770] sm:$0xff] }
 0x295   :  { %11583 = vmatprep.subr.mxu0 %v11548_v28  ;;  %11654 = vmatprep.subr.mxu1 %v11550_v40  ;;  %v6126_v23 = vadd.f32 %v6124_v61, %v16486_v57  ;;  %v12269_v61 = vld [vmem:[#allocation9 + $0x760] sm:$0xff]  ;;  %v12088_v41 = vld [vmem:[#allocation2 + $0x3c] sm:$0x1] }
 0x296   :  { %14113 = vmatmul.mubr.msk.f32.vlgmr.msra.gmra.mxu0 %vm929_vm0, %v11366_v50  ;;  %14114 = vmatmul.mubr.msk.f32.vlgmr.msra.gmra.mxu1 %vm929_vm0, %v11366_v50  ;;  %v6294_v38 = vrot.slane %v6286_v13, %v16017_v42  ;;  %v6301_v3 = vrot.slane %v6287_v6, %v16017_v42 }
 0x297   :  { %11584 = vmatpush1.msra.mxu0 %v11547_v8  ;;  %11655 = vmatpush1.msra.mxu1 %v11549_v30 }
 0x298   :  { %11585 = vmatprep.subr.mxu0 %v11544_v35  ;;  %11656 = vmatprep.subr.mxu1 %v11546_v45  ;;  %v6302_v58 = vcombine.low %v6294_v38, %v6301_v3  ;;  %v6382_v34 = vpop.f32.mrf.mxu0  ;;  %v6453_v4 = vpop.f32.mrf.mxu1 }
 0x299   :  { %11586 = vmatpush1.msra.mxu0 %v11543_v19  ;;  %11657 = vmatpush1.msra.mxu1 %v11545_v52 }
 0x29a   :  { %11619 = vmatprep.mubr.f32.mxu0 %v17265_v48  ;;  %11690 = vmatprep.mubr.f32.mxu1 %v17265_v48  ;;  %v6309_v18 = vrot.slane %v6302_v58, %v16017_v42  ;;  %v6384_v24 = vpop.f32.mrf.mxu0  ;;  %v6455_v7 = vpop.f32.mrf.mxu1 }
 0x29b   :  { %11759 = vmatprep.subr.mxu0 %v11548_v28  ;;  %11830 = vmatprep.subr.mxu1 %v11550_v40  ;;  %v6462_v17 = vcombine.low %v6382_v34, %v6384_v24  ;;  %v6463_v20 = vcombine.low %v6453_v4, %v6455_v7 }
 0x29c   :  { %14115 = vmatmul.mubr.msk.f32.vlgmr.msra.gmra.mxu0 %vm929_vm0, %v11551_v53  ;;  %14116 = vmatmul.mubr.msk.f32.vlgmr.msra.gmra.mxu1 %vm929_vm0, %v11551_v53  ;;  %v6311_v26 = vadd.f32 %v6309_v18, %v16496_v1  ;;  %v11912_v1 = vld [vmem:[#allocation2 + $0x1c] sm:$0x1]  ;;  %v12273_v18 = vld [vmem:[#allocation2 + $0x1d] sm:$0x1] }
 0x29d   :  { %11760 = vmatpush1.msra.mxu0 %v11547_v8  ;;  %11831 = vmatpush1.msra.mxu1 %v11549_v30  ;;  %v6470_v9 = vrot.slane %v6462_v17, %v16017_v42  ;;  %v6477_v11 = vrot.slane %v6463_v20, %v16017_v42  ;;  %v12266_v8 = vld [vmem:[#allocation9 + $0x748] sm:$0xff]  ;;  %v12268_v30 = vld [vmem:[#allocation9 + $0x758] sm:$0xff] }
 0x29e   :  { %11761 = vmatprep.subr.mxu0 %v11544_v35  ;;  %11832 = vmatprep.subr.mxu1 %v11546_v45  ;;  %v12265_v35 = vld [vmem:[#allocation9 + $0x740] sm:$0xff]  ;;  %v12267_v45 = vld [vmem:[#allocation9 + $0x750] sm:$0xff]  ;;  %v12631_v17 = vld [vmem:[#allocation9 + $0x7a8] sm:$0xff] }
 0x29f   :  { %11762 = vmatpush1.msra.mxu0 %v11543_v19  ;;  %11833 = vmatpush1.msra.mxu1 %v11545_v52  ;;  %v6478_v51 = vcombine.low %v6470_v9, %v6477_v11  ;;  %v6567_v57 = vpop.f32.mrf.mxu0  ;;  %v6638_v21 = vpop.f32.mrf.mxu1  ;;  %v12633_v20 = vld [vmem:[#allocation9 + $0x7b8] sm:$0xff] }
 0x2a0   :  { %11795 = vmatprep.mubr.f32.mxu0 %v17265_v48  ;;  %11866 = vmatprep.mubr.f32.mxu1 %v17265_v48 }
 0x2a1   :  { %11944 = vmatprep.subr.mxu0 %v11909_v59  ;;  %12015 = vmatprep.subr.mxu1 %v11911_v43  ;;  %v6485_v14 = vrot.slane %v6478_v51, %v16017_v42  ;;  %v6569_v15 = vpop.f32.mrf.mxu0  ;;  %v6640_v55 = vpop.f32.mrf.mxu1  ;;  %v12630_v51 = vld [vmem:[#allocation9 + $0x7a0] sm:$0xff] }
 0x2a2   :  { %14117 = vmatmul.mubr.msk.f32.vlgmr.msra.gmra.mxu0 %vm929_vm0, %v11727_v22  ;;  %14118 = vmatmul.mubr.msk.f32.vlgmr.msra.gmra.mxu1 %vm929_vm0, %v11727_v22  ;;  %v6647_v2 = vcombine.low %v6567_v57, %v6569_v15  ;;  %v6648_v56 = vcombine.low %v6638_v21, %v6640_v55  ;;  %v12632_v57 = vld [vmem:[#allocation9 + $0x7b0] sm:$0xff]  ;;  %v12629_v22 = vld [vmem:[#allocation9 + $0x798] sm:$0xff] }
 0x2a3   :  { %11945 = vmatpush1.msra.mxu0 %v11908_v44  ;;  %12016 = vmatpush1.msra.mxu1 %v11910_v39  ;;  %v6487_v63 = vadd.f32 %v6485_v14, %v6126_v23  ;;  %v12626_v14 = vld [vmem:[#allocation9 + $0x780] sm:$0xff]  ;;  %v12628_v15 = vld [vmem:[#allocation9 + $0x790] sm:$0xff] }
 0x2a4   :  { %11946 = vmatprep.subr.mxu0 %v11905_v54  ;;  %12017 = vmatprep.subr.mxu1 %v11907_v12  ;;  %v6655_v25 = vrot.slane %v6647_v2, %v16017_v42  ;;  %v6662_v10 = vrot.slane %v6648_v56, %v16017_v42 }
 0x2a5   :  { %11947 = vmatpush1.msra.mxu0 %v11904_v46  ;;  %12018 = vmatpush1.msra.mxu1 %v11906_v0 }
 0x2a6   :  { %11980 = vmatprep.mubr.f32.mxu0 %v17265_v48  ;;  %12051 = vmatprep.mubr.f32.mxu1 %v17265_v48  ;;  %v6663_v29 = vcombine.low %v6655_v25, %v6662_v10  ;;  %v6743_v16 = vpop.f32.mrf.mxu0  ;;  %v6814_v32 = vpop.f32.mrf.mxu1 }
 0x2a7   :  { %12120 = vmatprep.subr.mxu0 %v11909_v59  ;;  %12191 = vmatprep.subr.mxu1 %v11911_v43 }
 0x2a8   :  { %14119 = vmatmul.mubr.msk.f32.vlgmr.msra.gmra.mxu0 %vm929_vm0, %v11912_v1  ;;  %14120 = vmatmul.mubr.msk.f32.vlgmr.msra.gmra.mxu1 %vm929_vm0, %v11912_v1  ;;  %v6670_v5 = vrot.slane %v6663_v29, %v16017_v42  ;;  %v6745_v33 = vpop.f32.mrf.mxu0  ;;  %v6816_v31 = vpop.f32.mrf.mxu1  ;;  %v12634_v29 = vld [vmem:[#allocation2 + $0x1e] sm:$0x1] }
 0x2a9   :  { %12121 = vmatpush1.msra.mxu0 %v11908_v44  ;;  %12192 = vmatpush1.msra.mxu1 %v11910_v39  ;;  %v6823_v36 = vcombine.low %v6743_v16, %v6745_v33  ;;  %v6824_v49 = vcombine.low %v6814_v32, %v6816_v31  ;;  %v12449_v44 = vld [vmem:[#allocation2 + $0x3d] sm:$0x1]  ;;  %v12627_v39 = vld [vmem:[#allocation9 + $0x788] sm:$0xff] }
 0x2aa   :  { %12122 = vmatprep.subr.mxu0 %v11905_v54  ;;  %12193 = vmatprep.subr.mxu1 %v11907_v12  ;;  %v6672_v60 = vadd.f32 %v6670_v5, %v6311_v26  ;;  %v12992_v5 = vld [vmem:[#allocation9 + $0x7e8] sm:$0xff]  ;;  %v12994_v33 = vld [vmem:[#allocation9 + $0x7f8] sm:$0xff] }
 0x2ab   :  { %12123 = vmatpush1.msra.mxu0 %v11904_v46  ;;  %12194 = vmatpush1.msra.mxu1 %v11906_v0  ;;  %v6831_v28 = vrot.slane %v6823_v36, %v16017_v42  ;;  %v6838_v40 = vrot.slane %v6824_v49, %v16017_v42 }
 0x2ac   :  { %12156 = vmatprep.mubr.f32.mxu0 %v17265_v48  ;;  %12227 = vmatprep.mubr.f32.mxu1 %v17265_v48 }
 0x2ad   :  { %12305 = vmatprep.subr.mxu0 %v12270_v62  ;;  %12376 = vmatprep.subr.mxu1 %v12272_v27  ;;  %v6839_v13 = vcombine.low %v6831_v28, %v6838_v40  ;;  %v6928_v6 = vpop.f32.mrf.mxu0  ;;  %v6999_v50 = vpop.f32.mrf.mxu1 }
 0x2ae   :  { %14121 = vmatmul.mubr.msk.f32.vlgmr.msra.gmra.mxu0 %vm929_vm0, %v12088_v41  ;;  %14122 = vmatmul.mubr.msk.f32.vlgmr.msra.gmra.mxu1 %vm929_vm0, %v12088_v41  ;;  %v12990_v41 = vld [vmem:[#allocation9 + $0x7d8] sm:$0xff] }
 0x2af   :  { %12306 = vmatpush1.msra.mxu0 %v12269_v61  ;;  %12377 = vmatpush1.msra.mxu1 %v12271_v47  ;;  %v6846_v23 = vrot.slane %v6839_v13, %v16017_v42  ;;  %v6930_v19 = vpop.f32.mrf.mxu0  ;;  %v7001_v52 = vpop.f32.mrf.mxu1  ;;  %v12987_v13 = vld [vmem:[#allocation9 + $0x7c0] sm:$0xff] }
 0x2b0   :  { %12307 = vmatprep.subr.mxu0 %v12266_v8  ;;  %12378 = vmatprep.subr.mxu1 %v12268_v30  ;;  %v7008_v38 = vcombine.low %v6928_v6, %v6930_v19  ;;  %v7009_v3 = vcombine.low %v6999_v50, %v7001_v52  ;;  %v12989_v6 = vld [vmem:[#allocation9 + $0x7d0] sm:$0xff] }
 0x2b1   :  { %12308 = vmatpush1.msra.mxu0 %v12265_v35  ;;  %12379 = vmatpush1.msra.mxu1 %v12267_v45  ;;  %v6848_v58 = vadd.f32 %v6846_v23, %v6487_v63 }
 0x2b2   :  { %12341 = vmatprep.mubr.f32.mxu0 %v17265_v48  ;;  %12412 = vmatprep.mubr.f32.mxu1 %v17265_v48  ;;  %v7016_v34 = vrot.slane %v7008_v38, %v16017_v42  ;;  %v7023_v4 = vrot.slane %v7009_v3, %v16017_v42  ;;  %v12995_v38 = vld [vmem:[#allocation2 + $0x1f] sm:$0x1] }
 0x2b3   :  { %12481 = vmatprep.subr.mxu0 %v12270_v62  ;;  %12552 = vmatprep.subr.mxu1 %v12272_v27  ;;  %v12991_v62 = vld [vmem:[#allocation9 + $0x7e0] sm:$0xff]  ;;  %v12993_v27 = vld [vmem:[#allocation9 + $0x7f0] sm:$0xff] }
 0x2b4   :  { %14123 = vmatmul.mubr.msk.f32.vlgmr.msra.gmra.mxu0 %vm929_vm0, %v12273_v18  ;;  %14124 = vmatmul.mubr.msk.f32.vlgmr.msra.gmra.mxu1 %vm929_vm0, %v12273_v18  ;;  %v7024_v24 = vcombine.low %v7016_v34, %v7023_v4  ;;  %v7104_v7 = vpop.f32.mrf.mxu0  ;;  %v7175_v53 = vpop.f32.mrf.mxu1 }
 0x2b5   :  { %12482 = vmatpush1.msra.mxu0 %v12269_v61  ;;  %12553 = vmatpush1.msra.mxu1 %v12271_v47  ;;  %v12810_v61 = vld [vmem:[#allocation2 + $0x3e] sm:$0x1]  ;;  %v12988_v47 = vld [vmem:[#allocation9 + $0x7c8] sm:$0xff] }
 0x2b6   :  { %12483 = vmatprep.subr.mxu0 %v12266_v8  ;;  %12554 = vmatprep.subr.mxu1 %v12268_v30  ;;  %v7031_v26 = vrot.slane %v7024_v24, %v16017_v42  ;;  %v7106_v9 = vpop.f32.mrf.mxu0  ;;  %v7177_v11 = vpop.f32.mrf.mxu1 }
 0x2b7   :  { %12484 = vmatpush1.msra.mxu0 %v12265_v35  ;;  %12555 = vmatpush1.msra.mxu1 %v12267_v45  ;;  %v7184_v59 = vcombine.low %v7104_v7, %v7106_v9  ;;  %v7185_v43 = vcombine.low %v7175_v53, %v7177_v11 }
 0x2b8   :  { %12517 = vmatprep.mubr.f32.mxu0 %v17265_v48  ;;  %12588 = vmatprep.mubr.f32.mxu1 %v17265_v48  ;;  %v16548_v21 = vadd.f32 %v7031_v26, %v6672_v60 }
 0x2b9   :  { %12666 = vmatprep.subr.mxu0 %v12631_v17  ;;  %12737 = vmatprep.subr.mxu1 %v12633_v20  ;;  %v7192_v54 = vrot.slane %v7184_v59, %v16017_v42  ;;  %v7199_v12 = vrot.slane %v7185_v43, %v16017_v42 }
 0x2ba   :  { %14125 = vmatmul.mubr.msk.f32.vlgmr.msra.gmra.mxu0 %vm929_vm0, %v12449_v44  ;;  %14126 = vmatmul.mubr.msk.f32.vlgmr.msra.gmra.mxu1 %vm929_vm0, %v12449_v44 }
 0x2bb   :  { %12667 = vmatpush1.msra.mxu0 %v12630_v51  ;;  %12738 = vmatpush1.msra.mxu1 %v12632_v57  ;;  %v7200_v55 = vcombine.low %v7192_v54, %v7199_v12  ;;  %v7289_v46 = vpop.f32.mrf.mxu0  ;;  %v7360_v0 = vpop.f32.mrf.mxu1 }
 0x2bc   :  { %12668 = vmatprep.subr.mxu0 %v12627_v39  ;;  %12739 = vmatprep.subr.mxu1 %v12629_v22 }
 0x2bd   :  { %12669 = vmatpush1.msra.mxu0 %v12626_v14  ;;  %12740 = vmatpush1.msra.mxu1 %v12628_v15  ;;  %v7207_v2 = vrot.slane %v7200_v55, %v16017_v42  ;;  %v7291_v56 = vpop.f32.mrf.mxu0  ;;  %v7362_v63 = vpop.f32.mrf.mxu1 }
 0x2be   :  { %12702 = vmatprep.mubr.f32.mxu0 %v17265_v48  ;;  %12773 = vmatprep.mubr.f32.mxu1 %v17265_v48  ;;  %v7369_v25 = vcombine.low %v7289_v46, %v7291_v56  ;;  %v7370_v10 = vcombine.low %v7360_v0, %v7362_v63 }
 0x2bf   :  { %12842 = vmatprep.subr.mxu0 %v12631_v17  ;;  %12913 = vmatprep.subr.mxu1 %v12633_v20  ;;  %v7209_v16 = vadd.f32 %v7207_v2, %v6848_v58  ;;  %v13171_v20 = vld [vmem:[#allocation2 + $0x3f] sm:$0x1] }
 0x2c0   :  { %14127 = vmatmul.mubr.msk.f32.vlgmr.msra.gmra.mxu0 %vm929_vm0, %v12634_v29  ;;  %14128 = vmatmul.mubr.msk.f32.vlgmr.msra.gmra.mxu1 %vm929_vm0, %v12634_v29  ;;  %v7377_v32 = vrot.slane %v7369_v25, %v16017_v42  ;;  %v7384_v1 = vrot.slane %v7370_v10, %v16017_v42 }
 0x2c1   :  { %12843 = vmatpush1.msra.mxu0 %v12630_v51  ;;  %12914 = vmatpush1.msra.mxu1 %v12632_v57 }
 0x2c2   :  { %12844 = vmatprep.subr.mxu0 %v12627_v39  ;;  %12915 = vmatprep.subr.mxu1 %v12629_v22  ;;  %v7385_v31 = vcombine.low %v7377_v32, %v7384_v1  ;;  %v7465_v36 = vpop.f32.mrf.mxu0  ;;  %v7536_v49 = vpop.f32.mrf.mxu1 }
 0x2c3   :  { %12845 = vmatpush1.msra.mxu0 %v12626_v14  ;;  %12916 = vmatpush1.msra.mxu1 %v12628_v15 }
 0x2c4   :  { %12878 = vmatprep.mubr.f32.mxu0 %v17265_v48  ;;  %12949 = vmatprep.mubr.f32.mxu1 %v17265_v48  ;;  %v7392_v60 = vrot.slane %v7385_v31, %v16017_v42  ;;  %v7467_v28 = vpop.f32.mrf.mxu0  ;;  %v7538_v40 = vpop.f32.mrf.mxu1 }
 0x2c5   :  { %13027 = vmatprep.subr.mxu0 %v12992_v5  ;;  %13098 = vmatprep.subr.mxu1 %v12994_v33  ;;  %v7545_v8 = vcombine.low %v7465_v36, %v7467_v28  ;;  %v7546_v30 = vcombine.low %v7536_v49, %v7538_v40 }
 0x2c6   :  { %14129 = vmatmul.mubr.msk.f32.vlgmr.msra.gmra.mxu0 %vm929_vm0, %v12810_v61  ;;  %14130 = vmatmul.mubr.msk.f32.vlgmr.msra.gmra.mxu1 %vm929_vm0, %v12810_v61  ;;  %v7394_v50 = vadd.f32 %v7392_v60, %v16548_v21 }
 0x2c7   :  { %13028 = vmatpush1.msra.mxu0 %v12991_v62  ;;  %13099 = vmatpush1.msra.mxu1 %v12993_v27  ;;  %v7553_v35 = vrot.slane %v7545_v8, %v16017_v42  ;;  %v7560_v45 = vrot.slane %v7546_v30, %v16017_v42 }
 0x2c8   :  { %13029 = vmatprep.subr.mxu0 %v12988_v47  ;;  %13100 = vmatprep.subr.mxu1 %v12990_v41  ;;  %v7650_v23 = vpop.f32.mrf.mxu0  ;;  %v7721_v19 = vpop.f32.mrf.mxu1 }
 0x2c9   :  { %13030 = vmatpush1.msra.mxu0 %v12987_v13  ;;  %13101 = vmatpush1.msra.mxu1 %v12989_v6  ;;  %v7561_v52 = vcombine.low %v7553_v35, %v7560_v45 }
 0x2ca   :  { %13063 = vmatprep.mubr.f32.mxu0 %v17265_v48  ;;  %13134 = vmatprep.mubr.f32.mxu1 %v17265_v48  ;;  %v7652_v3 = vpop.f32.mrf.mxu0  ;;  %v7723_v58 = vpop.f32.mrf.mxu1 }
 0x2cb   :  { %14131 = vmatmul.mubr.msk.f32.vlgmr.msra.gmra.mxu0 %vm929_vm0, %v12995_v38  ;;  %14132 = vmatmul.mubr.msk.f32.vlgmr.msra.gmra.mxu1 %vm929_vm0, %v12995_v38  ;;  %v7568_v34 = vrot.slane %v7561_v52, %v16017_v42  ;;  %v7730_v4 = vcombine.low %v7650_v23, %v7652_v3  ;;  %v7731_v18 = vcombine.low %v7721_v19, %v7723_v58 }
 0x2cc   :  { %13203 = vmatprep.subr.mxu0 %v12992_v5  ;;  %13274 = vmatprep.subr.mxu1 %v12994_v33 }
 0x2cd   :  { %13204 = vmatpush1.msra.mxu0 %v12991_v62  ;;  %13275 = vmatpush1.msra.mxu1 %v12993_v27  ;;  %v7570_v24 = vadd.f32 %v7568_v34, %v7209_v16  ;;  %v7738_v7 = vrot.slane %v7730_v4, %v16017_v42  ;;  %v7745_v53 = vrot.slane %v7731_v18, %v16017_v42 }
 0x2ce   :  { %13205 = vmatprep.subr.mxu0 %v12988_v47  ;;  %13276 = vmatprep.subr.mxu1 %v12990_v41 }
 0x2cf   :  { %13206 = vmatpush1.msra.mxu0 %v12987_v13  ;;  %13239 = vmatprep.mubr.f32.mxu0 %v17265_v48  ;;  %v7746_v17 = vcombine.low %v7738_v7, %v7745_v53 }
 0x2d0   :  { %13277 = vmatpush1.msra.mxu1 %v12989_v6  ;;  %13310 = vmatprep.mubr.f32.mxu1 %v17265_v48 }
 0x2d1   :  { %14133 = vmatmul.mubr.msk.f32.vlgmr.msra.gmra.mxu0 %vm929_vm0, %v13171_v20  ;;  %14134 = vmatmul.mubr.msk.f32.vlgmr.msra.gmra.mxu1 %vm929_vm0, %v13171_v20  ;;  %v7753_v26 = vrot.slane %v7746_v17, %v16017_v42 }
 0x2d2   :  { %v7826_v9 = vpop.f32.mrf.mxu0  ;;  %v7897_v11 = vpop.f32.mrf.mxu1 }
 0x2d3   :  { %v7755_v59 = vadd.f32 %v7753_v26, %v7394_v50 }
 0x2d4   :  { %v7828_v43 = vpop.f32.mrf.mxu0  ;;  %v7899_v51 = vpop.f32.mrf.mxu1 }
 0x2d5   :  { %v7906_v57 = vcombine.low %v7826_v9, %v7828_v43  ;;  %v7907_v21 = vcombine.low %v7897_v11, %v7899_v51 }
 0x2d7   :  { %v7914_v44 = vrot.slane %v7906_v57, %v16017_v42  ;;  %v7921_v39 = vrot.slane %v7907_v21, %v16017_v42  ;;  %v8011_v22 = vpop.f32.mrf.mxu0  ;;  %v8082_v48 = vpop.f32.mrf.mxu1 }
 0x2d9   :  { %v7922_v54 = vcombine.low %v7914_v44, %v7921_v39  ;;  %v8013_v12 = vpop.f32.mrf.mxu0  ;;  %v8084_v14 = vpop.f32.mrf.mxu1 }
 0x2da   :  { %v8091_v15 = vcombine.low %v8011_v22, %v8013_v12  ;;  %v8092_v55 = vcombine.low %v8082_v48, %v8084_v14  ;;  %v16599_v48 = vld [vmem:[#allocation10 + $0xf8] sm:$0xff] }
 0x2db   :  { %v7929_v46 = vrot.slane %v7922_v54, %v16017_v42  ;;  %v16601_v54 = vld [vmem:[#allocation10 + $0x1f8] sm:$0xff]  ;;  %14135 = vmatprep.subr.mxu0 %v16599_v48 }
 0x2dc   :  { %v8099_v0 = vrot.slane %v8091_v15, %v16017_v42  ;;  %v8106_v2 = vrot.slane %v8092_v55, %v16017_v42  ;;  %14170 = vmatprep.subr.mxu1 %v16601_v54 }
 0x2dd   :  { %v7931_v56 = vadd.f32 %v7929_v46, %v7570_v24  ;;  %v8187_v63 = vpop.f32.mrf.mxu0  ;;  %v8258_v25 = vpop.f32.mrf.mxu1 }
 0x2de   :  { %v8107_v10 = vcombine.low %v8099_v0, %v8106_v2 }
 0x2df   :  { %v8189_v29 = vpop.f32.mrf.mxu0  ;;  %v8260_v16 = vpop.f32.mrf.mxu1 }
 0x2e0   :  { %v8114_v32 = vrot.slane %v8107_v10, %v16017_v42  ;;  %v8267_v1 = vcombine.low %v8187_v63, %v8189_v29  ;;  %v8268_v5 = vcombine.low %v8258_v25, %v8260_v16  ;;  %v16608_v29 = vld [vmem:[#allocation10 + $0x78] sm:$0xff] }
 0x2e1   :  { %17272 = vst [vmem:[#allocation26_spill] sm:$0xff] %v16608_v29  ;;  %v16610_v16 = vld [vmem:[#allocation10 + $0x178] sm:$0xff]  ;;  %14136 = vmatpush3.msra.mxu0 %v16608_v29 }
 0x2e2   :  { %v8116_v33 = vadd.f32 %v8114_v32, %v7755_v59  ;;  %v8275_v31 = vrot.slane %v8267_v1, %v16017_v42  ;;  %v8282_v36 = vrot.slane %v8268_v5, %v16017_v42  ;;  %17273 = vst [vmem:[#allocation25_spill] sm:$0xff] %v16610_v16  ;;  %14171 = vmatpush3.msra.mxu1 %v16610_v16  ;;  %v16614_v32 = vld [vmem:[#allocation10 + $0xf0] sm:$0xff] }
 0x2e3   :  { %v8372_v49 = vpop.f32.mrf.mxu0  ;;  %v8443_v62 = vpop.f32.mrf.mxu1  ;;  %17274 = vst [vmem:[#allocation19_spill] sm:$0xff] %v16614_v32  ;;  %v16616_v1 = vld [vmem:[#allocation10 + $0x1f0] sm:$0xff]  ;;  %14137 = vmatprep.subr.mxu0 %v16614_v32 }
 0x2e4   :  { %v8283_v27 = vcombine.low %v8275_v31, %v8282_v36  ;;  %17275 = vst [vmem:[#allocation20_spill] sm:$0xff] %v16616_v1  ;;  %v16618_v5 = vld [vmem:[#allocation10 + $0x70] sm:$0xff]  ;;  %14172 = vmatprep.subr.mxu1 %v16616_v1 }
 0x2e5   :  { %v8374_v60 = vpop.f32.mrf.mxu0  ;;  %v8445_v28 = vpop.f32.mrf.mxu1  ;;  %17276 = vst [vmem:[#allocation21_spill] sm:$0xff] %v16618_v5  ;;  %14138 = vmatpush3.msra.mxu0 %v16618_v5 }
 0x2e6   :  { %v8290_v40 = vrot.slane %v8283_v27, %v16017_v42  ;;  %v8452_v61 = vcombine.low %v8372_v49, %v8374_v60  ;;  %v8453_v47 = vcombine.low %v8443_v62, %v8445_v28  ;;  %v16626_v49 = vld [vmem:[#allocation10 + $0x170] sm:$0xff]  ;;  %v16628_v62 = vld [vmem:[#allocation10 + $0xe8] sm:$0xff] }
 0x2e7   :  { %17277 = vst [vmem:[#allocation22_spill] sm:$0xff] %v16626_v49  ;;  %17278 = vst [vmem:[#allocation23_spill] sm:$0xff] %v16628_v62  ;;  %v16630_v27 = vld [vmem:[#allocation10 + $0x1e8] sm:$0xff]  ;;  %14173 = vmatpush3.msra.mxu1 %v16626_v49  ;;  %14139 = vmatprep.subr.mxu0 %v16628_v62 }
 0x2e8   :  { %v8292_v41 = vadd.f32 %v8290_v40, %v7931_v56  ;;  %v8460_v8 = vrot.slane %v8452_v61, %v16017_v42  ;;  %v8467_v30 = vrot.slane %v8453_v47, %v16017_v42  ;;  %17279 = vst [vmem:[#allocation27_spill] sm:$0xff] %v16630_v27  ;;  %14174 = vmatprep.subr.mxu1 %v16630_v27  ;;  %v16636_v61 = vld [vmem:[#allocation10 + $0x68] sm:$0xff] }
 0x2e9   :  { %v8548_v13 = vpop.f32.mrf.mxu0  ;;  %v8619_v6 = vpop.f32.mrf.mxu1  ;;  %17280 = vst [vmem:[#allocation28_spill] sm:$0xff] %v16636_v61  ;;  %v16638_v47 = vld [vmem:[#allocation10 + $0x168] sm:$0xff]  ;;  %14140 = vmatpush3.msra.mxu0 %v16636_v61 }
 0x2ea   :  { %v8468_v50 = vcombine.low %v8460_v8, %v8467_v30  ;;  %17281 = vst [vmem:[#allocation24_spill] sm:$0xff] %v16638_v47  ;;  %14175 = vmatpush3.msra.mxu1 %v16638_v47  ;;  %v16642_v30 = vld [vmem:[#allocation10 + $0xe0] sm:$0xff] }
 0x2eb   :  { %v8550_v35 = vpop.f32.mrf.mxu0  ;;  %v8621_v45 = vpop.f32.mrf.mxu1  ;;  %17282 = vst [vmem:[#allocation29_spill] sm:$0xff] %v16642_v30  ;;  %14141 = vmatprep.subr.mxu0 %v16642_v30 }
 0x2ec   :  { %v8475_v23 = vrot.slane %v8468_v50, %v16017_v42  ;;  %v8628_v19 = vcombine.low %v8548_v13, %v8550_v35  ;;  %v8629_v52 = vcombine.low %v8619_v6, %v8621_v45  ;;  %v16644_v13 = vld [vmem:[#allocation10 + $0x1e0] sm:$0xff] }
 0x2ed   :  { %17283 = vst [vmem:[#allocation30_spill] sm:$0xff] %v16644_v13  ;;  %14176 = vmatprep.subr.mxu1 %v16644_v13  ;;  %v16649_v45 = vld [vmem:[#allocation10 + $0x60] sm:$0xff] }
 0x2ee   :  { %v8477_v38 = vadd.f32 %v8475_v23, %v8116_v33  ;;  %v8636_v3 = vrot.slane %v8628_v19, %v16017_v42  ;;  %v8643_v58 = vrot.slane %v8629_v52, %v16017_v42  ;;  %17284 = vst [vmem:[#allocation31_spill] sm:$0xff] %v16649_v45  ;;  %v16651_v23 = vld [vmem:[#allocation10 + $0x160] sm:$0xff]  ;;  %14142 = vmatpush3.msra.mxu0 %v16649_v45  ;;  %v16655_v19 = vld [vmem:[#allocation10 + $0xd8] sm:$0xff] }
 0x2ef   :  { %v8733_v34 = vpop.f32.mrf.mxu0  ;;  %v8804_v4 = vpop.f32.mrf.mxu1  ;;  %17285 = vst [vmem:[#allocation32_spill] sm:$0xff] %v16651_v23  ;;  %14177 = vmatpush3.msra.mxu1 %v16651_v23  ;;  %17286 = vst [vmem:[#allocation33_spill] sm:$0xff] %v16655_v19  ;;  %v16657_v52 = vld [vmem:[#allocation10 + $0x1d8] sm:$0xff]  ;;  %14143 = vmatprep.subr.mxu0 %v16655_v19 }
 0x2f0   :  { %v8644_v18 = vcombine.low %v8636_v3, %v8643_v58  ;;  %17287 = vst [vmem:[#allocation34_spill] sm:$0xff] %v16657_v52  ;;  %14178 = vmatprep.subr.mxu1 %v16657_v52 }
 0x2f1   :  { %v8735_v24 = vpop.f32.mrf.mxu0  ;;  %v8806_v7 = vpop.f32.mrf.mxu1 }
 0x2f2   :  { %v8651_v53 = vrot.slane %v8644_v18, %v16017_v42  ;;  %v8813_v17 = vcombine.low %v8733_v34, %v8735_v24  ;;  %v8814_v20 = vcombine.low %v8804_v4, %v8806_v7  ;;  %v16665_v34 = vld [vmem:[#allocation10 + $0x58] sm:$0xff]  ;;  %v16675_v7 = vld [vmem:[#allocation10 + $0xd0] sm:$0xff] }
 0x2f3   :  { %17288 = vst [vmem:[#allocation35_spill] sm:$0xff] %v16665_v34  ;;  %v16667_v4 = vld [vmem:[#allocation10 + $0x158] sm:$0xff]  ;;  %14144 = vmatpush3.msra.mxu0 %v16665_v34  ;;  %17290 = vst [vmem:[#allocation37_spill] sm:$0xff] %v16675_v7 }
 0x2f4   :  { %v8653_v26 = vadd.f32 %v8651_v53, %v8292_v41  ;;  %v8821_v9 = vrot.slane %v8813_v17, %v16017_v42  ;;  %v8828_v11 = vrot.slane %v8814_v20, %v16017_v42  ;;  %17289 = vst [vmem:[#allocation36_spill] sm:$0xff] %v16667_v4  ;;  %14179 = vmatpush3.msra.mxu1 %v16667_v4  ;;  %v16677_v53 = vld [vmem:[#allocation10 + $0x1d0] sm:$0xff] }
 0x2f5   :  { %v8909_v59 = vpop.f32.mrf.mxu0  ;;  %v8980_v43 = vpop.f32.mrf.mxu1  ;;  %17291 = vst [vmem:[#allocation38_spill] sm:$0xff] %v16677_v53  ;;  %14145 = vmatprep.subr.mxu0 %v16675_v7  ;;  %14180 = vmatprep.subr.mxu1 %v16677_v53  ;;  %v16681_v20 = vld [vmem:[#allocation10 + $0x50] sm:$0xff] }
 0x2f6   :  { %v8829_v51 = vcombine.low %v8821_v9, %v8828_v11  ;;  %17292 = vst [vmem:[#allocation39_spill] sm:$0xff] %v16681_v20  ;;  %14146 = vmatpush3.msra.mxu0 %v16681_v20 }
 0x2f7   :  { %v8911_v57 = vpop.f32.mrf.mxu0  ;;  %v8982_v21 = vpop.f32.mrf.mxu1 }
 0x2f8   :  { %v8836_v44 = vrot.slane %v8829_v51, %v16017_v42  ;;  %v8989_v39 = vcombine.low %v8909_v59, %v8911_v57  ;;  %v8990_v22 = vcombine.low %v8980_v43, %v8982_v21  ;;  %v16691_v59 = vld [vmem:[#allocation10 + $0xc8] sm:$0xff] }
 0x2f9   :  { %17294 = vst [vmem:[#allocation41_spill] sm:$0xff] %v16691_v59  ;;  %v16693_v43 = vld [vmem:[#allocation10 + $0x1c8] sm:$0xff]  ;;  %14147 = vmatprep.subr.mxu0 %v16691_v59 }
 0x2fa   :  { %v8838_v12 = vadd.f32 %v8836_v44, %v8477_v38  ;;  %v8997_v14 = vrot.slane %v8989_v39, %v16017_v42  ;;  %v9004_v15 = vrot.slane %v8990_v22, %v16017_v42  ;;  %17295 = vst [vmem:[#allocation42_spill] sm:$0xff] %v16693_v43  ;;  %v16698_v57 = vld [vmem:[#allocation10 + $0x48] sm:$0xff]  ;;  %v16704_v44 = vld [vmem:[#allocation10 + $0xc0] sm:$0xff] }
 0x2fb   :  { %v9094_v55 = vpop.f32.mrf.mxu0  ;;  %v9165_v46 = vpop.f32.mrf.mxu1  ;;  %17296 = vst [vmem:[#allocation43_spill] sm:$0xff] %v16698_v57  ;;  %v16700_v21 = vld [vmem:[#allocation10 + $0x148] sm:$0xff]  ;;  %14148 = vmatpush3.msra.mxu0 %v16698_v57  ;;  %17298 = vst [vmem:[#allocation45_spill] sm:$0xff] %v16704_v44  ;;  %v16706_v39 = vld [vmem:[#allocation10 + $0x1c0] sm:$0xff] }
 0x2fc   :  { %v9005_v0 = vcombine.low %v8997_v14, %v9004_v15  ;;  %17297 = vst [vmem:[#allocation44_spill] sm:$0xff] %v16700_v21  ;;  %17299 = vst [vmem:[#allocation46_spill] sm:$0xff] %v16706_v39  ;;  %14149 = vmatprep.subr.mxu0 %v16704_v44  ;;  %v16713_v14 = vld [vmem:[#allocation10 + $0x140] sm:$0xff] }
 0x2fd   :  { %v9096_v2 = vpop.f32.mrf.mxu0  ;;  %v9167_v56 = vpop.f32.mrf.mxu1  ;;  %17301 = vst [vmem:[#allocation48_spill] sm:$0xff] %v16713_v14 }
 0x2fe   :  { %v9012_v63 = vrot.slane %v9005_v0, %v16017_v42  ;;  %v9174_v25 = vcombine.low %v9094_v55, %v9096_v2  ;;  %v9175_v10 = vcombine.low %v9165_v46, %v9167_v56  ;;  %v16717_v46 = vld [vmem:[#allocation10 + $0xb8] sm:$0xff] }
 0x2ff   :  { %17302 = vst [vmem:[#allocation49_spill] sm:$0xff] %v16717_v46  ;;  %v16719_v0 = vld [vmem:[#allocation10 + $0x1b8] sm:$0xff] }
 0x300   :  { %v16620_v33 = vadd.f32 %v9012_v63, %v8653_v26  ;;  %v9182_v31 = vrot.slane %v9174_v25, %v16017_v42  ;;  %v9189_v36 = vrot.slane %v9175_v10, %v16017_v42  ;;  %v16683_v26 = vld [vmem:[#allocation10 + $0x150] sm:$0xff]  ;;  %17303 = vst [vmem:[#allocation50_spill] sm:$0xff] %v16719_v0  ;;  %v16723_v2 = vld [vmem:[#allocation10 + $0x38] sm:$0xff] }
 0x301   :  { %v9270_v60 = vpop.f32.mrf.mxu0  ;;  %v9341_v28 = vpop.f32.mrf.mxu1  ;;  %17293 = vst [vmem:[#allocation40_spill] sm:$0xff] %v16683_v26  ;;  %14181 = vmatpush3.msra.mxu1 %v16683_v26  ;;  %17304 = vst [vmem:[#allocation51_spill] sm:$0xff] %v16723_v2  ;;  %v16725_v56 = vld [vmem:[#allocation10 + $0x138] sm:$0xff]  ;;  %v16729_v10 = vld [vmem:[#allocation10 + $0xb0] sm:$0xff] }
 0x302   :  { %v9190_v40 = vcombine.low %v9182_v31, %v9189_v36  ;;  %14182 = vmatprep.subr.mxu1 %v16693_v43  ;;  %17305 = vst [vmem:[#allocation52_spill] sm:$0xff] %v16725_v56  ;;  %17306 = vst [vmem:[#allocation53_spill] sm:$0xff] %v16729_v10 }
 0x303   :  { %v9272_v41 = vpop.f32.mrf.mxu0  ;;  %v9343_v8 = vpop.f32.mrf.mxu1  ;;  %14183 = vmatpush3.msra.mxu1 %v16700_v21 }
 0x304   :  { %v9197_v6 = vrot.slane %v9190_v40, %v16017_v42  ;;  %v9350_v50 = vcombine.low %v9270_v60, %v9272_v41  ;;  %v9351_v35 = vcombine.low %v9341_v28, %v9343_v8  ;;  %14184 = vmatprep.subr.mxu1 %v16706_v39  ;;  %v16735_v60 = vld [vmem:[#allocation10 + $0x30] sm:$0xff]  ;;  %v16741_v40 = vld [vmem:[#allocation10 + $0xa8] sm:$0xff] }
 0x305   :  { %14185 = vmatpush3.msra.mxu1 %v16713_v14  ;;  %17308 = vst [vmem:[#allocation55_spill] sm:$0xff] %v16735_v60  ;;  %v16737_v28 = vld [vmem:[#allocation10 + $0x130] sm:$0xff]  ;;  %17310 = vst [vmem:[#allocation57_spill] sm:$0xff] %v16741_v40  ;;  %v16743_v41 = vld [vmem:[#allocation10 + $0x1a8] sm:$0xff] }
 0x306   :  { %v16659_v38 = vadd.f32 %v9197_v6, %v8838_v12  ;;  %v9358_v3 = vrot.slane %v9350_v50, %v16017_v42  ;;  %v9365_v58 = vrot.slane %v9351_v35, %v16017_v42  ;;  %v16711_v12 = vld [vmem:[#allocation10 + $0x40] sm:$0xff]  ;;  %14186 = vmatprep.subr.mxu1 %v16719_v0  ;;  %17309 = vst [vmem:[#allocation56_spill] sm:$0xff] %v16737_v28  ;;  %17311 = vst [vmem:[#allocation58_spill] sm:$0xff] %v16743_v41  ;;  %v16749_v50 = vld [vmem:[#allocation10 + $0x28] sm:$0xff] }
 0x307   :  { %v16669_v18 = vpop.f32.mrf.mxu0  ;;  %v16671_v24 = vpop.f32.mrf.mxu1  ;;  %17300 = vst [vmem:[#allocation47_spill] sm:$0xff] %v16711_v12  ;;  %14150 = vmatpush3.msra.mxu0 %v16711_v12  ;;  %14187 = vmatpush3.msra.mxu1 %v16725_v56  ;;  %17312 = vst [vmem:[#allocation59_spill] sm:$0xff] %v16749_v50  ;;  %v16751_v35 = vld [vmem:[#allocation10 + $0x128] sm:$0xff] }
 0x308   :  { %v9366_v17 = vcombine.low %v9358_v3, %v9365_v58  ;;  %14151 = vmatprep.subr.mxu0 %v16717_v46  ;;  %17313 = vst [vmem:[#allocation60_spill] sm:$0xff] %v16751_v35  ;;  %v16755_v3 = vld [vmem:[#allocation10 + $0xa0] sm:$0xff] }
 0x309   :  { %v16685_v9 = vpop.f32.mrf.mxu0  ;;  %v16687_v11 = vpop.f32.mrf.mxu1  ;;  %14152 = vmatpush3.msra.mxu0 %v16723_v2  ;;  %17314 = vst [vmem:[#allocation61_spill] sm:$0xff] %v16755_v3  ;;  %v16757_v58 = vld [vmem:[#allocation10 + $0x1a0] sm:$0xff] }
 0x30a   :  { %v9373_v51 = vrot.slane %v9366_v17, %v16017_v42  ;;  %14153 = vmatprep.subr.mxu0 %v16729_v10  ;;  %17315 = vst [vmem:[#allocation62_spill] sm:$0xff] %v16757_v58  ;;  %v9535_v49 = vcombine.low %v16669_v18, %v16685_v9  ;;  %v9536_v5 = vcombine.low %v16671_v24, %v16687_v11 }
 0x30b   :  { %14154 = vmatpush3.msra.mxu0 %v16735_v60 }
 0x30c   :  { %v9375_v22 = vadd.f32 %v9373_v51, %v16620_v33  ;;  %v16731_v33 = vld [vmem:[#allocation10 + $0x1b0] sm:$0xff]  ;;  %14155 = vmatprep.subr.mxu0 %v16741_v40  ;;  %v16761_v51 = vld [vmem:[#allocation10 + $0x20] sm:$0xff]  ;;  %v9543_v37 = vrot.slane %v9535_v49, %v16017_v42 }
 0x30d   :  { %v9631_v15 = vpop.f32.mrf.mxu0  ;;  %v9702_v55 = vpop.f32.mrf.mxu1  ;;  %17307 = vst [vmem:[#allocation54_spill] sm:$0xff] %v16731_v33  ;;  %14188 = vmatprep.subr.mxu1 %v16731_v33  ;;  %14156 = vmatpush3.msra.mxu0 %v16749_v50  ;;  %17316 = vst [vmem:[#allocation63_spill] sm:$0xff] %v16761_v51 }
 0x30e   :  { %14189 = vmatpush3.msra.mxu1 %v16737_v28  ;;  %14157 = vmatprep.subr.mxu0 %v16755_v3 }
 0x30f   :  { %v9633_v63 = vpop.f32.mrf.mxu0  ;;  %v9704_v25 = vpop.f32.mrf.mxu1  ;;  %14190 = vmatprep.subr.mxu1 %v16743_v41  ;;  %14158 = vmatpush3.msra.mxu0 %v16761_v51 }
 0x310   :  { %v9711_v31 = vcombine.low %v9631_v15, %v9633_v63  ;;  %v9712_v36 = vcombine.low %v9702_v55, %v9704_v25  ;;  %14191 = vmatpush3.msra.mxu1 %v16751_v35  ;;  %v16763_v15 = vld [vmem:[#allocation10 + $0x120] sm:$0xff]  ;;  %v16767_v55 = vld [vmem:[#allocation10 + $0x98] sm:$0xff] }
 0x311   :  { %14192 = vmatprep.subr.mxu1 %v16757_v58  ;;  %17317 = vst [vmem:[#allocation64_spill] sm:$0xff] %v16763_v15  ;;  %17318 = vst [vmem:[#allocation65_spill] sm:$0xff] %v16767_v55  ;;  %v16769_v63 = vld [vmem:[#allocation10 + $0x198] sm:$0xff]  ;;  %14159 = vmatprep.subr.mxu0 %v16767_v55 }
 0x312   :  { %v9719_v8 = vrot.slane %v9711_v31, %v16017_v42  ;;  %v9726_v6 = vrot.slane %v9712_v36, %v16017_v42  ;;  %14193 = vmatpush3.msra.mxu1 %v16763_v15  ;;  %17319 = vst [vmem:[#allocation66_spill] sm:$0xff] %v16769_v63  ;;  %v16774_v31 = vld [vmem:[#allocation10 + $0x18] sm:$0xff] }
 0x313   :  { %14194 = vmatprep.subr.mxu1 %v16769_v63  ;;  %17320 = vst [vmem:[#allocation67_spill] sm:$0xff] %v16774_v31  ;;  %v16776_v36 = vld [vmem:[#allocation10 + $0x118] sm:$0xff]  ;;  %14160 = vmatpush3.msra.mxu0 %v16774_v31  ;;  %v16790_v63 = vld [vmem:[#allocation10 + $0x110] sm:$0xff]  ;;  %v16794_v31 = vld [vmem:[#allocation10 + $0x88] sm:$0xff]  ;;  %v16798_v55 = vpop.f32.mrf.mxu0 }
 0x314   :  { %v9727_v17 = vcombine.low %v9719_v8, %v9726_v6  ;;  %17321 = vst [vmem:[#allocation68_spill] sm:$0xff] %v16776_v36  ;;  %14195 = vmatpush3.msra.mxu1 %v16776_v36  ;;  %v16780_v8 = vld [vmem:[#allocation10 + $0x90] sm:$0xff]  ;;  %17325 = vst [vmem:[#allocation72_spill] sm:$0xff] %v16790_v63  ;;  %v16796_v36 = vld [vmem:[#allocation10 + $0x188] sm:$0xff] }
 0x315   :  { %17322 = vst [vmem:[#allocation69_spill] sm:$0xff] %v16780_v8  ;;  %v16782_v6 = vld [vmem:[#allocation10 + $0x190] sm:$0xff]  ;;  %14161 = vmatprep.subr.mxu0 %v16780_v8  ;;  %17326 = vst [vmem:[#allocation73_spill] sm:$0xff] %v16794_v31  ;;  %v16816_v8 = vld [vmem:[#allocation10] sm:$0xff] }
 0x316   :  { %v9734_v25 = vrot.slane %v9727_v17, %v16017_v42  ;;  %17323 = vst [vmem:[#allocation70_spill] sm:$0xff] %v16782_v6  ;;  %14196 = vmatprep.subr.mxu1 %v16782_v6  ;;  %v16788_v17 = vld [vmem:[#allocation10 + $0x10] sm:$0xff]  ;;  %17327 = vst [vmem:[#allocation74_spill] sm:$0xff] %v16796_v36  ;;  %v16806_v6 = vld [vmem:[#allocation10 + $0x108] sm:$0xff] }
 0x317   :  { %17324 = vst [vmem:[#allocation71_spill] sm:$0xff] %v16788_v17  ;;  %14162 = vmatpush3.msra.mxu0 %v16788_v17  ;;  %14197 = vmatpush3.msra.mxu1 %v16790_v63  ;;  %17329 = vst [vmem:[#allocation76_spill] sm:$0xff] %v16806_v6  ;;  %v16810_v63 = vld [vmem:[#allocation10 + $0x80] sm:$0xff] }
 0x318   :  { %v16784_v15 = vadd.f32 %v9734_v25, %v9375_v22  ;;  %v16800_v22 = vpop.f32.mrf.mxu1  ;;  %14163 = vmatprep.subr.mxu0 %v16794_v31  ;;  %14198 = vmatprep.subr.mxu1 %v16796_v36  ;;  %v16804_v25 = vld [vmem:[#allocation10 + $0x8] sm:$0xff]  ;;  %17330 = vst [vmem:[#allocation77_spill] sm:$0xff] %v16810_v63  ;;  %v16812_v17 = vld [vmem:[#allocation10 + $0x180] sm:$0xff]  ;;  %17332 = vst [vmem:[#allocation79_spill] sm:$0xff] %v16816_v8  ;;  %v9818_v36 = vpop.f32.mrf.mxu0 }
 0x319   :  { %17328 = vst [vmem:[#allocation75_spill] sm:$0xff] %v16804_v25  ;;  %14164 = vmatpush3.msra.mxu0 %v16804_v25  ;;  %14199 = vmatpush3.msra.mxu1 %v16806_v6  ;;  %17331 = vst [vmem:[#allocation78_spill] sm:$0xff] %v16812_v17  ;;  %v16818_v31 = vld [vmem:[#allocation10 + $0x100] sm:$0xff]  ;;  %v9896_v1 = vcombine.low %v16798_v55, %v9818_v36 }
 0x31a   :  { %14165 = vmatprep.subr.mxu0 %v16810_v63  ;;  %14200 = vmatprep.subr.mxu1 %v16812_v17  ;;  %17333 = vst [vmem:[#allocation80_spill] sm:$0xff] %v16818_v31  ;;  %v9889_v25 = vpop.f32.mrf.mxu1  ;;  %v16824_v6 = vpop.f32.mrf.mxu0 }
 0x31b   :  { %14166 = vmatpush3.msra.mxu0 %v16816_v8  ;;  %14201 = vmatpush3.msra.mxu1 %v16818_v31  ;;  %v9897_v32 = vcombine.low %v16800_v22, %v9889_v25 }
 0x31c   :  { %14205 = vmatprep.subr.mxu0 %v16599_v48  ;;  %14240 = vmatprep.subr.mxu1 %v16601_v54  ;;  %v16826_v51 = vpop.f32.mrf.mxu1  ;;  %v16828_v63 = vpop.f32.mrf.mxu0 }
 0x31d   :  { %v10072_v18 = vcombine.low %v16824_v6, %v16828_v63 }
 0x31e   :  { %v16830_v17 = vpop.f32.mrf.mxu1 }
 0x31f   :  { %v16832_v58 = vpop.f32.mrf.mxu0  ;;  %v10073_v24 = vcombine.low %v16826_v51, %v16830_v17  ;;  %v10080_v6 = vrot.slane %v10072_v18, %v16017_v42 }
 0x320   :  { %v16834_v3 = vpop.f32.mrf.mxu1 }
 0x321   :  { %v16836_v8 = vpop.f32.mrf.mxu0 }
 0x322   :  { %v16838_v31 = vpop.f32.mrf.mxu1  ;;  %v10257_v9 = vcombine.low %v16832_v58, %v16836_v8  ;;  %v10087_v58 = vrot.slane %v10073_v24, %v16017_v42 }
 0x323   :  { %v10258_v11 = vcombine.low %v16834_v3, %v16838_v31 }
 0x324   :  { %v10265_v3 = vrot.slane %v10257_v9, %v16017_v42  ;;  %v10088_v25 = vcombine.low %v10080_v6, %v10087_v58 }
 0x325   :  { %v16840_v35 = vpop.f32.mrf.mxu0  ;;  %v16842_v48 = vpop.f32.mrf.mxu1  ;;  %v10272_v31 = vrot.slane %v10258_v11, %v16017_v42 }
 0x327   :  { %v16844_v54 = vpop.f32.mrf.mxu0  ;;  %v16846_v50 = vpop.f32.mrf.mxu1  ;;  %v10273_v17 = vcombine.low %v10265_v3, %v10272_v31 }
 0x328   :  { %v10433_v8 = vcombine.low %v16840_v35, %v16844_v54 }
 0x335   :  { %v16848_v41 = vpop.f32.mrf.mxu0  ;;  %v16850_v40 = vpop.f32.mrf.mxu1 }
 0x337   :  { %v10540_v28 = vpop.f32.mrf.mxu0  ;;  %v10611_v60 = vpop.f32.mrf.mxu1 }
 0x33e   :  { %v16852_v33 = vpop.f32.mrf.mxu0  ;;  %v16854_v10 = vpop.f32.mrf.mxu1 }
 0x340   :  { %v16856_v56 = vpop.f32.mrf.mxu0  ;;  %v16858_v2 = vpop.f32.mrf.mxu1 }
 0x344   :  { %v16860_v0 = vpop.f32.mrf.mxu0  ;;  %v16862_v46 = vpop.f32.mrf.mxu1 }
 0x346   :  { %v16864_v14 = vpop.f32.mrf.mxu0  ;;  %v16866_v12 = vpop.f32.mrf.mxu1 }
 0x347   :  { %v10979_v54 = vcombine.low %v16860_v0, %v16864_v14  ;;  %v10980_v18 = vcombine.low %v16862_v46, %v16866_v12  ;;  %v10095_v14 = vrot.slane %v10088_v25, %v16017_v42 }
 0x34a   :  { %v16868_v39 = vpop.f32.mrf.mxu0  ;;  %v16870_v44 = vpop.f32.mrf.mxu1 }
 0x34c   :  { %v16872_v21 = vpop.f32.mrf.mxu0  ;;  %v16874_v57 = vpop.f32.mrf.mxu1 }
 0x34d   :  { %v11156_v6 = vcombine.low %v16870_v44, %v16874_v57 }
 0x350   :  { %v16876_v43 = vpop.f32.mrf.mxu0  ;;  %v16878_v59 = vpop.f32.mrf.mxu1 }
 0x352   :  { %v16880_v26 = vpop.f32.mrf.mxu0  ;;  %v16882_v20 = vpop.f32.mrf.mxu1 }
 0x353   :  { %v11340_v9 = vcombine.low %v16876_v43, %v16880_v26  ;;  %v11341_v11 = vcombine.low %v16878_v59, %v16882_v20  ;;  %v10994_v26 = vrot.slane %v10980_v18, %v16017_v42  ;;  %v11155_v59 = vcombine.low %v16868_v39, %v16872_v21 }
 0x355   :  { %v11348_v58 = vrot.slane %v11340_v9, %v16017_v42  ;;  %v11355_v3 = vrot.slane %v11341_v11, %v16017_v42 }
 0x356   :  { %v16884_v53 = vpop.f32.mrf.mxu0  ;;  %v16886_v7 = vpop.f32.mrf.mxu1 }
 0x358   :  { %v16888_v4 = vpop.f32.mrf.mxu0  ;;  %v16890_v34 = vpop.f32.mrf.mxu1 }
 0x359   :  { %v11516_v21 = vcombine.low %v16884_v53, %v16888_v4  ;;  %v11517_v57 = vcombine.low %v16886_v7, %v16890_v34  ;;  %v11356_v4 = vcombine.low %v11348_v58, %v11355_v3 }
 0x35c   :  { %v16892_v52 = vpop.f32.mrf.mxu0  ;;  %v16894_v19 = vpop.f32.mrf.mxu1 }
 0x35e   :  { %v16896_v23 = vpop.f32.mrf.mxu0  ;;  %v16898_v45 = vpop.f32.mrf.mxu1 }
 0x362   :  { %v16900_v13 = vpop.f32.mrf.mxu0  ;;  %v16902_v30 = vpop.f32.mrf.mxu1 }
 0x363   :  { %17334 = vst [vmem:[#allocation81_spill] sm:$0xff] %v16900_v13  ;;  %17335 = vst [vmem:[#allocation82_spill] sm:$0xff] %v16902_v30  ;;  %v9550_v30 = vrot.slane %v9536_v5, %v16017_v42  ;;  %v9911_v13 = vrot.slane %v9897_v32, %v16017_v42  ;;  %v10619_v32 = vcombine.low %v16850_v40, %v10611_v60 }
 0x364   :  { %v16904_v47 = vpop.f32.mrf.mxu0  ;;  %v16906_v61 = vpop.f32.mrf.mxu1  ;;  %v10434_v60 = vcombine.low %v16842_v48, %v16846_v50  ;;  %v10441_v48 = vrot.slane %v10433_v8, %v16017_v42  ;;  %v11701_v8 = vcombine.low %v16892_v52, %v16896_v23 }
 0x365   :  { %17336 = vst [vmem:[#allocation83_spill] sm:$0xff] %v16906_v61  ;;  %v9904_v61 = vrot.slane %v9896_v1, %v16017_v42  ;;  %v10618_v1 = vcombine.low %v16848_v41, %v10540_v28  ;;  %v9551_v36 = vcombine.low %v9543_v37, %v9550_v30  ;;  %v10633_v40 = vrot.slane %v10619_v32, %v16017_v42 }
 0x366   :  { %v10794_v37 = vcombine.low %v16852_v33, %v16856_v56  ;;  %v10448_v56 = vrot.slane %v10434_v60, %v16017_v42  ;;  %v11702_v60 = vcombine.low %v16894_v19, %v16898_v45  ;;  %v11709_v53 = vrot.slane %v11701_v8, %v16017_v42 }
 0x367   :  { %v9912_v51 = vcombine.low %v9904_v61, %v9911_v13  ;;  %v10626_v28 = vrot.slane %v10618_v1, %v16017_v42  ;;  %v10795_v61 = vcombine.low %v16854_v10, %v16858_v2  ;;  %v9558_v41 = vrot.slane %v9551_v36, %v16017_v42 }
 0x368   :  { %v16908_v27 = vpop.f32.mrf.mxu0  ;;  %v16910_v62 = vpop.f32.mrf.mxu1  ;;  %v10802_v2 = vrot.slane %v10794_v37, %v16017_v42  ;;  %v10280_v1 = vrot.slane %v10273_v17, %v16017_v42  ;;  %v10449_v0 = vcombine.low %v10441_v48, %v10448_v56  ;;  %v11716_v34 = vrot.slane %v11702_v60, %v16017_v42 }
 0x369   :  { %v9919_v35 = vrot.slane %v9912_v51, %v16017_v42  ;;  %v10634_v33 = vcombine.low %v10626_v28, %v10633_v40  ;;  %v10809_v10 = vrot.slane %v10795_v61, %v16017_v42  ;;  %v9560_v24 = vadd.f32 %v9558_v41, %v16659_v38 }
 0x36a   :  { %v16918_v16 = vpop.f32.mrf.mxu0  ;;  %v16920_v29 = vpop.f32.mrf.mxu1  ;;  %v10987_v38 = vrot.slane %v10979_v54, %v16017_v42  ;;  %v10097_v28 = vadd.f32 %v10095_v14, %v16784_v15  ;;  %v10456_v40 = vrot.slane %v10449_v0, %v16017_v42  ;;  %v11163_v15 = vrot.slane %v11155_v59, %v16017_v42  ;;  %v17339_v48 = vld [vmem:[#allocation82_spill] sm:$0xff] }
 0x36b   :  { %v9921_v51 = vadd.f32 %v9919_v35, %v9560_v24  ;;  %v10641_v12 = vrot.slane %v10634_v33, %v16017_v42  ;;  %v10810_v46 = vcombine.low %v10802_v2, %v10809_v10  ;;  %v12062_v37 = vcombine.low %v16908_v27, %v16918_v16  ;;  %v17337_v35 = vld [vmem:[#allocation81_spill] sm:$0xff] }
 0x36c   :  { %v12063_v23 = vcombine.low %v16910_v62, %v16920_v29  ;;  %v10995_v52 = vcombine.low %v10987_v38, %v10994_v26  ;;  %v11170_v61 = vrot.slane %v11156_v6, %v16017_v42  ;;  %v11524_v62 = vrot.slane %v11516_v21, %v16017_v42  ;;  %v17338_v25 = vld [vmem:[#allocation83_spill] sm:$0xff] }
 0x36d   :  { %v10282_v31 = vadd.f32 %v10280_v1, %v9921_v51  ;;  %v10817_v39 = vrot.slane %v10810_v46, %v16017_v42  ;;  %v11531_v41 = vrot.slane %v11517_v57, %v16017_v42  ;;  %v11877_v17 = vcombine.low %v17337_v35, %v16904_v47 }
 0x36e   :  { %v16934_v55 = vpop.f32.mrf.mxu0  ;;  %v16936_v49 = vpop.f32.mrf.mxu1  ;;  %v11878_v56 = vcombine.low %v17339_v48, %v17338_v25  ;;  %v12070_v33 = vrot.slane %v12062_v37, %v16017_v42  ;;  %v12077_v2 = vrot.slane %v12063_v23, %v16017_v42  ;;  %v11363_v47 = vrot.slane %v11356_v4, %v16017_v42 }
 0x36f   :  { %v10643_v44 = vadd.f32 %v10641_v12, %v10282_v31  ;;  %v11717_v18 = vcombine.low %v11709_v53, %v11716_v34  ;;  %v11885_v51 = vrot.slane %v11877_v17, %v16017_v42  ;;  %v10458_v3 = vadd.f32 %v10456_v40, %v10097_v28 }
 0x370   :  { %v16940_v5 = vpop.f32.mrf.mxu0  ;;  %v16942_v63 = vpop.f32.mrf.mxu1  ;;  %v11892_v14 = vrot.slane %v11878_v56, %v16017_v42 }
 0x371   :  { %v12238_v10 = vcombine.low %v16934_v55, %v16940_v5  ;;  %v12239_v54 = vcombine.low %v16936_v49, %v16942_v63  ;;  %v11532_v49 = vcombine.low %v11524_v62, %v11531_v41  ;;  %v12078_v5 = vcombine.low %v12070_v33, %v12077_v2 }
 0x372   :  { %v10819_v37 = vadd.f32 %v10817_v39, %v10458_v3 }
 0x373   :  { %v12246_v26 = vrot.slane %v12238_v10, %v16017_v42  ;;  %v12253_v59 = vrot.slane %v12239_v54, %v16017_v42  ;;  %v11539_v28 = vrot.slane %v11532_v49, %v16017_v42 }
 0x374   :  { %v16958_v30 = vpop.f32.mrf.mxu0  ;;  %v16960_v13 = vpop.f32.mrf.mxu1 }
 0x375   :  { %v12254_v40 = vcombine.low %v12246_v26, %v12253_v59 }
 0x376   :  { %v16964_v50 = vpop.f32.mrf.mxu0  ;;  %v16966_v22 = vpop.f32.mrf.mxu1 }
 0x377   :  { %v12423_v7 = vcombine.low %v16958_v30, %v16964_v50  ;;  %v12424_v16 = vcombine.low %v16960_v13, %v16966_v22  ;;  %v11002_v13 = vrot.slane %v10995_v52, %v16017_v42  ;;  %v11171_v22 = vcombine.low %v11163_v15, %v11170_v61 }
 0x378   :  { %v12261_v25 = vrot.slane %v12254_v40, %v16017_v42  ;;  %v17351_v40 = vld [vmem:[#allocation29_spill] sm:$0xff] }
 0x379   :  { %v12431_v24 = vrot.slane %v12423_v7, %v16017_v42  ;;  %v12438_v9 = vrot.slane %v12424_v16, %v16017_v42  ;;  %v11004_v31 = vadd.f32 %v11002_v13, %v10643_v44 }
 0x37a   :  { %v16982_v32 = vpop.f32.mrf.mxu0  ;;  %v16984_v36 = vpop.f32.mrf.mxu1 }
 0x37b   :  { %v11365_v23 = vadd.f32 %v11363_v47, %v11004_v31 }
 0x37c   :  { %v16990_v43 = vpop.f32.mrf.mxu0  ;;  %v16992_v20 = vpop.f32.mrf.mxu1 }
 0x37d   :  { %v12599_v0 = vcombine.low %v16982_v32, %v16990_v43  ;;  %v12600_v55 = vcombine.low %v16984_v36, %v16992_v20  ;;  %v11724_v32 = vrot.slane %v11717_v18, %v16017_v42  ;;  %v12439_v43 = vcombine.low %v12431_v24, %v12438_v9 }
 0x37e   :  { %v11178_v36 = vrot.slane %v11171_v22, %v16017_v42  ;;  %v11893_v20 = vcombine.low %v11885_v51, %v11892_v14 }
 0x37f   :  { %v12607_v8 = vrot.slane %v12599_v0, %v16017_v42  ;;  %v12614_v60 = vrot.slane %v12600_v55, %v16017_v42  ;;  %v11726_v4 = vadd.f32 %v11724_v32, %v11365_v23  ;;  %v12446_v53 = vrot.slane %v12439_v43, %v16017_v42  ;;  %v17347_v23 = vld [vmem:[#allocation23_spill] sm:$0xff] }
 0x380   :  { %v12704_v45 = vpop.f32.mrf.mxu0  ;;  %v12775_v19 = vpop.f32.mrf.mxu1  ;;  %v11180_v16 = vadd.f32 %v11178_v36, %v10819_v37  ;;  %v11900_v39 = vrot.slane %v11893_v20, %v16017_v42  ;;  %v17341_v36 = vld [vmem:[#allocation26_spill] sm:$0xff]  ;;  %v17342_v20 = vld [vmem:[#allocation25_spill] sm:$0xff] }
 0x382   :  { %v12706_v27 = vpop.f32.mrf.mxu0  ;;  %v12777_v29 = vpop.f32.mrf.mxu1  ;;  %v11541_v17 = vadd.f32 %v11539_v28, %v11180_v16  ;;  %v17350_v28 = vld [vmem:[#allocation24_spill] sm:$0xff]  ;;  %v17360_v16 = vld [vmem:[#allocation38_spill] sm:$0xff] }
 0x383   :  { %v12784_v30 = vcombine.low %v12704_v45, %v12706_v27  ;;  %v12785_v50 = vcombine.low %v12775_v19, %v12777_v29  ;;  %v12085_v45 = vrot.slane %v12078_v5, %v16017_v42  ;;  %v12615_v27 = vcombine.low %v12607_v8, %v12614_v60  ;;  %v17344_v8 = vld [vmem:[#allocation20_spill] sm:$0xff]  ;;  %v17345_v60 = vld [vmem:[#allocation21_spill] sm:$0xff] }
 0x385   :  { %v12792_v63 = vrot.slane %v12784_v30, %v16017_v42  ;;  %v12799_v12 = vrot.slane %v12785_v50, %v16017_v42  ;;  %v12087_v29 = vadd.f32 %v12085_v45, %v11726_v4  ;;  %v11902_v50 = vadd.f32 %v11900_v39, %v11541_v17  ;;  %v17348_v45 = vld [vmem:[#allocation27_spill] sm:$0xff]  ;;  %v17356_v4 = vld [vmem:[#allocation34_spill] sm:$0xff]  ;;  %v17367_v17 = vld [vmem:[#allocation45_spill] sm:$0xff] }
 0x386   :  { %v12880_v11 = vpop.f32.mrf.mxu0  ;;  %v12951_v1 = vpop.f32.mrf.mxu1  ;;  %v12622_v13 = vrot.slane %v12615_v27, %v16017_v42  ;;  %v17361_v39 = vld [vmem:[#allocation39_spill] sm:$0xff]  ;;  %v17362_v27 = vld [vmem:[#allocation40_spill] sm:$0xff] }
 0x387   :  { %v12800_v19 = vcombine.low %v12792_v63, %v12799_v12  ;;  %v12448_v2 = vadd.f32 %v12446_v53, %v12087_v29  ;;  %v12263_v9 = vadd.f32 %v12261_v25, %v11902_v50  ;;  %v17357_v53 = vld [vmem:[#allocation35_spill] sm:$0xff]  ;;  %v17363_v29 = vld [vmem:[#allocation41_spill] sm:$0xff]  ;;  %v17368_v25 = vld [vmem:[#allocation46_spill] sm:$0xff] }
 0x388   :  { %v12882_v46 = vpop.f32.mrf.mxu0  ;;  %v12953_v38 = vpop.f32.mrf.mxu1  ;;  %v17374_v50 = vld [vmem:[#allocation52_spill] sm:$0xff] }
 0x389   :  { %v12960_v6 = vcombine.low %v12880_v11, %v12882_v46  ;;  %v12961_v58 = vcombine.low %v12951_v1, %v12953_v38  ;;  %v12807_v62 = vrot.slane %v12800_v19, %v16017_v42  ;;  %v17340_v1 = vld [vmem:[#allocation18_spill] sm:$0xff]  ;;  %v12624_v63 = vadd.f32 %v12622_v13, %v12263_v9  ;;  %v17349_v19 = vld [vmem:[#allocation28_spill] sm:$0xff]  ;;  %v17375_v13 = vld [vmem:[#allocation53_spill] sm:$0xff] }
 0x38a   :  { %v13420_v51 = vsub.s32 1, %v17340_v1  ;;  %v13428_v14 = vsub.s32 3, %v17340_v1  ;;  %v13416_v5 = vsub.s32 0, %v17340_v1  ;;  %v13424_v12 = vsub.s32 2, %v17340_v1  ;;  %v17382_v9 = vld [vmem:[#allocation60_spill] sm:$0xff] }
 0x38b   :  { %v13065_v21 = vpop.f32.mrf.mxu0  ;;  %v13136_v57 = vpop.f32.mrf.mxu1  ;;  %v12968_v44 = vrot.slane %v12960_v6, %v16017_v42  ;;  %v12975_v52 = vrot.slane %v12961_v58, %v16017_v42  ;;  %v12809_v54 = vadd.f32 %v12807_v62, %v12448_v2  ;;  %v17364_v62 = vld [vmem:[#allocation42_spill] sm:$0xff] }
 0x38c   :  { %v17372_v2 = vld [vmem:[#allocation50_spill] sm:$0xff] }
 0x38d   :  { %v13067_v15 = vpop.f32.mrf.mxu0  ;;  %v13138_v61 = vpop.f32.mrf.mxu1  ;;  %v12976_v48 = vcombine.low %v12968_v44, %v12975_v52  ;;  %v17352_v44 = vld [vmem:[#allocation30_spill] sm:$0xff]  ;;  %v17353_v52 = vld [vmem:[#allocation31_spill] sm:$0xff] }
 0x38e   :  { %v13145_v34 = vcombine.low %v13065_v21, %v13067_v15  ;;  %v13146_v7 = vcombine.low %v13136_v57, %v13138_v61  ;;  %v17346_v21 = vld [vmem:[#allocation22_spill] sm:$0xff]  ;;  %v17354_v15 = vld [vmem:[#allocation32_spill] sm:$0xff]  ;;  %v17355_v61 = vld [vmem:[#allocation33_spill] sm:$0xff] }
 0x38f   :  { %v12983_v11 = vrot.slane %v12976_v48, %v16017_v42  ;;  %v17369_v48 = vld [vmem:[#allocation47_spill] sm:$0xff] }
 0x390   :  { %v13153_v41 = vrot.slane %v13145_v34, %v16017_v42  ;;  %v13160_v35 = vrot.slane %v13146_v7, %v16017_v42  ;;  %v17358_v34 = vld [vmem:[#allocation36_spill] sm:$0xff]  ;;  %v17359_v7 = vld [vmem:[#allocation37_spill] sm:$0xff] }
 0x391   :  { %v13241_v56 = vpop.f32.mrf.mxu0  ;;  %v13312_v33 = vpop.f32.mrf.mxu1  ;;  %v12985_v26 = vadd.f32 %v12983_v11, %v12624_v63  ;;  %v17383_v11 = vld [vmem:[#allocation61_spill] sm:$0xff]  ;;  %v17389_v63 = vld [vmem:[#allocation67_spill] sm:$0xff] }
 0x392   :  { %v13161_v30 = vcombine.low %v13153_v41, %v13160_v35  ;;  %v17365_v41 = vld [vmem:[#allocation43_spill] sm:$0xff]  ;;  %v17366_v35 = vld [vmem:[#allocation44_spill] sm:$0xff] }
 0x393   :  { %v13243_v22 = vpop.f32.mrf.mxu0  ;;  %v13314_v10 = vpop.f32.mrf.mxu1 }
 0x394   :  { %v13168_v47 = vrot.slane %v13161_v30, %v16017_v42  ;;  %v13321_v18 = vcombine.low %v13241_v56, %v13243_v22  ;;  %v13322_v24 = vcombine.low %v13312_v33, %v13314_v10  ;;  %v17370_v56 = vld [vmem:[#allocation48_spill] sm:$0xff]  ;;  %v17371_v33 = vld [vmem:[#allocation49_spill] sm:$0xff]  ;;  %v17373_v30 = vld [vmem:[#allocation51_spill] sm:$0xff] }
 0x395   :  { %v17376_v22 = vld [vmem:[#allocation54_spill] sm:$0xff]  ;;  %v17377_v10 = vld [vmem:[#allocation55_spill] sm:$0xff] }
 0x396   :  { %v13170_v0 = vadd.f32 %v13168_v47, %v12809_v54  ;;  %v13329_v55 = vrot.slane %v13321_v18, %v16017_v42  ;;  %v13336_v49 = vrot.slane %v13322_v24, %v16017_v42  ;;  %v17378_v54 = vld [vmem:[#allocation56_spill] sm:$0xff]  ;;  %v17379_v47 = vld [vmem:[#allocation57_spill] sm:$0xff]  ;;  %v17380_v18 = vld [vmem:[#allocation58_spill] sm:$0xff] }
 0x397   :  { %v17381_v24 = vld [vmem:[#allocation59_spill] sm:$0xff] }
 0x398   :  { %v13347_v46 = vmax.f32 %v13170_v0, 0.0  ;;  %v13337_v38 = vcombine.low %v13329_v55, %v13336_v49  ;;  %v17386_v0 = vld [vmem:[#allocation64_spill] sm:$0xff]  ;;  %v17387_v55 = vld [vmem:[#allocation65_spill] sm:$0xff]  ;;  %v17388_v49 = vld [vmem:[#allocation66_spill] sm:$0xff] }
 0x39a   :  { %v13344_v59 = vrot.slane %v13337_v38, %v16017_v42  ;;  %v13421_v6 = vrot.slane %v13347_v46, %v13420_v51  ;;  %v13429_v58 = vrot.slane %v13347_v46, %v13428_v14  ;;  %v13417_v3 = vrot.slane %v13347_v46, %v13416_v5  ;;  %v17343_v42 = vld [vmem:[#allocation19_spill] sm:$0xff]  ;;  %v17391_v38 = vld [vmem:[#allocation69_spill] sm:$0xff] }
 0x39b   :  { %v13425_v31 = vrot.slane %v13347_v46, %v13424_v12  ;;  %v17390_v46 = vld [vmem:[#allocation68_spill] sm:$0xff] }
 0x39c   :  { %v13346_v32 = vadd.f32 %v13344_v59, %v12985_v26  ;;  %13498 = vmatprep.mubr.f32.mxu0 %v13421_v6  ;;  %13568 = vmatprep.mubr.f32.mxu1 %v13429_v58  ;;  %v17392_v26 = vld [vmem:[#allocation70_spill] sm:$0xff]  ;;  %v17393_v59 = vld [vmem:[#allocation71_spill] sm:$0xff]  ;;  %v17394_v6 = vld [vmem:[#allocation72_spill] sm:$0xff] }
 0x39d   :  { %13499 = vmatmul.mubr.f32.vlgmr.msra.gmra.mxu0 %v13417_v3  ;;  %13569 = vmatmul.mubr.f32.vlgmr.msra.gmra.mxu1 %v13425_v31  ;;  %v17395_v58 = vld [vmem:[#allocation73_spill] sm:$0xff]  ;;  %v17396_v3 = vld [vmem:[#allocation74_spill] sm:$0xff]  ;;  %v17397_v31 = vld [vmem:[#allocation75_spill] sm:$0xff] }
 0x39e   :  { %v17077_v43 = vmax.f32 %v13346_v32, 0.0  ;;  %14206 = vmatpush3.msra.mxu0 %v17341_v36  ;;  %14241 = vmatpush3.msra.mxu1 %v17342_v20  ;;  %v17398_v32 = vld [vmem:[#allocation76_spill] sm:$0xff]  ;;  %v17399_v36 = vld [vmem:[#allocation77_spill] sm:$0xff]  ;;  %v17400_v20 = vld [vmem:[#allocation78_spill] sm:$0xff] }
 0x39f   :  { %14207 = vmatprep.subr.mxu0 %v17343_v42  ;;  %14242 = vmatprep.subr.mxu1 %v17344_v8 }
 0x3a0   :  { %14208 = vmatpush3.msra.mxu0 %v17345_v60  ;;  %14243 = vmatpush3.msra.mxu1 %v17346_v21  ;;  %v13649_v57 = vrot.slane %v17077_v43, %v13420_v51  ;;  %v13657_v37 = vrot.slane %v17077_v43, %v13428_v14  ;;  %v17384_v51 = vld [vmem:[#allocation62_spill] sm:$0xff]  ;;  %v17385_v14 = vld [vmem:[#allocation63_spill] sm:$0xff]  ;;  %v13645_v42 = vrot.slane %v17077_v43, %v13416_v5  ;;  %v17402_v21 = vld [vmem:[#allocation80_spill] sm:$0xff] }
 0x3a1   :  { %14209 = vmatprep.subr.mxu0 %v17347_v23  ;;  %14244 = vmatprep.subr.mxu1 %v17348_v45  ;;  %v13653_v8 = vrot.slane %v17077_v43, %v13424_v12  ;;  %v17401_v60 = vld [vmem:[#allocation79_spill] sm:$0xff]  ;;  %v13412_v23 = vld [vmem:[%s17164_s6] sm:$0x1] }
 0x3a2   :  { %13726 = vmatprep.mubr.f32.mxu0 %v13649_v57  ;;  %13796 = vmatprep.mubr.f32.mxu1 %v13657_v37 }
 0x3a3   :  { %14210 = vmatpush3.msra.mxu0 %v17349_v19  ;;  %14245 = vmatpush3.msra.mxu1 %v17350_v28 }
 0x3a4   :  { %14211 = vmatprep.subr.mxu0 %v17351_v40  ;;  %14246 = vmatprep.subr.mxu1 %v17352_v44  ;;  %v13640_v44 = vld [vmem:[%s17164_s6] sm:$0x1] }
 0x3a5   :  { %14212 = vmatpush3.msra.mxu0 %v17353_v52  ;;  %14247 = vmatpush3.msra.mxu1 %v17354_v15 }
 0x3a6   :  { %14213 = vmatprep.subr.mxu0 %v17355_v61  ;;  %14248 = vmatprep.subr.mxu1 %v17356_v4 }
 0x3a7   :  { %14214 = vmatpush3.msra.mxu0 %v17357_v53  ;;  %14249 = vmatpush3.msra.mxu1 %v17358_v34 }
 0x3a8   :  { %14215 = vmatprep.subr.mxu0 %v17359_v7  ;;  %14250 = vmatprep.subr.mxu1 %v17360_v16 }
 0x3a9   :  { %14216 = vmatpush3.msra.mxu0 %v17361_v39  ;;  %14251 = vmatpush3.msra.mxu1 %v17362_v27 }
 0x3aa   :  { %14217 = vmatprep.subr.mxu0 %v17363_v29  ;;  %14252 = vmatprep.subr.mxu1 %v17364_v62 }
 0x3ab   :  { %14218 = vmatpush3.msra.mxu0 %v17365_v41  ;;  %14253 = vmatpush3.msra.mxu1 %v17366_v35 }
 0x3ac   :  { %14219 = vmatprep.subr.mxu0 %v17367_v17  ;;  %14254 = vmatprep.subr.mxu1 %v17368_v25 }
 0x3ad   :  { %14220 = vmatpush3.msra.mxu0 %v17369_v48  ;;  %14255 = vmatpush3.msra.mxu1 %v17370_v56 }
 0x3ae   :  { %14221 = vmatprep.subr.mxu0 %v17371_v33  ;;  %14256 = vmatprep.subr.mxu1 %v17372_v2 }
 0x3af   :  { %14222 = vmatpush3.msra.mxu0 %v17373_v30  ;;  %14257 = vmatpush3.msra.mxu1 %v17374_v50 }
 0x3b0   :  { %14223 = vmatprep.subr.mxu0 %v17375_v13  ;;  %14258 = vmatprep.subr.mxu1 %v17376_v22 }
 0x3b1   :  { %14224 = vmatpush3.msra.mxu0 %v17377_v10  ;;  %14259 = vmatpush3.msra.mxu1 %v17378_v54 }
 0x3b2   :  { %14225 = vmatprep.subr.mxu0 %v17379_v47  ;;  %14260 = vmatprep.subr.mxu1 %v17380_v18 }
 0x3b3   :  { %14226 = vmatpush3.msra.mxu0 %v17381_v24  ;;  %14261 = vmatpush3.msra.mxu1 %v17382_v9 }
 0x3b4   :  { %14227 = vmatprep.subr.mxu0 %v17383_v11  ;;  %14262 = vmatprep.subr.mxu1 %v17384_v51 }
 0x3b5   :  { %14228 = vmatpush3.msra.mxu0 %v17385_v14  ;;  %14263 = vmatpush3.msra.mxu1 %v17386_v0 }
 0x3b6   :  { %14229 = vmatprep.subr.mxu0 %v17387_v55  ;;  %14264 = vmatprep.subr.mxu1 %v17388_v49 }
 0x3b7   :  { %14230 = vmatpush3.msra.mxu0 %v17389_v63  ;;  %14265 = vmatpush3.msra.mxu1 %v17390_v46 }
 0x3b8   :  { %14231 = vmatprep.subr.mxu0 %v17391_v38  ;;  %14266 = vmatprep.subr.mxu1 %v17392_v26 }
 0x3b9   :  { %14232 = vmatpush3.msra.mxu0 %v17393_v59  ;;  %14267 = vmatpush3.msra.mxu1 %v17394_v6 }
 0x3ba   :  { %14233 = vmatprep.subr.mxu0 %v17395_v58  ;;  %14268 = vmatprep.subr.mxu1 %v17396_v3 }
 0x3bb   :  { %14234 = vmatpush3.msra.mxu0 %v17397_v31  ;;  %14269 = vmatpush3.msra.mxu1 %v17398_v32 }
 0x3bc   :  { %14235 = vmatprep.subr.mxu0 %v17399_v36  ;;  %14270 = vmatprep.subr.mxu1 %v17400_v20 }
 0x3bd   :  { %14236 = vmatpush3.msra.mxu0 %v17401_v60  ;;  %14271 = vmatpush3.msra.mxu1 %v17402_v21 }
 0x3be   :  { %13727 = vmatmul.mubr.f32.vlgmr.msra.gmra.mxu0 %v13645_v42  ;;  %13797 = vmatmul.mubr.f32.vlgmr.msra.gmra.mxu1 %v13653_v8 }
 0x45d   :  { %v14167_v57 = vpop.f32.mrf.mxu0  ;;  %v14202_v37 = vpop.f32.mrf.mxu1 }
 0x45f   :  { %v14168_v45 = vpop.f32.mrf.mxu0  ;;  %v14203_v19 = vpop.f32.mrf.mxu1 }
 0x460   :  { %v14169_v28 = vadd.f32 %v14168_v45, %v14167_v57  ;;  %v14204_v40 = vadd.f32 %v14203_v19, %v14202_v37 }
 0x462   :  { %v13501_v5 = vadd.f32 %v14169_v28, %v13412_v23 }
 0x464   :  { %v13571_v1 = vadd.f32 %v14204_v40, %v13501_v5 }
 0x466   :  { %13574 = vst [vmem:[#allocation12] sm:$0x1] %v13571_v1 }
 0x47e   :  { %v14237_v12 = vpop.f32.mrf.mxu0  ;;  %v14272_v43 = vpop.f32.mrf.mxu1 }
 0x480   :  { %v14238_v52 = vpop.f32.mrf.mxu0  ;;  %v14273_v15 = vpop.f32.mrf.mxu1 }
 0x481   :  { %v14239_v61 = vadd.f32 %v14238_v52, %v14237_v12  ;;  %v14274_v53 = vadd.f32 %v14273_v15, %v14272_v43 }
 0x483   :  { %v13729_v4 = vadd.f32 %v14239_v61, %v13640_v44 }
 0x485   :  { %v13799_v34 = vadd.f32 %v14274_v53, %v13729_v4 }
 0x487   :  { %13802 = vst [vmem:[#allocation12 + $0x1] sm:$0x1] %v13799_v34 }
 0x488   :  { %14450 = shalt.err (!%p14447_p10)
}
 0x489   :  { %13812 = dma.vmem_to_hbm [thread:$0]  %s13810_s17, 32, %s17165_s7, [#allocation5]  }
 0x48a   :  { %14467 = dma.done.wait [#allocation5], 32  }
 0x48b   :  { %14468 = vsyncadd [#allocation5], 4294967264 }
 0x48c   :  { %13816 = vsyncpa [#allocation4], 1 }
 0x48d   :  { %13817 = vsyncpa [#allocation11], 1 }
 0x48e   :  { %13818 = vsyncpa [#allocation5], 1 }
 0x48f   :  { %13819 = vsyncpa [#allocation6], 1 }
 0x490   :  { %13820 = vsyncpa [#allocation8], 1 }

</bundles_post_ra>
